<compile_context>
chip_gen: v6e
topology: v6e:2x2x1
jax: 0.10.0
libtpu: 0.0.40
codegen_flags: <defaults>
</compile_context>

<pallas_src>
import jax
import jax.numpy as jnp
from jax.experimental import pallas as pl
from jax.experimental.pallas import tpu as pltpu

N_OUT = 10
N_OUT_PAD = 128  # lane-dense padded width of the final layer


def _round_up(n, m):
    return ((n + m - 1) // m) * m


def _mlp_kernel(x_ref, w1_ref, b1_ref, w2_ref, b2_ref, w3_ref, b3_ref,
                w4_ref, b4_ref, out_ref):
    # Weights are bf16; activations cast to bf16 for the MXU; accumulation,
    # bias-add and ReLU stay in f32 (portable to v5e's non-bf16 VPU).
    xb = x_ref[...].astype(jnp.bfloat16)
    # fc1 + ReLU
    h = jnp.dot(xb, w1_ref[...], preferred_element_type=jnp.float32)
    h = jnp.maximum(h + b1_ref[...], 0.0)
    # dropout (p=0.2): identity in eval mode
    # fc2 + ReLU
    h = jnp.dot(h.astype(jnp.bfloat16), w2_ref[...],
                preferred_element_type=jnp.float32)
    h = jnp.maximum(h + b2_ref[...], 0.0)
    # fc3 + ReLU
    h = jnp.dot(h.astype(jnp.bfloat16), w3_ref[...],
                preferred_element_type=jnp.float32)
    h = jnp.maximum(h + b3_ref[...], 0.0)
    # fc4 (no activation) -- lane-padded to 128 columns (zeros beyond col 10)
    h = jnp.dot(h.astype(jnp.bfloat16), w4_ref[...],
                preferred_element_type=jnp.float32)
    out_ref[...] = (h + b4_ref[...]).astype(out_ref.dtype)


def mlp_forward(x, params, *, tm=128):
    """x: (B, in_size) float32. params: dict of transposed f32 weights + biases.

    Weights are quantized to bf16 at the call boundary; accumulation is f32.
    """
    B, in_size = x.shape

    # Batch tiling: for small B use one padded tile; for large B tile by `tm`
    # so the resident bf16 weights are reused for every batch tile.
    if B <= tm:
        TM = _round_up(B, 8)
        B_pad = TM
    else:
        TM = tm
        B_pad = _round_up(B, tm)
    if B_pad != B:
        x = jnp.pad(x, ((0, B_pad - B), (0, 0)))

    # bf16 weights (the dominant HBM traffic); biases stay f32, shaped (1, N).
    w1 = params["w1"].astype(jnp.bfloat16)
    w2 = params["w2"].astype(jnp.bfloat16)
    w3 = params["w3"].astype(jnp.bfloat16)
    w4 = params["w4"].astype(jnp.bfloat16)
    b1 = params["b1"].reshape(1, -1).astype(jnp.float32)
    b2 = params["b2"].reshape(1, -1).astype(jnp.float32)
    b3 = params["b3"].reshape(1, -1).astype(jnp.float32)
    b4 = params["b4"].reshape(1, -1).astype(jnp.float32)

    # Lane-pad the final layer (10 -> 128 columns) for an unmasked store.
    w4 = jnp.pad(w4, ((0, 0), (0, N_OUT_PAD - w4.shape[1])))
    b4 = jnp.pad(b4, ((0, 0), (0, N_OUT_PAD - b4.shape[1])))

    # Weights/biases: full-array block, constant block index -> resident in
    # VMEM across all batch tiles (DMA'd once, reused every grid step).
    resident = lambda a: pl.BlockSpec(a.shape, lambda i: (0,) * a.ndim)

    n_tiles = B_pad // TM
    out = pl.pallas_call(
        _mlp_kernel,
        out_shape=jax.ShapeDtypeStruct((B_pad, N_OUT_PAD), jnp.float32),
        grid=(n_tiles,),
        in_specs=[
            pl.BlockSpec((TM, in_size), lambda i: (i, 0)),   # x: tiled over batch
            resident(w1), resident(b1),
            resident(w2), resident(b2),
            resident(w3), resident(b3),
            resident(w4), resident(b4),
        ],
        out_specs=pl.BlockSpec((TM, N_OUT_PAD), lambda i: (i, 0)),
        compiler_params=pltpu.CompilerParams(
            dimension_semantics=("arbitrary",),
            vmem_limit_bytes=32 << 20,   # ~6 MiB bf16 weights (+buffers); fits v7x
        ),
    )(x, w1, b1, w2, b2, w3, b3, w4, b4)

    return out[:B, :N_OUT]


def init_params(key, in_size):
    """Deterministic init mimicking nn.Linear's U(-1/sqrt(fan_in), 1/sqrt(fan_in))."""
    sizes = [(in_size, 2048), (2048, 1024), (1024, 512), (512, N_OUT)]
    params = {}
    keys = jax.random.split(key, 2 * len(sizes))
    for i, (fin, fout) in enumerate(sizes):
        bound = 1.0 / jnp.sqrt(jnp.float32(fin))
        # stored as (in_features, out_features) == PyTorch weight.T
        params[f"w{i+1}"] = jax.random.uniform(
            keys[2 * i], (fin, fout), jnp.float32, -bound, bound)
        params[f"b{i+1}"] = jax.random.uniform(
            keys[2 * i + 1], (fout,), jnp.float32, -bound, bound)
    return params


def _ref_forward(x, params):
    """Pure-JAX reference with the same bf16-weight / f32-accumulate recipe."""
    h = x
    for i in range(1, 5):
        w = params[f"w{i}"].astype(jnp.bfloat16).astype(jnp.float32)
        hb = h.astype(jnp.bfloat16).astype(jnp.float32)
        h = hb @ w + params[f"b{i}"]
        if i < 4:
            h = jnp.maximum(h, 0.0)
    return h


if __name__ == "__main__":
    key = jax.random.PRNGKey(0)
    in_size = 128
    batch = 8

    kp, kx = jax.random.split(key)
    params = init_params(kp, in_size)
    x = jax.random.normal(kx, (batch, in_size), jnp.float32)

    out = mlp_forward(x, params)
    out = jax.block_until_ready(out)

    ref = _ref_forward(x, params)
    assert out.shape == (batch, N_OUT)
    assert jnp.allclose(out, ref, atol=1e-2, rtol=1e-3), (
        float(jnp.max(jnp.abs(out - ref))))

    print("KERNEL_OK")
</pallas_src>

<mosaic_0001>
module attributes {stable_mosaic.version = 11 : i64} {
  func.func @_mlp_kernel(%arg0: i32, %arg1: memref<8x128xf32, #tpu.memory_space<vmem>>, %arg2: memref<128x2048xbf16, #tpu.memory_space<vmem>>, %arg3: memref<1x2048xf32, #tpu.memory_space<vmem>>, %arg4: memref<2048x1024xbf16, #tpu.memory_space<vmem>>, %arg5: memref<1x1024xf32, #tpu.memory_space<vmem>>, %arg6: memref<1024x512xbf16, #tpu.memory_space<vmem>>, %arg7: memref<1x512xf32, #tpu.memory_space<vmem>>, %arg8: memref<512x128xbf16, #tpu.memory_space<vmem>>, %arg9: memref<1x128xf32, #tpu.memory_space<vmem>>, %arg10: memref<8x128xf32, #tpu.memory_space<vmem>>) attributes {dimension_semantics = [#tpu.dimension_semantics<arbitrary>], iteration_bounds = array<i64: 1>, scalar_prefetch = 0 : i64, scratch_operands = 0 : i64, tpu.core_type = #tpu.core_type<tc>, window_params = [{transform_indices = @transform_0, window_bounds = array<i64: 8, 128>}, {pipeline_mode = #tpu.pipeline_mode<synchronous>, transform_indices = @transform_1, window_bounds = array<i64: 128, 2048>}, {pipeline_mode = #tpu.pipeline_mode<synchronous>, transform_indices = @transform_2, window_bounds = array<i64: 1, 2048>}, {pipeline_mode = #tpu.pipeline_mode<synchronous>, transform_indices = @transform_3, window_bounds = array<i64: 2048, 1024>}, {pipeline_mode = #tpu.pipeline_mode<synchronous>, transform_indices = @transform_4, window_bounds = array<i64: 1, 1024>}, {pipeline_mode = #tpu.pipeline_mode<synchronous>, transform_indices = @transform_5, window_bounds = array<i64: 1024, 512>}, {pipeline_mode = #tpu.pipeline_mode<synchronous>, transform_indices = @transform_6, window_bounds = array<i64: 1, 512>}, {pipeline_mode = #tpu.pipeline_mode<synchronous>, transform_indices = @transform_7, window_bounds = array<i64: 512, 128>}, {pipeline_mode = #tpu.pipeline_mode<synchronous>, transform_indices = @transform_8, window_bounds = array<i64: 1, 128>}, {transform_indices = @transform_9, window_bounds = array<i64: 8, 128>}]} {
    %c0 = arith.constant 0 : index
    %c0_0 = arith.constant 0 : index
    %0 = vector.load %arg1[%c0, %c0_0] : memref<8x128xf32, #tpu.memory_space<vmem>>, vector<8x128xf32>
    %1 = arith.truncf %0 : vector<8x128xf32> to vector<8x128xbf16>
    %c0_1 = arith.constant 0 : index
    %c0_2 = arith.constant 0 : index
    %2 = vector.load %arg2[%c0_1, %c0_2] : memref<128x2048xbf16, #tpu.memory_space<vmem>>, vector<128x2048xbf16>
    %cst = arith.constant dense<0.000000e+00> : vector<8x2048xf32>
    %3 = tpu.matmul %1, %2, %cst {dimension_numbers = #tpu.dot_dimension_numbers<[1], [0], [0], [1], [0, 0, 1, 1], [], []>} : vector<8x128xbf16>, vector<128x2048xbf16>, vector<8x2048xf32> -> vector<8x2048xf32>
    %c0_3 = arith.constant 0 : index
    %c0_4 = arith.constant 0 : index
    %4 = vector.load %arg3[%c0_3, %c0_4] : memref<1x2048xf32, #tpu.memory_space<vmem>>, vector<1x2048xf32>
    %5 = vector.broadcast %4 : vector<1x2048xf32> to vector<8x2048xf32>
    %6 = arith.addf %3, %5 : vector<8x2048xf32>
    %cst_5 = arith.constant 0.000000e+00 : f32
    %7 = vector.broadcast %cst_5 : f32 to vector<8x2048xf32>
    %8 = arith.maximumf %6, %7 : vector<8x2048xf32>
    %9 = arith.truncf %8 : vector<8x2048xf32> to vector<8x2048xbf16>
    %c0_6 = arith.constant 0 : index
    %c0_7 = arith.constant 0 : index
    %10 = vector.load %arg4[%c0_6, %c0_7] : memref<2048x1024xbf16, #tpu.memory_space<vmem>>, vector<2048x1024xbf16>
    %cst_8 = arith.constant dense<0.000000e+00> : vector<8x1024xf32>
    %11 = tpu.matmul %9, %10, %cst_8 {dimension_numbers = #tpu.dot_dimension_numbers<[1], [0], [0], [1], [0, 0, 1, 1], [], []>} : vector<8x2048xbf16>, vector<2048x1024xbf16>, vector<8x1024xf32> -> vector<8x1024xf32>
    %c0_9 = arith.constant 0 : index
    %c0_10 = arith.constant 0 : index
    %12 = vector.load %arg5[%c0_9, %c0_10] : memref<1x1024xf32, #tpu.memory_space<vmem>>, vector<1x1024xf32>
    %13 = vector.broadcast %12 : vector<1x1024xf32> to vector<8x1024xf32>
    %14 = arith.addf %11, %13 : vector<8x1024xf32>
    %cst_11 = arith.constant 0.000000e+00 : f32
    %15 = vector.broadcast %cst_11 : f32 to vector<8x1024xf32>
    %16 = arith.maximumf %14, %15 : vector<8x1024xf32>
    %17 = arith.truncf %16 : vector<8x1024xf32> to vector<8x1024xbf16>
    %c0_12 = arith.constant 0 : index
    %c0_13 = arith.constant 0 : index
    %18 = vector.load %arg6[%c0_12, %c0_13] : memref<1024x512xbf16, #tpu.memory_space<vmem>>, vector<1024x512xbf16>
    %cst_14 = arith.constant dense<0.000000e+00> : vector<8x512xf32>
    %19 = tpu.matmul %17, %18, %cst_14 {dimension_numbers = #tpu.dot_dimension_numbers<[1], [0], [0], [1], [0, 0, 1, 1], [], []>} : vector<8x1024xbf16>, vector<1024x512xbf16>, vector<8x512xf32> -> vector<8x512xf32>
    %c0_15 = arith.constant 0 : index
    %c0_16 = arith.constant 0 : index
    %20 = vector.load %arg7[%c0_15, %c0_16] : memref<1x512xf32, #tpu.memory_space<vmem>>, vector<1x512xf32>
    %21 = vector.broadcast %20 : vector<1x512xf32> to vector<8x512xf32>
    %22 = arith.addf %19, %21 : vector<8x512xf32>
    %cst_17 = arith.constant 0.000000e+00 : f32
    %23 = vector.broadcast %cst_17 : f32 to vector<8x512xf32>
    %24 = arith.maximumf %22, %23 : vector<8x512xf32>
    %25 = arith.truncf %24 : vector<8x512xf32> to vector<8x512xbf16>
    %c0_18 = arith.constant 0 : index
    %c0_19 = arith.constant 0 : index
    %26 = vector.load %arg8[%c0_18, %c0_19] : memref<512x128xbf16, #tpu.memory_space<vmem>>, vector<512x128xbf16>
    %cst_20 = arith.constant dense<0.000000e+00> : vector<8x128xf32>
    %27 = tpu.matmul %25, %26, %cst_20 {dimension_numbers = #tpu.dot_dimension_numbers<[1], [0], [0], [1], [0, 0, 1, 1], [], []>} : vector<8x512xbf16>, vector<512x128xbf16>, vector<8x128xf32> -> vector<8x128xf32>
    %c0_21 = arith.constant 0 : index
    %c0_22 = arith.constant 0 : index
    %28 = vector.load %arg9[%c0_21, %c0_22] : memref<1x128xf32, #tpu.memory_space<vmem>>, vector<1x128xf32>
    %29 = vector.broadcast %28 : vector<1x128xf32> to vector<8x128xf32>
    %30 = arith.addf %27, %29 : vector<8x128xf32>
    %c0_23 = arith.constant 0 : index
    %c0_24 = arith.constant 0 : index
    %31 = vector.load %arg10[%c0_23, %c0_24] : memref<8x128xf32, #tpu.memory_space<vmem>>, vector<8x128xf32>
    tpu.vector_store %arg10[%c0_23, %c0_24], %30 {strides = array<i32>} : memref<8x128xf32, #tpu.memory_space<vmem>>, vector<8x128xf32>,
    return
  }
  func.func @transform_0(%arg0: i32) -> (i32, i32) {
    %c0_i32 = arith.constant 0 : i32
    %c0_i32_0 = arith.constant 0 : i32
    return %arg0, %c0_i32 : i32, i32
  }
  func.func @transform_1(%arg0: i32) -> (i32, i32) {
    %c0_i32 = arith.constant 0 : i32
    %c0_i32_0 = arith.constant 0 : i32
    %c0_i32_1 = arith.constant 0 : i32
    return %c0_i32, %c0_i32_0 : i32, i32
  }
  func.func @transform_2(%arg0: i32) -> (i32, i32) {
    %c0_i32 = arith.constant 0 : i32
    %c0_i32_0 = arith.constant 0 : i32
    %c0_i32_1 = arith.constant 0 : i32
    return %c0_i32, %c0_i32_0 : i32, i32
  }
  func.func @transform_3(%arg0: i32) -> (i32, i32) {
    %c0_i32 = arith.constant 0 : i32
    %c0_i32_0 = arith.constant 0 : i32
    %c0_i32_1 = arith.constant 0 : i32
    return %c0_i32, %c0_i32_0 : i32, i32
  }
  func.func @transform_4(%arg0: i32) -> (i32, i32) {
    %c0_i32 = arith.constant 0 : i32
    %c0_i32_0 = arith.constant 0 : i32
    %c0_i32_1 = arith.constant 0 : i32
    return %c0_i32, %c0_i32_0 : i32, i32
  }
  func.func @transform_5(%arg0: i32) -> (i32, i32) {
    %c0_i32 = arith.constant 0 : i32
    %c0_i32_0 = arith.constant 0 : i32
    %c0_i32_1 = arith.constant 0 : i32
    return %c0_i32, %c0_i32_0 : i32, i32
  }
  func.func @transform_6(%arg0: i32) -> (i32, i32) {
    %c0_i32 = arith.constant 0 : i32
    %c0_i32_0 = arith.constant 0 : i32
    %c0_i32_1 = arith.constant 0 : i32
    return %c0_i32, %c0_i32_0 : i32, i32
  }
  func.func @transform_7(%arg0: i32) -> (i32, i32) {
    %c0_i32 = arith.constant 0 : i32
    %c0_i32_0 = arith.constant 0 : i32
    %c0_i32_1 = arith.constant 0 : i32
    return %c0_i32, %c0_i32_0 : i32, i32
  }
  func.func @transform_8(%arg0: i32) -> (i32, i32) {
    %c0_i32 = arith.constant 0 : i32
    %c0_i32_0 = arith.constant 0 : i32
    %c0_i32_1 = arith.constant 0 : i32
    return %c0_i32, %c0_i32_0 : i32, i32
  }
  func.func @transform_9(%arg0: i32) -> (i32, i32) {
    %c0_i32 = arith.constant 0 : i32
    %c0_i32_0 = arith.constant 0 : i32
    return %arg0, %c0_i32 : i32, i32
  }
}

</mosaic_0001>

<bundles_post_ra>
// kernel: tpu_custom_call.1
= control target key start
LH: loop header
LB: loop body
LE: loop exit
PB: predicated region body
PF: predicated region fallthrough
CT: control target
= control target key end

     0   :  { %14 = vsyncpa [#allocation3], 0  ;;  %s13727_s0 = inlined_call_operand.hbm [shape: f32[8,128], index: 0, kind: input, shape index: {}]   ;;  %s13728_s1 = inlined_call_operand.hbm [shape: bf16[128,2048], index: 1, kind: input, shape index: {}]   ;;  %s13729_s2 = inlined_call_operand.hbm [shape: f32[1,2048], index: 2, kind: input, shape index: {}]   ;;  %s13730_s3 = inlined_call_operand.hbm [shape: bf16[2048,1024], index: 3, kind: input, shape index: {}]   ;;  %s13731_s4 = inlined_call_operand.hbm [shape: f32[1,1024], index: 4, kind: input, shape index: {}]   ;;  %s13732_s5 = inlined_call_operand.hbm [shape: bf16[1024,512], index: 5, kind: input, shape index: {}]   ;;  %s13733_s6 = inlined_call_operand.hbm [shape: f32[1,512], index: 6, kind: input, shape index: {}]   ;;  %s13734_s7 = inlined_call_operand.hbm [shape: bf16[512,128], index: 7, kind: input, shape index: {}]   ;;  %s13735_s8 = inlined_call_operand.hbm [shape: f32[1,128], index: 8, kind: input, shape index: {}]   ;;  %s13736_s9 = inlined_call_operand.hbm [shape: f32[8,128], index: 9, kind: output, shape index: {}]  }
   0x1   :  { %15 = vsyncpa [#allocation6], 0 }
   0x2   :  { %16 = vsyncpa [#allocation9], 0 }
   0x3   :  { %17 = vsyncpa [#allocation12], 0 }
   0x4   :  { %18 = vsyncpa [#allocation15], 0 }
   0x5   :  { %19 = vsyncpa [#allocation4], 0  ;;  %s13265_s30 = smov [#allocation5]  }
   0x6   :  { %s35_s10 = sshll.u32 %s13265_s30, 4  ;;  %s36_s10 = int_to_ptr.vmem [resolvable:$true] %s35_s10 }
   0x7   :  { %s13061_s11 = scalar_lea.vmem %s36_s10, 16384  ;;  %p13066_p1 = scmp.lt.s32.totalorder %s36_s10, %s36_s10 }
   0x8   :  { %p13062_p0 = scmp.ne.s32.totalorder %s36_s10, %s13061_s11  ;;  %p13067_p2 = scmp.lt.s32.totalorder %s13061_s11, %s13061_s11 }
   0xa   :  { %p13068_p3 = por %p13067_p2, %p13066_p1 }
   0xc   :  { %p13069_p4 = pnand %p13068_p3, %p13062_p0 }
   0xe   :  { %13072 = shalt.err (!%p13069_p4)
}
   0xf   :  { %s13266_s12 = smov 1024   ;;  %s13267_s13 = smov 64  }
  0x10   :  { %41 = dma.hbm_to_vmem [thread:$0]  %s13728_s1, 16384, %s36_s10, [#allocation6], %s13266_s12, %s13266_s12, %s13267_s13  }
  0x11   :  { %s13268_s16 = smov [#allocation8]  }
  0x12   :  { %s57_s17 = sshll.u32 %s13268_s16, 4  ;;  %s58_s17 = int_to_ptr.vmem [resolvable:$true] %s57_s17 }
  0x13   :  { %s13081_s18 = scalar_lea.vmem %s58_s17, 131072  ;;  %p13086_p6 = scmp.lt.s32.totalorder %s58_s17, %s58_s17 }
  0x14   :  { %p13082_p5 = scmp.ne.s32.totalorder %s58_s17, %s13081_s18  ;;  %p13087_p7 = scmp.lt.s32.totalorder %s13081_s18, %s13081_s18 }
  0x16   :  { %p13088_p8 = por %p13087_p7, %p13086_p6 }
  0x18   :  { %p13089_p9 = pnand %p13088_p8, %p13082_p5 }
  0x1a   :  { %13092 = shalt.err (!%p13089_p9)
}
  0x1b   :  { %s13269_s19 = smov 512   ;;  %s13270_s20 = smov 32  }
  0x1c   :  { %63 = dma.hbm_to_vmem [thread:$0]  %s13730_s3, 131072, %s58_s17, [#allocation9], %s13269_s19, %s13269_s19, %s13270_s20  }
  0x1d   :  { %s13271_s23 = smov [#allocation11]  }
  0x1e   :  { %s79_s24 = sshll.u32 %s13271_s23, 4  ;;  %s80_s24 = int_to_ptr.vmem [resolvable:$true] %s79_s24 }
  0x1f   :  { %s13101_s1 = scalar_lea.vmem %s80_s24, 32768  ;;  %p13106_p11 = scmp.lt.s32.totalorder %s80_s24, %s80_s24 }
  0x20   :  { %p13102_p10 = scmp.ne.s32.totalorder %s80_s24, %s13101_s1  ;;  %p13107_p12 = scmp.lt.s32.totalorder %s13101_s1, %s13101_s1 }
  0x22   :  { %p13108_p13 = por %p13107_p12, %p13106_p11 }
  0x24   :  { %p13109_p0 = pnand %p13108_p13, %p13102_p10 }
  0x26   :  { %13112 = shalt.err (!%p13109_p0)
}
  0x27   :  { %s13272_s25 = smov 256   ;;  %s13273_s26 = smov 16  }
  0x28   :  { %85 = dma.hbm_to_vmem [thread:$0]  %s13732_s5, 32768, %s80_s24, [#allocation12], %s13272_s25, %s13272_s25, %s13273_s26  }
  0x29   :  { %s13274_s29 = smov [#allocation14]  }
  0x2a   :  { %s101_s30 = sshll.u32 %s13274_s29, 4  ;;  %s102_s30 = int_to_ptr.vmem [resolvable:$true] %s101_s30 }
  0x2b   :  { %s13121_s3 = scalar_lea.vmem %s102_s30, 4096  ;;  %p13126_p2 = scmp.lt.s32.totalorder %s102_s30, %s102_s30 }
  0x2c   :  { %p13122_p1 = scmp.ne.s32.totalorder %s102_s30, %s13121_s3  ;;  %p13127_p3 = scmp.lt.s32.totalorder %s13121_s3, %s13121_s3 }
  0x2e   :  { %p13128_p4 = por %p13127_p3, %p13126_p2 }
  0x30   :  { %p13129_p5 = pnand %p13128_p4, %p13122_p1 }
  0x32   :  { %13132 = shalt.err (!%p13129_p5)
}
  0x33   :  { %s13275_s10 = smov 4   ;;  %s13276_s14 = smov [#allocation2]  }
  0x34   :  { %107 = dma.hbm_to_vmem [thread:$0]  %s13734_s7, 4096, %s102_s30, [#allocation15], %s13267_s13, %s13267_s13, %s13275_s10  }
  0x35   :  { %s26_s15 = sshll.u32 %s13276_s14, 4  ;;  %s13277_s5 = smov [#allocation7]   ;;  %s27_s15 = int_to_ptr.vmem [resolvable:$true] %s26_s15 }
  0x36   :  { %s48_s16 = sshll.u32 %s13277_s5, 4  ;;  %s13141_s17 = scalar_lea.vmem %s27_s15, 128  ;;  %s49_s16 = int_to_ptr.vmem [resolvable:$true] %s48_s16 }
  0x37   :  { %p13142_p6 = scmp.ne.s32.totalorder %s27_s15, %s13141_s17  ;;  %p13146_p7 = scmp.lt.s32.totalorder %s27_s15, %s27_s15 }
  0x38   :  { %p13147_p8 = scmp.lt.s32.totalorder %s13141_s17, %s13141_s17 }
  0x3a   :  { %p13148_p9 = por %p13147_p8, %p13146_p7 }
  0x3c   :  { %p13149_p10 = pnand %p13148_p9, %p13142_p6 }
  0x3e   :  { %13152 = shalt.err (!%p13149_p10)
}
  0x3f   :  { %29 = dma.hbm_to_vmem [thread:$0]  %s13727_s0, 128, %s27_s15, [#allocation3]  }
  0x40   :  { %s13161_s20 = scalar_lea.vmem %s49_s16, 256  ;;  %p13166_p12 = scmp.lt.s32.totalorder %s49_s16, %s49_s16 }
  0x41   :  { %p13162_p11 = scmp.ne.s32.totalorder %s49_s16, %s13161_s20  ;;  %p13167_p13 = scmp.lt.s32.totalorder %s13161_s20, %s13161_s20 }
  0x43   :  { %p13168_p0 = por %p13167_p13, %p13166_p12 }
  0x45   :  { %p13169_p1 = pnand %p13168_p0, %p13162_p11 }
  0x47   :  { %13172 = shalt.err (!%p13169_p1)
}
  0x48   :  { %51 = dma.hbm_to_vmem [thread:$0]  %s13729_s2, 256, %s49_s16, [#allocation6]  }
  0x49   :  { %s13278_s21 = smov [#allocation10]   ;;  %s13279_s23 = smov [#allocation13]  }
  0x4a   :  { %s70_s22 = sshll.u32 %s13278_s21, 4  ;;  %s92_s24 = sshll.u32 %s13279_s23, 4  ;;  %s71_s22 = int_to_ptr.vmem [resolvable:$true] %s70_s22  ;;  %s93_s24 = int_to_ptr.vmem [resolvable:$true] %s92_s24 }
  0x4b   :  { %s13181_s1 = scalar_lea.vmem %s71_s22, 128  ;;  %p13186_p3 = scmp.lt.s32.totalorder %s71_s22, %s71_s22 }
  0x4c   :  { %p13182_p2 = scmp.ne.s32.totalorder %s71_s22, %s13181_s1  ;;  %p13187_p4 = scmp.lt.s32.totalorder %s13181_s1, %s13181_s1 }
  0x4e   :  { %p13188_p5 = por %p13187_p4, %p13186_p3 }
  0x50   :  { %p13189_p6 = pnand %p13188_p5, %p13182_p2 }
  0x52   :  { %13192 = shalt.err (!%p13189_p6)
}
  0x53   :  { %73 = dma.hbm_to_vmem [thread:$0]  %s13731_s4, 128, %s71_s22, [#allocation9]  }
  0x54   :  { %s13201_s26 = scalar_lea.vmem %s93_s24, 64  ;;  %p13206_p8 = scmp.lt.s32.totalorder %s93_s24, %s93_s24 }
  0x55   :  { %p13202_p7 = scmp.ne.s32.totalorder %s93_s24, %s13201_s26  ;;  %p13207_p9 = scmp.lt.s32.totalorder %s13201_s26, %s13201_s26 }
  0x57   :  { %p13208_p10 = por %p13207_p9, %p13206_p8 }
  0x59   :  { %p13209_p11 = pnand %p13208_p10, %p13202_p7 }
  0x5b   :  { %13212 = shalt.err (!%p13209_p11)
}
  0x5c   :  { %95 = dma.hbm_to_vmem [thread:$0]  %s13733_s6, 64, %s93_s24, [#allocation12]  }
  0x5d   :  { %s13280_s28 = smov [#allocation16]  }
  0x5e   :  { %s114_s29 = sshll.u32 %s13280_s28, 4  ;;  %s115_s29 = int_to_ptr.vmem [resolvable:$true] %s114_s29 }
  0x5f   :  { %s13221_s30 = scalar_lea.vmem %s115_s29, 16  ;;  %s13225_s3 = scalar_lea.vmem %s115_s29, 32 }
  0x60   :  { %p13222_p12 = scmp.ne.s32.totalorder %s115_s29, %s13221_s30  ;;  %p13226_p13 = scmp.lt.s32.totalorder %s115_s29, %s115_s29 }
  0x61   :  { %p13227_p0 = scmp.lt.s32.totalorder %s13225_s3, %s13221_s30 }
  0x63   :  { %p13228_p1 = por %p13227_p0, %p13226_p13 }
  0x65   :  { %p13229_p2 = pnand %p13228_p1, %p13222_p12 }
  0x67   :  { %13232 = shalt.err (!%p13229_p2)
}
  0x68   :  { %117 = dma.hbm_to_vmem [thread:$0]  %s13735_s8, 16, %s115_s29, [#allocation15]  }
  0x69   :  { %13253 = dma.done.wait [#allocation3], 128  }
  0x6a   :  { %13254 = vsyncadd [#allocation3], 4294967168 }
  0x6b   :  { %13255 = dma.done.wait [#allocation6], 16640  }
  0x6c   :  { %13256 = vsyncadd [#allocation6], 4294950656 }
  0x6d   :  { %13257 = dma.done.wait [#allocation9], 131200  }
  0x6e   :  { %13258 = vsyncadd [#allocation9], 4294836096 }
  0x6f   :  { %13259 = dma.done.wait [#allocation12], 32832  }
  0x70   :  { %13260 = vsyncadd [#allocation12], 4294934464 }
  0x71   :  { %13261 = dma.done.wait [#allocation15], 4112  }
  0x72   :  { %13262 = vsyncadd [#allocation15], 4294963184  ;;  %v13281_v0 = vmov 0   ;;  %v260_v1 = vld [vmem:[#allocation5 + $0x380] sm:$0xff]  ;;  %v261_v3 = vld [vmem:[#allocation5 + $0x388] sm:$0xff]  ;;  %s13282_s6 = smov [#allocation17]  }
  0x73   :  { %1032 = vmatprep.mubr.bf16.mxu0 %v13281_v0  ;;  %1073 = vmatprep.mubr.bf16.mxu1 %v13281_v0  ;;  %v268_v2 = vld [vmem:[#allocation5 + $0x3c0] sm:$0xff]  ;;  %v269_v5 = vld [vmem:[#allocation5 + $0x3c8] sm:$0xff]  ;;  %v262_v63 = vld [vmem:[#allocation5 + $0x390] sm:$0xff]  ;;  %s11118_s8 = sshll.u32 %s13282_s6, 4  ;;  %s11119_s8 = int_to_ptr.vmem [resolvable:$true] %s11118_s8 }
  0x74   :  { %v11244_v4 = vcombine.high %v260_v1, %v268_v2  ;;  %v11243_v6 = vcombine.low %v260_v1, %v268_v2  ;;  %v244_v7 = vld [vmem:[#allocation5 + $0x300] sm:$0xff]  ;;  %v11246_v9 = vcombine.high %v261_v3, %v269_v5  ;;  %v11245_v10 = vcombine.low %v261_v3, %v269_v5  ;;  %v245_v12 = vld [vmem:[#allocation5 + $0x308] sm:$0xff]  ;;  %v270_v1 = vld [vmem:[#allocation5 + $0x3d0] sm:$0xff]  ;;  %s13233_s11 = scalar_lea.vmem %s11119_s8, 128  ;;  %p13238_p4 = scmp.lt.s32.totalorder %s11119_s8, %s11119_s8 }
  0x75   :  { %v252_v8 = vld [vmem:[#allocation5 + $0x340] sm:$0xff]  ;;  %v253_v13 = vld [vmem:[#allocation5 + $0x348] sm:$0xff]  ;;  %v263_v2 = vld [vmem:[#allocation5 + $0x398] sm:$0xff]  ;;  %p13234_p3 = scmp.ne.s32.totalorder %s11119_s8, %s13233_s11  ;;  %p13239_p5 = scmp.lt.s32.totalorder %s13233_s11, %s13233_s11 }
  0x76   :  { %v11228_v11 = vcombine.high %v244_v7, %v252_v8  ;;  %v228_v14 = vld [vmem:[#allocation5 + $0x280] sm:$0xff]  ;;  %1000 = vmatprep.subr.bf16.mxu0 %v11244_v4  ;;  %v11230_v15 = vcombine.high %v245_v12, %v253_v13  ;;  %v229_v17 = vld [vmem:[#allocation5 + $0x288] sm:$0xff]  ;;  %1041 = vmatprep.subr.bf16.mxu1 %v11246_v9  ;;  %v11227_v19 = vcombine.low %v244_v7, %v252_v8  ;;  %v271_v3 = vld [vmem:[#allocation5 + $0x3d8] sm:$0xff] }
  0x77   :  { %v236_v16 = vld [vmem:[#allocation5 + $0x2c0] sm:$0xff]  ;;  %v237_v18 = vld [vmem:[#allocation5 + $0x2c8] sm:$0xff]  ;;  %1001 = vmatpush1.bf16.msra.mxu0 %v11243_v6  ;;  %1042 = vmatpush1.bf16.msra.mxu1 %v11245_v10  ;;  %v11229_v20 = vcombine.low %v245_v12, %v253_v13  ;;  %v146_v5 = vld [vmem:[#allocation2] sm:$0xff]  ;;  %v11248_v7 = vcombine.high %v262_v63, %v270_v1  ;;  %v11250_v8 = vcombine.high %v263_v2, %v271_v3  ;;  %p13240_p6 = por %p13239_p5, %p13238_p4 }
  0x78   :  { %1002 = vmatprep.subr.bf16.mxu0 %v11228_v11  ;;  %v11212_v21 = vcombine.high %v228_v14, %v236_v16  ;;  %1043 = vmatprep.subr.bf16.mxu1 %v11230_v15  ;;  %v11214_v22 = vcombine.high %v229_v17, %v237_v18  ;;  %v212_v23 = vld [vmem:[#allocation5 + $0x200] sm:$0xff]  ;;  %v213_v25 = vld [vmem:[#allocation5 + $0x208] sm:$0xff]  ;;  %v11211_v27 = vcombine.low %v228_v14, %v236_v16  ;;  %v246_v9 = vld [vmem:[#allocation5 + $0x310] sm:$0xff] }
  0x79   :  { %v220_v24 = vld [vmem:[#allocation5 + $0x240] sm:$0xff]  ;;  %v221_v26 = vld [vmem:[#allocation5 + $0x248] sm:$0xff]  ;;  %v11213_v28 = vcombine.low %v229_v17, %v237_v18  ;;  %v254_v10 = vld [vmem:[#allocation5 + $0x350] sm:$0xff]  ;;  %v13365_v11 = vpack.c.bf16 %v146_v5, %v146_v5  ;;  %v11247_v14 = vcombine.low %v262_v63, %v270_v1  ;;  %v11249_v15 = vcombine.low %v263_v2, %v271_v3  ;;  %p13241_p7 = pnand %p13240_p6, %p13234_p3 }
  0x7a   :  { %v11196_v29 = vcombine.high %v212_v23, %v220_v24  ;;  %v11198_v30 = vcombine.high %v213_v25, %v221_v26  ;;  %v196_v31 = vld [vmem:[#allocation5 + $0x180] sm:$0xff]  ;;  %v197_v33 = vld [vmem:[#allocation5 + $0x188] sm:$0xff]  ;;  %v11195_v35 = vcombine.low %v212_v23, %v220_v24  ;;  %v11197_v36 = vcombine.low %v213_v25, %v221_v26  ;;  %v247_v12 = vld [vmem:[#allocation5 + $0x318] sm:$0xff] }
  0x7b   :  { %1003 = vmatpush1.bf16.msra.mxu0 %v11227_v19  ;;  %1044 = vmatpush1.bf16.msra.mxu1 %v11229_v20  ;;  %v204_v32 = vld [vmem:[#allocation5 + $0x1c0] sm:$0xff]  ;;  %v205_v34 = vld [vmem:[#allocation5 + $0x1c8] sm:$0xff]  ;;  %v255_v13 = vld [vmem:[#allocation5 + $0x358] sm:$0xff]  ;;  %v11232_v16 = vcombine.high %v246_v9, %v254_v10 }
  0x7c   :  { %1004 = vmatprep.subr.bf16.mxu0 %v11212_v21  ;;  %1045 = vmatprep.subr.bf16.mxu1 %v11214_v22  ;;  %v11180_v37 = vcombine.high %v196_v31, %v204_v32  ;;  %v11182_v38 = vcombine.high %v197_v33, %v205_v34  ;;  %v180_v39 = vld [vmem:[#allocation5 + $0x100] sm:$0xff]  ;;  %v181_v41 = vld [vmem:[#allocation5 + $0x108] sm:$0xff]  ;;  %v11179_v43 = vcombine.low %v196_v31, %v204_v32  ;;  %v230_v18 = vld [vmem:[#allocation5 + $0x290] sm:$0xff] }
  0x7d   :  { %v188_v40 = vld [vmem:[#allocation5 + $0x140] sm:$0xff]  ;;  %v189_v42 = vld [vmem:[#allocation5 + $0x148] sm:$0xff]  ;;  %v11181_v44 = vcombine.low %v197_v33, %v205_v34  ;;  %v11234_v17 = vcombine.high %v247_v12, %v255_v13  ;;  %v238_v19 = vld [vmem:[#allocation5 + $0x2d0] sm:$0xff]  ;;  %v11231_v22 = vcombine.low %v246_v9, %v254_v10  ;;  %v11233_v23 = vcombine.low %v247_v12, %v255_v13 }
  0x7e   :  { %v11164_v45 = vcombine.high %v180_v39, %v188_v40  ;;  %v11166_v46 = vcombine.high %v181_v41, %v189_v42  ;;  %v164_v47 = vld [vmem:[#allocation5 + $0x80] sm:$0xff]  ;;  %v165_v49 = vld [vmem:[#allocation5 + $0x88] sm:$0xff]  ;;  %v11163_v51 = vcombine.low %v180_v39, %v188_v40  ;;  %v11165_v52 = vcombine.low %v181_v41, %v189_v42  ;;  %v231_v20 = vld [vmem:[#allocation5 + $0x298] sm:$0xff] }
  0x7f   :  { %1005 = vmatpush1.bf16.msra.mxu0 %v11211_v27  ;;  %1046 = vmatpush1.bf16.msra.mxu1 %v11213_v28  ;;  %v172_v48 = vld [vmem:[#allocation5 + $0xc0] sm:$0xff]  ;;  %v173_v50 = vld [vmem:[#allocation5 + $0xc8] sm:$0xff]  ;;  %v239_v21 = vld [vmem:[#allocation5 + $0x2d8] sm:$0xff]  ;;  %v11216_v24 = vcombine.high %v230_v18, %v238_v19 }
  0x80   :  { %1006 = vmatprep.subr.bf16.mxu0 %v11196_v29  ;;  %1047 = vmatprep.subr.bf16.mxu1 %v11198_v30  ;;  %v11148_v53 = vcombine.high %v164_v47, %v172_v48  ;;  %v11150_v54 = vcombine.high %v165_v49, %v173_v50  ;;  %v148_v55 = vld [vmem:[#allocation5] sm:$0xff]  ;;  %v149_v57 = vld [vmem:[#allocation5 + $0x8] sm:$0xff]  ;;  %v11147_v59 = vcombine.low %v164_v47, %v172_v48  ;;  %v214_v26 = vld [vmem:[#allocation5 + $0x210] sm:$0xff] }
  0x81   :  { %v156_v56 = vld [vmem:[#allocation5 + $0x40] sm:$0xff]  ;;  %v157_v58 = vld [vmem:[#allocation5 + $0x48] sm:$0xff]  ;;  %v11149_v60 = vcombine.low %v165_v49, %v173_v50  ;;  %v11218_v25 = vcombine.high %v231_v20, %v239_v21  ;;  %v222_v27 = vld [vmem:[#allocation5 + $0x250] sm:$0xff]  ;;  %v11215_v30 = vcombine.low %v230_v18, %v238_v19  ;;  %v11217_v31 = vcombine.low %v231_v20, %v239_v21 }
  0x82   :  { %v11132_v61 = vcombine.high %v148_v55, %v156_v56  ;;  %v11134_v62 = vcombine.high %v149_v57, %v157_v58  ;;  %v11131_v4 = vcombine.low %v148_v55, %v156_v56  ;;  %v11133_v6 = vcombine.low %v149_v57, %v157_v58  ;;  %v215_v28 = vld [vmem:[#allocation5 + $0x218] sm:$0xff]  ;;  %v198_v34 = vld [vmem:[#allocation5 + $0x190] sm:$0xff]  ;;  %v264_v3 = vld [vmem:[#allocation5 + $0x3a0] sm:$0xff] }
  0x83   :  { %1007 = vmatpush1.bf16.msra.mxu0 %v11195_v35  ;;  %1048 = vmatpush1.bf16.msra.mxu1 %v11197_v36  ;;  %v223_v29 = vld [vmem:[#allocation5 + $0x258] sm:$0xff]  ;;  %v11200_v32 = vcombine.high %v214_v26, %v222_v27  ;;  %v206_v35 = vld [vmem:[#allocation5 + $0x1d0] sm:$0xff]  ;;  %v265_v5 = vld [vmem:[#allocation5 + $0x3a8] sm:$0xff] }
  0x84   :  { %1008 = vmatprep.subr.bf16.mxu0 %v11180_v37  ;;  %1049 = vmatprep.subr.bf16.mxu1 %v11182_v38  ;;  %v11202_v33 = vcombine.high %v215_v28, %v223_v29  ;;  %v199_v36 = vld [vmem:[#allocation5 + $0x198] sm:$0xff]  ;;  %v11199_v38 = vcombine.low %v214_v26, %v222_v27  ;;  %v11201_v39 = vcombine.low %v215_v28, %v223_v29  ;;  %v182_v42 = vld [vmem:[#allocation5 + $0x110] sm:$0xff]  ;;  %v256_v12 = vld [vmem:[#allocation5 + $0x360] sm:$0xff] }
  0x85   :  { %v207_v37 = vld [vmem:[#allocation5 + $0x1d8] sm:$0xff]  ;;  %v11184_v40 = vcombine.high %v198_v34, %v206_v35  ;;  %v166_v50 = vld [vmem:[#allocation5 + $0x90] sm:$0xff]  ;;  %v249_v13 = vld [vmem:[#allocation5 + $0x328] sm:$0xff] }
  0x86   :  { %v11186_v41 = vcombine.high %v199_v36, %v207_v37  ;;  %v11185_v47 = vcombine.low %v199_v36, %v207_v37  ;;  %v150_v58 = vld [vmem:[#allocation5 + $0x10] sm:$0xff]  ;;  %v240_v18 = vld [vmem:[#allocation5 + $0x2e0] sm:$0xff]  ;;  %v233_v21 = vld [vmem:[#allocation5 + $0x2a8] sm:$0xff] }
  0x87   :  { %1009 = vmatpush1.bf16.msra.mxu0 %v11179_v43  ;;  %1050 = vmatpush1.bf16.msra.mxu1 %v11181_v44  ;;  %v190_v43 = vld [vmem:[#allocation5 + $0x150] sm:$0xff]  ;;  %v183_v44 = vld [vmem:[#allocation5 + $0x118] sm:$0xff]  ;;  %v224_v26 = vld [vmem:[#allocation5 + $0x260] sm:$0xff] }
  0x88   :  { %1010 = vmatprep.subr.bf16.mxu0 %v11164_v45  ;;  %1051 = vmatprep.subr.bf16.mxu1 %v11166_v46  ;;  %v191_v45 = vld [vmem:[#allocation5 + $0x158] sm:$0xff]  ;;  %v11183_v46 = vcombine.low %v198_v34, %v206_v35  ;;  %v11168_v48 = vcombine.high %v182_v42, %v190_v43  ;;  %v217_v29 = vld [vmem:[#allocation5 + $0x228] sm:$0xff]  ;;  %v208_v34 = vld [vmem:[#allocation5 + $0x1e0] sm:$0xff] }
  0x89   :  { %v11170_v49 = vcombine.high %v183_v44, %v191_v45  ;;  %v11169_v55 = vcombine.low %v183_v44, %v191_v45  ;;  %v201_v37 = vld [vmem:[#allocation5 + $0x1a8] sm:$0xff] }
  0x8a   :  { %v185_v45 = vld [vmem:[#allocation5 + $0x128] sm:$0xff] }
  0x8b   :  { %1011 = vmatpush1.bf16.msra.mxu0 %v11163_v51  ;;  %1052 = vmatpush1.bf16.msra.mxu1 %v11165_v52  ;;  %v174_v51 = vld [vmem:[#allocation5 + $0xd0] sm:$0xff]  ;;  %v167_v52 = vld [vmem:[#allocation5 + $0x98] sm:$0xff] }
  0x8c   :  { %1012 = vmatprep.subr.bf16.mxu0 %v11148_v53  ;;  %1053 = vmatprep.subr.bf16.mxu1 %v11150_v54  ;;  %v175_v53 = vld [vmem:[#allocation5 + $0xd8] sm:$0xff]  ;;  %v11167_v54 = vcombine.low %v182_v42, %v190_v43  ;;  %v11152_v56 = vcombine.high %v166_v50, %v174_v51  ;;  %v192_v42 = vld [vmem:[#allocation5 + $0x160] sm:$0xff] }
  0x8d   :  { %v11154_v57 = vcombine.high %v167_v52, %v175_v53  ;;  %v11153_v63 = vcombine.low %v167_v52, %v175_v53  ;;  %v169_v53 = vld [vmem:[#allocation5 + $0xa8] sm:$0xff] }
  0x8f   :  { %1013 = vmatpush1.bf16.msra.mxu0 %v11147_v59  ;;  %1054 = vmatpush1.bf16.msra.mxu1 %v11149_v60  ;;  %v158_v59 = vld [vmem:[#allocation5 + $0x50] sm:$0xff]  ;;  %v151_v60 = vld [vmem:[#allocation5 + $0x18] sm:$0xff] }
  0x90   :  { %1014 = vmatprep.subr.bf16.mxu0 %v11132_v61  ;;  %1055 = vmatprep.subr.bf16.mxu1 %v11134_v62  ;;  %v159_v61 = vld [vmem:[#allocation5 + $0x58] sm:$0xff]  ;;  %v11151_v62 = vcombine.low %v166_v50, %v174_v51  ;;  %v11136_v1 = vcombine.high %v150_v58, %v158_v59  ;;  %v176_v50 = vld [vmem:[#allocation5 + $0xe0] sm:$0xff] }
  0x91   :  { %v11138_v2 = vcombine.high %v151_v60, %v159_v61  ;;  %v11137_v9 = vcombine.low %v151_v60, %v159_v61  ;;  %v153_v61 = vld [vmem:[#allocation5 + $0x28] sm:$0xff] }
  0x93   :  { %1015 = vmatpush1.bf16.msra.mxu0 %v11131_v4  ;;  %1056 = vmatpush1.bf16.msra.mxu1 %v11133_v6  ;;  %v272_v4 = vld [vmem:[#allocation5 + $0x3e0] sm:$0xff]  ;;  %v273_v6 = vld [vmem:[#allocation5 + $0x3e8] sm:$0xff] }
  0x94   :  { %1082 = vmatprep.subr.bf16.mxu0 %v11248_v7  ;;  %1123 = vmatprep.subr.bf16.mxu1 %v11250_v8  ;;  %v11135_v7 = vcombine.low %v150_v58, %v158_v59  ;;  %v248_v8 = vld [vmem:[#allocation5 + $0x320] sm:$0xff]  ;;  %v11252_v10 = vcombine.high %v264_v3, %v272_v4  ;;  %v11253_v19 = vcombine.low %v265_v5, %v273_v6 }
  0x95   :  { %v11236_v20 = vcombine.high %v248_v8, %v256_v12  ;;  %v160_v58 = vld [vmem:[#allocation5 + $0x60] sm:$0xff] }
  0x96   :  { %1033 = vmatmul.mubr.bf16.vlgmr.msra.gmra.mxu0 %v13365_v11  ;;  %1074 = vmatmul.mubr.bf16.vlgmr.msra.gmra.mxu1 %v13365_v11 }
  0x97   :  { %1083 = vmatpush1.bf16.msra.mxu0 %v11247_v14  ;;  %1124 = vmatpush1.bf16.msra.mxu1 %v11249_v15  ;;  %v257_v14 = vld [vmem:[#allocation5 + $0x368] sm:$0xff]  ;;  %v11254_v15 = vcombine.high %v265_v5, %v273_v6  ;;  %v267_v6 = vld [vmem:[#allocation5 + $0x3b8] sm:$0xff] }
  0x98   :  { %1084 = vmatprep.subr.bf16.mxu0 %v11232_v16  ;;  %1125 = vmatprep.subr.bf16.mxu1 %v11234_v17  ;;  %v11251_v16 = vcombine.low %v264_v3, %v272_v4  ;;  %v232_v17 = vld [vmem:[#allocation5 + $0x2a0] sm:$0xff]  ;;  %v11237_v27 = vcombine.low %v249_v13, %v257_v14  ;;  %v274_v3 = vld [vmem:[#allocation5 + $0x3f0] sm:$0xff] }
  0x99   :  { %1114 = vmatprep.mubr.bf16.mxu0 %v13281_v0  ;;  %1155 = vmatprep.mubr.bf16.mxu1 %v13281_v0  ;;  %v11220_v28 = vcombine.high %v232_v17, %v240_v18 }
  0x9b   :  { %1085 = vmatpush1.bf16.msra.mxu0 %v11231_v22  ;;  %1126 = vmatpush1.bf16.msra.mxu1 %v11233_v23  ;;  %v241_v22 = vld [vmem:[#allocation5 + $0x2e8] sm:$0xff]  ;;  %v11238_v23 = vcombine.high %v249_v13, %v257_v14 }
  0x9c   :  { %1086 = vmatprep.subr.bf16.mxu0 %v11216_v24  ;;  %1127 = vmatprep.subr.bf16.mxu1 %v11218_v25  ;;  %v11235_v24 = vcombine.low %v248_v8, %v256_v12  ;;  %v216_v25 = vld [vmem:[#allocation5 + $0x220] sm:$0xff]  ;;  %v11221_v35 = vcombine.low %v233_v21, %v241_v22  ;;  %v258_v12 = vld [vmem:[#allocation5 + $0x370] sm:$0xff] }
  0x9d   :  { %v11204_v36 = vcombine.high %v216_v25, %v224_v26 }
  0x9f   :  { %1087 = vmatpush1.bf16.msra.mxu0 %v11215_v30  ;;  %1128 = vmatpush1.bf16.msra.mxu1 %v11217_v31  ;;  %v225_v30 = vld [vmem:[#allocation5 + $0x268] sm:$0xff]  ;;  %v11222_v31 = vcombine.high %v233_v21, %v241_v22  ;;  %v234_v22 = vld [vmem:[#allocation5 + $0x2b0] sm:$0xff] }
  0xa0   :  { %1088 = vmatprep.subr.bf16.mxu0 %v11200_v32  ;;  %1129 = vmatprep.subr.bf16.mxu1 %v11202_v33  ;;  %v11219_v32 = vcombine.low %v232_v17, %v240_v18  ;;  %v200_v33 = vld [vmem:[#allocation5 + $0x1a0] sm:$0xff]  ;;  %v11205_v43 = vcombine.low %v217_v29, %v225_v30 }
  0xa1   :  { %v11188_v44 = vcombine.high %v200_v33, %v208_v34 }
  0xa3   :  { %1089 = vmatpush1.bf16.msra.mxu0 %v11199_v38  ;;  %1130 = vmatpush1.bf16.msra.mxu1 %v11201_v39  ;;  %v209_v38 = vld [vmem:[#allocation5 + $0x1e8] sm:$0xff]  ;;  %v11206_v39 = vcombine.high %v217_v29, %v225_v30  ;;  %v218_v30 = vld [vmem:[#allocation5 + $0x230] sm:$0xff] }
  0xa4   :  { %1090 = vmatprep.subr.bf16.mxu0 %v11184_v40  ;;  %1131 = vmatprep.subr.bf16.mxu1 %v11186_v41  ;;  %v11203_v40 = vcombine.low %v216_v25, %v224_v26  ;;  %v184_v41 = vld [vmem:[#allocation5 + $0x120] sm:$0xff]  ;;  %v11189_v51 = vcombine.low %v201_v37, %v209_v38  ;;  %v243_v25 = vld [vmem:[#allocation5 + $0x2f8] sm:$0xff] }
  0xa5   :  { %v11172_v52 = vcombine.high %v184_v41, %v192_v42 }
  0xa7   :  { %1091 = vmatpush1.bf16.msra.mxu0 %v11183_v46  ;;  %1132 = vmatpush1.bf16.msra.mxu1 %v11185_v47  ;;  %v193_v46 = vld [vmem:[#allocation5 + $0x168] sm:$0xff]  ;;  %v11190_v47 = vcombine.high %v201_v37, %v209_v38  ;;  %v202_v38 = vld [vmem:[#allocation5 + $0x1b0] sm:$0xff] }
  0xa8   :  { %1092 = vmatprep.subr.bf16.mxu0 %v11168_v48  ;;  %1133 = vmatprep.subr.bf16.mxu1 %v11170_v49  ;;  %v11187_v48 = vcombine.low %v200_v33, %v208_v34  ;;  %v168_v49 = vld [vmem:[#allocation5 + $0xa0] sm:$0xff]  ;;  %v11173_v59 = vcombine.low %v185_v45, %v193_v46  ;;  %v227_v33 = vld [vmem:[#allocation5 + $0x278] sm:$0xff] }
  0xa9   :  { %v11156_v60 = vcombine.high %v168_v49, %v176_v50 }
  0xab   :  { %1093 = vmatpush1.bf16.msra.mxu0 %v11167_v54  ;;  %1134 = vmatpush1.bf16.msra.mxu1 %v11169_v55  ;;  %v177_v54 = vld [vmem:[#allocation5 + $0xe8] sm:$0xff]  ;;  %v11174_v55 = vcombine.high %v185_v45, %v193_v46 }
  0xac   :  { %1094 = vmatprep.subr.bf16.mxu0 %v11152_v56  ;;  %1135 = vmatprep.subr.bf16.mxu1 %v11154_v57  ;;  %v11171_v56 = vcombine.low %v184_v41, %v192_v42  ;;  %v152_v57 = vld [vmem:[#allocation5 + $0x20] sm:$0xff]  ;;  %v11157_v4 = vcombine.low %v169_v53, %v177_v54  ;;  %v211_v41 = vld [vmem:[#allocation5 + $0x1f8] sm:$0xff] }
  0xad   :  { %v11140_v5 = vcombine.high %v152_v57, %v160_v58 }
  0xaf   :  { %1095 = vmatpush1.bf16.msra.mxu0 %v11151_v62  ;;  %1136 = vmatpush1.bf16.msra.mxu1 %v11153_v63  ;;  %v161_v62 = vld [vmem:[#allocation5 + $0x68] sm:$0xff]  ;;  %v11158_v63 = vcombine.high %v169_v53, %v177_v54 }
  0xb0   :  { %1096 = vmatprep.subr.bf16.mxu0 %v11136_v1  ;;  %1137 = vmatprep.subr.bf16.mxu1 %v11138_v2  ;;  %v11155_v1 = vcombine.low %v168_v49, %v176_v50  ;;  %v266_v2 = vld [vmem:[#allocation5 + $0x3b0] sm:$0xff]  ;;  %v11142_v8 = vcombine.high %v153_v61, %v161_v62  ;;  %v11141_v13 = vcombine.low %v153_v61, %v161_v62 }
  0xb1   :  { %v11256_v14 = vcombine.high %v266_v2, %v274_v3  ;;  %v11255_v18 = vcombine.low %v266_v2, %v274_v3  ;;  %v170_v50 = vld [vmem:[#allocation5 + $0xb0] sm:$0xff] }
  0xb2   :  { %v1416_v3 = vld [vmem:[#allocation8 + $0x1c0] sm:$0xff] }
  0xb3   :  { %1097 = vmatpush1.bf16.msra.mxu0 %v11135_v7  ;;  %1138 = vmatpush1.bf16.msra.mxu1 %v11137_v9  ;;  %v275_v7 = vld [vmem:[#allocation5 + $0x3f8] sm:$0xff]  ;;  %v11139_v9 = vcombine.low %v152_v57, %v160_v58  ;;  %v154_v58 = vld [vmem:[#allocation5 + $0x30] sm:$0xff] }
  0xb4   :  { %1164 = vmatprep.subr.bf16.mxu0 %v11252_v10  ;;  %1205 = vmatprep.subr.bf16.mxu1 %v11254_v15  ;;  %v250_v10 = vld [vmem:[#allocation5 + $0x330] sm:$0xff]  ;;  %v251_v15 = vld [vmem:[#allocation5 + $0x338] sm:$0xff]  ;;  %v11258_v17 = vcombine.high %v267_v6, %v275_v7 }
  0xb5   :  { %v11239_v26 = vcombine.low %v250_v10, %v258_v12 }
  0xb6   :  { %1115 = vmatmul.mubr.bf16.vlgmr.msra.gmra.mxu0 %v13365_v11  ;;  %1156 = vmatmul.mubr.bf16.vlgmr.msra.gmra.mxu1 %v13365_v11 }
  0xb7   :  { %1165 = vmatpush1.bf16.msra.mxu0 %v11251_v16  ;;  %1206 = vmatpush1.bf16.msra.mxu1 %v11253_v19  ;;  %v259_v16 = vld [vmem:[#allocation5 + $0x378] sm:$0xff]  ;;  %v11257_v19 = vcombine.low %v267_v6, %v275_v7 }
  0xb8   :  { %1166 = vmatprep.subr.bf16.mxu0 %v11236_v20  ;;  %1207 = vmatprep.subr.bf16.mxu1 %v11238_v23  ;;  %v11240_v20 = vcombine.high %v250_v10, %v258_v12  ;;  %v11242_v21 = vcombine.high %v251_v15, %v259_v16  ;;  %v242_v23 = vld [vmem:[#allocation5 + $0x2f0] sm:$0xff] }
  0xb9   :  { %1196 = vmatprep.mubr.bf16.mxu0 %v13281_v0  ;;  %1237 = vmatprep.mubr.bf16.mxu1 %v13281_v0  ;;  %v11223_v34 = vcombine.low %v234_v22, %v242_v23  ;;  %v1408_v12 = vld [vmem:[#allocation8 + $0x180] sm:$0xff] }
  0xbb   :  { %1167 = vmatpush1.bf16.msra.mxu0 %v11235_v24  ;;  %1208 = vmatpush1.bf16.msra.mxu1 %v11237_v27  ;;  %v235_v24 = vld [vmem:[#allocation5 + $0x2b8] sm:$0xff]  ;;  %v11241_v27 = vcombine.low %v251_v15, %v259_v16 }
  0xbc   :  { %1168 = vmatprep.subr.bf16.mxu0 %v11220_v28  ;;  %1209 = vmatprep.subr.bf16.mxu1 %v11222_v31  ;;  %v11224_v28 = vcombine.high %v234_v22, %v242_v23  ;;  %v11226_v29 = vcombine.high %v235_v24, %v243_v25  ;;  %v226_v31 = vld [vmem:[#allocation5 + $0x270] sm:$0xff] }
  0xbd   :  { %v11207_v42 = vcombine.low %v218_v30, %v226_v31 }
  0xbf   :  { %1169 = vmatpush1.bf16.msra.mxu0 %v11219_v32  ;;  %1210 = vmatpush1.bf16.msra.mxu1 %v11221_v35  ;;  %v219_v32 = vld [vmem:[#allocation5 + $0x238] sm:$0xff]  ;;  %v11225_v35 = vcombine.low %v235_v24, %v243_v25  ;;  %v1528_v25 = vld [vmem:[#allocation8 + $0x540] sm:$0xff] }
  0xc0   :  { %1170 = vmatprep.subr.bf16.mxu0 %v11204_v36  ;;  %1211 = vmatprep.subr.bf16.mxu1 %v11206_v39  ;;  %v11208_v36 = vcombine.high %v218_v30, %v226_v31  ;;  %v11210_v37 = vcombine.high %v219_v32, %v227_v33  ;;  %v210_v39 = vld [vmem:[#allocation5 + $0x1f0] sm:$0xff]  ;;  %v11209_v45 = vcombine.low %v219_v32, %v227_v33 }
  0xc1   :  { %v11191_v49 = vcombine.low %v202_v38, %v210_v39  ;;  %v1520_v33 = vld [vmem:[#allocation8 + $0x500] sm:$0xff] }
  0xc3   :  { %1171 = vmatpush1.bf16.msra.mxu0 %v11203_v40  ;;  %1212 = vmatpush1.bf16.msra.mxu1 %v11205_v43  ;;  %v203_v40 = vld [vmem:[#allocation5 + $0x1b8] sm:$0xff]  ;;  %v186_v43 = vld [vmem:[#allocation5 + $0x130] sm:$0xff] }
  0xc4   :  { %1172 = vmatprep.subr.bf16.mxu0 %v11188_v44  ;;  %1213 = vmatprep.subr.bf16.mxu1 %v11190_v47  ;;  %v194_v44 = vld [vmem:[#allocation5 + $0x170] sm:$0xff]  ;;  %v11194_v46 = vcombine.high %v203_v40, %v211_v41  ;;  %v187_v47 = vld [vmem:[#allocation5 + $0x138] sm:$0xff] }
  0xc5   :  { %v11176_v53 = vcombine.high %v186_v43, %v194_v44  ;;  %v11175_v57 = vcombine.low %v186_v43, %v194_v44  ;;  %v1376_v43 = vld [vmem:[#allocation8 + $0x80] sm:$0xff] }
  0xc6   :  { %v1380_v44 = vld [vmem:[#allocation8 + $0xa0] sm:$0xff] }
  0xc7   :  { %1173 = vmatpush1.bf16.msra.mxu0 %v11187_v48  ;;  %1214 = vmatpush1.bf16.msra.mxu1 %v11189_v51  ;;  %v195_v48 = vld [vmem:[#allocation5 + $0x178] sm:$0xff]  ;;  %v178_v51 = vld [vmem:[#allocation5 + $0xf0] sm:$0xff] }
  0xc8   :  { %1174 = vmatprep.subr.bf16.mxu0 %v11172_v52  ;;  %1215 = vmatprep.subr.bf16.mxu1 %v11174_v55  ;;  %v11193_v52 = vcombine.low %v203_v40, %v211_v41  ;;  %v11178_v54 = vcombine.high %v187_v47, %v195_v48  ;;  %v171_v55 = vld [vmem:[#allocation5 + $0xb8] sm:$0xff]  ;;  %v11160_v61 = vcombine.high %v170_v50, %v178_v51  ;;  %v1512_v40 = vld [vmem:[#allocation8 + $0x4c0] sm:$0xff] }
  0xc9   :  { %v11159_v2 = vcombine.low %v170_v50, %v178_v51  ;;  %v1516_v41 = vld [vmem:[#allocation8 + $0x4e0] sm:$0xff] }
  0xca   :  { %v1368_v50 = vld [vmem:[#allocation8 + $0x40] sm:$0xff] }
  0xcb   :  { %1175 = vmatpush1.bf16.msra.mxu0 %v11171_v56  ;;  %1216 = vmatpush1.bf16.msra.mxu1 %v11173_v59  ;;  %v179_v56 = vld [vmem:[#allocation5 + $0xf8] sm:$0xff]  ;;  %v162_v59 = vld [vmem:[#allocation5 + $0x70] sm:$0xff] }
  0xcc   :  { %1176 = vmatprep.subr.bf16.mxu0 %v11156_v60  ;;  %1217 = vmatprep.subr.bf16.mxu1 %v11158_v63  ;;  %v11177_v60 = vcombine.low %v187_v47, %v195_v48  ;;  %v11162_v62 = vcombine.high %v171_v55, %v179_v56  ;;  %v155_v63 = vld [vmem:[#allocation5 + $0x38] sm:$0xff]  ;;  %v11144_v6 = vcombine.high %v154_v58, %v162_v59  ;;  %v1504_v47 = vld [vmem:[#allocation8 + $0x480] sm:$0xff] }
  0xcd   :  { %v11143_v10 = vcombine.low %v154_v58, %v162_v59  ;;  %v1508_v48 = vld [vmem:[#allocation8 + $0x4a0] sm:$0xff] }
  0xce   :  { %v1372_v51 = vld [vmem:[#allocation8 + $0x60] sm:$0xff] }
  0xcf   :  { %1177 = vmatpush1.bf16.msra.mxu0 %v11155_v1  ;;  %1218 = vmatpush1.bf16.msra.mxu1 %v11157_v4  ;;  %v163_v1 = vld [vmem:[#allocation5 + $0x78] sm:$0xff]  ;;  %v1420_v4 = vld [vmem:[#allocation8 + $0x1e0] sm:$0xff] }
  0xd0   :  { %1178 = vmatprep.subr.bf16.mxu0 %v11140_v5  ;;  %1219 = vmatprep.subr.bf16.mxu1 %v11142_v8  ;;  %v11161_v5 = vcombine.low %v171_v55, %v179_v56  ;;  %v11146_v7 = vcombine.high %v155_v63, %v163_v1  ;;  %v1544_v8 = vld [vmem:[#allocation8 + $0x5c0] sm:$0xff]  ;;  %v11316_v15 = vcombine.high %v1416_v3, %v1420_v4 }
  0xd1   :  { %v1496_v55 = vld [vmem:[#allocation8 + $0x440] sm:$0xff] }
  0xd2   :  { %v1500_v56 = vld [vmem:[#allocation8 + $0x460] sm:$0xff] }
  0xd3   :  { %1179 = vmatpush1.bf16.msra.mxu0 %v11139_v9  ;;  %1220 = vmatpush1.bf16.msra.mxu1 %v11141_v13  ;;  %v1548_v9 = vld [vmem:[#allocation8 + $0x5e0] sm:$0xff] }
  0xd4   :  { %1246 = vmatprep.subr.bf16.mxu0 %v11256_v14  ;;  %1287 = vmatprep.subr.bf16.mxu1 %v11258_v17  ;;  %v1412_v13 = vld [vmem:[#allocation8 + $0x1a0] sm:$0xff]  ;;  %v11145_v14 = vcombine.low %v155_v63, %v163_v1  ;;  %v11444_v16 = vcombine.high %v1544_v8, %v1548_v9  ;;  %v11443_v22 = vcombine.low %v1544_v8, %v1548_v9 }
  0xd5   :  { %v1536_v17 = vld [vmem:[#allocation8 + $0x580] sm:$0xff]  ;;  %v11308_v23 = vcombine.high %v1408_v12, %v1412_v13 }
  0xd6   :  { %1197 = vmatmul.mubr.bf16.vlgmr.msra.gmra.mxu0 %v13365_v11  ;;  %1238 = vmatmul.mubr.bf16.vlgmr.msra.gmra.mxu1 %v13365_v11  ;;  %v1360_v58 = vld [vmem:[#allocation8] sm:$0xff] }
  0xd7   :  { %1247 = vmatpush1.bf16.msra.mxu0 %v11255_v18  ;;  %1288 = vmatpush1.bf16.msra.mxu1 %v11257_v19  ;;  %v1540_v18 = vld [vmem:[#allocation8 + $0x5a0] sm:$0xff]  ;;  %v11315_v19 = vcombine.low %v1416_v3, %v1420_v4 }
  0xd8   :  { %1248 = vmatprep.subr.bf16.mxu0 %v11240_v20  ;;  %1289 = vmatprep.subr.bf16.mxu1 %v11242_v21  ;;  %v1400_v20 = vld [vmem:[#allocation8 + $0x140] sm:$0xff]  ;;  %v11436_v24 = vcombine.high %v1536_v17, %v1540_v18  ;;  %v11435_v30 = vcombine.low %v1536_v17, %v1540_v18 }
  0xd9   :  { %1278 = vmatprep.mubr.bf16.mxu0 %v13281_v0  ;;  %1319 = vmatprep.mubr.bf16.mxu1 %v13281_v0  ;;  %v11192_v0 = vcombine.high %v202_v38, %v210_v39  ;;  %v1404_v21 = vld [vmem:[#allocation8 + $0x160] sm:$0xff] }
  0xda   :  { %v11300_v31 = vcombine.high %v1400_v20, %v1404_v21  ;;  %v1364_v59 = vld [vmem:[#allocation8 + $0x20] sm:$0xff] }
  0xdb   :  { %1249 = vmatpush1.bf16.msra.mxu0 %v11239_v26  ;;  %1290 = vmatpush1.bf16.msra.mxu1 %v11241_v27  ;;  %v1532_v26 = vld [vmem:[#allocation8 + $0x560] sm:$0xff]  ;;  %v11307_v27 = vcombine.low %v1408_v12, %v1412_v13 }
  0xdc   :  { %1250 = vmatprep.subr.bf16.mxu0 %v11224_v28  ;;  %1291 = vmatprep.subr.bf16.mxu1 %v11226_v29  ;;  %v1392_v28 = vld [vmem:[#allocation8 + $0x100] sm:$0xff]  ;;  %v11428_v32 = vcombine.high %v1528_v25, %v1532_v26  ;;  %v11427_v38 = vcombine.low %v1528_v25, %v1532_v26 }
  0xdd   :  { %v1396_v29 = vld [vmem:[#allocation8 + $0x120] sm:$0xff] }
  0xde   :  { %v1488_v63 = vld [vmem:[#allocation8 + $0x400] sm:$0xff] }
  0xdf   :  { %1251 = vmatpush1.bf16.msra.mxu0 %v11223_v34  ;;  %1292 = vmatpush1.bf16.msra.mxu1 %v11225_v35  ;;  %v1524_v34 = vld [vmem:[#allocation8 + $0x520] sm:$0xff]  ;;  %v11299_v35 = vcombine.low %v1400_v20, %v1404_v21 }
  0xe0   :  { %1252 = vmatprep.subr.bf16.mxu0 %v11208_v36  ;;  %1293 = vmatprep.subr.bf16.mxu1 %v11210_v37  ;;  %v1384_v36 = vld [vmem:[#allocation8 + $0xc0] sm:$0xff]  ;;  %v11420_v39 = vcombine.high %v1520_v33, %v1524_v34 }
  0xe1   :  { %v1388_v37 = vld [vmem:[#allocation8 + $0xe0] sm:$0xff] }
  0xe2   :  { %v1492_v1 = vld [vmem:[#allocation8 + $0x420] sm:$0xff] }
  0xe3   :  { %1253 = vmatpush1.bf16.msra.mxu0 %v11207_v42  ;;  %1294 = vmatpush1.bf16.msra.mxu1 %v11209_v45  ;;  %v11291_v42 = vcombine.low %v1392_v28, %v1396_v29  ;;  %v11419_v45 = vcombine.low %v1520_v33, %v1524_v34  ;;  %v1480_v3 = vld [vmem:[#allocation8 + $0x3c0] sm:$0xff] }
  0xe4   :  { %1254 = vmatprep.subr.bf16.mxu0 %v11192_v0  ;;  %1295 = vmatprep.subr.bf16.mxu1 %v11194_v46  ;;  %v11284_v0 = vcombine.high %v1384_v36, %v1388_v37  ;;  %v11412_v46 = vcombine.high %v1512_v40, %v1516_v41  ;;  %v1484_v4 = vld [vmem:[#allocation8 + $0x3e0] sm:$0xff] }
  0xe5   :  { %v1608_v8 = vld [vmem:[#allocation8 + $0x7c0] sm:$0xff] }
  0xe6   :  { %v1612_v9 = vld [vmem:[#allocation8 + $0x7e0] sm:$0xff] }
  0xe7   :  { %1255 = vmatpush1.bf16.msra.mxu0 %v11191_v49  ;;  %1296 = vmatpush1.bf16.msra.mxu1 %v11193_v52  ;;  %v11283_v49 = vcombine.low %v1384_v36, %v1388_v37  ;;  %v11411_v52 = vcombine.low %v1512_v40, %v1516_v41  ;;  %v1472_v12 = vld [vmem:[#allocation8 + $0x380] sm:$0xff] }
  0xe8   :  { %1256 = vmatprep.subr.bf16.mxu0 %v11176_v53  ;;  %1297 = vmatprep.subr.bf16.mxu1 %v11178_v54  ;;  %v11276_v53 = vcombine.high %v1376_v43, %v1380_v44  ;;  %v11404_v54 = vcombine.high %v1504_v47, %v1508_v48  ;;  %v1476_v13 = vld [vmem:[#allocation8 + $0x3a0] sm:$0xff] }
  0xe9   :  { %v1600_v17 = vld [vmem:[#allocation8 + $0x780] sm:$0xff] }
  0xea   :  { %v1604_v18 = vld [vmem:[#allocation8 + $0x7a0] sm:$0xff] }
  0xeb   :  { %1257 = vmatpush1.bf16.msra.mxu0 %v11175_v57  ;;  %1298 = vmatpush1.bf16.msra.mxu1 %v11177_v60  ;;  %v11275_v57 = vcombine.low %v1376_v43, %v1380_v44  ;;  %v11403_v60 = vcombine.low %v1504_v47, %v1508_v48  ;;  %v1464_v20 = vld [vmem:[#allocation8 + $0x340] sm:$0xff] }
  0xec   :  { %1258 = vmatprep.subr.bf16.mxu0 %v11160_v61  ;;  %1299 = vmatprep.subr.bf16.mxu1 %v11162_v62  ;;  %v11268_v61 = vcombine.high %v1368_v50, %v1372_v51  ;;  %v11396_v62 = vcombine.high %v1496_v55, %v1500_v56  ;;  %v1468_v21 = vld [vmem:[#allocation8 + $0x360] sm:$0xff] }
  0xed   :  { %v1592_v25 = vld [vmem:[#allocation8 + $0x740] sm:$0xff] }
  0xee   :  { %v1596_v26 = vld [vmem:[#allocation8 + $0x760] sm:$0xff] }
  0xef   :  { %1259 = vmatpush1.bf16.msra.mxu0 %v11159_v2  ;;  %1300 = vmatpush1.bf16.msra.mxu1 %v11161_v5  ;;  %v11267_v2 = vcombine.low %v1368_v50, %v1372_v51  ;;  %v11395_v5 = vcombine.low %v1496_v55, %v1500_v56  ;;  %v1584_v33 = vld [vmem:[#allocation8 + $0x700] sm:$0xff] }
  0xf0   :  { %1260 = vmatprep.subr.bf16.mxu0 %v11144_v6  ;;  %1301 = vmatprep.subr.bf16.mxu1 %v11146_v7  ;;  %v11260_v6 = vcombine.high %v1360_v58, %v1364_v59  ;;  %v11388_v7 = vcombine.high %v1488_v63, %v1492_v1  ;;  %v1588_v34 = vld [vmem:[#allocation8 + $0x720] sm:$0xff] }
  0xf1   :  { %v1448_v36 = vld [vmem:[#allocation8 + $0x2c0] sm:$0xff] }
  0xf2   :  { %v1452_v37 = vld [vmem:[#allocation8 + $0x2e0] sm:$0xff] }
  0xf3   :  { %1261 = vmatpush1.bf16.msra.mxu0 %v11143_v10  ;;  %1302 = vmatpush1.bf16.msra.mxu1 %v11145_v14  ;;  %v11259_v10 = vcombine.low %v1360_v58, %v1364_v59  ;;  %v11387_v14 = vcombine.low %v1488_v63, %v1492_v1  ;;  %v1576_v40 = vld [vmem:[#allocation8 + $0x6c0] sm:$0xff] }
  0xf4   :  { %7546 = vmatprep.subr.bf16.mxu0 %v11316_v15  ;;  %7587 = vmatprep.subr.bf16.mxu1 %v11444_v16  ;;  %v11380_v15 = vcombine.high %v1480_v3, %v1484_v4  ;;  %v11508_v16 = vcombine.high %v1608_v8, %v1612_v9  ;;  %v1580_v41 = vld [vmem:[#allocation8 + $0x6e0] sm:$0xff] }
  0xf5   :  { %v1440_v43 = vld [vmem:[#allocation8 + $0x280] sm:$0xff] }
  0xf6   :  { %1279 = vmatmul.mubr.bf16.vlgmr.msra.gmra.mxu0 %v13365_v11  ;;  %1320 = vmatmul.mubr.bf16.vlgmr.msra.gmra.mxu1 %v13365_v11  ;;  %v11292_v11 = vcombine.high %v1392_v28, %v1396_v29  ;;  %v1456_v28 = vld [vmem:[#allocation8 + $0x300] sm:$0xff] }
  0xf7   :  { %7547 = vmatpush1.bf16.msra.mxu0 %v11315_v19  ;;  %7588 = vmatpush1.bf16.msra.mxu1 %v11443_v22  ;;  %v11379_v19 = vcombine.low %v1480_v3, %v1484_v4  ;;  %v11507_v22 = vcombine.low %v1608_v8, %v1612_v9  ;;  %v1460_v29 = vld [vmem:[#allocation8 + $0x320] sm:$0xff] }
  0xf8   :  { %7548 = vmatprep.subr.bf16.mxu0 %v11308_v23  ;;  %7589 = vmatprep.subr.bf16.mxu1 %v11436_v24  ;;  %v11372_v23 = vcombine.high %v1472_v12, %v1476_v13  ;;  %v11500_v24 = vcombine.high %v1600_v17, %v1604_v18  ;;  %v1444_v44 = vld [vmem:[#allocation8 + $0x2a0] sm:$0xff] }
  0xf9   :  { %v1568_v47 = vld [vmem:[#allocation8 + $0x680] sm:$0xff] }
  0xfa   :  { %v1572_v48 = vld [vmem:[#allocation8 + $0x6a0] sm:$0xff] }
  0xfb   :  { %7549 = vmatpush1.bf16.msra.mxu0 %v11307_v27  ;;  %7590 = vmatpush1.bf16.msra.mxu1 %v11435_v30  ;;  %v11371_v27 = vcombine.low %v1472_v12, %v1476_v13  ;;  %v11499_v30 = vcombine.low %v1600_v17, %v1604_v18  ;;  %v1432_v50 = vld [vmem:[#allocation8 + $0x240] sm:$0xff]  ;;  %v13395_v18 = vld [vmem:[#allocation7] sm:$0xff] }
  0xfc   :  { %7550 = vmatprep.subr.bf16.mxu0 %v11300_v31  ;;  %7591 = vmatprep.subr.bf16.mxu1 %v11428_v32  ;;  %v11364_v31 = vcombine.high %v1464_v20, %v1468_v21  ;;  %v11492_v32 = vcombine.high %v1592_v25, %v1596_v26  ;;  %v1436_v51 = vld [vmem:[#allocation8 + $0x260] sm:$0xff] }
  0xfd   :  { %v1560_v55 = vld [vmem:[#allocation8 + $0x640] sm:$0xff] }
  0xfe   :  { %v1564_v56 = vld [vmem:[#allocation8 + $0x660] sm:$0xff] }
  0xff   :  { %7551 = vmatpush1.bf16.msra.mxu0 %v11299_v35  ;;  %7592 = vmatpush1.bf16.msra.mxu1 %v11427_v38  ;;  %v11363_v35 = vcombine.low %v1464_v20, %v1468_v21  ;;  %v11491_v38 = vcombine.low %v1592_v25, %v1596_v26  ;;  %v1424_v58 = vld [vmem:[#allocation8 + $0x200] sm:$0xff] }
 0x100   :  { %7552 = vmatprep.subr.bf16.mxu0 %v11292_v11  ;;  %7593 = vmatprep.subr.bf16.mxu1 %v11420_v39  ;;  %v11356_v11 = vcombine.high %v1456_v28, %v1460_v29  ;;  %v11484_v39 = vcombine.high %v1584_v33, %v1588_v34  ;;  %v1428_v59 = vld [vmem:[#allocation8 + $0x220] sm:$0xff] }
 0x101   :  { %v1552_v63 = vld [vmem:[#allocation8 + $0x600] sm:$0xff] }
 0x102   :  { %v1556_v1 = vld [vmem:[#allocation8 + $0x620] sm:$0xff] }
 0x103   :  { %7553 = vmatpush1.bf16.msra.mxu0 %v11291_v42  ;;  %7594 = vmatpush1.bf16.msra.mxu1 %v11419_v45  ;;  %v11355_v42 = vcombine.low %v1456_v28, %v1460_v29  ;;  %v11483_v45 = vcombine.low %v1584_v33, %v1588_v34  ;;  %v13381_v3 = vld [vmem:[#allocation8 + $0x9c0] sm:$0xff]  ;;  %v11451_v12 = vcombine.low %v1552_v63, %v1556_v1 }
 0x104   :  { %7554 = vmatprep.subr.bf16.mxu0 %v11284_v0  ;;  %7595 = vmatprep.subr.bf16.mxu1 %v11412_v46  ;;  %v11348_v0 = vcombine.high %v1448_v36, %v1452_v37  ;;  %v11476_v46 = vcombine.high %v1576_v40, %v1580_v41  ;;  %v13383_v4 = vld [vmem:[#allocation8 + $0x9e0] sm:$0xff] }
 0x105   :  { %v13385_v8 = vld [vmem:[#allocation8 + $0xdc0] sm:$0xff]  ;;  %v11572_v13 = vcombine.high %v13381_v3, %v13383_v4 }
 0x106   :  { %v1804_v9 = vld [vmem:[#allocation8 + $0xde0] sm:$0xff] }
 0x107   :  { %7555 = vmatpush1.bf16.msra.mxu0 %v11283_v49  ;;  %7596 = vmatpush1.bf16.msra.mxu1 %v11411_v52  ;;  %v11347_v49 = vcombine.low %v1448_v36, %v1452_v37  ;;  %v11475_v52 = vcombine.low %v1576_v40, %v1580_v41 }
 0x108   :  { %7556 = vmatprep.subr.bf16.mxu0 %v11276_v53  ;;  %7597 = vmatprep.subr.bf16.mxu1 %v11404_v54  ;;  %v11340_v53 = vcombine.high %v1440_v43, %v1444_v44  ;;  %v11468_v54 = vcombine.high %v1568_v47, %v1572_v48 }
 0x10b   :  { %7557 = vmatpush1.bf16.msra.mxu0 %v11275_v57  ;;  %7598 = vmatpush1.bf16.msra.mxu1 %v11403_v60  ;;  %v11339_v57 = vcombine.low %v1440_v43, %v1444_v44  ;;  %v11467_v60 = vcombine.low %v1568_v47, %v1572_v48  ;;  %v1796_v43 = vld [vmem:[#allocation8 + $0xda0] sm:$0xff] }
 0x10c   :  { %7558 = vmatprep.subr.bf16.mxu0 %v11268_v61  ;;  %7599 = vmatprep.subr.bf16.mxu1 %v11396_v62  ;;  %v11332_v61 = vcombine.high %v1432_v50, %v1436_v51  ;;  %v11460_v62 = vcombine.high %v1560_v55, %v1564_v56 }
 0x10f   :  { %7559 = vmatpush1.bf16.msra.mxu0 %v11267_v2  ;;  %7600 = vmatpush1.bf16.msra.mxu1 %v11395_v5  ;;  %v11331_v2 = vcombine.low %v1432_v50, %v1436_v51  ;;  %v11459_v5 = vcombine.low %v1560_v55, %v1564_v56  ;;  %v1788_v55 = vld [vmem:[#allocation8 + $0xd60] sm:$0xff] }
 0x110   :  { %7560 = vmatprep.subr.bf16.mxu0 %v11260_v6  ;;  %7601 = vmatprep.subr.bf16.mxu1 %v11388_v7  ;;  %v11324_v6 = vcombine.high %v1424_v58, %v1428_v59  ;;  %v11452_v7 = vcombine.high %v1552_v63, %v1556_v1  ;;  %v1780_v63 = vld [vmem:[#allocation8 + $0xd20] sm:$0xff] }
 0x113   :  { %7561 = vmatpush1.bf16.msra.mxu0 %v11259_v10  ;;  %7602 = vmatpush1.bf16.msra.mxu1 %v11387_v14  ;;  %v11323_v10 = vcombine.low %v1424_v58, %v1428_v59  ;;  %v11700_v14 = vcombine.high %v13385_v8, %v1804_v9 }
 0x114   :  { %7562 = vmatprep.subr.bf16.mxu0 %v11380_v15  ;;  %7603 = vmatprep.subr.bf16.mxu1 %v11508_v16  ;;  %v280_v15 = vlaneseq }
 0x116   :  { %v13390_v16 = vshrl.u32 %v280_v15, 7  ;;  %v1636_v15 = vld [vmem:[#allocation8 + $0x8a0] sm:$0xff] }
 0x117   :  { %7563 = vmatpush2.bf16.msra.mxu0 %v11379_v19  ;;  %7604 = vmatpush2.bf16.msra.mxu1 %v11507_v22 }
 0x118   :  { %7564 = vmatprep.subr.bf16.mxu0 %v11372_v23  ;;  %7605 = vmatprep.subr.bf16.mxu1 %v11500_v24  ;;  %v13393_v17 = vsub.s32 0, %v13390_v16  ;;  %v13398_v19 = vsub.s32 2, %v13390_v16  ;;  %v13401_v20 = vsub.s32 1, %v13390_v16  ;;  %v13404_v21 = vsub.s32 3, %v13390_v16 }
 0x11a   :  { %v283_v22 = vrot.slane %v13395_v18, %v13393_v17  ;;  %v291_v23 = vrot.slane %v13395_v18, %v13398_v19  ;;  %v287_v24 = vrot.slane %v13395_v18, %v13401_v20  ;;  %v295_v26 = vrot.slane %v13395_v18, %v13404_v21 }
 0x11b   :  { %7565 = vmatpush2.bf16.msra.mxu0 %v11371_v27  ;;  %7606 = vmatpush2.bf16.msra.mxu1 %v11499_v30 }
 0x11c   :  { %7566 = vmatprep.subr.bf16.mxu0 %v11364_v31  ;;  %7607 = vmatprep.subr.bf16.mxu1 %v11492_v32 }
 0x11f   :  { %7567 = vmatpush2.bf16.msra.mxu0 %v11363_v35  ;;  %7608 = vmatpush2.bf16.msra.mxu1 %v11491_v38 }
 0x120   :  { %7568 = vmatprep.subr.bf16.mxu0 %v11356_v11  ;;  %7609 = vmatprep.subr.bf16.mxu1 %v11484_v39  ;;  %v1664_v11 = vld [vmem:[#allocation8 + $0x980] sm:$0xff] }
 0x121   :  { %v1668_v39 = vld [vmem:[#allocation8 + $0x9a0] sm:$0xff] }
 0x122   :  { %v11564_v50 = vcombine.high %v1664_v11, %v1668_v39  ;;  %v11563_v56 = vcombine.low %v1664_v11, %v1668_v39  ;;  %v1620_v11 = vld [vmem:[#allocation8 + $0x820] sm:$0xff] }
 0x123   :  { %7569 = vmatpush2.bf16.msra.mxu0 %v11355_v42  ;;  %7610 = vmatpush2.bf16.msra.mxu1 %v11483_v45  ;;  %v1792_v42 = vld [vmem:[#allocation8 + $0xd80] sm:$0xff] }
 0x124   :  { %7570 = vmatprep.subr.bf16.mxu0 %v11348_v0  ;;  %7611 = vmatprep.subr.bf16.mxu1 %v11476_v46  ;;  %v11571_v46 = vcombine.low %v13381_v3, %v13383_v4  ;;  %v11692_v51 = vcombine.high %v1792_v42, %v1796_v43  ;;  %v1744_v39 = vld [vmem:[#allocation8 + $0xc00] sm:$0xff] }
 0x127   :  { %7571 = vmatpush2.bf16.msra.mxu0 %v11347_v49  ;;  %7612 = vmatpush2.bf16.msra.mxu1 %v11475_v52  ;;  %v11699_v49 = vcombine.low %v13385_v8, %v1804_v9  ;;  %v1656_v52 = vld [vmem:[#allocation8 + $0x940] sm:$0xff] }
 0x128   :  { %7572 = vmatprep.subr.bf16.mxu0 %v11340_v53  ;;  %7613 = vmatprep.subr.bf16.mxu1 %v11468_v54  ;;  %v1660_v53 = vld [vmem:[#allocation8 + $0x960] sm:$0xff] }
 0x129   :  { %v1784_v54 = vld [vmem:[#allocation8 + $0xd40] sm:$0xff]  ;;  %v11556_v58 = vcombine.high %v1656_v52, %v1660_v53  ;;  %v11555_v1 = vcombine.low %v1656_v52, %v1660_v53 }
 0x12a   :  { %v11684_v59 = vcombine.high %v1784_v54, %v1788_v55  ;;  %v1772_v8 = vld [vmem:[#allocation8 + $0xce0] sm:$0xff] }
 0x12b   :  { %7573 = vmatpush2.bf16.msra.mxu0 %v11339_v57  ;;  %7614 = vmatpush2.bf16.msra.mxu1 %v11467_v60  ;;  %v11691_v57 = vcombine.low %v1792_v42, %v1796_v43  ;;  %v1648_v60 = vld [vmem:[#allocation8 + $0x900] sm:$0xff] }
 0x12c   :  { %7574 = vmatprep.subr.bf16.mxu0 %v11332_v61  ;;  %7615 = vmatprep.subr.bf16.mxu1 %v11460_v62  ;;  %v1652_v61 = vld [vmem:[#allocation8 + $0x920] sm:$0xff] }
 0x12d   :  { %v1776_v62 = vld [vmem:[#allocation8 + $0xd00] sm:$0xff]  ;;  %v11548_v3 = vcombine.high %v1648_v60, %v1652_v61  ;;  %v11547_v9 = vcombine.low %v1648_v60, %v1652_v61 }
 0x12e   :  { %v11676_v4 = vcombine.high %v1776_v62, %v1780_v63  ;;  %v1740_v52 = vld [vmem:[#allocation8 + $0xbe0] sm:$0xff] }
 0x12f   :  { %7575 = vmatpush2.bf16.msra.mxu0 %v11331_v2  ;;  %7616 = vmatpush2.bf16.msra.mxu1 %v11459_v5  ;;  %v11683_v2 = vcombine.low %v1784_v54, %v1788_v55  ;;  %v1640_v5 = vld [vmem:[#allocation8 + $0x8c0] sm:$0xff] }
 0x130   :  { %7576 = vmatprep.subr.bf16.mxu0 %v11324_v6  ;;  %7617 = vmatprep.subr.bf16.mxu1 %v11452_v7  ;;  %v1644_v6 = vld [vmem:[#allocation8 + $0x8e0] sm:$0xff] }
 0x131   :  { %v1768_v7 = vld [vmem:[#allocation8 + $0xcc0] sm:$0xff] }
 0x132   :  { %v1864_v54 = vld [vmem:[#allocation8 + $0xfc0] sm:$0xff] }
 0x133   :  { %7577 = vmatpush2.bf16.msra.mxu0 %v11323_v10  ;;  %7618 = vmatpush2.bf16.msra.mxu1 %v11451_v12  ;;  %v11675_v10 = vcombine.low %v1776_v62, %v1780_v63  ;;  %v11540_v12 = vcombine.high %v1640_v5, %v1644_v6  ;;  %v1868_v55 = vld [vmem:[#allocation8 + $0xfe0] sm:$0xff] }
 0x134   :  { %7628 = vmatprep.subr.bf16.mxu0 %v11572_v13  ;;  %7669 = vmatprep.subr.bf16.mxu1 %v11700_v14  ;;  %v11668_v13 = vcombine.high %v1768_v7, %v1772_v8  ;;  %v1632_v14 = vld [vmem:[#allocation8 + $0x880] sm:$0xff] }
 0x156   :  { %v1034_v25 = vpop.f32.mrf.mxu0  ;;  %v1075_v28 = vpop.f32.mrf.mxu1 }
 0x157   :  { %v1035_v27 = vadd.f32 %v1034_v25, %v283_v22  ;;  %v1076_v29 = vadd.f32 %v1075_v28, %v291_v23  ;;  %v1760_v22 = vld [vmem:[#allocation8 + $0xc80] sm:$0xff]  ;;  %v11667_v25 = vcombine.low %v1768_v7, %v1772_v8 }
 0x158   :  { %v1036_v30 = vpop.f32.mrf.mxu0  ;;  %v1077_v32 = vpop.f32.mrf.mxu1  ;;  %v1764_v23 = vld [vmem:[#allocation8 + $0xca0] sm:$0xff] }
 0x159   :  { %v1037_v31 = vadd.f32 %v1036_v30, %v287_v24  ;;  %v1328_v33 = vmax.f32 %v1035_v27, 0.0  ;;  %v1330_v34 = vmax.f32 %v1076_v29, 0.0  ;;  %v1078_v35 = vadd.f32 %v1077_v32, %v295_v26  ;;  %v1624_v28 = vld [vmem:[#allocation8 + $0x840] sm:$0xff] }
 0x15a   :  { %v1038_v36 = vpop.f32.mrf.mxu0  ;;  %v1079_v38 = vpop.f32.mrf.mxu1  ;;  %v11539_v24 = vcombine.low %v1640_v5, %v1644_v6  ;;  %v11532_v26 = vcombine.high %v1632_v14, %v1636_v15  ;;  %v11660_v27 = vcombine.high %v1760_v22, %v1764_v23  ;;  %v1628_v29 = vld [vmem:[#allocation8 + $0x860] sm:$0xff]  ;;  %v11531_v32 = vcombine.low %v1632_v14, %v1636_v15 }
 0x15b   :  { %v1329_v37 = vmax.f32 %v1037_v31, 0.0  ;;  %v1331_v40 = vmax.f32 %v1078_v35, 0.0  ;;  %v13414_v44 = vpack.c.bf16 %v1330_v34, %v1330_v34  ;;  %v13420_v47 = vpack.c.bf16 %v1328_v33, %v1328_v33  ;;  %v1752_v30 = vld [vmem:[#allocation8 + $0xc40] sm:$0xff] }
 0x15c   :  { %v1039_v41 = vpop.f32.mrf.mxu0  ;;  %v1080_v0 = vpop.f32.mrf.mxu1  ;;  %v1756_v31 = vld [vmem:[#allocation8 + $0xc60] sm:$0xff]  ;;  %v13430_v33 = vsub.s32 5, %v13390_v16  ;;  %v11659_v34 = vcombine.low %v1760_v22, %v1764_v23  ;;  %v11524_v35 = vcombine.high %v1624_v28, %v1628_v29  ;;  %v13433_v36 = vsub.s32 7, %v13390_v16 }
 0x15d   :  { %v13416_v45 = vpack.c.bf16 %v1329_v37, %v1329_v37  ;;  %v13422_v48 = vpack.c.bf16 %v1331_v40, %v1331_v40  ;;  %v11652_v37 = vcombine.high %v1752_v30, %v1756_v31  ;;  %v1616_v38 = vld [vmem:[#allocation8 + $0x800] sm:$0xff]  ;;  %v11523_v41 = vcombine.low %v1624_v28, %v1628_v29 }
 0x15e   :  { %v1748_v40 = vld [vmem:[#allocation8 + $0xc20] sm:$0xff]  ;;  %v303_v42 = vrot.slane %v13395_v18, %v13430_v33  ;;  %v11651_v43 = vcombine.low %v1752_v30, %v1756_v31  ;;  %v11516_v0 = vcombine.high %v1616_v38, %v1620_v11  ;;  %v11763_v14 = vcombine.low %v1864_v54, %v1868_v55 }
 0x15f   :  { %7578 = vmatprep.mubr.bf16.mxu0 %v13416_v45  ;;  %7619 = vmatprep.mubr.bf16.mxu1 %v13422_v48  ;;  %v11643_v60 = vcombine.low %v1744_v39, %v1748_v40  ;;  %v1856_v6 = vld [vmem:[#allocation8 + $0xf80] sm:$0xff] }
 0x160   :  { %7579 = vmatmul.mubr.bf16.vlgmr.msra.gmra.mxu0 %v13420_v47  ;;  %7620 = vmatmul.mubr.bf16.vlgmr.msra.gmra.mxu1 %v13414_v44  ;;  %v1860_v7 = vld [vmem:[#allocation8 + $0xfa0] sm:$0xff] }
 0x161   :  { %7629 = vmatpush1.bf16.msra.mxu0 %v11571_v46  ;;  %7670 = vmatpush1.bf16.msra.mxu1 %v11699_v49  ;;  %v311_v49 = vrot.slane %v13395_v18, %v13433_v36  ;;  %v11756_v23 = vcombine.high %v1856_v6, %v1860_v7  ;;  %v11755_v29 = vcombine.low %v1856_v6, %v1860_v7 }
 0x162   :  { %7630 = vmatprep.subr.bf16.mxu0 %v11564_v50  ;;  %7671 = vmatprep.subr.bf16.mxu1 %v11692_v51  ;;  %v11644_v50 = vcombine.high %v1744_v39, %v1748_v40  ;;  %v1736_v51 = vld [vmem:[#allocation8 + $0xbc0] sm:$0xff] }
 0x163   :  { %v11636_v61 = vcombine.high %v1736_v51, %v1740_v52 }
 0x165   :  { %7631 = vmatpush1.bf16.msra.mxu0 %v11563_v56  ;;  %7672 = vmatpush1.bf16.msra.mxu1 %v11691_v57  ;;  %v11515_v57 = vcombine.low %v1616_v38, %v1620_v11 }
 0x166   :  { %7632 = vmatprep.subr.bf16.mxu0 %v11556_v58  ;;  %7673 = vmatprep.subr.bf16.mxu1 %v11684_v59 }
 0x169   :  { %7633 = vmatpush1.bf16.msra.mxu0 %v11555_v1  ;;  %7674 = vmatpush1.bf16.msra.mxu1 %v11683_v2  ;;  %v11764_v1 = vcombine.high %v1864_v54, %v1868_v55  ;;  %v1728_v2 = vld [vmem:[#allocation8 + $0xb80] sm:$0xff] }
 0x16a   :  { %7634 = vmatprep.subr.bf16.mxu0 %v11548_v3  ;;  %7675 = vmatprep.subr.bf16.mxu1 %v11676_v4  ;;  %v1732_v3 = vld [vmem:[#allocation8 + $0xba0] sm:$0xff] }
 0x16b   :  { %v11628_v15 = vcombine.high %v1728_v2, %v1732_v3  ;;  %v11627_v28 = vcombine.low %v1728_v2, %v1732_v3  ;;  %v1696_v54 = vld [vmem:[#allocation8 + $0xa80] sm:$0xff] }
 0x16c   :  { %v1700_v55 = vld [vmem:[#allocation8 + $0xaa0] sm:$0xff] }
 0x16d   :  { %7635 = vmatpush1.bf16.msra.mxu0 %v11547_v9  ;;  %7676 = vmatpush1.bf16.msra.mxu1 %v11675_v10  ;;  %v11635_v10 = vcombine.low %v1736_v51, %v1740_v52  ;;  %v1692_v2 = vld [vmem:[#allocation8 + $0xa60] sm:$0xff]  ;;  %v11595_v6 = vcombine.low %v1696_v54, %v1700_v55 }
 0x16e   :  { %7636 = vmatprep.subr.bf16.mxu0 %v11540_v12  ;;  %7677 = vmatprep.subr.bf16.mxu1 %v11668_v13  ;;  %v1816_v3 = vld [vmem:[#allocation8 + $0xe40] sm:$0xff] }
 0x171   :  { %7637 = vmatpush1.bf16.msra.mxu0 %v11539_v24  ;;  %7678 = vmatpush1.bf16.msra.mxu1 %v11667_v25  ;;  %v1720_v24 = vld [vmem:[#allocation8 + $0xb40] sm:$0xff] }
 0x172   :  { %7638 = vmatprep.subr.bf16.mxu0 %v11532_v26  ;;  %7679 = vmatprep.subr.bf16.mxu1 %v11660_v27  ;;  %v1724_v25 = vld [vmem:[#allocation8 + $0xb60] sm:$0xff] }
 0x173   :  { %v1848_v26 = vld [vmem:[#allocation8 + $0xf40] sm:$0xff]  ;;  %v11620_v30 = vcombine.high %v1720_v24, %v1724_v25  ;;  %v11619_v38 = vcombine.low %v1720_v24, %v1724_v25 }
 0x174   :  { %v1852_v27 = vld [vmem:[#allocation8 + $0xf60] sm:$0xff] }
 0x175   :  { %7639 = vmatpush1.bf16.msra.mxu0 %v11531_v32  ;;  %7680 = vmatpush1.bf16.msra.mxu1 %v11659_v34  ;;  %v11748_v31 = vcombine.high %v1848_v26, %v1852_v27  ;;  %v1712_v32 = vld [vmem:[#allocation8 + $0xb00] sm:$0xff]  ;;  %v11747_v11 = vcombine.low %v1848_v26, %v1852_v27 }
 0x176   :  { %7640 = vmatprep.subr.bf16.mxu0 %v11524_v35  ;;  %v13437_v46 = vpop.f32.mrf.mxu0  ;;  %7681 = vmatprep.subr.bf16.mxu1 %v11652_v37  ;;  %v13441_v53 = vpop.f32.mrf.mxu1  ;;  %v1716_v34 = vld [vmem:[#allocation8 + $0xb20] sm:$0xff] }
 0x177   :  { %v1840_v35 = vld [vmem:[#allocation8 + $0xf00] sm:$0xff]  ;;  %v11612_v39 = vcombine.high %v1712_v32, %v1716_v34 }
 0x178   :  { %v1118_v56 = vpop.f32.mrf.mxu0  ;;  %v1159_v59 = vpop.f32.mrf.mxu1  ;;  %v1844_v37 = vld [vmem:[#allocation8 + $0xf20] sm:$0xff] }
 0x179   :  { %7641 = vmatpush1.bf16.msra.mxu0 %v11523_v41  ;;  %v1119_v58 = vadd.f32 %v1118_v56, %v303_v42  ;;  %7682 = vmatpush1.bf16.msra.mxu1 %v11651_v43  ;;  %v1160_v63 = vadd.f32 %v1159_v59, %v311_v49  ;;  %v11740_v40 = vcombine.high %v1840_v35, %v1844_v37  ;;  %v1704_v41 = vld [vmem:[#allocation8 + $0xac0] sm:$0xff]  ;;  %v13450_v59 = vsub.s32 6, %v13390_v16 }
 0x17a   :  { %7642 = vmatprep.subr.bf16.mxu0 %v11516_v0  ;;  %v1120_v62 = vpop.f32.mrf.mxu0  ;;  %7683 = vmatprep.subr.bf16.mxu1 %v11644_v50  ;;  %v1161_v5 = vpop.f32.mrf.mxu1  ;;  %v1708_v42 = vld [vmem:[#allocation8 + $0xae0] sm:$0xff]  ;;  %v11611_v49 = vcombine.low %v1712_v32, %v1716_v34  ;;  %v11739_v50 = vcombine.low %v1840_v35, %v1844_v37 }
 0x17b   :  { %v1333_v4 = vmax.f32 %v1119_v58, 0.0  ;;  %v1335_v8 = vmax.f32 %v1160_v63, 0.0  ;;  %v1832_v43 = vld [vmem:[#allocation8 + $0xec0] sm:$0xff]  ;;  %v11604_v51 = vcombine.high %v1704_v41, %v1708_v42  ;;  %v11603_v58 = vcombine.low %v1704_v41, %v1708_v42 }
 0x17c   :  { %v1121_v9 = vpop.f32.mrf.mxu0  ;;  %v1162_v13 = vpop.f32.mrf.mxu1  ;;  %v1836_v0 = vld [vmem:[#allocation8 + $0xee0] sm:$0xff]  ;;  %v11596_v62 = vcombine.high %v1696_v54, %v1700_v55  ;;  %v307_v5 = vrot.slane %v13395_v18, %v13450_v59 }
 0x17d   :  { %7643 = vmatpush1.bf16.msra.mxu0 %v11515_v57  ;;  %v13443_v12 = vpack.c.bf16 %v1333_v4, %v1333_v4  ;;  %7684 = vmatpush1.bf16.msra.mxu1 %v11643_v60  ;;  %v13445_v22 = vpack.c.bf16 %v1335_v8, %v1335_v8  ;;  %v11732_v52 = vcombine.high %v1832_v43, %v1836_v0  ;;  %v1824_v56 = vld [vmem:[#allocation8 + $0xe80] sm:$0xff]  ;;  %v13459_v9 = vld [vmem:[#allocation7 + $0x8] sm:$0xff] }
 0x17e   :  { %7644 = vmatprep.subr.bf16.mxu0 %v11636_v61  ;;  %7685 = vmatprep.subr.bf16.mxu1 %v11764_v1  ;;  %v1828_v57 = vld [vmem:[#allocation8 + $0xea0] sm:$0xff]  ;;  %v11731_v60 = vcombine.low %v1832_v43, %v1836_v0  ;;  %v13453_v61 = vsub.s32 4, %v13390_v16  ;;  %v1158_v24 = vadd.f32 %v13441_v53, %v307_v5 }
 0x17f   :  { %7660 = vmatprep.mubr.bf16.mxu0 %v13443_v12  ;;  %7701 = vmatprep.mubr.bf16.mxu1 %v13445_v22  ;;  %v11724_v63 = vcombine.high %v1824_v56, %v1828_v57  ;;  %v1688_v1 = vld [vmem:[#allocation8 + $0xa40] sm:$0xff]  ;;  %v11723_v8 = vcombine.low %v1824_v56, %v1828_v57 }
 0x180   :  { %v1820_v4 = vld [vmem:[#allocation8 + $0xe60] sm:$0xff]  ;;  %v299_v7 = vrot.slane %v13395_v18, %v13453_v61  ;;  %v11588_v16 = vcombine.high %v1688_v1, %v1692_v2  ;;  %v11587_v25 = vcombine.low %v1688_v1, %v1692_v2  ;;  %v319_v18 = vrot.slane %v13459_v9, %v13401_v20 }
 0x181   :  { %7645 = vmatpush2.bf16.msra.mxu0 %v11635_v10  ;;  %7686 = vmatpush2.bf16.msra.mxu1 %v11763_v14  ;;  %v11716_v10 = vcombine.high %v1816_v3, %v1820_v4  ;;  %v1680_v13 = vld [vmem:[#allocation8 + $0xa00] sm:$0xff]  ;;  %v11715_v26 = vcombine.low %v1816_v3, %v1820_v4 }
 0x182   :  { %7646 = vmatprep.subr.bf16.mxu0 %v11628_v15  ;;  %7687 = vmatprep.subr.bf16.mxu1 %v11756_v23  ;;  %v1684_v14 = vld [vmem:[#allocation8 + $0xa20] sm:$0xff]  ;;  %v1117_v27 = vadd.f32 %v13437_v46, %v299_v7 }
 0x183   :  { %v1808_v15 = vld [vmem:[#allocation8 + $0xe00] sm:$0xff]  ;;  %v11579_v46 = vcombine.low %v1680_v13, %v1684_v14 }
 0x184   :  { %v1812_v23 = vld [vmem:[#allocation8 + $0xe20] sm:$0xff]  ;;  %v1332_v41 = vmax.f32 %v1117_v27, 0.0 }
 0x185   :  { %7647 = vmatpush2.bf16.msra.mxu0 %v11627_v28  ;;  %7688 = vmatpush2.bf16.msra.mxu1 %v11755_v29  ;;  %v11580_v28 = vcombine.high %v1680_v13, %v1684_v14  ;;  %v1928_v32 = vld [vmem:[#allocation8 + $0x11c0] sm:$0xff]  ;;  %v11707_v42 = vcombine.low %v1808_v15, %v1812_v23 }
 0x186   :  { %7648 = vmatprep.subr.bf16.mxu0 %v11620_v30  ;;  %7689 = vmatprep.subr.bf16.mxu1 %v11748_v31  ;;  %v327_v30 = vrot.slane %v13459_v9, %v13404_v21  ;;  %v11708_v31 = vcombine.high %v1808_v15, %v1812_v23  ;;  %v1932_v53 = vld [vmem:[#allocation8 + $0x11e0] sm:$0xff]  ;;  %v13473_v2 = vpack.c.bf16 %v1332_v41, %v1332_v41 }
 0x187   :  { %v2056_v35 = vld [vmem:[#allocation8 + $0x15c0] sm:$0xff]  ;;  %v11828_v43 = vcombine.high %v1928_v32, %v1932_v53 }
 0x188   :  { %v2060_v37 = vld [vmem:[#allocation8 + $0x15e0] sm:$0xff] }
 0x189   :  { %7649 = vmatpush2.bf16.msra.mxu0 %v11619_v38  ;;  %7690 = vmatpush2.bf16.msra.mxu1 %v11747_v11  ;;  %v1334_v11 = vmax.f32 %v1158_v24, 0.0  ;;  %v2048_v56 = vld [vmem:[#allocation8 + $0x1580] sm:$0xff]  ;;  %v11955_v3 = vcombine.low %v2056_v35, %v2060_v37 }
 0x18a   :  { %7650 = vmatprep.subr.bf16.mxu0 %v11612_v39  ;;  %7691 = vmatprep.subr.bf16.mxu1 %v11740_v40  ;;  %v2052_v57 = vld [vmem:[#allocation8 + $0x15a0] sm:$0xff] }
 0x18b   :  { %v11948_v5 = vcombine.high %v2048_v56, %v2052_v57  ;;  %v1916_v7 = vld [vmem:[#allocation8 + $0x1160] sm:$0xff]  ;;  %v11947_v15 = vcombine.low %v2048_v56, %v2052_v57 }
 0x18c   :  { %v2036_v27 = vld [vmem:[#allocation8 + $0x1520] sm:$0xff] }
 0x18d   :  { %7651 = vmatpush2.bf16.msra.mxu0 %v11611_v49  ;;  %7692 = vmatpush2.bf16.msra.mxu1 %v11739_v50  ;;  %v11956_v50 = vcombine.high %v2056_v35, %v2060_v37  ;;  %v1900_v35 = vld [vmem:[#allocation8 + $0x10e0] sm:$0xff] }
 0x18e   :  { %7652 = vmatprep.subr.bf16.mxu0 %v11604_v51  ;;  %7693 = vmatprep.subr.bf16.mxu1 %v11732_v52  ;;  %v1920_v51 = vld [vmem:[#allocation8 + $0x1180] sm:$0xff] }
 0x18f   :  { %v1924_v52 = vld [vmem:[#allocation8 + $0x11a0] sm:$0xff] }
 0x190   :  { %v11820_v4 = vcombine.high %v1920_v51, %v1924_v52  ;;  %v11819_v14 = vcombine.low %v1920_v51, %v1924_v52  ;;  %v2024_v37 = vld [vmem:[#allocation8 + $0x14c0] sm:$0xff] }
 0x191   :  { %7653 = vmatpush2.bf16.msra.mxu0 %v11603_v58  ;;  %7694 = vmatpush2.bf16.msra.mxu1 %v11731_v60  ;;  %v1888_v41 = vld [vmem:[#allocation8 + $0x1080] sm:$0xff] }
 0x192   :  { %7654 = vmatprep.subr.bf16.mxu0 %v11596_v62  ;;  %7695 = vmatprep.subr.bf16.mxu1 %v11724_v63  ;;  %v13471_v62 = vpack.c.bf16 %v1334_v11, %v1334_v11  ;;  %v11827_v63 = vcombine.low %v1928_v32, %v1932_v53  ;;  %v1896_v53 = vld [vmem:[#allocation8 + $0x10c0] sm:$0xff] }
 0x193   :  { %v2008_v56 = vld [vmem:[#allocation8 + $0x1440] sm:$0xff] }
 0x194   :  { %v2012_v57 = vld [vmem:[#allocation8 + $0x1460] sm:$0xff] }
 0x195   :  { %7655 = vmatpush2.bf16.msra.mxu0 %v11595_v6  ;;  %7696 = vmatpush2.bf16.msra.mxu1 %v11723_v8  ;;  %v1912_v6 = vld [vmem:[#allocation8 + $0x1140] sm:$0xff] }
 0x196   :  { %7656 = vmatprep.subr.bf16.mxu0 %v11588_v16  ;;  %v13465_v29 = vpop.f32.mrf.mxu0  ;;  %7697 = vmatprep.subr.bf16.mxu1 %v11716_v10  ;;  %v13469_v34 = vpop.f32.mrf.mxu1  ;;  %v2040_v16 = vld [vmem:[#allocation8 + $0x1540] sm:$0xff]  ;;  %v11812_v23 = vcombine.high %v1912_v6, %v1916_v7 }
 0x197   :  { %v2044_v10 = vld [vmem:[#allocation8 + $0x1560] sm:$0xff] }
 0x198   :  { %v1200_v38 = vpop.f32.mrf.mxu0  ;;  %v1241_v40 = vpop.f32.mrf.mxu1  ;;  %v11940_v24 = vcombine.high %v2040_v16, %v2044_v10 }
 0x199   :  { %7657 = vmatpush2.bf16.msra.mxu0 %v11587_v25  ;;  %v1201_v39 = vadd.f32 %v1200_v38, %v319_v18  ;;  %7698 = vmatpush2.bf16.msra.mxu1 %v11715_v26  ;;  %v1242_v49 = vadd.f32 %v1241_v40, %v327_v30  ;;  %v1904_v25 = vld [vmem:[#allocation8 + $0x1100] sm:$0xff]  ;;  %v11939_v30 = vcombine.low %v2040_v16, %v2044_v10 }
 0x19a   :  { %7658 = vmatprep.subr.bf16.mxu0 %v11580_v28  ;;  %v1202_v0 = vpop.f32.mrf.mxu0  ;;  %7699 = vmatprep.subr.bf16.mxu1 %v11708_v31  ;;  %v1243_v55 = vpop.f32.mrf.mxu1  ;;  %v1908_v26 = vld [vmem:[#allocation8 + $0x1120] sm:$0xff]  ;;  %v11811_v28 = vcombine.low %v1912_v6, %v1916_v7  ;;  %v339_v16 = vrot.slane %v13459_v9, %v13450_v59 }
 0x19b   :  { %v1337_v54 = vmax.f32 %v1201_v39, 0.0  ;;  %v1339_v58 = vmax.f32 %v1242_v49, 0.0  ;;  %v2032_v18 = vld [vmem:[#allocation8 + $0x1500] sm:$0xff]  ;;  %v11804_v31 = vcombine.high %v1904_v25, %v1908_v26  ;;  %v11803_v11 = vcombine.low %v1904_v25, %v1908_v26 }
 0x19c   :  { %v1203_v60 = vpop.f32.mrf.mxu0  ;;  %v1244_v1 = vpop.f32.mrf.mxu1  ;;  %v11932_v32 = vcombine.high %v2032_v18, %v2036_v27  ;;  %v2028_v38 = vld [vmem:[#allocation8 + $0x14e0] sm:$0xff]  ;;  %v11796_v39 = vcombine.high %v1896_v53, %v1900_v35  ;;  %v11795_v49 = vcombine.low %v1896_v53, %v1900_v35 }
 0x19d   :  { %7659 = vmatpush2.bf16.msra.mxu0 %v11579_v46  ;;  %7700 = vmatpush2.bf16.msra.mxu1 %v11707_v42  ;;  %v13475_v8 = vpack.c.bf16 %v1337_v54, %v1337_v54  ;;  %v13478_v13 = vpack.c.bf16 %v1339_v58, %v1339_v58  ;;  %v11931_v46 = vcombine.low %v2032_v18, %v2036_v27  ;;  %v1892_v42 = vld [vmem:[#allocation8 + $0x10a0] sm:$0xff] }
 0x19e   :  { %7710 = vmatprep.subr.bf16.mxu0 %v11828_v43  ;;  %7751 = vmatprep.subr.bf16.mxu1 %v11956_v50  ;;  %v11924_v40 = vcombine.high %v2024_v37, %v2028_v38  ;;  %v2016_v43 = vld [vmem:[#allocation8 + $0x1480] sm:$0xff]  ;;  %v11923_v50 = vcombine.low %v2024_v37, %v2028_v38  ;;  %v11788_v51 = vcombine.high %v1888_v41, %v1892_v42 }
 0x19f   :  { %v2020_v0 = vld [vmem:[#allocation8 + $0x14a0] sm:$0xff]  ;;  %v11787_v58 = vcombine.low %v1888_v41, %v1892_v42  ;;  %v11908_v1 = vcombine.high %v2008_v56, %v2012_v57 }
 0x1a0   :  { %7661 = vmatmul.mubr.bf16.vlgmr.msra.gmra.mxu0 %v13473_v2  ;;  %7702 = vmatmul.mubr.bf16.vlgmr.msra.gmra.mxu1 %v13471_v62  ;;  %v11916_v52 = vcombine.high %v2016_v43, %v2020_v0  ;;  %v1880_v54 = vld [vmem:[#allocation8 + $0x1040] sm:$0xff]  ;;  %v11915_v60 = vcombine.low %v2016_v43, %v2020_v0 }
 0x1a1   :  { %7711 = vmatpush1.bf16.msra.mxu0 %v11827_v63  ;;  %7752 = vmatpush1.bf16.msra.mxu1 %v11955_v3  ;;  %v1884_v55 = vld [vmem:[#allocation8 + $0x1060] sm:$0xff] }
 0x1a2   :  { %7712 = vmatprep.subr.bf16.mxu0 %v11820_v4  ;;  %7753 = vmatprep.subr.bf16.mxu1 %v11948_v5  ;;  %v11780_v63 = vcombine.high %v1880_v54, %v1884_v55  ;;  %v1872_v3 = vld [vmem:[#allocation8 + $0x1000] sm:$0xff]  ;;  %v331_v5 = vrot.slane %v13459_v9, %v13453_v61  ;;  %v11779_v10 = vcombine.low %v1880_v54, %v1884_v55 }
 0x1a3   :  { %7742 = vmatprep.mubr.bf16.mxu0 %v13475_v8  ;;  %7783 = vmatprep.mubr.bf16.mxu1 %v13478_v13  ;;  %v1876_v4 = vld [vmem:[#allocation8 + $0x1020] sm:$0xff] }
 0x1a4   :  { %v2000_v6 = vld [vmem:[#allocation8 + $0x1400] sm:$0xff]  ;;  %v11771_v53 = vcombine.low %v1872_v3, %v1876_v4 }
 0x1a5   :  { %7713 = vmatpush1.bf16.msra.mxu0 %v11819_v14  ;;  %7754 = vmatpush1.bf16.msra.mxu1 %v11947_v15  ;;  %v2004_v7 = vld [vmem:[#allocation8 + $0x1420] sm:$0xff]  ;;  %v11907_v14 = vcombine.low %v2008_v56, %v2012_v57  ;;  %v11772_v15 = vcombine.high %v1872_v3, %v1876_v4 }
 0x1a6   :  { %7714 = vmatprep.subr.bf16.mxu0 %v11812_v23  ;;  %7755 = vmatprep.subr.bf16.mxu1 %v11940_v24  ;;  %v11900_v24 = vcombine.high %v2000_v6, %v2004_v7  ;;  %v1992_v25 = vld [vmem:[#allocation8 + $0x13c0] sm:$0xff]  ;;  %v11899_v37 = vcombine.low %v2000_v6, %v2004_v7 }
 0x1a7   :  { %v1996_v26 = vld [vmem:[#allocation8 + $0x13e0] sm:$0xff] }
 0x1a8   :  { %v11892_v38 = vcombine.high %v1992_v25, %v1996_v26  ;;  %v2112_v42 = vld [vmem:[#allocation8 + $0x1780] sm:$0xff] }
 0x1a9   :  { %7715 = vmatpush1.bf16.msra.mxu0 %v11811_v28  ;;  %7756 = vmatpush1.bf16.msra.mxu1 %v11939_v30  ;;  %v2120_v28 = vld [vmem:[#allocation8 + $0x17c0] sm:$0xff] }
 0x1aa   :  { %7716 = vmatprep.subr.bf16.mxu0 %v11804_v31  ;;  %7757 = vmatprep.subr.bf16.mxu1 %v11932_v32  ;;  %v2124_v30 = vld [vmem:[#allocation8 + $0x17e0] sm:$0xff] }
 0x1ab   :  { %v2116_v43 = vld [vmem:[#allocation8 + $0x17a0] sm:$0xff] }
 0x1ac   :  { %v12012_v54 = vcombine.high %v2112_v42, %v2116_v43  ;;  %v1976_v55 = vld [vmem:[#allocation8 + $0x1340] sm:$0xff] }
 0x1ad   :  { %7717 = vmatpush1.bf16.msra.mxu0 %v11803_v11  ;;  %7758 = vmatpush1.bf16.msra.mxu1 %v11931_v46  ;;  %v12020_v46 = vcombine.high %v2120_v28, %v2124_v30  ;;  %v1980_v56 = vld [vmem:[#allocation8 + $0x1360] sm:$0xff] }
 0x1ae   :  { %7718 = vmatprep.subr.bf16.mxu0 %v11796_v39  ;;  %7759 = vmatprep.subr.bf16.mxu1 %v11924_v40  ;;  %v1984_v39 = vld [vmem:[#allocation8 + $0x1380] sm:$0xff] }
 0x1af   :  { %v1988_v40 = vld [vmem:[#allocation8 + $0x13a0] sm:$0xff] }
 0x1b0   :  { %v2104_v57 = vld [vmem:[#allocation8 + $0x1740] sm:$0xff] }
 0x1b1   :  { %7719 = vmatpush1.bf16.msra.mxu0 %v11795_v49  ;;  %7760 = vmatpush1.bf16.msra.mxu1 %v11923_v50  ;;  %v11891_v49 = vcombine.low %v1992_v25, %v1996_v26  ;;  %v1968_v4 = vld [vmem:[#allocation8 + $0x1300] sm:$0xff] }
 0x1b2   :  { %7720 = vmatprep.subr.bf16.mxu0 %v11788_v51  ;;  %7761 = vmatprep.subr.bf16.mxu1 %v11916_v52  ;;  %v12019_v51 = vcombine.low %v2120_v28, %v2124_v30  ;;  %v11884_v52 = vcombine.high %v1984_v39, %v1988_v40  ;;  %v2096_v6 = vld [vmem:[#allocation8 + $0x1700] sm:$0xff] }
 0x1b3   :  { %v2100_v7 = vld [vmem:[#allocation8 + $0x1720] sm:$0xff] }
 0x1b4   :  { %v2088_v25 = vld [vmem:[#allocation8 + $0x16c0] sm:$0xff]  ;;  %v11995_v28 = vcombine.low %v2096_v6, %v2100_v7 }
 0x1b5   :  { %7721 = vmatpush1.bf16.msra.mxu0 %v11787_v58  ;;  %7762 = vmatpush1.bf16.msra.mxu1 %v11915_v60  ;;  %v2108_v58 = vld [vmem:[#allocation8 + $0x1760] sm:$0xff]  ;;  %v11883_v60 = vcombine.low %v1984_v39, %v1988_v40 }
 0x1b6   :  { %7722 = vmatprep.subr.bf16.mxu0 %v11780_v63  ;;  %v1280_v23 = vpop.f32.mrf.mxu0  ;;  %7763 = vmatprep.subr.bf16.mxu1 %v11908_v1  ;;  %v1321_v27 = vpop.f32.mrf.mxu1  ;;  %v12011_v63 = vcombine.low %v2112_v42, %v2116_v43  ;;  %v11876_v1 = vcombine.high %v1976_v55, %v1980_v56  ;;  %v12004_v3 = vcombine.high %v2104_v57, %v2108_v58  ;;  %v2092_v26 = vld [vmem:[#allocation8 + $0x16e0] sm:$0xff] }
 0x1b7   :  { %v13487_v18 = vadd.f32 %v1280_v23, %v331_v5  ;;  %v13491_v32 = vadd.f32 %v1321_v27, %v339_v16  ;;  %v1972_v5 = vld [vmem:[#allocation8 + $0x1320] sm:$0xff]  ;;  %v11875_v16 = vcombine.low %v1976_v55, %v1980_v56  ;;  %v11987_v40 = vcombine.low %v2088_v25, %v2092_v26 }
 0x1b8   :  { %v13489_v31 = vpop.f32.mrf.mxu0  ;;  %v13493_v35 = vpop.f32.mrf.mxu1  ;;  %v1960_v23 = vld [vmem:[#allocation8 + $0x12c0] sm:$0xff]  ;;  %v11867_v27 = vcombine.low %v1968_v4, %v1972_v5  ;;  %v323_v56 = vrot.slane %v13459_v9, %v13398_v19 }
 0x1b9   :  { %7723 = vmatpush1.bf16.msra.mxu0 %v11779_v10  ;;  %7764 = vmatpush1.bf16.msra.mxu1 %v11907_v14  ;;  %v12003_v10 = vcombine.low %v2104_v57, %v2108_v58  ;;  %v11868_v14 = vcombine.high %v1968_v4, %v1972_v5  ;;  %v1944_v43 = vld [vmem:[#allocation8 + $0x1240] sm:$0xff]  ;;  %v343_v4 = vrot.slane %v13459_v9, %v13433_v36 }
 0x1ba   :  { %7724 = vmatprep.subr.bf16.mxu0 %v11772_v15  ;;  %v1284_v11 = vpop.f32.mrf.mxu0  ;;  %7765 = vmatprep.subr.bf16.mxu1 %v11900_v24  ;;  %v1325_v41 = vpop.f32.mrf.mxu1  ;;  %v11996_v15 = vcombine.high %v2096_v6, %v2100_v7  ;;  %v1964_v24 = vld [vmem:[#allocation8 + $0x12e0] sm:$0xff] }
 0x1bb   :  { %v11860_v30 = vcombine.high %v1960_v23, %v1964_v24  ;;  %v2080_v11 = vld [vmem:[#allocation8 + $0x1680] sm:$0xff]  ;;  %v11859_v39 = vcombine.low %v1960_v23, %v1964_v24 }
 0x1bc   :  { %v1285_v0 = vpop.f32.mrf.mxu0  ;;  %v1326_v50 = vpop.f32.mrf.mxu1  ;;  %v1936_v58 = vld [vmem:[#allocation8 + $0x1200] sm:$0xff] }
 0x1bd   :  { %7725 = vmatpush1.bf16.msra.mxu0 %v11771_v53  ;;  %7766 = vmatpush1.bf16.msra.mxu1 %v11899_v37  ;;  %v11988_v53 = vcombine.high %v2088_v25, %v2092_v26  ;;  %v1952_v37 = vld [vmem:[#allocation8 + $0x1280] sm:$0xff]  ;;  %v1324_v25 = vadd.f32 %v13493_v35, %v343_v4 }
 0x1be   :  { %7726 = vmatprep.subr.bf16.mxu0 %v11892_v38  ;;  %7767 = vmatprep.subr.bf16.mxu1 %v12020_v46  ;;  %v1956_v38 = vld [vmem:[#allocation8 + $0x12a0] sm:$0xff] }
 0x1bf   :  { %v2084_v46 = vld [vmem:[#allocation8 + $0x16a0] sm:$0xff]  ;;  %v11852_v41 = vcombine.high %v1952_v37, %v1956_v38 }
 0x1c0   :  { %v11980_v42 = vcombine.high %v2080_v11, %v2084_v46  ;;  %v1948_v0 = vld [vmem:[#allocation8 + $0x1260] sm:$0xff] }
 0x1c1   :  { %7727 = vmatpush2.bf16.msra.mxu0 %v11891_v49  ;;  %7768 = vmatpush2.bf16.msra.mxu1 %v12019_v51  ;;  %v2072_v49 = vld [vmem:[#allocation8 + $0x1640] sm:$0xff]  ;;  %v11851_v51 = vcombine.low %v1952_v37, %v1956_v38  ;;  %v11844_v55 = vcombine.high %v1944_v43, %v1948_v0  ;;  %v11843_v5 = vcombine.low %v1944_v43, %v1948_v0 }
 0x1c2   :  { %7728 = vmatprep.subr.bf16.mxu0 %v11884_v52  ;;  %7769 = vmatprep.subr.bf16.mxu1 %v12012_v54  ;;  %v2076_v50 = vld [vmem:[#allocation8 + $0x1660] sm:$0xff]  ;;  %v315_v52 = vrot.slane %v13459_v9, %v13393_v17  ;;  %v11979_v54 = vcombine.low %v2080_v11, %v2084_v46 }
 0x1c3   :  { %v11972_v57 = vcombine.high %v2072_v49, %v2076_v50  ;;  %v11971_v7 = vcombine.low %v2072_v49, %v2076_v50  ;;  %v2184_v23 = vld [vmem:[#allocation8 + $0x19c0] sm:$0xff] }
 0x1c4   :  { %v1199_v6 = vadd.f32 %v13465_v29, %v315_v52  ;;  %v2188_v24 = vld [vmem:[#allocation8 + $0x19e0] sm:$0xff] }
 0x1c5   :  { %7729 = vmatpush2.bf16.msra.mxu0 %v11883_v60  ;;  %7770 = vmatpush2.bf16.msra.mxu1 %v12011_v63  ;;  %v1940_v60 = vld [vmem:[#allocation8 + $0x1220] sm:$0xff]  ;;  %v335_v63 = vrot.slane %v13459_v9, %v13430_v33  ;;  %v12083_v35 = vcombine.low %v2184_v23, %v2188_v24 }
 0x1c6   :  { %7730 = vmatprep.subr.bf16.mxu0 %v11876_v1  ;;  %7771 = vmatprep.subr.bf16.mxu1 %v12004_v3  ;;  %v2064_v1 = vld [vmem:[#allocation8 + $0x1600] sm:$0xff] }
 0x1c7   :  { %v2068_v3 = vld [vmem:[#allocation8 + $0x1620] sm:$0xff] }
 0x1c8   :  { %v2312_v26 = vld [vmem:[#allocation8 + $0x1dc0] sm:$0xff]  ;;  %v11963_v29 = vcombine.low %v2064_v1, %v2068_v3 }
 0x1c9   :  { %7731 = vmatpush2.bf16.msra.mxu0 %v11875_v16  ;;  %7772 = vmatpush2.bf16.msra.mxu1 %v12003_v10  ;;  %v11836_v16 = vcombine.high %v1936_v58, %v1940_v60  ;;  %v1240_v10 = vadd.f32 %v13469_v34, %v323_v56  ;;  %v2316_v9 = vld [vmem:[#allocation8 + $0x1de0] sm:$0xff] }
 0x1ca   :  { %7732 = vmatprep.subr.bf16.mxu0 %v11868_v14  ;;  %7773 = vmatprep.subr.bf16.mxu1 %v11996_v15  ;;  %v11964_v14 = vcombine.high %v2064_v1, %v2068_v3  ;;  %v1283_v15 = vadd.f32 %v13489_v31, %v335_v63  ;;  %v12212_v37 = vcombine.high %v2312_v26, %v2316_v9  ;;  %v2176_v38 = vld [vmem:[#allocation8 + $0x1980] sm:$0xff]  ;;  %v1343_v31 = vmax.f32 %v1324_v25, 0.0 }
 0x1cb   :  { %v2180_v11 = vld [vmem:[#allocation8 + $0x19a0] sm:$0xff] }
 0x1cc   :  { %v1341_v34 = vmax.f32 %v1283_v15, 0.0  ;;  %v2304_v46 = vld [vmem:[#allocation8 + $0x1d80] sm:$0xff]  ;;  %v13513_v52 = vpack.c.bf16 %v1343_v31, %v1343_v31  ;;  %v12075_v56 = vcombine.low %v2176_v38, %v2180_v11 }
 0x1cd   :  { %7733 = vmatpush2.bf16.msra.mxu0 %v11867_v27  ;;  %7774 = vmatpush2.bf16.msra.mxu1 %v11995_v28  ;;  %v11835_v27 = vcombine.low %v1936_v58, %v1940_v60  ;;  %v1336_v28 = vmax.f32 %v1199_v6, 0.0  ;;  %v2168_v50 = vld [vmem:[#allocation8 + $0x1940] sm:$0xff] }
 0x1ce   :  { %7734 = vmatprep.subr.bf16.mxu0 %v11860_v30  ;;  %7775 = vmatprep.subr.bf16.mxu1 %v11988_v53  ;;  %v12084_v30 = vcombine.high %v2184_v23, %v2188_v24  ;;  %v1338_v53 = vmax.f32 %v1240_v10, 0.0  ;;  %v13511_v0 = vpack.c.bf16 %v1341_v34, %v1341_v34  ;;  %v2160_v63 = vld [vmem:[#allocation8 + $0x1900] sm:$0xff] }
 0x1cf   :  { %v2164_v1 = vld [vmem:[#allocation8 + $0x1920] sm:$0xff] }
 0x1d0   :  { %v13509_v43 = vpack.c.bf16 %v1338_v53, %v1338_v53  ;;  %v2288_v3 = vld [vmem:[#allocation8 + $0x1d00] sm:$0xff]  ;;  %v12059_v24 = vcombine.low %v2160_v63, %v2164_v1 }
 0x1d1   :  { %7735 = vmatpush2.bf16.msra.mxu0 %v11859_v39  ;;  %7776 = vmatpush2.bf16.msra.mxu1 %v11987_v40  ;;  %v2308_v39 = vld [vmem:[#allocation8 + $0x1da0] sm:$0xff]  ;;  %v13507_v40 = vpack.c.bf16 %v1336_v28, %v1336_v28 }
 0x1d2   :  { %7736 = vmatprep.subr.bf16.mxu0 %v11852_v41  ;;  %7777 = vmatprep.subr.bf16.mxu1 %v11980_v42  ;;  %v12211_v41 = vcombine.low %v2312_v26, %v2316_v9  ;;  %v12076_v42 = vcombine.high %v2176_v38, %v2180_v11  ;;  %v12204_v49 = vcombine.high %v2304_v46, %v2308_v39  ;;  %v2292_v4 = vld [vmem:[#allocation8 + $0x1d20] sm:$0xff] }
 0x1d3   :  { %v2152_v10 = vld [vmem:[#allocation8 + $0x18c0] sm:$0xff]  ;;  %v12187_v25 = vcombine.low %v2288_v3, %v2292_v4 }
 0x1d4   :  { %v2280_v15 = vld [vmem:[#allocation8 + $0x1cc0] sm:$0xff] }
 0x1d5   :  { %7737 = vmatpush2.bf16.msra.mxu0 %v11851_v51  ;;  %7778 = vmatpush2.bf16.msra.mxu1 %v11979_v54  ;;  %v2172_v51 = vld [vmem:[#allocation8 + $0x1960] sm:$0xff] }
 0x1d6   :  { %7738 = vmatprep.subr.bf16.mxu0 %v11844_v55  ;;  %7779 = vmatprep.subr.bf16.mxu1 %v11972_v57  ;;  %v2296_v54 = vld [vmem:[#allocation8 + $0x1d40] sm:$0xff]  ;;  %v12203_v57 = vcombine.low %v2304_v46, %v2308_v39  ;;  %v12068_v58 = vcombine.high %v2168_v50, %v2172_v51 }
 0x1d7   :  { %v2300_v55 = vld [vmem:[#allocation8 + $0x1d60] sm:$0xff] }
 0x1d8   :  { %v12196_v60 = vcombine.high %v2296_v54, %v2300_v55  ;;  %v12195_v6 = vcombine.low %v2296_v54, %v2300_v55  ;;  %v2284_v23 = vld [vmem:[#allocation8 + $0x1ce0] sm:$0xff] }
 0x1d9   :  { %7739 = vmatpush2.bf16.msra.mxu0 %v11843_v5  ;;  %7780 = vmatpush2.bf16.msra.mxu1 %v11971_v7  ;;  %v12067_v5 = vcombine.low %v2168_v50, %v2172_v51  ;;  %v12060_v7 = vcombine.high %v2160_v63, %v2164_v1  ;;  %v12180_v9 = vcombine.high %v2280_v15, %v2284_v23  ;;  %v2148_v28 = vld [vmem:[#allocation8 + $0x18a0] sm:$0xff] }
 0x1da   :  { %7740 = vmatprep.subr.bf16.mxu0 %v11836_v16  ;;  %7781 = vmatprep.subr.bf16.mxu1 %v11964_v14  ;;  %v12188_v16 = vcombine.high %v2288_v3, %v2292_v4  ;;  %v2156_v14 = vld [vmem:[#allocation8 + $0x18e0] sm:$0xff]  ;;  %v12179_v34 = vcombine.low %v2280_v15, %v2284_v23 }
 0x1db   :  { %v12052_v26 = vcombine.high %v2152_v10, %v2156_v14  ;;  %v12051_v53 = vcombine.low %v2152_v10, %v2156_v14  ;;  %v2136_v11 = vld [vmem:[#allocation8 + $0x1840] sm:$0xff] }
 0x1dc   :  { %v2140_v31 = vld [vmem:[#allocation8 + $0x1860] sm:$0xff] }
 0x1dd   :  { %7741 = vmatpush2.bf16.msra.mxu0 %v11835_v27  ;;  %7782 = vmatpush2.bf16.msra.mxu1 %v11963_v29  ;;  %v2144_v27 = vld [vmem:[#allocation8 + $0x1880] sm:$0xff] }
 0x1de   :  { %7792 = vmatprep.subr.bf16.mxu0 %v12084_v30  ;;  %7833 = vmatprep.subr.bf16.mxu1 %v12212_v37  ;;  %v2272_v29 = vld [vmem:[#allocation8 + $0x1c80] sm:$0xff]  ;;  %v12044_v37 = vcombine.high %v2144_v27, %v2148_v28 }
 0x1df   :  { %v2276_v30 = vld [vmem:[#allocation8 + $0x1ca0] sm:$0xff] }
 0x1e0   :  { %7743 = vmatmul.mubr.bf16.vlgmr.msra.gmra.mxu0 %v13507_v40  ;;  %7784 = vmatmul.mubr.bf16.vlgmr.msra.gmra.mxu1 %v13509_v43  ;;  %v12172_v38 = vcombine.high %v2272_v29, %v2276_v30  ;;  %v2264_v46 = vld [vmem:[#allocation8 + $0x1c40] sm:$0xff] }
 0x1e1   :  { %7793 = vmatpush1.bf16.msra.mxu0 %v12083_v35  ;;  %7834 = vmatpush1.bf16.msra.mxu1 %v12211_v41  ;;  %v2268_v39 = vld [vmem:[#allocation8 + $0x1c60] sm:$0xff]  ;;  %v12043_v35 = vcombine.low %v2144_v27, %v2148_v28  ;;  %v12171_v41 = vcombine.low %v2272_v29, %v2276_v30 }
 0x1e2   :  { %7794 = vmatprep.subr.bf16.mxu0 %v12076_v42  ;;  %7835 = vmatprep.subr.bf16.mxu1 %v12204_v49  ;;  %v12036_v42 = vcombine.high %v2136_v11, %v2140_v31  ;;  %v12164_v49 = vcombine.high %v2264_v46, %v2268_v39  ;;  %v2128_v50 = vld [vmem:[#allocation8 + $0x1800] sm:$0xff] }
 0x1e3   :  { %7824 = vmatprep.mubr.bf16.mxu0 %v13511_v0  ;;  %7865 = vmatprep.mubr.bf16.mxu1 %v13513_v52  ;;  %v2132_v51 = vld [vmem:[#allocation8 + $0x1820] sm:$0xff] }
 0x1e4   :  { %v2256_v54 = vld [vmem:[#allocation8 + $0x1c00] sm:$0xff] }
 0x1e5   :  { %7795 = vmatpush1.bf16.msra.mxu0 %v12075_v56  ;;  %7836 = vmatpush1.bf16.msra.mxu1 %v12203_v57  ;;  %v2260_v55 = vld [vmem:[#allocation8 + $0x1c20] sm:$0xff]  ;;  %v12035_v56 = vcombine.low %v2136_v11, %v2140_v31  ;;  %v12163_v57 = vcombine.low %v2264_v46, %v2268_v39 }
 0x1e6   :  { %7796 = vmatprep.subr.bf16.mxu0 %v12068_v58  ;;  %7837 = vmatprep.subr.bf16.mxu1 %v12196_v60  ;;  %v12028_v58 = vcombine.high %v2128_v50, %v2132_v51  ;;  %v12156_v60 = vcombine.high %v2256_v54, %v2260_v55  ;;  %v2248_v63 = vld [vmem:[#allocation8 + $0x1bc0] sm:$0xff] }
 0x1e7   :  { %v2252_v1 = vld [vmem:[#allocation8 + $0x1be0] sm:$0xff] }
 0x1e8   :  { %v2376_v3 = vld [vmem:[#allocation8 + $0x1fc0] sm:$0xff] }
 0x1e9   :  { %7797 = vmatpush1.bf16.msra.mxu0 %v12067_v5  ;;  %7838 = vmatpush1.bf16.msra.mxu1 %v12195_v6  ;;  %v2380_v4 = vld [vmem:[#allocation8 + $0x1fe0] sm:$0xff]  ;;  %v12027_v5 = vcombine.low %v2128_v50, %v2132_v51  ;;  %v12155_v6 = vcombine.low %v2256_v54, %v2260_v55 }
 0x1ea   :  { %7798 = vmatprep.subr.bf16.mxu0 %v12060_v7  ;;  %7839 = vmatprep.subr.bf16.mxu1 %v12188_v16  ;;  %v12148_v7 = vcombine.high %v2248_v63, %v2252_v1  ;;  %v12276_v16 = vcombine.high %v2376_v3, %v2380_v4  ;;  %v2240_v10 = vld [vmem:[#allocation8 + $0x1b80] sm:$0xff] }
 0x1eb   :  { %v2244_v14 = vld [vmem:[#allocation8 + $0x1ba0] sm:$0xff] }
 0x1ec   :  { %v2368_v15 = vld [vmem:[#allocation8 + $0x1f80] sm:$0xff] }
 0x1ed   :  { %7799 = vmatpush1.bf16.msra.mxu0 %v12059_v24  ;;  %7840 = vmatpush1.bf16.msra.mxu1 %v12187_v25  ;;  %v2372_v23 = vld [vmem:[#allocation8 + $0x1fa0] sm:$0xff]  ;;  %v12147_v24 = vcombine.low %v2248_v63, %v2252_v1  ;;  %v12275_v25 = vcombine.low %v2376_v3, %v2380_v4 }
 0x1ee   :  { %7800 = vmatprep.subr.bf16.mxu0 %v12052_v26  ;;  %7841 = vmatprep.subr.bf16.mxu1 %v12180_v9  ;;  %v12140_v26 = vcombine.high %v2240_v10, %v2244_v14  ;;  %v12268_v9 = vcombine.high %v2368_v15, %v2372_v23  ;;  %v2232_v27 = vld [vmem:[#allocation8 + $0x1b40] sm:$0xff] }
 0x1ef   :  { %v2236_v28 = vld [vmem:[#allocation8 + $0x1b60] sm:$0xff] }
 0x1f0   :  { %v2360_v29 = vld [vmem:[#allocation8 + $0x1f40] sm:$0xff] }
 0x1f1   :  { %7801 = vmatpush1.bf16.msra.mxu0 %v12051_v53  ;;  %7842 = vmatpush1.bf16.msra.mxu1 %v12179_v34  ;;  %v2364_v30 = vld [vmem:[#allocation8 + $0x1f60] sm:$0xff]  ;;  %v12139_v53 = vcombine.low %v2240_v10, %v2244_v14  ;;  %v12267_v34 = vcombine.low %v2368_v15, %v2372_v23 }
 0x1f2   :  { %7802 = vmatprep.subr.bf16.mxu0 %v12044_v37  ;;  %7843 = vmatprep.subr.bf16.mxu1 %v12172_v38  ;;  %v12132_v37 = vcombine.high %v2232_v27, %v2236_v28  ;;  %v12260_v38 = vcombine.high %v2360_v29, %v2364_v30  ;;  %v2224_v11 = vld [vmem:[#allocation8 + $0x1b00] sm:$0xff] }
 0x1f3   :  { %v2228_v31 = vld [vmem:[#allocation8 + $0x1b20] sm:$0xff] }
 0x1f4   :  { %v2352_v46 = vld [vmem:[#allocation8 + $0x1f00] sm:$0xff] }
 0x1f5   :  { %7803 = vmatpush1.bf16.msra.mxu0 %v12043_v35  ;;  %7844 = vmatpush1.bf16.msra.mxu1 %v12171_v41  ;;  %v2356_v39 = vld [vmem:[#allocation8 + $0x1f20] sm:$0xff]  ;;  %v12131_v35 = vcombine.low %v2232_v27, %v2236_v28  ;;  %v12259_v41 = vcombine.low %v2360_v29, %v2364_v30 }
 0x1f6   :  { %7804 = vmatprep.subr.bf16.mxu0 %v12036_v42  ;;  %7845 = vmatprep.subr.bf16.mxu1 %v12164_v49  ;;  %v12124_v42 = vcombine.high %v2224_v11, %v2228_v31  ;;  %v12252_v49 = vcombine.high %v2352_v46, %v2356_v39  ;;  %v2216_v50 = vld [vmem:[#allocation8 + $0x1ac0] sm:$0xff] }
 0x1f7   :  { %v2220_v51 = vld [vmem:[#allocation8 + $0x1ae0] sm:$0xff] }
 0x1f8   :  { %v2344_v54 = vld [vmem:[#allocation8 + $0x1ec0] sm:$0xff] }
 0x1f9   :  { %7805 = vmatpush1.bf16.msra.mxu0 %v12035_v56  ;;  %7846 = vmatpush1.bf16.msra.mxu1 %v12163_v57  ;;  %v2348_v55 = vld [vmem:[#allocation8 + $0x1ee0] sm:$0xff]  ;;  %v12123_v56 = vcombine.low %v2224_v11, %v2228_v31  ;;  %v12251_v57 = vcombine.low %v2352_v46, %v2356_v39  ;;  %v1417_v11 = vld [vmem:[#allocation8 + $0x1c8] sm:$0xff] }
 0x1fa   :  { %7806 = vmatprep.subr.bf16.mxu0 %v12028_v58  ;;  %7847 = vmatprep.subr.bf16.mxu1 %v12156_v60  ;;  %v12116_v58 = vcombine.high %v2216_v50, %v2220_v51  ;;  %v12244_v60 = vcombine.high %v2344_v54, %v2348_v55  ;;  %v2208_v63 = vld [vmem:[#allocation8 + $0x1a80] sm:$0xff]  ;;  %v1421_v31 = vld [vmem:[#allocation8 + $0x1e8] sm:$0xff] }
 0x1fb   :  { %v2212_v1 = vld [vmem:[#allocation8 + $0x1aa0] sm:$0xff]  ;;  %v1545_v46 = vld [vmem:[#allocation8 + $0x5c8] sm:$0xff] }
 0x1fc   :  { %v2336_v3 = vld [vmem:[#allocation8 + $0x1e80] sm:$0xff]  ;;  %v1549_v39 = vld [vmem:[#allocation8 + $0x5e8] sm:$0xff] }
 0x1fd   :  { %7807 = vmatpush1.bf16.msra.mxu0 %v12027_v5  ;;  %7848 = vmatpush1.bf16.msra.mxu1 %v12155_v6  ;;  %v2340_v4 = vld [vmem:[#allocation8 + $0x1ea0] sm:$0xff]  ;;  %v12115_v5 = vcombine.low %v2216_v50, %v2220_v51  ;;  %v12243_v6 = vcombine.low %v2344_v54, %v2348_v55  ;;  %v1342_v51 = vmax.f32 %v13491_v32, 0.0  ;;  %v11446_v54 = vcombine.high %v1545_v46, %v1549_v39  ;;  %v1409_v55 = vld [vmem:[#allocation8 + $0x188] sm:$0xff] }
 0x1fe   :  { %7808 = vmatprep.subr.bf16.mxu0 %v12148_v7  ;;  %7849 = vmatprep.subr.bf16.mxu1 %v12276_v16  ;;  %v12108_v7 = vcombine.high %v2208_v63, %v2212_v1  ;;  %v12236_v16 = vcombine.high %v2336_v3, %v2340_v4  ;;  %v2200_v10 = vld [vmem:[#allocation8 + $0x1a40] sm:$0xff] }
 0x1ff   :  { %v2204_v14 = vld [vmem:[#allocation8 + $0x1a60] sm:$0xff] }
 0x200   :  { %v2328_v15 = vld [vmem:[#allocation8 + $0x1e40] sm:$0xff] }
 0x201   :  { %7809 = vmatpush2.bf16.msra.mxu0 %v12147_v24  ;;  %7850 = vmatpush2.bf16.msra.mxu1 %v12275_v25  ;;  %v2332_v23 = vld [vmem:[#allocation8 + $0x1e60] sm:$0xff]  ;;  %v12107_v24 = vcombine.low %v2208_v63, %v2212_v1  ;;  %v12235_v25 = vcombine.low %v2336_v3, %v2340_v4  ;;  %v1541_v63 = vld [vmem:[#allocation8 + $0x5a8] sm:$0xff]  ;;  %v13524_v3 = vpack.c.bf16 %v1342_v51, %v1342_v51 }
 0x202   :  { %7810 = vmatprep.subr.bf16.mxu0 %v12140_v26  ;;  %7851 = vmatprep.subr.bf16.mxu1 %v12268_v9  ;;  %v12100_v26 = vcombine.high %v2200_v10, %v2204_v14  ;;  %v12228_v9 = vcombine.high %v2328_v15, %v2332_v23  ;;  %v2192_v27 = vld [vmem:[#allocation8 + $0x1a00] sm:$0xff]  ;;  %v1385_v51 = vld [vmem:[#allocation8 + $0xc8] sm:$0xff] }
 0x203   :  { %v2196_v28 = vld [vmem:[#allocation8 + $0x1a20] sm:$0xff] }
 0x204   :  { %v2320_v29 = vld [vmem:[#allocation8 + $0x1e00] sm:$0xff] }
 0x205   :  { %7811 = vmatpush2.bf16.msra.mxu0 %v12139_v53  ;;  %7852 = vmatpush2.bf16.msra.mxu1 %v12267_v34  ;;  %v2324_v30 = vld [vmem:[#allocation8 + $0x1e20] sm:$0xff]  ;;  %v12099_v53 = vcombine.low %v2200_v10, %v2204_v14  ;;  %v12227_v34 = vcombine.low %v2328_v15, %v2332_v23  ;;  %v1529_v10 = vld [vmem:[#allocation8 + $0x548] sm:$0xff] }
 0x206   :  { %7812 = vmatprep.subr.bf16.mxu0 %v12132_v37  ;;  %7853 = vmatprep.subr.bf16.mxu1 %v12260_v38  ;;  %v12092_v37 = vcombine.high %v2192_v27, %v2196_v28  ;;  %v12220_v38 = vcombine.high %v2320_v29, %v2324_v30  ;;  %v2384_v50 = vld [vmem:[#allocation10] sm:$0xff]  ;;  %v1533_v14 = vld [vmem:[#allocation8 + $0x568] sm:$0xff] }
 0x207   :  { %v2393_v32 = vrot.slane %v2384_v50, %v13401_v20 }
 0x209   :  { %7813 = vmatpush2.bf16.msra.mxu0 %v12131_v35  ;;  %7854 = vmatpush2.bf16.msra.mxu1 %v12259_v41  ;;  %v12091_v35 = vcombine.low %v2192_v27, %v2196_v28  ;;  %v1340_v41 = vmax.f32 %v13487_v18, 0.0  ;;  %v11445_v18 = vcombine.low %v1545_v46, %v1549_v39 }
 0x20a   :  { %7814 = vmatprep.subr.bf16.mxu0 %v12124_v42  ;;  %7855 = vmatprep.subr.bf16.mxu1 %v12252_v49  ;;  %v12219_v42 = vcombine.low %v2320_v29, %v2324_v30  ;;  %v11318_v49 = vcombine.high %v1417_v11, %v1421_v31  ;;  %v11430_v30 = vcombine.high %v1529_v10, %v1533_v14 }
 0x20b   :  { %v13522_v1 = vpack.c.bf16 %v1340_v41, %v1340_v41  ;;  %v11429_v41 = vcombine.low %v1529_v10, %v1533_v14  ;;  %v1369_v14 = vld [vmem:[#allocation8 + $0x48] sm:$0xff] }
 0x20d   :  { %7815 = vmatpush2.bf16.msra.mxu0 %v12123_v56  ;;  %7856 = vmatpush2.bf16.msra.mxu1 %v12251_v57  ;;  %v1413_v56 = vld [vmem:[#allocation8 + $0x1a8] sm:$0xff]  ;;  %v11317_v57 = vcombine.low %v1417_v11, %v1421_v31 }
 0x20e   :  { %7816 = vmatprep.subr.bf16.mxu0 %v12116_v58  ;;  %7857 = vmatprep.subr.bf16.mxu1 %v12244_v60  ;;  %v2389_v58 = vrot.slane %v2384_v50, %v13393_v17  ;;  %v1537_v60 = vld [vmem:[#allocation8 + $0x588] sm:$0xff]  ;;  %v11310_v4 = vcombine.high %v1409_v55, %v1413_v56 }
 0x20f   :  { %v1525_v11 = vld [vmem:[#allocation8 + $0x528] sm:$0xff] }
 0x211   :  { %7817 = vmatpush2.bf16.msra.mxu0 %v12115_v5  ;;  %7858 = vmatpush2.bf16.msra.mxu1 %v12243_v6  ;;  %v1401_v5 = vld [vmem:[#allocation8 + $0x148] sm:$0xff] }
 0x212   :  { %7818 = vmatprep.subr.bf16.mxu0 %v12108_v7  ;;  %7859 = vmatprep.subr.bf16.mxu1 %v12236_v16  ;;  %v1405_v6 = vld [vmem:[#allocation8 + $0x168] sm:$0xff]  ;;  %v11438_v16 = vcombine.high %v1537_v60, %v1541_v63 }
 0x213   :  { %v11301_v39 = vcombine.low %v1401_v5, %v1405_v6 }
 0x215   :  { %7819 = vmatpush2.bf16.msra.mxu0 %v12107_v24  ;;  %7860 = vmatpush2.bf16.msra.mxu1 %v12235_v25  ;;  %v11309_v24 = vcombine.low %v1409_v55, %v1413_v56  ;;  %v1513_v55 = vld [vmem:[#allocation8 + $0x4c8] sm:$0xff] }
 0x216   :  { %7820 = vmatprep.subr.bf16.mxu0 %v12100_v26  ;;  %7861 = vmatprep.subr.bf16.mxu1 %v12228_v9  ;;  %v11437_v26 = vcombine.low %v1537_v60, %v1541_v63  ;;  %v11302_v9 = vcombine.high %v1401_v5, %v1405_v6  ;;  %v1517_v56 = vld [vmem:[#allocation8 + $0x4e8] sm:$0xff] }
 0x217   :  { %v11414_v63 = vcombine.high %v1513_v55, %v1517_v56  ;;  %v1509_v5 = vld [vmem:[#allocation8 + $0x4a8] sm:$0xff] }
 0x219   :  { %7821 = vmatpush2.bf16.msra.mxu0 %v12099_v53  ;;  %7862 = vmatpush2.bf16.msra.mxu1 %v12227_v34  ;;  %v1393_v53 = vld [vmem:[#allocation8 + $0x108] sm:$0xff] }
 0x21a   :  { %7822 = vmatprep.subr.bf16.mxu0 %v12092_v37  ;;  %7863 = vmatprep.subr.bf16.mxu1 %v12220_v38  ;;  %v1397_v34 = vld [vmem:[#allocation8 + $0x128] sm:$0xff] }
 0x21b   :  { %v1521_v38 = vld [vmem:[#allocation8 + $0x508] sm:$0xff] }
 0x21c   :  { %v11422_v50 = vcombine.high %v1521_v38, %v1525_v11 }
 0x21d   :  { %7823 = vmatpush2.bf16.msra.mxu0 %v12091_v35  ;;  %7864 = vmatpush2.bf16.msra.mxu1 %v12219_v42  ;;  %v11294_v42 = vcombine.high %v1393_v53, %v1397_v34 }
 0x21e   :  { %7874 = vmatprep.subr.bf16.mxu0 %v11318_v49  ;;  %7915 = vmatprep.subr.bf16.mxu1 %v11446_v54  ;;  %v1389_v54 = vld [vmem:[#allocation8 + $0xe8] sm:$0xff] }
 0x21f   :  { %v11286_v60 = vcombine.high %v1385_v51, %v1389_v54  ;;  %v11285_v6 = vcombine.low %v1385_v51, %v1389_v54 }
 0x220   :  { %7825 = vmatmul.mubr.bf16.vlgmr.msra.gmra.mxu0 %v13522_v1  ;;  %v7580_v7 = vpop.f32.mrf.mxu0  ;;  %7866 = vmatmul.mubr.bf16.vlgmr.msra.gmra.mxu1 %v13524_v3  ;;  %v7621_v23 = vpop.f32.mrf.mxu1 }
 0x221   :  { %v7581_v15 = vadd.f32 %v7580_v7, %v2389_v58  ;;  %7875 = vmatpush1.bf16.msra.mxu0 %v11317_v57  ;;  %7906 = vmatprep.mubr.bf16.mxu0 %v13416_v45  ;;  %v11293_v57 = vcombine.low %v1393_v53, %v1397_v34  ;;  %v11421_v58 = vcombine.low %v1521_v38, %v1525_v11  ;;  %v1489_v53 = vld [vmem:[#allocation8 + $0x408] sm:$0xff] }
 0x222   :  { %7916 = vmatpush1.bf16.msra.mxu1 %v11445_v18  ;;  %v7582_v25 = vpop.f32.mrf.mxu0  ;;  %7947 = vmatprep.mubr.bf16.mxu1 %v13422_v48  ;;  %v7623_v29 = vpop.f32.mrf.mxu1  ;;  %v1377_v18 = vld [vmem:[#allocation8 + $0x88] sm:$0xff]  ;;  %v11413_v7 = vcombine.low %v1513_v55, %v1517_v56 }
 0x223   :  { %v13530_v27 = vadd.f32 %v7621_v23, %v7581_v15  ;;  %v7583_v28 = vadd.f32 %v7582_v25, %v2393_v32  ;;  %7876 = vmatprep.subr.bf16.mxu0 %v11310_v4  ;;  %7917 = vmatprep.subr.bf16.mxu1 %v11438_v16  ;;  %v1381_v32 = vld [vmem:[#allocation8 + $0xa8] sm:$0xff] }
 0x224   :  { %v7584_v37 = vpop.f32.mrf.mxu0  ;;  %v7625_v46 = vpop.f32.mrf.mxu1  ;;  %v1505_v4 = vld [vmem:[#allocation8 + $0x488] sm:$0xff]  ;;  %v11278_v16 = vcombine.high %v1377_v18, %v1381_v32  ;;  %v11277_v25 = vcombine.low %v1377_v18, %v1381_v32 }
 0x225   :  { %v13533_v31 = vadd.f32 %v7623_v29, %v7583_v28  ;;  %7877 = vmatpush1.bf16.msra.mxu0 %v11309_v24  ;;  %v11406_v10 = vcombine.high %v1505_v4, %v1509_v5  ;;  %v1373_v15 = vld [vmem:[#allocation8 + $0x68] sm:$0xff] }
 0x226   :  { %7918 = vmatpush1.bf16.msra.mxu1 %v11437_v26  ;;  %v7585_v35 = vpop.f32.mrf.mxu0  ;;  %7878 = vmatprep.subr.bf16.mxu0 %v11302_v9  ;;  %v7626_v49 = vpop.f32.mrf.mxu1  ;;  %v1497_v23 = vld [vmem:[#allocation8 + $0x448] sm:$0xff]  ;;  %v11405_v26 = vcombine.low %v1505_v4, %v1509_v5  ;;  %v11270_v9 = vcombine.high %v1369_v14, %v1373_v15  ;;  %v11269_v37 = vcombine.low %v1369_v14, %v1373_v15 }
 0x227   :  { %7919 = vmatprep.subr.bf16.mxu1 %v11430_v30  ;;  %v1501_v24 = vld [vmem:[#allocation8 + $0x468] sm:$0xff] }
 0x228   :  { %v11398_v28 = vcombine.high %v1497_v23, %v1501_v24  ;;  %v1361_v29 = vld [vmem:[#allocation8 + $0x8] sm:$0xff]  ;;  %v11397_v38 = vcombine.low %v1497_v23, %v1501_v24 }
 0x229   :  { %7879 = vmatpush1.bf16.msra.mxu0 %v11301_v39  ;;  %v1365_v30 = vld [vmem:[#allocation8 + $0x28] sm:$0xff] }
 0x22a   :  { %7920 = vmatpush1.bf16.msra.mxu1 %v11429_v41  ;;  %7880 = vmatprep.subr.bf16.mxu0 %v11294_v42  ;;  %v1493_v34 = vld [vmem:[#allocation8 + $0x428] sm:$0xff]  ;;  %v11262_v11 = vcombine.high %v1361_v29, %v1365_v30  ;;  %v11261_v49 = vcombine.low %v1361_v29, %v1365_v30 }
 0x22b   :  { %7921 = vmatprep.subr.bf16.mxu1 %v11422_v50  ;;  %v11390_v46 = vcombine.high %v1489_v53, %v1493_v34  ;;  %v1481_v39 = vld [vmem:[#allocation8 + $0x3c8] sm:$0xff]  ;;  %v11389_v50 = vcombine.low %v1489_v53, %v1493_v34 }
 0x22c   :  { %v1485_v35 = vld [vmem:[#allocation8 + $0x3e8] sm:$0xff] }
 0x22d   :  { %7881 = vmatpush1.bf16.msra.mxu0 %v11293_v57  ;;  %v1609_v41 = vld [vmem:[#allocation8 + $0x7c8] sm:$0xff]  ;;  %v11382_v51 = vcombine.high %v1481_v39, %v1485_v35 }
 0x22e   :  { %7922 = vmatpush1.bf16.msra.mxu1 %v11421_v58  ;;  %7882 = vmatprep.subr.bf16.mxu0 %v11286_v60  ;;  %v1613_v42 = vld [vmem:[#allocation8 + $0x7e8] sm:$0xff]  ;;  %v11381_v60 = vcombine.low %v1481_v39, %v1485_v35 }
 0x22f   :  { %7923 = vmatprep.subr.bf16.mxu1 %v11414_v63  ;;  %v11510_v54 = vcombine.high %v1609_v41, %v1613_v42  ;;  %v1473_v55 = vld [vmem:[#allocation8 + $0x388] sm:$0xff]  ;;  %v11509_v63 = vcombine.low %v1609_v41, %v1613_v42 }
 0x230   :  { %v1477_v56 = vld [vmem:[#allocation8 + $0x3a8] sm:$0xff] }
 0x231   :  { %7883 = vmatpush1.bf16.msra.mxu0 %v11285_v6  ;;  %v1601_v57 = vld [vmem:[#allocation8 + $0x788] sm:$0xff]  ;;  %v11374_v18 = vcombine.high %v1473_v55, %v1477_v56 }
 0x232   :  { %7924 = vmatpush1.bf16.msra.mxu1 %v11413_v7  ;;  %7884 = vmatprep.subr.bf16.mxu0 %v11278_v16  ;;  %v1605_v58 = vld [vmem:[#allocation8 + $0x7a8] sm:$0xff]  ;;  %v11373_v16 = vcombine.low %v1473_v55, %v1477_v56 }
 0x233   :  { %7925 = vmatprep.subr.bf16.mxu1 %v11406_v10  ;;  %v11502_v32 = vcombine.high %v1601_v57, %v1605_v58  ;;  %v1465_v4 = vld [vmem:[#allocation8 + $0x348] sm:$0xff]  ;;  %v11501_v10 = vcombine.low %v1601_v57, %v1605_v58 }
 0x234   :  { %v1469_v5 = vld [vmem:[#allocation8 + $0x368] sm:$0xff] }
 0x235   :  { %7885 = vmatpush1.bf16.msra.mxu0 %v11277_v25  ;;  %v1593_v6 = vld [vmem:[#allocation8 + $0x748] sm:$0xff]  ;;  %v11366_v14 = vcombine.high %v1465_v4, %v1469_v5 }
 0x236   :  { %7926 = vmatpush1.bf16.msra.mxu1 %v11405_v26  ;;  %7886 = vmatprep.subr.bf16.mxu0 %v11270_v9  ;;  %v1597_v7 = vld [vmem:[#allocation8 + $0x768] sm:$0xff]  ;;  %v11365_v9 = vcombine.low %v1465_v4, %v1469_v5 }
 0x237   :  { %7927 = vmatprep.subr.bf16.mxu1 %v11398_v28  ;;  %v11494_v15 = vcombine.high %v1593_v6, %v1597_v7  ;;  %v1457_v23 = vld [vmem:[#allocation8 + $0x308] sm:$0xff]  ;;  %v11493_v28 = vcombine.low %v1593_v6, %v1597_v7 }
 0x238   :  { %v1461_v24 = vld [vmem:[#allocation8 + $0x328] sm:$0xff] }
 0x239   :  { %7887 = vmatpush1.bf16.msra.mxu0 %v11269_v37  ;;  %v1585_v25 = vld [vmem:[#allocation8 + $0x708] sm:$0xff]  ;;  %v11358_v29 = vcombine.high %v1457_v23, %v1461_v24 }
 0x23a   :  { %7928 = vmatpush1.bf16.msra.mxu1 %v11397_v38  ;;  %7888 = vmatprep.subr.bf16.mxu0 %v11262_v11  ;;  %v1589_v26 = vld [vmem:[#allocation8 + $0x728] sm:$0xff]  ;;  %v11357_v11 = vcombine.low %v1457_v23, %v1461_v24 }
 0x23b   :  { %7929 = vmatprep.subr.bf16.mxu1 %v11390_v46  ;;  %v11486_v30 = vcombine.high %v1585_v25, %v1589_v26  ;;  %v1449_v53 = vld [vmem:[#allocation8 + $0x2c8] sm:$0xff]  ;;  %v11485_v46 = vcombine.low %v1585_v25, %v1589_v26 }
 0x23c   :  { %v1453_v34 = vld [vmem:[#allocation8 + $0x2e8] sm:$0xff] }
 0x23d   :  { %7889 = vmatpush1.bf16.msra.mxu0 %v11261_v49  ;;  %v1577_v37 = vld [vmem:[#allocation8 + $0x6c8] sm:$0xff]  ;;  %v11350_v39 = vcombine.high %v1449_v53, %v1453_v34 }
 0x23e   :  { %7930 = vmatpush1.bf16.msra.mxu1 %v11389_v50  ;;  %7890 = vmatprep.subr.bf16.mxu0 %v11382_v51  ;;  %v1581_v38 = vld [vmem:[#allocation8 + $0x6e8] sm:$0xff]  ;;  %v11349_v51 = vcombine.low %v1449_v53, %v1453_v34 }
 0x23f   :  { %7931 = vmatprep.subr.bf16.mxu1 %v11510_v54  ;;  %v11478_v35 = vcombine.high %v1577_v37, %v1581_v38  ;;  %v1441_v41 = vld [vmem:[#allocation8 + $0x288] sm:$0xff]  ;;  %v11477_v54 = vcombine.low %v1577_v37, %v1581_v38 }
 0x240   :  { %v1445_v42 = vld [vmem:[#allocation8 + $0x2a8] sm:$0xff] }
 0x241   :  { %7891 = vmatpush2.bf16.msra.mxu0 %v11381_v60  ;;  %v1569_v49 = vld [vmem:[#allocation8 + $0x688] sm:$0xff]  ;;  %v11342_v55 = vcombine.high %v1441_v41, %v1445_v42 }
 0x242   :  { %7932 = vmatpush2.bf16.msra.mxu1 %v11509_v63  ;;  %7892 = vmatprep.subr.bf16.mxu0 %v11374_v18  ;;  %v1573_v50 = vld [vmem:[#allocation8 + $0x6a8] sm:$0xff]  ;;  %v11341_v18 = vcombine.low %v1441_v41, %v1445_v42 }
 0x243   :  { %7933 = vmatprep.subr.bf16.mxu1 %v11502_v32  ;;  %v11470_v56 = vcombine.high %v1569_v49, %v1573_v50  ;;  %v1433_v57 = vld [vmem:[#allocation8 + $0x248] sm:$0xff]  ;;  %v11469_v32 = vcombine.low %v1569_v49, %v1573_v50 }
 0x244   :  { %v1437_v58 = vld [vmem:[#allocation8 + $0x268] sm:$0xff] }
 0x245   :  { %7893 = vmatpush2.bf16.msra.mxu0 %v11373_v16  ;;  %v1561_v60 = vld [vmem:[#allocation8 + $0x648] sm:$0xff]  ;;  %v11334_v4 = vcombine.high %v1433_v57, %v1437_v58 }
 0x246   :  { %7934 = vmatpush2.bf16.msra.mxu1 %v11501_v10  ;;  %7894 = vmatprep.subr.bf16.mxu0 %v11366_v14  ;;  %v1565_v63 = vld [vmem:[#allocation8 + $0x668] sm:$0xff]  ;;  %v11333_v14 = vcombine.low %v1433_v57, %v1437_v58 }
 0x247   :  { %7935 = vmatprep.subr.bf16.mxu1 %v11494_v15  ;;  %v11462_v5 = vcombine.high %v1561_v60, %v1565_v63  ;;  %v1425_v6 = vld [vmem:[#allocation8 + $0x208] sm:$0xff]  ;;  %v11461_v15 = vcombine.low %v1561_v60, %v1565_v63 }
 0x248   :  { %v1429_v7 = vld [vmem:[#allocation8 + $0x228] sm:$0xff] }
 0x249   :  { %7895 = vmatpush2.bf16.msra.mxu0 %v11365_v9  ;;  %v1553_v16 = vld [vmem:[#allocation8 + $0x608] sm:$0xff]  ;;  %v11326_v23 = vcombine.high %v1425_v6, %v1429_v7 }
 0x24a   :  { %7936 = vmatpush2.bf16.msra.mxu1 %v11493_v28  ;;  %7896 = vmatprep.subr.bf16.mxu0 %v11358_v29  ;;  %v1557_v10 = vld [vmem:[#allocation8 + $0x628] sm:$0xff]  ;;  %v11325_v29 = vcombine.low %v1425_v6, %v1429_v7 }
 0x24b   :  { %7937 = vmatprep.subr.bf16.mxu1 %v11486_v30  ;;  %v11454_v24 = vcombine.high %v1553_v16, %v1557_v10  ;;  %v1673_v25 = vld [vmem:[#allocation8 + $0x9c8] sm:$0xff]  ;;  %v11453_v30 = vcombine.low %v1553_v16, %v1557_v10 }
 0x24c   :  { %v1677_v26 = vld [vmem:[#allocation8 + $0x9e8] sm:$0xff] }
 0x24d   :  { %7897 = vmatpush2.bf16.msra.mxu0 %v11357_v11  ;;  %v1801_v9 = vld [vmem:[#allocation8 + $0xdc8] sm:$0xff]  ;;  %v11574_v53 = vcombine.high %v1673_v25, %v1677_v26  ;;  %v11573_v11 = vcombine.low %v1673_v25, %v1677_v26 }
 0x24e   :  { %7938 = vmatpush2.bf16.msra.mxu1 %v11485_v46  ;;  %7898 = vmatprep.subr.bf16.mxu0 %v11350_v39  ;;  %v1805_v28 = vld [vmem:[#allocation8 + $0xde8] sm:$0xff] }
 0x24f   :  { %7939 = vmatprep.subr.bf16.mxu1 %v11478_v35  ;;  %v11702_v34 = vcombine.high %v1801_v9, %v1805_v28  ;;  %v1665_v37 = vld [vmem:[#allocation8 + $0x988] sm:$0xff]  ;;  %v11701_v35 = vcombine.low %v1801_v9, %v1805_v28 }
 0x250   :  { %v1669_v38 = vld [vmem:[#allocation8 + $0x9a8] sm:$0xff] }
 0x251   :  { %7899 = vmatpush2.bf16.msra.mxu0 %v11349_v51  ;;  %v1793_v46 = vld [vmem:[#allocation8 + $0xd88] sm:$0xff]  ;;  %v11566_v41 = vcombine.high %v1665_v37, %v1669_v38  ;;  %v11565_v58 = vcombine.low %v1665_v37, %v1669_v38 }
 0x252   :  { %7940 = vmatpush2.bf16.msra.mxu1 %v11477_v54  ;;  %7900 = vmatprep.subr.bf16.mxu0 %v11342_v55  ;;  %v1797_v39 = vld [vmem:[#allocation8 + $0xda8] sm:$0xff] }
 0x253   :  { %7941 = vmatprep.subr.bf16.mxu1 %v11470_v56  ;;  %v1657_v42 = vld [vmem:[#allocation8 + $0x948] sm:$0xff]  ;;  %v11694_v51 = vcombine.high %v1793_v46, %v1797_v39  ;;  %v11693_v63 = vcombine.low %v1793_v46, %v1797_v39 }
 0x254   :  { %v1661_v49 = vld [vmem:[#allocation8 + $0x968] sm:$0xff] }
 0x255   :  { %7901 = vmatpush2.bf16.msra.mxu0 %v11341_v18  ;;  %v1785_v54 = vld [vmem:[#allocation8 + $0xd48] sm:$0xff]  ;;  %v11558_v18 = vcombine.high %v1657_v42, %v1661_v49 }
 0x256   :  { %7942 = vmatpush2.bf16.msra.mxu1 %v11469_v32  ;;  %7902 = vmatprep.subr.bf16.mxu0 %v11334_v4  ;;  %v1789_v55 = vld [vmem:[#allocation8 + $0xd68] sm:$0xff] }
 0x257   :  { %7943 = vmatprep.subr.bf16.mxu1 %v11462_v5  ;;  %v1649_v6 = vld [vmem:[#allocation8 + $0x908] sm:$0xff]  ;;  %v11685_v26 = vcombine.low %v1785_v54, %v1789_v55 }
 0x258   :  { %v1653_v7 = vld [vmem:[#allocation8 + $0x928] sm:$0xff] }
 0x259   :  { %7903 = vmatpush2.bf16.msra.mxu0 %v11333_v14  ;;  %v1777_v10 = vld [vmem:[#allocation8 + $0xd08] sm:$0xff]  ;;  %v11550_v9 = vcombine.high %v1649_v6, %v1653_v7  ;;  %v11549_v37 = vcombine.low %v1649_v6, %v1653_v7 }
 0x25a   :  { %7944 = vmatpush2.bf16.msra.mxu1 %v11461_v15  ;;  %7904 = vmatprep.subr.bf16.mxu0 %v11326_v23  ;;  %v1781_v14 = vld [vmem:[#allocation8 + $0xd28] sm:$0xff] }
 0x25b   :  { %7945 = vmatprep.subr.bf16.mxu1 %v11454_v24  ;;  %v11557_v24 = vcombine.low %v1657_v42, %v1661_v49  ;;  %v11678_v28 = vcombine.high %v1777_v10, %v1781_v14  ;;  %v11677_v38 = vcombine.low %v1777_v10, %v1781_v14  ;;  %v1633_v39 = vld [vmem:[#allocation8 + $0x888] sm:$0xff] }
 0x25c   :  { %v1765_v42 = vld [vmem:[#allocation8 + $0xca8] sm:$0xff] }
 0x25d   :  { %7905 = vmatpush2.bf16.msra.mxu0 %v11325_v29  ;;  %v1641_v29 = vld [vmem:[#allocation8 + $0x8c8] sm:$0xff] }
 0x25e   :  { %7946 = vmatpush2.bf16.msra.mxu1 %v11453_v30  ;;  %7956 = vmatprep.subr.bf16.mxu0 %v11574_v53  ;;  %v1645_v30 = vld [vmem:[#allocation8 + $0x8e8] sm:$0xff] }
 0x25f   :  { %7997 = vmatprep.subr.bf16.mxu1 %v11702_v34  ;;  %v1769_v53 = vld [vmem:[#allocation8 + $0xcc8] sm:$0xff]  ;;  %v11541_v49 = vcombine.low %v1641_v29, %v1645_v30 }
 0x260   :  { %v7662_v50 = vpop.f32.mrf.mxu0  ;;  %7907 = vmatmul.mubr.bf16.vlgmr.msra.gmra.mxu0 %v13420_v47  ;;  %v7703_v57 = vpop.f32.mrf.mxu1  ;;  %v1773_v34 = vld [vmem:[#allocation8 + $0xce8] sm:$0xff] }
 0x261   :  { %v7663_v56 = vadd.f32 %v7662_v50, %v13530_v27  ;;  %7948 = vmatmul.mubr.bf16.vlgmr.msra.gmra.mxu1 %v13414_v44  ;;  %7957 = vmatpush1.bf16.msra.mxu0 %v11573_v11  ;;  %v11686_v27 = vcombine.high %v1785_v54, %v1789_v55  ;;  %v11542_v11 = vcombine.high %v1641_v29, %v1645_v30  ;;  %v1625_v55 = vld [vmem:[#allocation8 + $0x848] sm:$0xff] }
 0x262   :  { %7988 = vmatprep.mubr.bf16.mxu0 %v13443_v12  ;;  %7998 = vmatpush1.bf16.msra.mxu1 %v11701_v35  ;;  %v7664_v60 = vpop.f32.mrf.mxu0  ;;  %v7705_v5 = vpop.f32.mrf.mxu1  ;;  %v11670_v46 = vcombine.high %v1769_v53, %v1773_v34  ;;  %v1637_v35 = vld [vmem:[#allocation8 + $0x8a8] sm:$0xff]  ;;  %v11669_v50 = vcombine.low %v1769_v53, %v1773_v34 }
 0x263   :  { %v13539_v32 = vadd.f32 %v7703_v57, %v7663_v56  ;;  %8029 = vmatprep.mubr.bf16.mxu1 %v13445_v22  ;;  %v7665_v4 = vadd.f32 %v7664_v60, %v13533_v31  ;;  %7958 = vmatprep.subr.bf16.mxu0 %v11566_v41  ;;  %v1761_v41 = vld [vmem:[#allocation8 + $0xc88] sm:$0xff]  ;;  %v11533_v60 = vcombine.low %v1633_v39, %v1637_v35 }
 0x264   :  { %v7666_v16 = vpop.f32.mrf.mxu0  ;;  %7999 = vmatprep.subr.bf16.mxu1 %v11694_v51  ;;  %v7707_v23 = vpop.f32.mrf.mxu1  ;;  %v11534_v51 = vcombine.high %v1633_v39, %v1637_v35  ;;  %v11662_v54 = vcombine.high %v1761_v41, %v1765_v42  ;;  %v1629_v56 = vld [vmem:[#allocation8 + $0x868] sm:$0xff] }
 0x265   :  { %v13543_v15 = vadd.f32 %v7705_v5, %v7665_v4  ;;  %7959 = vmatpush1.bf16.msra.mxu0 %v11565_v58  ;;  %v1753_v57 = vld [vmem:[#allocation8 + $0xc48] sm:$0xff]  ;;  %v11525_v16 = vcombine.low %v1625_v55, %v1629_v56 }
 0x266   :  { %8000 = vmatpush1.bf16.msra.mxu1 %v11693_v63  ;;  %v7667_v25 = vpop.f32.mrf.mxu0  ;;  %7960 = vmatprep.subr.bf16.mxu0 %v11558_v18  ;;  %v7708_v31 = vpop.f32.mrf.mxu1  ;;  %v1757_v58 = vld [vmem:[#allocation8 + $0xc68] sm:$0xff]  ;;  %v11661_v63 = vcombine.low %v1761_v41, %v1765_v42  ;;  %v11526_v18 = vcombine.high %v1625_v55, %v1629_v56 }
 0x267   :  { %8001 = vmatprep.subr.bf16.mxu1 %v11686_v27  ;;  %v11654_v4 = vcombine.high %v1753_v57, %v1757_v58  ;;  %v1617_v5 = vld [vmem:[#allocation8 + $0x808] sm:$0xff]  ;;  %v11653_v10 = vcombine.low %v1753_v57, %v1757_v58 }
 0x268   :  { %v1621_v27 = vld [vmem:[#allocation8 + $0x828] sm:$0xff] }
 0x269   :  { %7961 = vmatpush1.bf16.msra.mxu0 %v11557_v24  ;;  %v1745_v6 = vld [vmem:[#allocation8 + $0xc08] sm:$0xff]  ;;  %v11518_v14 = vcombine.high %v1617_v5, %v1621_v27  ;;  %v11517_v31 = vcombine.low %v1617_v5, %v1621_v27 }
 0x26a   :  { %8002 = vmatpush1.bf16.msra.mxu1 %v11685_v26  ;;  %7962 = vmatprep.subr.bf16.mxu0 %v11550_v9  ;;  %v1749_v7 = vld [vmem:[#allocation8 + $0xc28] sm:$0xff] }
 0x26b   :  { %8003 = vmatprep.subr.bf16.mxu1 %v11678_v28  ;;  %v11646_v23 = vcombine.high %v1745_v6, %v1749_v7  ;;  %v1737_v24 = vld [vmem:[#allocation8 + $0xbc8] sm:$0xff]  ;;  %v11645_v28 = vcombine.low %v1745_v6, %v1749_v7 }
 0x26c   :  { %v1741_v25 = vld [vmem:[#allocation8 + $0xbe8] sm:$0xff] }
 0x26d   :  { %7963 = vmatpush1.bf16.msra.mxu0 %v11549_v37  ;;  %v1865_v26 = vld [vmem:[#allocation8 + $0xfc8] sm:$0xff]  ;;  %v11638_v29 = vcombine.high %v1737_v24, %v1741_v25 }
 0x26e   :  { %8004 = vmatpush1.bf16.msra.mxu1 %v11677_v38  ;;  %7964 = vmatprep.subr.bf16.mxu0 %v11542_v11  ;;  %v1869_v9 = vld [vmem:[#allocation8 + $0xfe8] sm:$0xff]  ;;  %v11637_v11 = vcombine.low %v1737_v24, %v1741_v25 }
 0x26f   :  { %8005 = vmatprep.subr.bf16.mxu1 %v11670_v46  ;;  %v11766_v30 = vcombine.high %v1865_v26, %v1869_v9  ;;  %v1729_v53 = vld [vmem:[#allocation8 + $0xb88] sm:$0xff]  ;;  %v11765_v46 = vcombine.low %v1865_v26, %v1869_v9 }
 0x270   :  { %v1733_v34 = vld [vmem:[#allocation8 + $0xba8] sm:$0xff] }
 0x271   :  { %7965 = vmatpush1.bf16.msra.mxu0 %v11541_v49  ;;  %v1857_v37 = vld [vmem:[#allocation8 + $0xf88] sm:$0xff]  ;;  %v11630_v39 = vcombine.high %v1729_v53, %v1733_v34 }
 0x272   :  { %8006 = vmatpush1.bf16.msra.mxu1 %v11669_v50  ;;  %7966 = vmatprep.subr.bf16.mxu0 %v11534_v51  ;;  %v1861_v38 = vld [vmem:[#allocation8 + $0xfa8] sm:$0xff]  ;;  %v11629_v51 = vcombine.low %v1729_v53, %v1733_v34 }
 0x273   :  { %8007 = vmatprep.subr.bf16.mxu1 %v11662_v54  ;;  %v11758_v35 = vcombine.high %v1857_v37, %v1861_v38  ;;  %v1721_v41 = vld [vmem:[#allocation8 + $0xb48] sm:$0xff]  ;;  %v11757_v54 = vcombine.low %v1857_v37, %v1861_v38 }
 0x274   :  { %v1725_v42 = vld [vmem:[#allocation8 + $0xb68] sm:$0xff] }
 0x275   :  { %7967 = vmatpush1.bf16.msra.mxu0 %v11533_v60  ;;  %v1849_v49 = vld [vmem:[#allocation8 + $0xf48] sm:$0xff]  ;;  %v11622_v55 = vcombine.high %v1721_v41, %v1725_v42 }
 0x276   :  { %8008 = vmatpush1.bf16.msra.mxu1 %v11661_v63  ;;  %7968 = vmatprep.subr.bf16.mxu0 %v11526_v18  ;;  %v1853_v50 = vld [vmem:[#allocation8 + $0xf68] sm:$0xff]  ;;  %v11621_v18 = vcombine.low %v1721_v41, %v1725_v42 }
 0x277   :  { %8009 = vmatprep.subr.bf16.mxu1 %v11654_v4  ;;  %v11750_v56 = vcombine.high %v1849_v49, %v1853_v50  ;;  %v1713_v57 = vld [vmem:[#allocation8 + $0xb08] sm:$0xff]  ;;  %v11749_v4 = vcombine.low %v1849_v49, %v1853_v50 }
 0x278   :  { %v1717_v58 = vld [vmem:[#allocation8 + $0xb28] sm:$0xff] }
 0x279   :  { %7969 = vmatpush1.bf16.msra.mxu0 %v11525_v16  ;;  %v1841_v60 = vld [vmem:[#allocation8 + $0xf08] sm:$0xff]  ;;  %v11614_v5 = vcombine.high %v1713_v57, %v1717_v58 }
 0x27a   :  { %8010 = vmatpush1.bf16.msra.mxu1 %v11653_v10  ;;  %7970 = vmatprep.subr.bf16.mxu0 %v11518_v14  ;;  %v1845_v63 = vld [vmem:[#allocation8 + $0xf28] sm:$0xff]  ;;  %v11613_v14 = vcombine.low %v1713_v57, %v1717_v58 }
 0x27b   :  { %8011 = vmatprep.subr.bf16.mxu1 %v11646_v23  ;;  %v11742_v27 = vcombine.high %v1841_v60, %v1845_v63  ;;  %v1705_v6 = vld [vmem:[#allocation8 + $0xac8] sm:$0xff]  ;;  %v11741_v23 = vcombine.low %v1841_v60, %v1845_v63 }
 0x27c   :  { %v1709_v7 = vld [vmem:[#allocation8 + $0xae8] sm:$0xff] }
 0x27d   :  { %7971 = vmatpush1.bf16.msra.mxu0 %v11517_v31  ;;  %v1833_v16 = vld [vmem:[#allocation8 + $0xec8] sm:$0xff]  ;;  %v11606_v24 = vcombine.high %v1705_v6, %v1709_v7 }
 0x27e   :  { %8012 = vmatpush1.bf16.msra.mxu1 %v11645_v28  ;;  %7972 = vmatprep.subr.bf16.mxu0 %v11638_v29  ;;  %v1837_v10 = vld [vmem:[#allocation8 + $0xee8] sm:$0xff]  ;;  %v11605_v29 = vcombine.low %v1705_v6, %v1709_v7 }
 0x27f   :  { %8013 = vmatprep.subr.bf16.mxu1 %v11766_v30  ;;  %v11734_v25 = vcombine.high %v1833_v16, %v1837_v10  ;;  %v1697_v26 = vld [vmem:[#allocation8 + $0xa88] sm:$0xff]  ;;  %v11733_v30 = vcombine.low %v1833_v16, %v1837_v10 }
 0x280   :  { %v1701_v9 = vld [vmem:[#allocation8 + $0xaa8] sm:$0xff] }
 0x281   :  { %7973 = vmatpush2.bf16.msra.mxu0 %v11637_v11  ;;  %v1825_v31 = vld [vmem:[#allocation8 + $0xe88] sm:$0xff]  ;;  %v11598_v53 = vcombine.high %v1697_v26, %v1701_v9 }
 0x282   :  { %8014 = vmatpush2.bf16.msra.mxu1 %v11765_v46  ;;  %7974 = vmatprep.subr.bf16.mxu0 %v11630_v39  ;;  %v1829_v28 = vld [vmem:[#allocation8 + $0xea8] sm:$0xff]  ;;  %v11597_v39 = vcombine.low %v1697_v26, %v1701_v9 }
 0x283   :  { %8015 = vmatprep.subr.bf16.mxu1 %v11758_v35  ;;  %v11726_v34 = vcombine.high %v1825_v31, %v1829_v28  ;;  %v1689_v37 = vld [vmem:[#allocation8 + $0xa48] sm:$0xff]  ;;  %v11725_v35 = vcombine.low %v1825_v31, %v1829_v28 }
 0x284   :  { %v1693_v38 = vld [vmem:[#allocation8 + $0xa68] sm:$0xff] }
 0x285   :  { %7975 = vmatpush2.bf16.msra.mxu0 %v11629_v51  ;;  %v1817_v11 = vld [vmem:[#allocation8 + $0xe48] sm:$0xff]  ;;  %v11590_v41 = vcombine.high %v1689_v37, %v1693_v38 }
 0x286   :  { %8016 = vmatpush2.bf16.msra.mxu1 %v11757_v54  ;;  %7976 = vmatprep.subr.bf16.mxu0 %v11622_v55  ;;  %v1821_v46 = vld [vmem:[#allocation8 + $0xe68] sm:$0xff]  ;;  %v11589_v55 = vcombine.low %v1689_v37, %v1693_v38 }
 0x287   :  { %8017 = vmatprep.subr.bf16.mxu1 %v11750_v56  ;;  %v11718_v42 = vcombine.high %v1817_v11, %v1821_v46  ;;  %v1681_v49 = vld [vmem:[#allocation8 + $0xa08] sm:$0xff]  ;;  %v11717_v56 = vcombine.low %v1817_v11, %v1821_v46 }
 0x288   :  { %v1685_v50 = vld [vmem:[#allocation8 + $0xa28] sm:$0xff] }
 0x289   :  { %7977 = vmatpush2.bf16.msra.mxu0 %v11621_v18  ;;  %v1809_v51 = vld [vmem:[#allocation8 + $0xe08] sm:$0xff]  ;;  %v11582_v57 = vcombine.high %v1681_v49, %v1685_v50 }
 0x28a   :  { %8018 = vmatpush2.bf16.msra.mxu1 %v11749_v4  ;;  %7978 = vmatprep.subr.bf16.mxu0 %v11614_v5  ;;  %v1813_v54 = vld [vmem:[#allocation8 + $0xe28] sm:$0xff]  ;;  %v11581_v5 = vcombine.low %v1681_v49, %v1685_v50 }
 0x28b   :  { %8019 = vmatprep.subr.bf16.mxu1 %v11742_v27  ;;  %v11710_v58 = vcombine.high %v1809_v51, %v1813_v54  ;;  %v1929_v60 = vld [vmem:[#allocation8 + $0x11c8] sm:$0xff]  ;;  %v11709_v27 = vcombine.low %v1809_v51, %v1813_v54 }
 0x28c   :  { %v1933_v63 = vld [vmem:[#allocation8 + $0x11e8] sm:$0xff] }
 0x28d   :  { %7979 = vmatpush2.bf16.msra.mxu0 %v11613_v14  ;;  %v2057_v18 = vld [vmem:[#allocation8 + $0x15c8] sm:$0xff]  ;;  %v11830_v6 = vcombine.high %v1929_v60, %v1933_v63  ;;  %v11829_v14 = vcombine.low %v1929_v60, %v1933_v63 }
 0x28e   :  { %8020 = vmatpush2.bf16.msra.mxu1 %v11741_v23  ;;  %7980 = vmatprep.subr.bf16.mxu0 %v11606_v24  ;;  %v2061_v4 = vld [vmem:[#allocation8 + $0x15e8] sm:$0xff] }
 0x28f   :  { %8021 = vmatprep.subr.bf16.mxu1 %v11734_v25  ;;  %v11958_v7 = vcombine.high %v2057_v18, %v2061_v4  ;;  %v1921_v16 = vld [vmem:[#allocation8 + $0x1188] sm:$0xff]  ;;  %v11957_v25 = vcombine.low %v2057_v18, %v2061_v4 }
 0x290   :  { %v1925_v10 = vld [vmem:[#allocation8 + $0x11a8] sm:$0xff] }
 0x291   :  { %7981 = vmatpush2.bf16.msra.mxu0 %v11605_v29  ;;  %v2049_v23 = vld [vmem:[#allocation8 + $0x1588] sm:$0xff]  ;;  %v11822_v26 = vcombine.high %v1921_v16, %v1925_v10  ;;  %v11821_v38 = vcombine.low %v1921_v16, %v1925_v10 }
 0x292   :  { %8022 = vmatpush2.bf16.msra.mxu1 %v11733_v30  ;;  %7982 = vmatprep.subr.bf16.mxu0 %v11598_v53  ;;  %v2053_v24 = vld [vmem:[#allocation8 + $0x15a8] sm:$0xff] }
 0x293   :  { %8023 = vmatprep.subr.bf16.mxu1 %v11726_v34  ;;  %v1913_v9 = vld [vmem:[#allocation8 + $0x1148] sm:$0xff]  ;;  %v11950_v29 = vcombine.high %v2049_v23, %v2053_v24  ;;  %v11949_v46 = vcombine.low %v2049_v23, %v2053_v24 }
 0x294   :  { %v1917_v31 = vld [vmem:[#allocation8 + $0x1168] sm:$0xff] }
 0x295   :  { %7983 = vmatpush2.bf16.msra.mxu0 %v11597_v39  ;;  %v2041_v30 = vld [vmem:[#allocation8 + $0x1548] sm:$0xff]  ;;  %v11814_v39 = vcombine.high %v1913_v9, %v1917_v31 }
 0x296   :  { %8024 = vmatpush2.bf16.msra.mxu1 %v11725_v35  ;;  %7984 = vmatprep.subr.bf16.mxu0 %v11590_v41  ;;  %v2045_v53 = vld [vmem:[#allocation8 + $0x1568] sm:$0xff] }
 0x297   :  { %8025 = vmatprep.subr.bf16.mxu1 %v11718_v42  ;;  %v1905_v49 = vld [vmem:[#allocation8 + $0x1108] sm:$0xff]  ;;  %v11941_v63 = vcombine.low %v2041_v30, %v2045_v53 }
 0x298   :  { %v1909_v50 = vld [vmem:[#allocation8 + $0x1128] sm:$0xff] }
 0x299   :  { %7985 = vmatpush2.bf16.msra.mxu0 %v11589_v55  ;;  %v2033_v54 = vld [vmem:[#allocation8 + $0x1508] sm:$0xff]  ;;  %v11806_v18 = vcombine.high %v1905_v49, %v1909_v50  ;;  %v11805_v16 = vcombine.low %v1905_v49, %v1909_v50 }
 0x29a   :  { %8026 = vmatpush2.bf16.msra.mxu1 %v11717_v56  ;;  %7986 = vmatprep.subr.bf16.mxu0 %v11582_v57  ;;  %v2037_v55 = vld [vmem:[#allocation8 + $0x1528] sm:$0xff] }
 0x29b   :  { %8027 = vmatprep.subr.bf16.mxu1 %v11710_v58  ;;  %v11813_v58 = vcombine.low %v1913_v9, %v1917_v31  ;;  %v11934_v4 = vcombine.high %v2033_v54, %v2037_v55  ;;  %v11933_v10 = vcombine.low %v2033_v54, %v2037_v55  ;;  %v1889_v24 = vld [vmem:[#allocation8 + $0x1088] sm:$0xff] }
 0x29c   :  { %v2021_v9 = vld [vmem:[#allocation8 + $0x14a8] sm:$0xff] }
 0x29d   :  { %7987 = vmatpush2.bf16.msra.mxu0 %v11581_v5  ;;  %v1897_v5 = vld [vmem:[#allocation8 + $0x10c8] sm:$0xff] }
 0x29e   :  { %8028 = vmatpush2.bf16.msra.mxu1 %v11709_v27  ;;  %8038 = vmatprep.subr.bf16.mxu0 %v11830_v6  ;;  %v1901_v27 = vld [vmem:[#allocation8 + $0x10e8] sm:$0xff] }
 0x29f   :  { %8079 = vmatprep.subr.bf16.mxu1 %v11958_v7  ;;  %v2025_v6 = vld [vmem:[#allocation8 + $0x14c8] sm:$0xff]  ;;  %v11797_v31 = vcombine.low %v1897_v5, %v1901_v27 }
 0x2a0   :  { %v7744_v28 = vpop.f32.mrf.mxu0  ;;  %7989 = vmatmul.mubr.bf16.vlgmr.msra.gmra.mxu0 %v13473_v2  ;;  %v7785_v37 = vpop.f32.mrf.mxu1  ;;  %v2029_v7 = vld [vmem:[#allocation8 + $0x14e8] sm:$0xff] }
 0x2a1   :  { %v7745_v34 = vadd.f32 %v7744_v28, %v13539_v32  ;;  %8030 = vmatmul.mubr.bf16.vlgmr.msra.gmra.mxu1 %v13471_v62  ;;  %8039 = vmatpush1.bf16.msra.mxu0 %v11829_v14  ;;  %v11942_v32 = vcombine.high %v2041_v30, %v2045_v53  ;;  %v11798_v14 = vcombine.high %v1897_v5, %v1901_v27  ;;  %v1881_v53 = vld [vmem:[#allocation8 + $0x1048] sm:$0xff] }
 0x2a2   :  { %8070 = vmatprep.mubr.bf16.mxu0 %v13475_v8  ;;  %8080 = vmatpush1.bf16.msra.mxu1 %v11957_v25  ;;  %v7746_v11 = vpop.f32.mrf.mxu0  ;;  %v7787_v42 = vpop.f32.mrf.mxu1  ;;  %v11926_v23 = vcombine.high %v2025_v6, %v2029_v7  ;;  %v1893_v25 = vld [vmem:[#allocation8 + $0x10a8] sm:$0xff]  ;;  %v11925_v28 = vcombine.low %v2025_v6, %v2029_v7 }
 0x2a3   :  { %v13549_v35 = vadd.f32 %v7785_v37, %v7745_v34  ;;  %8111 = vmatprep.mubr.bf16.mxu1 %v13478_v13  ;;  %v7747_v41 = vadd.f32 %v7746_v11, %v13543_v15  ;;  %8040 = vmatprep.subr.bf16.mxu0 %v11822_v26  ;;  %v2017_v26 = vld [vmem:[#allocation8 + $0x1488] sm:$0xff]  ;;  %v11789_v11 = vcombine.low %v1889_v24, %v1893_v25 }
 0x2a4   :  { %v7748_v51 = vpop.f32.mrf.mxu0  ;;  %8081 = vmatprep.subr.bf16.mxu1 %v11950_v29  ;;  %v7789_v57 = vpop.f32.mrf.mxu1  ;;  %v11790_v29 = vcombine.high %v1889_v24, %v1893_v25  ;;  %v11918_v30 = vcombine.high %v2017_v26, %v2021_v9  ;;  %v1885_v34 = vld [vmem:[#allocation8 + $0x1068] sm:$0xff] }
 0x2a5   :  { %v13553_v56 = vadd.f32 %v7787_v42, %v7747_v41  ;;  %8041 = vmatpush1.bf16.msra.mxu0 %v11821_v38  ;;  %v2009_v37 = vld [vmem:[#allocation8 + $0x1448] sm:$0xff]  ;;  %v11781_v51 = vcombine.low %v1881_v53, %v1885_v34 }
 0x2a6   :  { %8082 = vmatpush1.bf16.msra.mxu1 %v11949_v46  ;;  %v7749_v60 = vpop.f32.mrf.mxu0  ;;  %8042 = vmatprep.subr.bf16.mxu0 %v11814_v39  ;;  %v7790_v15 = vpop.f32.mrf.mxu1  ;;  %v2013_v38 = vld [vmem:[#allocation8 + $0x1468] sm:$0xff]  ;;  %v11917_v46 = vcombine.low %v2017_v26, %v2021_v9  ;;  %v11782_v39 = vcombine.high %v1881_v53, %v1885_v34 }
 0x2a7   :  { %8083 = vmatprep.subr.bf16.mxu1 %v11942_v32  ;;  %v11910_v41 = vcombine.high %v2009_v37, %v2013_v38  ;;  %v1873_v42 = vld [vmem:[#allocation8 + $0x1008] sm:$0xff]  ;;  %v11909_v54 = vcombine.low %v2009_v37, %v2013_v38 }
 0x2a8   :  { %v1877_v32 = vld [vmem:[#allocation8 + $0x1028] sm:$0xff] }
 0x2a9   :  { %8043 = vmatpush1.bf16.msra.mxu0 %v11813_v58  ;;  %v2001_v49 = vld [vmem:[#allocation8 + $0x1408] sm:$0xff]  ;;  %v11774_v55 = vcombine.high %v1873_v42, %v1877_v32  ;;  %v11773_v15 = vcombine.low %v1873_v42, %v1877_v32 }
 0x2aa   :  { %8084 = vmatpush1.bf16.msra.mxu1 %v11941_v63  ;;  %8044 = vmatprep.subr.bf16.mxu0 %v11806_v18  ;;  %v2005_v50 = vld [vmem:[#allocation8 + $0x1428] sm:$0xff] }
 0x2ab   :  { %8085 = vmatprep.subr.bf16.mxu1 %v11934_v4  ;;  %v11902_v57 = vcombine.high %v2001_v49, %v2005_v50  ;;  %v1993_v58 = vld [vmem:[#allocation8 + $0x13c8] sm:$0xff]  ;;  %v11901_v4 = vcombine.low %v2001_v49, %v2005_v50 }
 0x2ac   :  { %v1997_v60 = vld [vmem:[#allocation8 + $0x13e8] sm:$0xff] }
 0x2ad   :  { %8045 = vmatpush1.bf16.msra.mxu0 %v11805_v16  ;;  %v2121_v63 = vld [vmem:[#allocation8 + $0x17c8] sm:$0xff]  ;;  %v11894_v5 = vcombine.high %v1993_v58, %v1997_v60 }
 0x2ae   :  { %8086 = vmatpush1.bf16.msra.mxu1 %v11933_v10  ;;  %8046 = vmatprep.subr.bf16.mxu0 %v11798_v14  ;;  %v2125_v18 = vld [vmem:[#allocation8 + $0x17e8] sm:$0xff]  ;;  %v11893_v14 = vcombine.low %v1993_v58, %v1997_v60 }
 0x2af   :  { %8087 = vmatprep.subr.bf16.mxu1 %v11926_v23  ;;  %v12022_v27 = vcombine.high %v2121_v63, %v2125_v18  ;;  %v1985_v6 = vld [vmem:[#allocation8 + $0x1388] sm:$0xff]  ;;  %v12021_v23 = vcombine.low %v2121_v63, %v2125_v18 }
 0x2b0   :  { %v1989_v7 = vld [vmem:[#allocation8 + $0x13a8] sm:$0xff] }
 0x2b1   :  { %8047 = vmatpush1.bf16.msra.mxu0 %v11797_v31  ;;  %v2113_v16 = vld [vmem:[#allocation8 + $0x1788] sm:$0xff]  ;;  %v11886_v24 = vcombine.high %v1985_v6, %v1989_v7 }
 0x2b2   :  { %8088 = vmatpush1.bf16.msra.mxu1 %v11925_v28  ;;  %8048 = vmatprep.subr.bf16.mxu0 %v11790_v29  ;;  %v2117_v10 = vld [vmem:[#allocation8 + $0x17a8] sm:$0xff]  ;;  %v11885_v29 = vcombine.low %v1985_v6, %v1989_v7 }
 0x2b3   :  { %8089 = vmatprep.subr.bf16.mxu1 %v11918_v30  ;;  %v12014_v25 = vcombine.high %v2113_v16, %v2117_v10  ;;  %v1977_v26 = vld [vmem:[#allocation8 + $0x1348] sm:$0xff]  ;;  %v12013_v30 = vcombine.low %v2113_v16, %v2117_v10 }
 0x2b4   :  { %v1981_v9 = vld [vmem:[#allocation8 + $0x1368] sm:$0xff] }
 0x2b5   :  { %8049 = vmatpush1.bf16.msra.mxu0 %v11789_v11  ;;  %v2105_v31 = vld [vmem:[#allocation8 + $0x1748] sm:$0xff]  ;;  %v11878_v53 = vcombine.high %v1977_v26, %v1981_v9 }
 0x2b6   :  { %8090 = vmatpush1.bf16.msra.mxu1 %v11917_v46  ;;  %8050 = vmatprep.subr.bf16.mxu0 %v11782_v39  ;;  %v2109_v28 = vld [vmem:[#allocation8 + $0x1768] sm:$0xff]  ;;  %v11877_v39 = vcombine.low %v1977_v26, %v1981_v9 }
 0x2b7   :  { %8091 = vmatprep.subr.bf16.mxu1 %v11910_v41  ;;  %v12006_v34 = vcombine.high %v2105_v31, %v2109_v28  ;;  %v1969_v37 = vld [vmem:[#allocation8 + $0x1308] sm:$0xff]  ;;  %v12005_v41 = vcombine.low %v2105_v31, %v2109_v28 }
 0x2b8   :  { %v1973_v38 = vld [vmem:[#allocation8 + $0x1328] sm:$0xff] }
 0x2b9   :  { %8051 = vmatpush1.bf16.msra.mxu0 %v11781_v51  ;;  %v2097_v11 = vld [vmem:[#allocation8 + $0x1708] sm:$0xff]  ;;  %v11870_v42 = vcombine.high %v1969_v37, %v1973_v38 }
 0x2ba   :  { %8092 = vmatpush1.bf16.msra.mxu1 %v11909_v54  ;;  %8052 = vmatprep.subr.bf16.mxu0 %v11774_v55  ;;  %v2101_v46 = vld [vmem:[#allocation8 + $0x1728] sm:$0xff]  ;;  %v11869_v55 = vcombine.low %v1969_v37, %v1973_v38 }
 0x2bb   :  { %8093 = vmatprep.subr.bf16.mxu1 %v11902_v57  ;;  %v11998_v32 = vcombine.high %v2097_v11, %v2101_v46  ;;  %v1961_v49 = vld [vmem:[#allocation8 + $0x12c8] sm:$0xff]  ;;  %v11997_v57 = vcombine.low %v2097_v11, %v2101_v46 }
 0x2bc   :  { %v1965_v50 = vld [vmem:[#allocation8 + $0x12e8] sm:$0xff] }
 0x2bd   :  { %8053 = vmatpush1.bf16.msra.mxu0 %v11773_v15  ;;  %v2089_v51 = vld [vmem:[#allocation8 + $0x16c8] sm:$0xff]  ;;  %v11862_v58 = vcombine.high %v1961_v49, %v1965_v50 }
 0x2be   :  { %8094 = vmatpush1.bf16.msra.mxu1 %v11901_v4  ;;  %8054 = vmatprep.subr.bf16.mxu0 %v11894_v5  ;;  %v2093_v54 = vld [vmem:[#allocation8 + $0x16e8] sm:$0xff]  ;;  %v11861_v5 = vcombine.low %v1961_v49, %v1965_v50 }
 0x2bf   :  { %8095 = vmatprep.subr.bf16.mxu1 %v12022_v27  ;;  %v11990_v60 = vcombine.high %v2089_v51, %v2093_v54  ;;  %v1953_v63 = vld [vmem:[#allocation8 + $0x1288] sm:$0xff]  ;;  %v11989_v27 = vcombine.low %v2089_v51, %v2093_v54 }
 0x2c0   :  { %v1957_v18 = vld [vmem:[#allocation8 + $0x12a8] sm:$0xff] }
 0x2c1   :  { %8055 = vmatpush2.bf16.msra.mxu0 %v11893_v14  ;;  %v2081_v15 = vld [vmem:[#allocation8 + $0x1688] sm:$0xff]  ;;  %v11854_v6 = vcombine.high %v1953_v63, %v1957_v18 }
 0x2c2   :  { %8096 = vmatpush2.bf16.msra.mxu1 %v12021_v23  ;;  %8056 = vmatprep.subr.bf16.mxu0 %v11886_v24  ;;  %v2085_v4 = vld [vmem:[#allocation8 + $0x16a8] sm:$0xff]  ;;  %v11853_v24 = vcombine.low %v1953_v63, %v1957_v18 }
 0x2c3   :  { %8097 = vmatprep.subr.bf16.mxu1 %v12014_v25  ;;  %v11982_v7 = vcombine.high %v2081_v15, %v2085_v4  ;;  %v1945_v16 = vld [vmem:[#allocation8 + $0x1248] sm:$0xff]  ;;  %v11981_v25 = vcombine.low %v2081_v15, %v2085_v4 }
 0x2c4   :  { %v1949_v10 = vld [vmem:[#allocation8 + $0x1268] sm:$0xff] }
 0x2c5   :  { %8057 = vmatpush2.bf16.msra.mxu0 %v11885_v29  ;;  %v2073_v14 = vld [vmem:[#allocation8 + $0x1648] sm:$0xff]  ;;  %v11846_v26 = vcombine.high %v1945_v16, %v1949_v10 }
 0x2c6   :  { %8098 = vmatpush2.bf16.msra.mxu1 %v12013_v30  ;;  %8058 = vmatprep.subr.bf16.mxu0 %v11878_v53  ;;  %v2077_v23 = vld [vmem:[#allocation8 + $0x1668] sm:$0xff]  ;;  %v11845_v53 = vcombine.low %v1945_v16, %v1949_v10 }
 0x2c7   :  { %8099 = vmatprep.subr.bf16.mxu1 %v12006_v34  ;;  %v11974_v9 = vcombine.high %v2073_v14, %v2077_v23  ;;  %v1937_v31 = vld [vmem:[#allocation8 + $0x1208] sm:$0xff]  ;;  %v11973_v34 = vcombine.low %v2073_v14, %v2077_v23 }
 0x2c8   :  { %v1941_v28 = vld [vmem:[#allocation8 + $0x1228] sm:$0xff] }
 0x2c9   :  { %8059 = vmatpush2.bf16.msra.mxu0 %v11877_v39  ;;  %v2065_v29 = vld [vmem:[#allocation8 + $0x1608] sm:$0xff]  ;;  %v11838_v37 = vcombine.high %v1937_v31, %v1941_v28 }
 0x2ca   :  { %8100 = vmatpush2.bf16.msra.mxu1 %v12005_v41  ;;  %8060 = vmatprep.subr.bf16.mxu0 %v11870_v42  ;;  %v2069_v30 = vld [vmem:[#allocation8 + $0x1628] sm:$0xff]  ;;  %v11837_v42 = vcombine.low %v1937_v31, %v1941_v28 }
 0x2cb   :  { %8101 = vmatprep.subr.bf16.mxu1 %v11998_v32  ;;  %v11966_v38 = vcombine.high %v2065_v29, %v2069_v30  ;;  %v2185_v11 = vld [vmem:[#allocation8 + $0x19c8] sm:$0xff]  ;;  %v11965_v32 = vcombine.low %v2065_v29, %v2069_v30 }
 0x2cc   :  { %v2189_v46 = vld [vmem:[#allocation8 + $0x19e8] sm:$0xff] }
 0x2cd   :  { %8061 = vmatpush2.bf16.msra.mxu0 %v11869_v55  ;;  %v2313_v39 = vld [vmem:[#allocation8 + $0x1dc8] sm:$0xff]  ;;  %v12086_v49 = vcombine.high %v2185_v11, %v2189_v46  ;;  %v12085_v55 = vcombine.low %v2185_v11, %v2189_v46 }
 0x2ce   :  { %8102 = vmatpush2.bf16.msra.mxu1 %v11997_v57  ;;  %8062 = vmatprep.subr.bf16.mxu0 %v11862_v58  ;;  %v2317_v41 = vld [vmem:[#allocation8 + $0x1de8] sm:$0xff] }
 0x2cf   :  { %8103 = vmatprep.subr.bf16.mxu1 %v11990_v60  ;;  %v12214_v50 = vcombine.high %v2313_v39, %v2317_v41  ;;  %v2177_v51 = vld [vmem:[#allocation8 + $0x1988] sm:$0xff]  ;;  %v12213_v60 = vcombine.low %v2313_v39, %v2317_v41 }
 0x2d0   :  { %v2181_v54 = vld [vmem:[#allocation8 + $0x19a8] sm:$0xff] }
 0x2d1   :  { %8063 = vmatpush2.bf16.msra.mxu0 %v11861_v5  ;;  %v2305_v57 = vld [vmem:[#allocation8 + $0x1d88] sm:$0xff]  ;;  %v12078_v63 = vcombine.high %v2177_v51, %v2181_v54  ;;  %v12077_v10 = vcombine.low %v2177_v51, %v2181_v54 }
 0x2d2   :  { %8104 = vmatpush2.bf16.msra.mxu1 %v11989_v27  ;;  %8064 = vmatprep.subr.bf16.mxu0 %v11854_v6  ;;  %v2309_v58 = vld [vmem:[#allocation8 + $0x1da8] sm:$0xff] }
 0x2d3   :  { %8105 = vmatprep.subr.bf16.mxu1 %v11982_v7  ;;  %v2169_v18 = vld [vmem:[#allocation8 + $0x1948] sm:$0xff]  ;;  %v12206_v5 = vcombine.high %v2305_v57, %v2309_v58  ;;  %v12205_v23 = vcombine.low %v2305_v57, %v2309_v58 }
 0x2d4   :  { %v2173_v15 = vld [vmem:[#allocation8 + $0x1968] sm:$0xff] }
 0x2d5   :  { %8065 = vmatpush2.bf16.msra.mxu0 %v11853_v24  ;;  %v2297_v27 = vld [vmem:[#allocation8 + $0x1d48] sm:$0xff]  ;;  %v12070_v24 = vcombine.high %v2169_v18, %v2173_v15 }
 0x2d6   :  { %8106 = vmatpush2.bf16.msra.mxu1 %v11981_v25  ;;  %8066 = vmatprep.subr.bf16.mxu0 %v11846_v26  ;;  %v2301_v6 = vld [vmem:[#allocation8 + $0x1d68] sm:$0xff] }
 0x2d7   :  { %8107 = vmatprep.subr.bf16.mxu1 %v11974_v9  ;;  %v2161_v31 = vld [vmem:[#allocation8 + $0x1908] sm:$0xff]  ;;  %v12197_v46 = vcombine.low %v2297_v27, %v2301_v6 }
 0x2d8   :  { %v2165_v28 = vld [vmem:[#allocation8 + $0x1928] sm:$0xff] }
 0x2d9   :  { %8067 = vmatpush2.bf16.msra.mxu0 %v11845_v53  ;;  %v2289_v30 = vld [vmem:[#allocation8 + $0x1d08] sm:$0xff]  ;;  %v12062_v39 = vcombine.high %v2161_v31, %v2165_v28  ;;  %v12061_v51 = vcombine.low %v2161_v31, %v2165_v28 }
 0x2da   :  { %8108 = vmatpush2.bf16.msra.mxu1 %v11973_v34  ;;  %8068 = vmatprep.subr.bf16.mxu0 %v11838_v37  ;;  %v2293_v53 = vld [vmem:[#allocation8 + $0x1d28] sm:$0xff] }
 0x2db   :  { %8109 = vmatprep.subr.bf16.mxu1 %v11966_v38  ;;  %v12069_v38 = vcombine.low %v2169_v18, %v2173_v15  ;;  %v12190_v41 = vcombine.high %v2289_v30, %v2293_v53  ;;  %v12189_v54 = vcombine.low %v2289_v30, %v2293_v53  ;;  %v2145_v58 = vld [vmem:[#allocation8 + $0x1888] sm:$0xff] }
 0x2dc   :  { %v2277_v18 = vld [vmem:[#allocation8 + $0x1ca8] sm:$0xff] }
 0x2dd   :  { %8069 = vmatpush2.bf16.msra.mxu0 %v11837_v42  ;;  %v2153_v42 = vld [vmem:[#allocation8 + $0x18c8] sm:$0xff] }
 0x2de   :  { %8110 = vmatpush2.bf16.msra.mxu1 %v11965_v32  ;;  %8120 = vmatprep.subr.bf16.mxu0 %v12086_v49  ;;  %v2157_v32 = vld [vmem:[#allocation8 + $0x18e8] sm:$0xff] }
 0x2df   :  { %8161 = vmatprep.subr.bf16.mxu1 %v12214_v50  ;;  %v2281_v49 = vld [vmem:[#allocation8 + $0x1cc8] sm:$0xff]  ;;  %v12053_v15 = vcombine.low %v2153_v42, %v2157_v32 }
 0x2e0   :  { %v7826_v4 = vpop.f32.mrf.mxu0  ;;  %8071 = vmatmul.mubr.bf16.vlgmr.msra.gmra.mxu0 %v13507_v40  ;;  %v7867_v16 = vpop.f32.mrf.mxu1  ;;  %v2285_v50 = vld [vmem:[#allocation8 + $0x1ce8] sm:$0xff] }
 0x2e1   :  { %v7827_v7 = vadd.f32 %v7826_v4, %v13549_v35  ;;  %8112 = vmatmul.mubr.bf16.vlgmr.msra.gmra.mxu1 %v13509_v43  ;;  %8121 = vmatpush1.bf16.msra.mxu0 %v12085_v55  ;;  %v12198_v35 = vcombine.high %v2297_v27, %v2301_v6  ;;  %v12054_v55 = vcombine.high %v2153_v42, %v2157_v32  ;;  %v2137_v6 = vld [vmem:[#allocation8 + $0x1848] sm:$0xff] }
 0x2e2   :  { %8152 = vmatprep.mubr.bf16.mxu0 %v13511_v0  ;;  %8162 = vmatpush1.bf16.msra.mxu1 %v12213_v60  ;;  %v7828_v14 = vpop.f32.mrf.mxu0  ;;  %v7869_v9 = vpop.f32.mrf.mxu1  ;;  %v12182_v57 = vcombine.high %v2281_v49, %v2285_v50  ;;  %v2149_v60 = vld [vmem:[#allocation8 + $0x18a8] sm:$0xff]  ;;  %v12181_v4 = vcombine.low %v2281_v49, %v2285_v50 }
 0x2e3   :  { %v13559_v25 = vadd.f32 %v7867_v16, %v7827_v7  ;;  %8193 = vmatprep.mubr.bf16.mxu1 %v13513_v52  ;;  %v7829_v26 = vadd.f32 %v7828_v14, %v13553_v56  ;;  %8122 = vmatprep.subr.bf16.mxu0 %v12078_v63  ;;  %v2273_v63 = vld [vmem:[#allocation8 + $0x1c88] sm:$0xff]  ;;  %v12045_v14 = vcombine.low %v2145_v58, %v2149_v60 }
 0x2e4   :  { %v7830_v29 = vpop.f32.mrf.mxu0  ;;  %8163 = vmatprep.subr.bf16.mxu1 %v12206_v5  ;;  %v7871_v37 = vpop.f32.mrf.mxu1  ;;  %v12046_v5 = vcombine.high %v2145_v58, %v2149_v60  ;;  %v12174_v27 = vcombine.high %v2273_v63, %v2277_v18  ;;  %v2141_v7 = vld [vmem:[#allocation8 + $0x1868] sm:$0xff] }
 0x2e5   :  { %v13563_v34 = vadd.f32 %v7869_v9, %v7829_v26  ;;  %8123 = vmatpush1.bf16.msra.mxu0 %v12077_v10  ;;  %v2265_v16 = vld [vmem:[#allocation8 + $0x1c48] sm:$0xff]  ;;  %v12037_v29 = vcombine.low %v2137_v6, %v2141_v7 }
 0x2e6   :  { %8164 = vmatpush1.bf16.msra.mxu1 %v12205_v23  ;;  %v7831_v11 = vpop.f32.mrf.mxu0  ;;  %8124 = vmatprep.subr.bf16.mxu0 %v12070_v24  ;;  %v7872_v56 = vpop.f32.mrf.mxu1  ;;  %v2269_v10 = vld [vmem:[#allocation8 + $0x1c68] sm:$0xff]  ;;  %v12173_v23 = vcombine.low %v2273_v63, %v2277_v18  ;;  %v12038_v24 = vcombine.high %v2137_v6, %v2141_v7 }
 0x2e7   :  { %8165 = vmatprep.subr.bf16.mxu1 %v12198_v35  ;;  %v12166_v26 = vcombine.high %v2265_v16, %v2269_v10  ;;  %v2129_v9 = vld [vmem:[#allocation8 + $0x1808] sm:$0xff]  ;;  %v12165_v30 = vcombine.low %v2265_v16, %v2269_v10 }
 0x2e8   :  { %v2133_v35 = vld [vmem:[#allocation8 + $0x1828] sm:$0xff] }
 0x2e9   :  { %8125 = vmatpush1.bf16.msra.mxu0 %v12069_v38  ;;  %v2257_v31 = vld [vmem:[#allocation8 + $0x1c08] sm:$0xff]  ;;  %v12030_v53 = vcombine.high %v2129_v9, %v2133_v35  ;;  %v12029_v56 = vcombine.low %v2129_v9, %v2133_v35 }
 0x2ea   :  { %8166 = vmatpush1.bf16.msra.mxu1 %v12197_v46  ;;  %8126 = vmatprep.subr.bf16.mxu0 %v12062_v39  ;;  %v2261_v28 = vld [vmem:[#allocation8 + $0x1c28] sm:$0xff] }
 0x2eb   :  { %8167 = vmatprep.subr.bf16.mxu1 %v12190_v41  ;;  %v12158_v37 = vcombine.high %v2257_v31, %v2261_v28  ;;  %v2249_v38 = vld [vmem:[#allocation8 + $0x1bc8] sm:$0xff]  ;;  %v12157_v41 = vcombine.low %v2257_v31, %v2261_v28 }
 0x2ec   :  { %v2253_v11 = vld [vmem:[#allocation8 + $0x1be8] sm:$0xff] }
 0x2ed   :  { %8127 = vmatpush1.bf16.msra.mxu0 %v12061_v51  ;;  %v2377_v46 = vld [vmem:[#allocation8 + $0x1fc8] sm:$0xff]  ;;  %v12150_v42 = vcombine.high %v2249_v38, %v2253_v11 }
 0x2ee   :  { %8168 = vmatpush1.bf16.msra.mxu1 %v12189_v54  ;;  %8128 = vmatprep.subr.bf16.mxu0 %v12054_v55  ;;  %v2381_v39 = vld [vmem:[#allocation8 + $0x1fe8] sm:$0xff]  ;;  %v12149_v55 = vcombine.low %v2249_v38, %v2253_v11 }
 0x2ef   :  { %8169 = vmatprep.subr.bf16.mxu1 %v12182_v57  ;;  %v12278_v32 = vcombine.high %v2377_v46, %v2381_v39  ;;  %v2241_v49 = vld [vmem:[#allocation8 + $0x1b88] sm:$0xff]  ;;  %v12277_v57 = vcombine.low %v2377_v46, %v2381_v39 }
 0x2f0   :  { %v2245_v50 = vld [vmem:[#allocation8 + $0x1ba8] sm:$0xff] }
 0x2f1   :  { %8129 = vmatpush1.bf16.msra.mxu0 %v12053_v15  ;;  %v2369_v51 = vld [vmem:[#allocation8 + $0x1f88] sm:$0xff]  ;;  %v12142_v58 = vcombine.high %v2241_v49, %v2245_v50 }
 0x2f2   :  { %8170 = vmatpush1.bf16.msra.mxu1 %v12181_v4  ;;  %8130 = vmatprep.subr.bf16.mxu0 %v12046_v5  ;;  %v2373_v54 = vld [vmem:[#allocation8 + $0x1fa8] sm:$0xff]  ;;  %v12141_v5 = vcombine.low %v2241_v49, %v2245_v50 }
 0x2f3   :  { %8171 = vmatprep.subr.bf16.mxu1 %v12174_v27  ;;  %v12270_v60 = vcombine.high %v2369_v51, %v2373_v54  ;;  %v2233_v63 = vld [vmem:[#allocation8 + $0x1b48] sm:$0xff]  ;;  %v12269_v27 = vcombine.low %v2369_v51, %v2373_v54 }
 0x2f4   :  { %v2237_v18 = vld [vmem:[#allocation8 + $0x1b68] sm:$0xff] }
 0x2f5   :  { %8131 = vmatpush1.bf16.msra.mxu0 %v12045_v14  ;;  %v2361_v15 = vld [vmem:[#allocation8 + $0x1f48] sm:$0xff]  ;;  %v12134_v6 = vcombine.high %v2233_v63, %v2237_v18 }
 0x2f6   :  { %8172 = vmatpush1.bf16.msra.mxu1 %v12173_v23  ;;  %8132 = vmatprep.subr.bf16.mxu0 %v12038_v24  ;;  %v2365_v4 = vld [vmem:[#allocation8 + $0x1f68] sm:$0xff]  ;;  %v12133_v24 = vcombine.low %v2233_v63, %v2237_v18 }
 0x2f7   :  { %8173 = vmatprep.subr.bf16.mxu1 %v12166_v26  ;;  %v12262_v7 = vcombine.high %v2361_v15, %v2365_v4  ;;  %v2225_v16 = vld [vmem:[#allocation8 + $0x1b08] sm:$0xff]  ;;  %v12261_v26 = vcombine.low %v2361_v15, %v2365_v4 }
 0x2f8   :  { %v2229_v10 = vld [vmem:[#allocation8 + $0x1b28] sm:$0xff] }
 0x2f9   :  { %8133 = vmatpush1.bf16.msra.mxu0 %v12037_v29  ;;  %v2353_v14 = vld [vmem:[#allocation8 + $0x1f08] sm:$0xff]  ;;  %v12126_v9 = vcombine.high %v2225_v16, %v2229_v10 }
 0x2fa   :  { %8174 = vmatpush1.bf16.msra.mxu1 %v12165_v30  ;;  %8134 = vmatprep.subr.bf16.mxu0 %v12030_v53  ;;  %v2357_v23 = vld [vmem:[#allocation8 + $0x1f28] sm:$0xff]  ;;  %v12125_v53 = vcombine.low %v2225_v16, %v2229_v10 }
 0x2fb   :  { %8175 = vmatprep.subr.bf16.mxu1 %v12158_v37  ;;  %v12254_v35 = vcombine.high %v2353_v14, %v2357_v23  ;;  %v2217_v31 = vld [vmem:[#allocation8 + $0x1ac8] sm:$0xff]  ;;  %v12253_v37 = vcombine.low %v2353_v14, %v2357_v23  ;;  %v1418_v14 = vld [vmem:[#allocation8 + $0x1d0] sm:$0xff] }
 0x2fc   :  { %v2221_v28 = vld [vmem:[#allocation8 + $0x1ae8] sm:$0xff]  ;;  %v1422_v23 = vld [vmem:[#allocation8 + $0x1f0] sm:$0xff] }
 0x2fd   :  { %8135 = vmatpush1.bf16.msra.mxu0 %v12029_v56  ;;  %v2345_v29 = vld [vmem:[#allocation8 + $0x1ec8] sm:$0xff]  ;;  %v12118_v38 = vcombine.high %v2217_v31, %v2221_v28 }
 0x2fe   :  { %8176 = vmatpush1.bf16.msra.mxu1 %v12157_v41  ;;  %8136 = vmatprep.subr.bf16.mxu0 %v12150_v42  ;;  %v2349_v30 = vld [vmem:[#allocation8 + $0x1ee8] sm:$0xff]  ;;  %v12117_v42 = vcombine.low %v2217_v31, %v2221_v28  ;;  %v11320_v31 = vcombine.high %v1418_v14, %v1422_v23 }
 0x2ff   :  { %8177 = vmatprep.subr.bf16.mxu1 %v12278_v32  ;;  %v12246_v11 = vcombine.high %v2345_v29, %v2349_v30  ;;  %v2209_v46 = vld [vmem:[#allocation8 + $0x1a88] sm:$0xff]  ;;  %v12245_v32 = vcombine.low %v2345_v29, %v2349_v30  ;;  %v1410_v29 = vld [vmem:[#allocation8 + $0x190] sm:$0xff] }
 0x300   :  { %v2213_v39 = vld [vmem:[#allocation8 + $0x1aa8] sm:$0xff]  ;;  %v1414_v30 = vld [vmem:[#allocation8 + $0x1b0] sm:$0xff] }
 0x301   :  { %8137 = vmatpush2.bf16.msra.mxu0 %v12149_v55  ;;  %v2337_v56 = vld [vmem:[#allocation8 + $0x1e88] sm:$0xff]  ;;  %v12110_v49 = vcombine.high %v2209_v46, %v2213_v39 }
 0x302   :  { %8178 = vmatpush2.bf16.msra.mxu1 %v12277_v57  ;;  %8138 = vmatprep.subr.bf16.mxu0 %v12142_v58  ;;  %v2341_v41 = vld [vmem:[#allocation8 + $0x1ea8] sm:$0xff]  ;;  %v12109_v58 = vcombine.low %v2209_v46, %v2213_v39  ;;  %v1542_v46 = vld [vmem:[#allocation8 + $0x5b0] sm:$0xff] }
 0x303   :  { %8179 = vmatprep.subr.bf16.mxu1 %v12270_v60  ;;  %v12238_v50 = vcombine.high %v2337_v56, %v2341_v41  ;;  %v2201_v51 = vld [vmem:[#allocation8 + $0x1a48] sm:$0xff]  ;;  %v12237_v60 = vcombine.low %v2337_v56, %v2341_v41  ;;  %v11312_v41 = vcombine.high %v1410_v29, %v1414_v30 }
 0x304   :  { %v2205_v54 = vld [vmem:[#allocation8 + $0x1a68] sm:$0xff] }
 0x305   :  { %8139 = vmatpush2.bf16.msra.mxu0 %v12141_v5  ;;  %v2329_v55 = vld [vmem:[#allocation8 + $0x1e48] sm:$0xff]  ;;  %v12102_v63 = vcombine.high %v2201_v51, %v2205_v54 }
 0x306   :  { %8180 = vmatpush2.bf16.msra.mxu1 %v12269_v27  ;;  %8140 = vmatprep.subr.bf16.mxu0 %v12134_v6  ;;  %v2333_v57 = vld [vmem:[#allocation8 + $0x1e68] sm:$0xff]  ;;  %v12101_v6 = vcombine.low %v2201_v51, %v2205_v54  ;;  %v1530_v51 = vld [vmem:[#allocation8 + $0x550] sm:$0xff] }
 0x307   :  { %8181 = vmatprep.subr.bf16.mxu1 %v12262_v7  ;;  %v12230_v18 = vcombine.high %v2329_v55, %v2333_v57  ;;  %v2193_v15 = vld [vmem:[#allocation8 + $0x1a08] sm:$0xff]  ;;  %v12229_v7 = vcombine.low %v2329_v55, %v2333_v57  ;;  %v1534_v54 = vld [vmem:[#allocation8 + $0x570] sm:$0xff] }
 0x308   :  { %v2197_v4 = vld [vmem:[#allocation8 + $0x1a28] sm:$0xff] }
 0x309   :  { %8141 = vmatpush2.bf16.msra.mxu0 %v12133_v24  ;;  %v2321_v5 = vld [vmem:[#allocation8 + $0x1e08] sm:$0xff]  ;;  %v12094_v16 = vcombine.high %v2193_v15, %v2197_v4  ;;  %v1546_v24 = vld [vmem:[#allocation8 + $0x5d0] sm:$0xff] }
 0x30a   :  { %8182 = vmatpush2.bf16.msra.mxu1 %v12261_v26  ;;  %8142 = vmatprep.subr.bf16.mxu0 %v12126_v9  ;;  %v2325_v27 = vld [vmem:[#allocation8 + $0x1e28] sm:$0xff]  ;;  %v1550_v26 = vld [vmem:[#allocation8 + $0x5f0] sm:$0xff]  ;;  %v12093_v9 = vcombine.low %v2193_v15, %v2197_v4 }
 0x30b   :  { %8183 = vmatprep.subr.bf16.mxu1 %v12254_v35  ;;  %v12222_v10 = vcombine.high %v2321_v5, %v2325_v27  ;;  %v12221_v35 = vcombine.low %v2321_v5, %v2325_v27  ;;  %v11448_v28 = vcombine.high %v1546_v24, %v1550_v26  ;;  %v11447_v39 = vcombine.low %v1546_v24, %v1550_v26 }
 0x30c   :  { %v11432_v27 = vcombine.high %v1530_v51, %v1534_v54 }
 0x30d   :  { %8143 = vmatpush2.bf16.msra.mxu0 %v12125_v53  ;;  %v13050_v53 = vld [vmem:[#allocation10] sm:$0xff] }
 0x30e   :  { %8184 = vmatpush2.bf16.msra.mxu1 %v12253_v37  ;;  %8144 = vmatprep.subr.bf16.mxu0 %v12118_v38  ;;  %v2397_v37 = vrot.slane %v13050_v53, %v13398_v19  ;;  %v11319_v38 = vcombine.low %v1418_v14, %v1422_v23  ;;  %v2401_v56 = vrot.slane %v13050_v53, %v13404_v21  ;;  %v1526_v14 = vld [vmem:[#allocation8 + $0x530] sm:$0xff] }
 0x30f   :  { %8185 = vmatprep.subr.bf16.mxu1 %v12246_v11  ;;  %v1538_v11 = vld [vmem:[#allocation8 + $0x590] sm:$0xff] }
 0x310   :  { %v1390_v53 = vld [vmem:[#allocation8 + $0xf0] sm:$0xff] }
 0x311   :  { %8145 = vmatpush2.bf16.msra.mxu0 %v12117_v42  ;;  %v1402_v42 = vld [vmem:[#allocation8 + $0x150] sm:$0xff] }
 0x312   :  { %8186 = vmatpush2.bf16.msra.mxu1 %v12245_v32  ;;  %8146 = vmatprep.subr.bf16.mxu0 %v12110_v49  ;;  %v1406_v32 = vld [vmem:[#allocation8 + $0x170] sm:$0xff] }
 0x313   :  { %8187 = vmatprep.subr.bf16.mxu1 %v12238_v50  ;;  %v11440_v50 = vcombine.high %v1538_v11, %v1542_v46  ;;  %v11303_v26 = vcombine.low %v1402_v42, %v1406_v32 }
 0x315   :  { %8147 = vmatpush2.bf16.msra.mxu0 %v12109_v58  ;;  %v11311_v58 = vcombine.low %v1410_v29, %v1414_v30  ;;  %v1386_v30 = vld [vmem:[#allocation8 + $0xd0] sm:$0xff] }
 0x316   :  { %8188 = vmatpush2.bf16.msra.mxu1 %v12237_v60  ;;  %8148 = vmatprep.subr.bf16.mxu0 %v12102_v63  ;;  %v11439_v63 = vcombine.low %v1538_v11, %v1542_v46 }
 0x317   :  { %8189 = vmatprep.subr.bf16.mxu1 %v12230_v18  ;;  %v11304_v18 = vcombine.high %v1402_v42, %v1406_v32  ;;  %v1382_v42 = vld [vmem:[#allocation8 + $0xb0] sm:$0xff] }
 0x318   :  { %v1506_v32 = vld [vmem:[#allocation8 + $0x490] sm:$0xff] }
 0x319   :  { %8149 = vmatpush2.bf16.msra.mxu0 %v12101_v6  ;;  %v1394_v6 = vld [vmem:[#allocation8 + $0x110] sm:$0xff] }
 0x31a   :  { %8190 = vmatpush2.bf16.msra.mxu1 %v12229_v7  ;;  %8150 = vmatprep.subr.bf16.mxu0 %v12094_v16  ;;  %v1398_v7 = vld [vmem:[#allocation8 + $0x130] sm:$0xff] }
 0x31b   :  { %8191 = vmatprep.subr.bf16.mxu1 %v12222_v10  ;;  %v1522_v10 = vld [vmem:[#allocation8 + $0x510] sm:$0xff]  ;;  %v11295_v11 = vcombine.low %v1394_v6, %v1398_v7 }
 0x31c   :  { %v11424_v29 = vcombine.high %v1522_v10, %v1526_v14  ;;  %v11423_v46 = vcombine.low %v1522_v10, %v1526_v14  ;;  %v1494_v10 = vld [vmem:[#allocation8 + $0x430] sm:$0xff] }
 0x31d   :  { %8151 = vmatpush2.bf16.msra.mxu0 %v12093_v9 }
 0x31e   :  { %8192 = vmatpush2.bf16.msra.mxu1 %v12221_v35  ;;  %8202 = vmatprep.subr.bf16.mxu0 %v11320_v31  ;;  %v11431_v35 = vcombine.low %v1530_v51, %v1534_v54  ;;  %v11296_v31 = vcombine.high %v1394_v6, %v1398_v7  ;;  %v1362_v6 = vld [vmem:[#allocation8 + $0x10] sm:$0xff] }
 0x31f   :  { %8243 = vmatprep.subr.bf16.mxu1 %v11448_v28  ;;  %v1366_v7 = vld [vmem:[#allocation8 + $0x30] sm:$0xff] }
 0x320   :  { %v7908_v49 = vpop.f32.mrf.mxu0  ;;  %8153 = vmatmul.mubr.bf16.vlgmr.msra.gmra.mxu0 %v13522_v1 }
 0x321   :  { %v7909_v55 = vadd.f32 %v7908_v49, %v2397_v37  ;;  %v7949_v57 = vpop.f32.mrf.mxu1  ;;  %8194 = vmatmul.mubr.bf16.vlgmr.msra.gmra.mxu1 %v13524_v3  ;;  %8203 = vmatpush1.bf16.msra.mxu0 %v11319_v38  ;;  %v1514_v37 = vld [vmem:[#allocation8 + $0x4d0] sm:$0xff] }
 0x322   :  { %8234 = vmatprep.mubr.bf16.mxu0 %v13416_v45  ;;  %8244 = vmatpush1.bf16.msra.mxu1 %v11447_v39  ;;  %v7910_v60 = vpop.f32.mrf.mxu0  ;;  %v1518_v38 = vld [vmem:[#allocation8 + $0x4f0] sm:$0xff]  ;;  %v11288_v39 = vcombine.high %v1386_v30, %v1390_v53 }
 0x323   :  { %v13570_v15 = vadd.f32 %v7949_v57, %v7909_v55  ;;  %8275 = vmatprep.mubr.bf16.mxu1 %v13422_v48  ;;  %v7911_v4 = vadd.f32 %v7910_v60, %v2401_v56  ;;  %v7951_v5 = vpop.f32.mrf.mxu1  ;;  %8204 = vmatprep.subr.bf16.mxu0 %v11312_v41  ;;  %v11416_v56 = vcombine.high %v1514_v37, %v1518_v38  ;;  %v1378_v41 = vld [vmem:[#allocation8 + $0x90] sm:$0xff] }
 0x324   :  { %v7912_v16 = vpop.f32.mrf.mxu0  ;;  %8245 = vmatprep.subr.bf16.mxu1 %v11440_v50  ;;  %v1510_v49 = vld [vmem:[#allocation8 + $0x4b0] sm:$0xff]  ;;  %v11287_v50 = vcombine.low %v1386_v30, %v1390_v53  ;;  %v11415_v51 = vcombine.low %v1514_v37, %v1518_v38  ;;  %v11280_v54 = vcombine.high %v1378_v41, %v1382_v42  ;;  %v11263_v30 = vcombine.low %v1362_v6, %v1366_v7 }
 0x325   :  { %v13573_v23 = vadd.f32 %v7951_v5, %v7911_v4  ;;  %v7953_v24 = vpop.f32.mrf.mxu1  ;;  %8205 = vmatpush1.bf16.msra.mxu0 %v11311_v58  ;;  %v11408_v55 = vcombine.high %v1506_v32, %v1510_v49  ;;  %v1370_v57 = vld [vmem:[#allocation8 + $0x50] sm:$0xff]  ;;  %v11407_v4 = vcombine.low %v1506_v32, %v1510_v49 }
 0x326   :  { %8246 = vmatpush1.bf16.msra.mxu1 %v11439_v63  ;;  %v7913_v9 = vpop.f32.mrf.mxu0  ;;  %8206 = vmatprep.subr.bf16.mxu0 %v11304_v18  ;;  %v1374_v58 = vld [vmem:[#allocation8 + $0x70] sm:$0xff]  ;;  %v11279_v18 = vcombine.low %v1378_v41, %v1382_v42 }
 0x327   :  { %v7954_v28 = vpop.f32.mrf.mxu1  ;;  %8247 = vmatprep.subr.bf16.mxu1 %v11432_v27  ;;  %v1498_v60 = vld [vmem:[#allocation8 + $0x450] sm:$0xff]  ;;  %v11272_v5 = vcombine.high %v1370_v57, %v1374_v58  ;;  %v11271_v14 = vcombine.low %v1370_v57, %v1374_v58 }
 0x328   :  { %v1502_v63 = vld [vmem:[#allocation8 + $0x470] sm:$0xff] }
 0x329   :  { %8207 = vmatpush1.bf16.msra.mxu0 %v11303_v26  ;;  %v11400_v27 = vcombine.high %v1498_v60, %v1502_v63  ;;  %v1490_v16 = vld [vmem:[#allocation8 + $0x410] sm:$0xff]  ;;  %v11399_v24 = vcombine.low %v1498_v60, %v1502_v63  ;;  %v11264_v26 = vcombine.high %v1362_v6, %v1366_v7 }
 0x32a   :  { %8248 = vmatpush1.bf16.msra.mxu1 %v11431_v35  ;;  %8208 = vmatprep.subr.bf16.mxu0 %v11296_v31  ;;  %v11392_v9 = vcombine.high %v1490_v16, %v1494_v10  ;;  %v1482_v35 = vld [vmem:[#allocation8 + $0x3d0] sm:$0xff]  ;;  %v11391_v53 = vcombine.low %v1490_v16, %v1494_v10 }
 0x32b   :  { %8249 = vmatprep.subr.bf16.mxu1 %v11424_v29  ;;  %v1486_v31 = vld [vmem:[#allocation8 + $0x3f0] sm:$0xff] }
 0x32c   :  { %v1610_v28 = vld [vmem:[#allocation8 + $0x7d0] sm:$0xff]  ;;  %v11384_v37 = vcombine.high %v1482_v35, %v1486_v31  ;;  %v11383_v41 = vcombine.low %v1482_v35, %v1486_v31 }
 0x32d   :  { %8209 = vmatpush1.bf16.msra.mxu0 %v11295_v11  ;;  %v1614_v29 = vld [vmem:[#allocation8 + $0x7f0] sm:$0xff] }
 0x32e   :  { %8250 = vmatpush1.bf16.msra.mxu1 %v11423_v46  ;;  %8210 = vmatprep.subr.bf16.mxu0 %v11288_v39  ;;  %v11512_v38 = vcombine.high %v1610_v28, %v1614_v29  ;;  %v1474_v11 = vld [vmem:[#allocation8 + $0x390] sm:$0xff]  ;;  %v11511_v42 = vcombine.low %v1610_v28, %v1614_v29 }
 0x32f   :  { %8251 = vmatprep.subr.bf16.mxu1 %v11416_v56  ;;  %v1478_v46 = vld [vmem:[#allocation8 + $0x3b0] sm:$0xff] }
 0x330   :  { %v1602_v39 = vld [vmem:[#allocation8 + $0x790] sm:$0xff]  ;;  %v11376_v32 = vcombine.high %v1474_v11, %v1478_v46  ;;  %v11375_v57 = vcombine.low %v1474_v11, %v1478_v46 }
 0x331   :  { %8211 = vmatpush1.bf16.msra.mxu0 %v11287_v50  ;;  %v1606_v56 = vld [vmem:[#allocation8 + $0x7b0] sm:$0xff] }
 0x332   :  { %8252 = vmatpush1.bf16.msra.mxu1 %v11415_v51  ;;  %8212 = vmatprep.subr.bf16.mxu0 %v11280_v54  ;;  %v11504_v49 = vcombine.high %v1602_v39, %v1606_v56  ;;  %v1466_v50 = vld [vmem:[#allocation8 + $0x350] sm:$0xff]  ;;  %v11503_v58 = vcombine.low %v1602_v39, %v1606_v56 }
 0x333   :  { %8253 = vmatprep.subr.bf16.mxu1 %v11408_v55  ;;  %v1470_v51 = vld [vmem:[#allocation8 + $0x370] sm:$0xff] }
 0x334   :  { %v1594_v54 = vld [vmem:[#allocation8 + $0x750] sm:$0xff]  ;;  %v11368_v60 = vcombine.high %v1466_v50, %v1470_v51  ;;  %v11367_v6 = vcombine.low %v1466_v50, %v1470_v51 }
 0x335   :  { %8213 = vmatpush1.bf16.msra.mxu0 %v11279_v18  ;;  %v1598_v55 = vld [vmem:[#allocation8 + $0x770] sm:$0xff] }
 0x336   :  { %8254 = vmatpush1.bf16.msra.mxu1 %v11407_v4  ;;  %8214 = vmatprep.subr.bf16.mxu0 %v11272_v5  ;;  %v11496_v63 = vcombine.high %v1594_v54, %v1598_v55  ;;  %v1458_v18 = vld [vmem:[#allocation8 + $0x310] sm:$0xff]  ;;  %v11495_v7 = vcombine.low %v1594_v54, %v1598_v55 }
 0x337   :  { %8255 = vmatprep.subr.bf16.mxu1 %v11400_v27  ;;  %v1462_v4 = vld [vmem:[#allocation8 + $0x330] sm:$0xff] }
 0x338   :  { %v1586_v5 = vld [vmem:[#allocation8 + $0x710] sm:$0xff]  ;;  %v11360_v16 = vcombine.high %v1458_v18, %v1462_v4  ;;  %v11359_v35 = vcombine.low %v1458_v18, %v1462_v4 }
 0x339   :  { %8215 = vmatpush1.bf16.msra.mxu0 %v11271_v14  ;;  %v1590_v27 = vld [vmem:[#allocation8 + $0x730] sm:$0xff] }
 0x33a   :  { %8256 = vmatpush1.bf16.msra.mxu1 %v11399_v24  ;;  %8216 = vmatprep.subr.bf16.mxu0 %v11264_v26  ;;  %v11488_v10 = vcombine.high %v1586_v5, %v1590_v27  ;;  %v1450_v14 = vld [vmem:[#allocation8 + $0x2d0] sm:$0xff]  ;;  %v11487_v31 = vcombine.low %v1586_v5, %v1590_v27 }
 0x33b   :  { %8257 = vmatprep.subr.bf16.mxu1 %v11392_v9  ;;  %v1454_v24 = vld [vmem:[#allocation8 + $0x2f0] sm:$0xff] }
 0x33c   :  { %v1578_v26 = vld [vmem:[#allocation8 + $0x6d0] sm:$0xff]  ;;  %v11352_v28 = vcombine.high %v1450_v14, %v1454_v24  ;;  %v11351_v11 = vcombine.low %v1450_v14, %v1454_v24 }
 0x33d   :  { %8217 = vmatpush1.bf16.msra.mxu0 %v11263_v30  ;;  %v1582_v9 = vld [vmem:[#allocation8 + $0x6f0] sm:$0xff] }
 0x33e   :  { %8258 = vmatpush1.bf16.msra.mxu1 %v11391_v53  ;;  %8218 = vmatprep.subr.bf16.mxu0 %v11384_v37  ;;  %v11480_v29 = vcombine.high %v1578_v26, %v1582_v9  ;;  %v1442_v30 = vld [vmem:[#allocation8 + $0x290] sm:$0xff]  ;;  %v11479_v46 = vcombine.low %v1578_v26, %v1582_v9 }
 0x33f   :  { %8259 = vmatprep.subr.bf16.mxu1 %v11512_v38  ;;  %v1446_v53 = vld [vmem:[#allocation8 + $0x2b0] sm:$0xff] }
 0x340   :  { %v1570_v37 = vld [vmem:[#allocation8 + $0x690] sm:$0xff]  ;;  %v11344_v39 = vcombine.high %v1442_v30, %v1446_v53  ;;  %v11343_v50 = vcombine.low %v1442_v30, %v1446_v53 }
 0x341   :  { %8219 = vmatpush2.bf16.msra.mxu0 %v11383_v41  ;;  %v1574_v38 = vld [vmem:[#allocation8 + $0x6b0] sm:$0xff] }
 0x342   :  { %8260 = vmatpush2.bf16.msra.mxu1 %v11511_v42  ;;  %8220 = vmatprep.subr.bf16.mxu0 %v11376_v32  ;;  %v11472_v56 = vcombine.high %v1570_v37, %v1574_v38  ;;  %v1434_v41 = vld [vmem:[#allocation8 + $0x250] sm:$0xff]  ;;  %v11471_v51 = vcombine.low %v1570_v37, %v1574_v38 }
 0x343   :  { %8261 = vmatprep.subr.bf16.mxu1 %v11504_v49  ;;  %v1438_v42 = vld [vmem:[#allocation8 + $0x270] sm:$0xff] }
 0x344   :  { %v1562_v32 = vld [vmem:[#allocation8 + $0x650] sm:$0xff]  ;;  %v11336_v54 = vcombine.high %v1434_v41, %v1438_v42  ;;  %v11335_v18 = vcombine.low %v1434_v41, %v1438_v42 }
 0x345   :  { %8221 = vmatpush2.bf16.msra.mxu0 %v11375_v57  ;;  %v1566_v49 = vld [vmem:[#allocation8 + $0x670] sm:$0xff] }
 0x346   :  { %8262 = vmatpush2.bf16.msra.mxu1 %v11503_v58  ;;  %8222 = vmatprep.subr.bf16.mxu0 %v11368_v60  ;;  %v11464_v55 = vcombine.high %v1562_v32, %v1566_v49  ;;  %v1426_v57 = vld [vmem:[#allocation8 + $0x210] sm:$0xff]  ;;  %v11463_v4 = vcombine.low %v1562_v32, %v1566_v49 }
 0x347   :  { %8263 = vmatprep.subr.bf16.mxu1 %v11496_v63  ;;  %v1430_v58 = vld [vmem:[#allocation8 + $0x230] sm:$0xff] }
 0x348   :  { %v1554_v60 = vld [vmem:[#allocation8 + $0x610] sm:$0xff]  ;;  %v11328_v5 = vcombine.high %v1426_v57, %v1430_v58  ;;  %v11327_v14 = vcombine.low %v1426_v57, %v1430_v58 }
 0x349   :  { %8223 = vmatpush2.bf16.msra.mxu0 %v11367_v6  ;;  %v1558_v63 = vld [vmem:[#allocation8 + $0x630] sm:$0xff] }
 0x34a   :  { %8264 = vmatpush2.bf16.msra.mxu1 %v11495_v7  ;;  %8224 = vmatprep.subr.bf16.mxu0 %v11360_v16  ;;  %v11456_v27 = vcombine.high %v1554_v60, %v1558_v63  ;;  %v1674_v6 = vld [vmem:[#allocation8 + $0x9d0] sm:$0xff]  ;;  %v11455_v24 = vcombine.low %v1554_v60, %v1558_v63 }
 0x34b   :  { %8265 = vmatprep.subr.bf16.mxu1 %v11488_v10  ;;  %v1678_v7 = vld [vmem:[#allocation8 + $0x9f0] sm:$0xff] }
 0x34c   :  { %v1802_v16 = vld [vmem:[#allocation8 + $0xdd0] sm:$0xff]  ;;  %v11576_v26 = vcombine.high %v1674_v6, %v1678_v7 }
 0x34d   :  { %8225 = vmatpush2.bf16.msra.mxu0 %v11359_v35  ;;  %v1806_v10 = vld [vmem:[#allocation8 + $0xdf0] sm:$0xff] }
 0x34e   :  { %8266 = vmatpush2.bf16.msra.mxu1 %v11487_v31  ;;  %8226 = vmatprep.subr.bf16.mxu0 %v11352_v28  ;;  %v11704_v9 = vcombine.high %v1802_v16, %v1806_v10  ;;  %v1666_v35 = vld [vmem:[#allocation8 + $0x990] sm:$0xff]  ;;  %v11575_v28 = vcombine.low %v1674_v6, %v1678_v7  ;;  %v11703_v53 = vcombine.low %v1802_v16, %v1806_v10 }
 0x34f   :  { %8267 = vmatprep.subr.bf16.mxu1 %v11480_v29  ;;  %v1670_v31 = vld [vmem:[#allocation8 + $0x9b0] sm:$0xff] }
 0x350   :  { %v1794_v29 = vld [vmem:[#allocation8 + $0xd90] sm:$0xff]  ;;  %v11568_v37 = vcombine.high %v1666_v35, %v1670_v31  ;;  %v11567_v49 = vcombine.low %v1666_v35, %v1670_v31 }
 0x351   :  { %8227 = vmatpush2.bf16.msra.mxu0 %v11351_v11  ;;  %v1798_v30 = vld [vmem:[#allocation8 + $0xdb0] sm:$0xff] }
 0x352   :  { %8268 = vmatpush2.bf16.msra.mxu1 %v11479_v46  ;;  %8228 = vmatprep.subr.bf16.mxu0 %v11344_v39  ;;  %v1658_v38 = vld [vmem:[#allocation8 + $0x950] sm:$0xff]  ;;  %v11696_v39 = vcombine.high %v1794_v29, %v1798_v30 }
 0x353   :  { %8269 = vmatprep.subr.bf16.mxu1 %v11472_v56  ;;  %v1662_v11 = vld [vmem:[#allocation8 + $0x970] sm:$0xff] }
 0x354   :  { %v1786_v56 = vld [vmem:[#allocation8 + $0xd50] sm:$0xff]  ;;  %v11559_v7 = vcombine.low %v1658_v38, %v1662_v11 }
 0x355   :  { %8229 = vmatpush2.bf16.msra.mxu0 %v11343_v50  ;;  %v1790_v41 = vld [vmem:[#allocation8 + $0xd70] sm:$0xff] }
 0x356   :  { %8270 = vmatpush2.bf16.msra.mxu1 %v11471_v51  ;;  %8230 = vmatprep.subr.bf16.mxu0 %v11336_v54  ;;  %v11695_v51 = vcombine.low %v1794_v29, %v1798_v30  ;;  %v11560_v54 = vcombine.high %v1658_v38, %v1662_v11  ;;  %v1650_v60 = vld [vmem:[#allocation8 + $0x910] sm:$0xff]  ;;  %v11687_v10 = vcombine.low %v1786_v56, %v1790_v41 }
 0x357   :  { %8271 = vmatprep.subr.bf16.mxu1 %v11464_v55  ;;  %v1654_v63 = vld [vmem:[#allocation8 + $0x930] sm:$0xff] }
 0x358   :  { %v1770_v35 = vld [vmem:[#allocation8 + $0xcd0] sm:$0xff] }
 0x359   :  { %8231 = vmatpush2.bf16.msra.mxu0 %v11335_v18  ;;  %v1774_v31 = vld [vmem:[#allocation8 + $0xcf0] sm:$0xff] }
 0x35a   :  { %8272 = vmatpush2.bf16.msra.mxu1 %v11463_v4  ;;  %8232 = vmatprep.subr.bf16.mxu0 %v11328_v5  ;;  %v1778_v4 = vld [vmem:[#allocation8 + $0xd10] sm:$0xff] }
 0x35b   :  { %8273 = vmatprep.subr.bf16.mxu1 %v11456_v27  ;;  %v1782_v5 = vld [vmem:[#allocation8 + $0xd30] sm:$0xff] }
 0x35c   :  { %v11679_v29 = vcombine.low %v1778_v4, %v1782_v5  ;;  %v1638_v38 = vld [vmem:[#allocation8 + $0x8b0] sm:$0xff] }
 0x35d   :  { %8233 = vmatpush2.bf16.msra.mxu0 %v11327_v14  ;;  %v11552_v14 = vcombine.high %v1650_v60, %v1654_v63  ;;  %v1762_v11 = vld [vmem:[#allocation8 + $0xc90] sm:$0xff] }
 0x35e   :  { %8274 = vmatpush2.bf16.msra.mxu1 %v11455_v24  ;;  %8284 = vmatprep.subr.bf16.mxu0 %v11576_v26  ;;  %v11680_v24 = vcombine.high %v1778_v4, %v1782_v5  ;;  %v1642_v26 = vld [vmem:[#allocation8 + $0x8d0] sm:$0xff] }
 0x35f   :  { %8325 = vmatprep.subr.bf16.mxu1 %v11704_v9  ;;  %v1646_v9 = vld [vmem:[#allocation8 + $0x8f0] sm:$0xff] }
 0x360   :  { %v7990_v46 = vpop.f32.mrf.mxu0  ;;  %8235 = vmatmul.mubr.bf16.vlgmr.msra.gmra.mxu0 %v13420_v47  ;;  %v11544_v30 = vcombine.high %v1642_v26, %v1646_v9  ;;  %v1750_v4 = vld [vmem:[#allocation8 + $0xc30] sm:$0xff] }
 0x361   :  { %v7991_v42 = vadd.f32 %v7990_v46, %v13570_v15  ;;  %v8031_v32 = vpop.f32.mrf.mxu1  ;;  %8276 = vmatmul.mubr.bf16.vlgmr.msra.gmra.mxu1 %v13414_v44  ;;  %8285 = vmatpush1.bf16.msra.mxu0 %v11575_v28  ;;  %v11688_v15 = vcombine.high %v1786_v56, %v1790_v41  ;;  %v11551_v28 = vcombine.low %v1650_v60, %v1654_v63  ;;  %v1766_v46 = vld [vmem:[#allocation8 + $0xcb0] sm:$0xff] }
 0x362   :  { %8316 = vmatprep.mubr.bf16.mxu0 %v13443_v12  ;;  %8326 = vmatpush1.bf16.msra.mxu1 %v11703_v53  ;;  %v7992_v50 = vpop.f32.mrf.mxu0  ;;  %v11672_v53 = vcombine.high %v1770_v35, %v1774_v31  ;;  %v11671_v56 = vcombine.low %v1770_v35, %v1774_v31  ;;  %v1618_v60 = vld [vmem:[#allocation8 + $0x810] sm:$0xff] }
 0x363   :  { %v13579_v55 = vadd.f32 %v8031_v32, %v7991_v42  ;;  %8357 = vmatprep.mubr.bf16.mxu1 %v13445_v22  ;;  %v7993_v57 = vadd.f32 %v7992_v50, %v13573_v23  ;;  %v8033_v58 = vpop.f32.mrf.mxu1  ;;  %8286 = vmatprep.subr.bf16.mxu0 %v11568_v37  ;;  %v1634_v37 = vld [vmem:[#allocation8 + $0x890] sm:$0xff]  ;;  %v11664_v42 = vcombine.high %v1762_v11, %v1766_v46 }
 0x364   :  { %v7994_v18 = vpop.f32.mrf.mxu0  ;;  %8327 = vmatprep.subr.bf16.mxu1 %v11696_v39  ;;  %v11543_v39 = vcombine.low %v1642_v26, %v1646_v9  ;;  %v11536_v41 = vcombine.high %v1634_v37, %v1638_v38  ;;  %v1626_v32 = vld [vmem:[#allocation8 + $0x850] sm:$0xff] }
 0x365   :  { %v13583_v27 = vadd.f32 %v8033_v58, %v7993_v57  ;;  %v8035_v6 = vpop.f32.mrf.mxu1  ;;  %8287 = vmatpush1.bf16.msra.mxu0 %v11567_v49  ;;  %v1630_v49 = vld [vmem:[#allocation8 + $0x870] sm:$0xff]  ;;  %v11663_v57 = vcombine.low %v1762_v11, %v1766_v46 }
 0x366   :  { %8328 = vmatpush1.bf16.msra.mxu1 %v11695_v51  ;;  %v7995_v16 = vpop.f32.mrf.mxu0  ;;  %8288 = vmatprep.subr.bf16.mxu0 %v11560_v54  ;;  %v1754_v50 = vld [vmem:[#allocation8 + $0xc50] sm:$0xff]  ;;  %v11535_v54 = vcombine.low %v1634_v37, %v1638_v38  ;;  %v11528_v58 = vcombine.high %v1626_v32, %v1630_v49  ;;  %v11527_v5 = vcombine.low %v1626_v32, %v1630_v49 }
 0x367   :  { %v8036_v23 = vpop.f32.mrf.mxu1  ;;  %8329 = vmatprep.subr.bf16.mxu1 %v11688_v15  ;;  %v1758_v51 = vld [vmem:[#allocation8 + $0xc70] sm:$0xff] }
 0x368   :  { %v11656_v15 = vcombine.high %v1754_v50, %v1758_v51  ;;  %v1622_v63 = vld [vmem:[#allocation8 + $0x830] sm:$0xff]  ;;  %v11655_v6 = vcombine.low %v1754_v50, %v1758_v51 }
 0x369   :  { %8289 = vmatpush1.bf16.msra.mxu0 %v11559_v7  ;;  %v1746_v18 = vld [vmem:[#allocation8 + $0xc10] sm:$0xff]  ;;  %v11520_v7 = vcombine.high %v1618_v60, %v1622_v63  ;;  %v11519_v26 = vcombine.low %v1618_v60, %v1622_v63 }
 0x36a   :  { %8330 = vmatpush1.bf16.msra.mxu1 %v11687_v10  ;;  %8290 = vmatprep.subr.bf16.mxu0 %v11552_v14  ;;  %v11648_v16 = vcombine.high %v1746_v18, %v1750_v4  ;;  %v1738_v10 = vld [vmem:[#allocation8 + $0xbd0] sm:$0xff]  ;;  %v11647_v9 = vcombine.low %v1746_v18, %v1750_v4 }
 0x36b   :  { %8331 = vmatprep.subr.bf16.mxu1 %v11680_v24  ;;  %v1742_v14 = vld [vmem:[#allocation8 + $0xbf0] sm:$0xff] }
 0x36c   :  { %v1866_v23 = vld [vmem:[#allocation8 + $0xfd0] sm:$0xff]  ;;  %v11640_v35 = vcombine.high %v1738_v10, %v1742_v14  ;;  %v11639_v37 = vcombine.low %v1738_v10, %v1742_v14 }
 0x36d   :  { %8291 = vmatpush1.bf16.msra.mxu0 %v11551_v28  ;;  %v1870_v24 = vld [vmem:[#allocation8 + $0xff0] sm:$0xff] }
 0x36e   :  { %8332 = vmatpush1.bf16.msra.mxu1 %v11679_v29  ;;  %8292 = vmatprep.subr.bf16.mxu0 %v11544_v30  ;;  %v11768_v31 = vcombine.high %v1866_v23, %v1870_v24  ;;  %v1730_v28 = vld [vmem:[#allocation8 + $0xb90] sm:$0xff]  ;;  %v11767_v38 = vcombine.low %v1866_v23, %v1870_v24 }
 0x36f   :  { %8333 = vmatprep.subr.bf16.mxu1 %v11672_v53  ;;  %v1734_v29 = vld [vmem:[#allocation8 + $0xbb0] sm:$0xff] }
 0x370   :  { %v1858_v30 = vld [vmem:[#allocation8 + $0xf90] sm:$0xff]  ;;  %v11632_v11 = vcombine.high %v1730_v28, %v1734_v29  ;;  %v11631_v32 = vcombine.low %v1730_v28, %v1734_v29 }
 0x371   :  { %8293 = vmatpush1.bf16.msra.mxu0 %v11543_v39  ;;  %v1862_v53 = vld [vmem:[#allocation8 + $0xfb0] sm:$0xff] }
 0x372   :  { %8334 = vmatpush1.bf16.msra.mxu1 %v11671_v56  ;;  %8294 = vmatprep.subr.bf16.mxu0 %v11536_v41  ;;  %v11760_v46 = vcombine.high %v1858_v30, %v1862_v53  ;;  %v1722_v39 = vld [vmem:[#allocation8 + $0xb50] sm:$0xff]  ;;  %v11759_v49 = vcombine.low %v1858_v30, %v1862_v53 }
 0x373   :  { %8335 = vmatprep.subr.bf16.mxu1 %v11664_v42  ;;  %v1726_v56 = vld [vmem:[#allocation8 + $0xb70] sm:$0xff] }
 0x374   :  { %v1850_v41 = vld [vmem:[#allocation8 + $0xf50] sm:$0xff]  ;;  %v11624_v50 = vcombine.high %v1722_v39, %v1726_v56  ;;  %v11623_v60 = vcombine.low %v1722_v39, %v1726_v56 }
 0x375   :  { %8295 = vmatpush1.bf16.msra.mxu0 %v11535_v54  ;;  %v1854_v42 = vld [vmem:[#allocation8 + $0xf70] sm:$0xff] }
 0x376   :  { %8336 = vmatpush1.bf16.msra.mxu1 %v11663_v57  ;;  %8296 = vmatprep.subr.bf16.mxu0 %v11528_v58  ;;  %v11752_v51 = vcombine.high %v1850_v41, %v1854_v42  ;;  %v1714_v54 = vld [vmem:[#allocation8 + $0xb10] sm:$0xff]  ;;  %v11751_v63 = vcombine.low %v1850_v41, %v1854_v42 }
 0x377   :  { %8337 = vmatprep.subr.bf16.mxu1 %v11656_v15  ;;  %v1718_v57 = vld [vmem:[#allocation8 + $0xb30] sm:$0xff] }
 0x378   :  { %v1842_v58 = vld [vmem:[#allocation8 + $0xf10] sm:$0xff]  ;;  %v11616_v18 = vcombine.high %v1714_v54, %v1718_v57  ;;  %v11615_v10 = vcombine.low %v1714_v54, %v1718_v57 }
 0x379   :  { %8297 = vmatpush1.bf16.msra.mxu0 %v11527_v5  ;;  %v1846_v15 = vld [vmem:[#allocation8 + $0xf30] sm:$0xff] }
 0x37a   :  { %8338 = vmatpush1.bf16.msra.mxu1 %v11655_v6  ;;  %8298 = vmatprep.subr.bf16.mxu0 %v11520_v7  ;;  %v11744_v4 = vcombine.high %v1842_v58, %v1846_v15  ;;  %v1706_v5 = vld [vmem:[#allocation8 + $0xad0] sm:$0xff]  ;;  %v11743_v14 = vcombine.low %v1842_v58, %v1846_v15 }
 0x37b   :  { %8339 = vmatprep.subr.bf16.mxu1 %v11648_v16  ;;  %v1710_v6 = vld [vmem:[#allocation8 + $0xaf0] sm:$0xff] }
 0x37c   :  { %v1834_v7 = vld [vmem:[#allocation8 + $0xed0] sm:$0xff]  ;;  %v11608_v23 = vcombine.high %v1706_v5, %v1710_v6  ;;  %v11607_v28 = vcombine.low %v1706_v5, %v1710_v6 }
 0x37d   :  { %8299 = vmatpush1.bf16.msra.mxu0 %v11519_v26  ;;  %v1838_v16 = vld [vmem:[#allocation8 + $0xef0] sm:$0xff] }
 0x37e   :  { %8340 = vmatpush1.bf16.msra.mxu1 %v11647_v9  ;;  %8300 = vmatprep.subr.bf16.mxu0 %v11640_v35  ;;  %v11736_v24 = vcombine.high %v1834_v7, %v1838_v16  ;;  %v1698_v26 = vld [vmem:[#allocation8 + $0xa90] sm:$0xff]  ;;  %v11735_v29 = vcombine.low %v1834_v7, %v1838_v16 }
 0x37f   :  { %8341 = vmatprep.subr.bf16.mxu1 %v11768_v31  ;;  %v1702_v9 = vld [vmem:[#allocation8 + $0xab0] sm:$0xff] }
 0x380   :  { %v1826_v35 = vld [vmem:[#allocation8 + $0xe90] sm:$0xff]  ;;  %v11600_v30 = vcombine.high %v1698_v26, %v1702_v9  ;;  %v11599_v39 = vcombine.low %v1698_v26, %v1702_v9 }
 0x381   :  { %8301 = vmatpush2.bf16.msra.mxu0 %v11639_v37  ;;  %v1830_v31 = vld [vmem:[#allocation8 + $0xeb0] sm:$0xff] }
 0x382   :  { %8342 = vmatpush2.bf16.msra.mxu1 %v11767_v38  ;;  %8302 = vmatprep.subr.bf16.mxu0 %v11632_v11  ;;  %v11728_v53 = vcombine.high %v1826_v35, %v1830_v31  ;;  %v1690_v37 = vld [vmem:[#allocation8 + $0xa50] sm:$0xff]  ;;  %v11727_v56 = vcombine.low %v1826_v35, %v1830_v31 }
 0x383   :  { %8343 = vmatprep.subr.bf16.mxu1 %v11760_v46  ;;  %v1694_v38 = vld [vmem:[#allocation8 + $0xa70] sm:$0xff] }
 0x384   :  { %v1818_v11 = vld [vmem:[#allocation8 + $0xe50] sm:$0xff]  ;;  %v11592_v41 = vcombine.high %v1690_v37, %v1694_v38  ;;  %v11591_v54 = vcombine.low %v1690_v37, %v1694_v38 }
 0x385   :  { %8303 = vmatpush2.bf16.msra.mxu0 %v11631_v32  ;;  %v1822_v46 = vld [vmem:[#allocation8 + $0xe70] sm:$0xff] }
 0x386   :  { %8344 = vmatpush2.bf16.msra.mxu1 %v11759_v49  ;;  %8304 = vmatprep.subr.bf16.mxu0 %v11624_v50  ;;  %v11720_v42 = vcombine.high %v1818_v11, %v1822_v46  ;;  %v1682_v32 = vld [vmem:[#allocation8 + $0xa10] sm:$0xff]  ;;  %v11719_v57 = vcombine.low %v1818_v11, %v1822_v46 }
 0x387   :  { %8345 = vmatprep.subr.bf16.mxu1 %v11752_v51  ;;  %v1686_v49 = vld [vmem:[#allocation8 + $0xa30] sm:$0xff] }
 0x388   :  { %v1810_v50 = vld [vmem:[#allocation8 + $0xe10] sm:$0xff]  ;;  %v11584_v58 = vcombine.high %v1682_v32, %v1686_v49  ;;  %v11583_v5 = vcombine.low %v1682_v32, %v1686_v49 }
 0x389   :  { %8305 = vmatpush2.bf16.msra.mxu0 %v11623_v60  ;;  %v1814_v51 = vld [vmem:[#allocation8 + $0xe30] sm:$0xff] }
 0x38a   :  { %8346 = vmatpush2.bf16.msra.mxu1 %v11751_v63  ;;  %8306 = vmatprep.subr.bf16.mxu0 %v11616_v18  ;;  %v11712_v15 = vcombine.high %v1810_v50, %v1814_v51  ;;  %v1930_v60 = vld [vmem:[#allocation8 + $0x11d0] sm:$0xff]  ;;  %v11711_v6 = vcombine.low %v1810_v50, %v1814_v51 }
 0x38b   :  { %8347 = vmatprep.subr.bf16.mxu1 %v11744_v4  ;;  %v1934_v63 = vld [vmem:[#allocation8 + $0x11f0] sm:$0xff] }
 0x38c   :  { %v2058_v18 = vld [vmem:[#allocation8 + $0x15d0] sm:$0xff]  ;;  %v11832_v7 = vcombine.high %v1930_v60, %v1934_v63 }
 0x38d   :  { %8307 = vmatpush2.bf16.msra.mxu0 %v11615_v10  ;;  %v2062_v4 = vld [vmem:[#allocation8 + $0x15f0] sm:$0xff] }
 0x38e   :  { %8348 = vmatpush2.bf16.msra.mxu1 %v11743_v14  ;;  %8308 = vmatprep.subr.bf16.mxu0 %v11608_v23  ;;  %v11960_v16 = vcombine.high %v2058_v18, %v2062_v4  ;;  %v1922_v10 = vld [vmem:[#allocation8 + $0x1190] sm:$0xff]  ;;  %v11831_v23 = vcombine.low %v1930_v60, %v1934_v63  ;;  %v11959_v9 = vcombine.low %v2058_v18, %v2062_v4 }
 0x38f   :  { %8349 = vmatprep.subr.bf16.mxu1 %v11736_v24  ;;  %v1926_v14 = vld [vmem:[#allocation8 + $0x11b0] sm:$0xff] }
 0x390   :  { %v2050_v24 = vld [vmem:[#allocation8 + $0x1590] sm:$0xff]  ;;  %v11824_v35 = vcombine.high %v1922_v10, %v1926_v14  ;;  %v11823_v46 = vcombine.low %v1922_v10, %v1926_v14 }
 0x391   :  { %8309 = vmatpush2.bf16.msra.mxu0 %v11607_v28  ;;  %v2054_v26 = vld [vmem:[#allocation8 + $0x15b0] sm:$0xff] }
 0x392   :  { %8350 = vmatpush2.bf16.msra.mxu1 %v11735_v29  ;;  %8310 = vmatprep.subr.bf16.mxu0 %v11600_v30  ;;  %v1914_v31 = vld [vmem:[#allocation8 + $0x1150] sm:$0xff]  ;;  %v11952_v30 = vcombine.high %v2050_v24, %v2054_v26 }
 0x393   :  { %8351 = vmatprep.subr.bf16.mxu1 %v11728_v53  ;;  %v1918_v28 = vld [vmem:[#allocation8 + $0x1170] sm:$0xff] }
 0x394   :  { %v2042_v53 = vld [vmem:[#allocation8 + $0x1550] sm:$0xff]  ;;  %v11815_v63 = vcombine.low %v1914_v31, %v1918_v28 }
 0x395   :  { %8311 = vmatpush2.bf16.msra.mxu0 %v11599_v39  ;;  %v2046_v37 = vld [vmem:[#allocation8 + $0x1570] sm:$0xff] }
 0x396   :  { %8352 = vmatpush2.bf16.msra.mxu1 %v11727_v56  ;;  %8312 = vmatprep.subr.bf16.mxu0 %v11592_v41  ;;  %v11951_v56 = vcombine.low %v2050_v24, %v2054_v26  ;;  %v11816_v41 = vcombine.high %v1914_v31, %v1918_v28  ;;  %v1906_v50 = vld [vmem:[#allocation8 + $0x1110] sm:$0xff]  ;;  %v11943_v4 = vcombine.low %v2042_v53, %v2046_v37 }
 0x397   :  { %8353 = vmatprep.subr.bf16.mxu1 %v11720_v42  ;;  %v1910_v51 = vld [vmem:[#allocation8 + $0x1130] sm:$0xff] }
 0x398   :  { %v2026_v10 = vld [vmem:[#allocation8 + $0x14d0] sm:$0xff] }
 0x399   :  { %8313 = vmatpush2.bf16.msra.mxu0 %v11591_v54  ;;  %v2030_v14 = vld [vmem:[#allocation8 + $0x14f0] sm:$0xff] }
 0x39a   :  { %8354 = vmatpush2.bf16.msra.mxu1 %v11719_v57  ;;  %8314 = vmatprep.subr.bf16.mxu0 %v11584_v58  ;;  %v2034_v57 = vld [vmem:[#allocation8 + $0x1510] sm:$0xff] }
 0x39b   :  { %8355 = vmatprep.subr.bf16.mxu1 %v11712_v15  ;;  %v2038_v58 = vld [vmem:[#allocation8 + $0x1530] sm:$0xff] }
 0x39c   :  { %v11935_v24 = vcombine.low %v2034_v57, %v2038_v58  ;;  %v1894_v31 = vld [vmem:[#allocation8 + $0x10b0] sm:$0xff] }
 0x39d   :  { %8315 = vmatpush2.bf16.msra.mxu0 %v11583_v5  ;;  %v11808_v5 = vcombine.high %v1906_v50, %v1910_v51  ;;  %v2018_v28 = vld [vmem:[#allocation8 + $0x1490] sm:$0xff] }
 0x39e   :  { %8356 = vmatpush2.bf16.msra.mxu1 %v11711_v6  ;;  %8366 = vmatprep.subr.bf16.mxu0 %v11832_v7  ;;  %v11936_v6 = vcombine.high %v2034_v57, %v2038_v58  ;;  %v1898_v7 = vld [vmem:[#allocation8 + $0x10d0] sm:$0xff] }
 0x39f   :  { %8407 = vmatprep.subr.bf16.mxu1 %v11960_v16  ;;  %v1902_v16 = vld [vmem:[#allocation8 + $0x10f0] sm:$0xff] }
 0x3a0   :  { %v8072_v29 = vpop.f32.mrf.mxu0  ;;  %8317 = vmatmul.mubr.bf16.vlgmr.msra.gmra.mxu0 %v13473_v2  ;;  %v11800_v26 = vcombine.high %v1898_v7, %v1902_v16  ;;  %v2006_v57 = vld [vmem:[#allocation8 + $0x1430] sm:$0xff] }
 0x3a1   :  { %v8073_v38 = vadd.f32 %v8072_v29, %v13579_v55  ;;  %v8113_v11 = vpop.f32.mrf.mxu1  ;;  %8358 = vmatmul.mubr.bf16.vlgmr.msra.gmra.mxu1 %v13471_v62  ;;  %8367 = vmatpush1.bf16.msra.mxu0 %v11831_v23  ;;  %v11944_v55 = vcombine.high %v2042_v53, %v2046_v37  ;;  %v11807_v23 = vcombine.low %v1906_v50, %v1910_v51  ;;  %v2022_v29 = vld [vmem:[#allocation8 + $0x14b0] sm:$0xff] }
 0x3a2   :  { %8398 = vmatprep.mubr.bf16.mxu0 %v13475_v8  ;;  %8408 = vmatpush1.bf16.msra.mxu1 %v11959_v9  ;;  %v8074_v39 = vpop.f32.mrf.mxu0  ;;  %v11928_v9 = vcombine.high %v2026_v10, %v2030_v14  ;;  %v11927_v53 = vcombine.low %v2026_v10, %v2030_v14  ;;  %v1874_v50 = vld [vmem:[#allocation8 + $0x1010] sm:$0xff] }
 0x3a3   :  { %v13589_v42 = vadd.f32 %v8113_v11, %v8073_v38  ;;  %8439 = vmatprep.mubr.bf16.mxu1 %v13478_v13  ;;  %v8075_v32 = vadd.f32 %v8074_v39, %v13583_v27  ;;  %v8115_v49 = vpop.f32.mrf.mxu1  ;;  %8368 = vmatprep.subr.bf16.mxu0 %v11824_v35  ;;  %v1890_v35 = vld [vmem:[#allocation8 + $0x1090] sm:$0xff]  ;;  %v11920_v38 = vcombine.high %v2018_v28, %v2022_v29 }
 0x3a4   :  { %v8076_v54 = vpop.f32.mrf.mxu0  ;;  %8409 = vmatprep.subr.bf16.mxu1 %v11952_v30  ;;  %v11799_v30 = vcombine.low %v1898_v7, %v1902_v16  ;;  %v11792_v37 = vcombine.high %v1890_v35, %v1894_v31  ;;  %v1882_v11 = vld [vmem:[#allocation8 + $0x1050] sm:$0xff] }
 0x3a5   :  { %v13593_v15 = vadd.f32 %v8115_v49, %v8075_v32  ;;  %v8117_v60 = vpop.f32.mrf.mxu1  ;;  %8369 = vmatpush1.bf16.msra.mxu0 %v11823_v46  ;;  %v1886_v46 = vld [vmem:[#allocation8 + $0x1070] sm:$0xff]  ;;  %v11919_v32 = vcombine.low %v2018_v28, %v2022_v29 }
 0x3a6   :  { %8410 = vmatpush1.bf16.msra.mxu1 %v11951_v56  ;;  %v8077_v18 = vpop.f32.mrf.mxu0  ;;  %8370 = vmatprep.subr.bf16.mxu0 %v11816_v41  ;;  %v2010_v39 = vld [vmem:[#allocation8 + $0x1450] sm:$0xff]  ;;  %v11791_v41 = vcombine.low %v1890_v35, %v1894_v31  ;;  %v11784_v49 = vcombine.high %v1882_v11, %v1886_v46  ;;  %v11783_v58 = vcombine.low %v1882_v11, %v1886_v46 }
 0x3a7   :  { %v8118_v27 = vpop.f32.mrf.mxu1  ;;  %8411 = vmatprep.subr.bf16.mxu1 %v11944_v55  ;;  %v2014_v56 = vld [vmem:[#allocation8 + $0x1470] sm:$0xff] }
 0x3a8   :  { %v11912_v55 = vcombine.high %v2010_v39, %v2014_v56  ;;  %v1878_v51 = vld [vmem:[#allocation8 + $0x1030] sm:$0xff]  ;;  %v11911_v60 = vcombine.low %v2010_v39, %v2014_v56 }
 0x3a9   :  { %8371 = vmatpush1.bf16.msra.mxu0 %v11815_v63  ;;  %v2002_v54 = vld [vmem:[#allocation8 + $0x1410] sm:$0xff]  ;;  %v11776_v63 = vcombine.high %v1874_v50, %v1878_v51  ;;  %v11775_v7 = vcombine.low %v1874_v50, %v1878_v51 }
 0x3aa   :  { %8412 = vmatpush1.bf16.msra.mxu1 %v11943_v4  ;;  %8372 = vmatprep.subr.bf16.mxu0 %v11808_v5  ;;  %v11904_v18 = vcombine.high %v2002_v54, %v2006_v57  ;;  %v1994_v4 = vld [vmem:[#allocation8 + $0x13d0] sm:$0xff]  ;;  %v11903_v16 = vcombine.low %v2002_v54, %v2006_v57 }
 0x3ab   :  { %8413 = vmatprep.subr.bf16.mxu1 %v11936_v6  ;;  %v1998_v5 = vld [vmem:[#allocation8 + $0x13f0] sm:$0xff] }
 0x3ac   :  { %v2122_v27 = vld [vmem:[#allocation8 + $0x17d0] sm:$0xff]  ;;  %v11896_v10 = vcombine.high %v1994_v4, %v1998_v5  ;;  %v11895_v35 = vcombine.low %v1994_v4, %v1998_v5 }
 0x3ad   :  { %8373 = vmatpush1.bf16.msra.mxu0 %v11807_v23  ;;  %v2126_v6 = vld [vmem:[#allocation8 + $0x17f0] sm:$0xff] }
 0x3ae   :  { %8414 = vmatpush1.bf16.msra.mxu1 %v11935_v24  ;;  %8374 = vmatprep.subr.bf16.mxu0 %v11800_v26  ;;  %v12024_v14 = vcombine.high %v2122_v27, %v2126_v6  ;;  %v1986_v23 = vld [vmem:[#allocation8 + $0x1390] sm:$0xff]  ;;  %v12023_v31 = vcombine.low %v2122_v27, %v2126_v6 }
 0x3af   :  { %8415 = vmatprep.subr.bf16.mxu1 %v11928_v9  ;;  %v1990_v24 = vld [vmem:[#allocation8 + $0x13b0] sm:$0xff] }
 0x3b0   :  { %v2114_v26 = vld [vmem:[#allocation8 + $0x1790] sm:$0xff]  ;;  %v11888_v28 = vcombine.high %v1986_v23, %v1990_v24  ;;  %v11887_v11 = vcombine.low %v1986_v23, %v1990_v24 }
 0x3b1   :  { %8375 = vmatpush1.bf16.msra.mxu0 %v11799_v30  ;;  %v2118_v9 = vld [vmem:[#allocation8 + $0x17b0] sm:$0xff] }
 0x3b2   :  { %8416 = vmatpush1.bf16.msra.mxu1 %v11927_v53  ;;  %8376 = vmatprep.subr.bf16.mxu0 %v11792_v37  ;;  %v12016_v29 = vcombine.high %v2114_v26, %v2118_v9  ;;  %v1978_v30 = vld [vmem:[#allocation8 + $0x1350] sm:$0xff]  ;;  %v12015_v46 = vcombine.low %v2114_v26, %v2118_v9 }
 0x3b3   :  { %8417 = vmatprep.subr.bf16.mxu1 %v11920_v38  ;;  %v1982_v53 = vld [vmem:[#allocation8 + $0x1370] sm:$0xff] }
 0x3b4   :  { %v2106_v37 = vld [vmem:[#allocation8 + $0x1750] sm:$0xff]  ;;  %v11880_v39 = vcombine.high %v1978_v30, %v1982_v53  ;;  %v11879_v50 = vcombine.low %v1978_v30, %v1982_v53 }
 0x3b5   :  { %8377 = vmatpush1.bf16.msra.mxu0 %v11791_v41  ;;  %v2110_v38 = vld [vmem:[#allocation8 + $0x1770] sm:$0xff] }
 0x3b6   :  { %8418 = vmatpush1.bf16.msra.mxu1 %v11919_v32  ;;  %8378 = vmatprep.subr.bf16.mxu0 %v11784_v49  ;;  %v12008_v56 = vcombine.high %v2106_v37, %v2110_v38  ;;  %v1970_v41 = vld [vmem:[#allocation8 + $0x1310] sm:$0xff]  ;;  %v12007_v51 = vcombine.low %v2106_v37, %v2110_v38 }
 0x3b7   :  { %8419 = vmatprep.subr.bf16.mxu1 %v11912_v55  ;;  %v1974_v32 = vld [vmem:[#allocation8 + $0x1330] sm:$0xff] }
 0x3b8   :  { %v2098_v49 = vld [vmem:[#allocation8 + $0x1710] sm:$0xff]  ;;  %v11872_v54 = vcombine.high %v1970_v41, %v1974_v32  ;;  %v11871_v4 = vcombine.low %v1970_v41, %v1974_v32 }
 0x3b9   :  { %8379 = vmatpush1.bf16.msra.mxu0 %v11783_v58  ;;  %v2102_v55 = vld [vmem:[#allocation8 + $0x1730] sm:$0xff] }
 0x3ba   :  { %8420 = vmatpush1.bf16.msra.mxu1 %v11911_v60  ;;  %8380 = vmatprep.subr.bf16.mxu0 %v11776_v63  ;;  %v12000_v57 = vcombine.high %v2098_v49, %v2102_v55  ;;  %v1962_v58 = vld [vmem:[#allocation8 + $0x12d0] sm:$0xff]  ;;  %v11999_v5 = vcombine.low %v2098_v49, %v2102_v55 }
 0x3bb   :  { %8421 = vmatprep.subr.bf16.mxu1 %v11904_v18  ;;  %v1966_v60 = vld [vmem:[#allocation8 + $0x12f0] sm:$0xff] }
 0x3bc   :  { %v2090_v63 = vld [vmem:[#allocation8 + $0x16d0] sm:$0xff]  ;;  %v11864_v27 = vcombine.high %v1962_v58, %v1966_v60  ;;  %v11863_v23 = vcombine.low %v1962_v58, %v1966_v60 }
 0x3bd   :  { %8381 = vmatpush1.bf16.msra.mxu0 %v11775_v7  ;;  %v2094_v18 = vld [vmem:[#allocation8 + $0x16f0] sm:$0xff] }
 0x3be   :  { %8422 = vmatpush1.bf16.msra.mxu1 %v11903_v16  ;;  %8382 = vmatprep.subr.bf16.mxu0 %v11896_v10  ;;  %v11992_v6 = vcombine.high %v2090_v63, %v2094_v18  ;;  %v1954_v7 = vld [vmem:[#allocation8 + $0x1290] sm:$0xff]  ;;  %v11991_v24 = vcombine.low %v2090_v63, %v2094_v18 }
 0x3bf   :  { %8423 = vmatprep.subr.bf16.mxu1 %v12024_v14  ;;  %v1958_v16 = vld [vmem:[#allocation8 + $0x12b0] sm:$0xff] }
 0x3c0   :  { %v2082_v10 = vld [vmem:[#allocation8 + $0x1690] sm:$0xff]  ;;  %v11856_v26 = vcombine.high %v1954_v7, %v1958_v16  ;;  %v11855_v30 = vcombine.low %v1954_v7, %v1958_v16 }
 0x3c1   :  { %8383 = vmatpush2.bf16.msra.mxu0 %v11895_v35  ;;  %v2086_v14 = vld [vmem:[#allocation8 + $0x16b0] sm:$0xff] }
 0x3c2   :  { %8424 = vmatpush2.bf16.msra.mxu1 %v12023_v31  ;;  %8384 = vmatprep.subr.bf16.mxu0 %v11888_v28  ;;  %v11984_v9 = vcombine.high %v2082_v10, %v2086_v14  ;;  %v1946_v35 = vld [vmem:[#allocation8 + $0x1250] sm:$0xff]  ;;  %v11983_v53 = vcombine.low %v2082_v10, %v2086_v14 }
 0x3c3   :  { %8425 = vmatprep.subr.bf16.mxu1 %v12016_v29  ;;  %v1950_v31 = vld [vmem:[#allocation8 + $0x1270] sm:$0xff] }
 0x3c4   :  { %v2074_v28 = vld [vmem:[#allocation8 + $0x1650] sm:$0xff]  ;;  %v11848_v37 = vcombine.high %v1946_v35, %v1950_v31  ;;  %v11847_v41 = vcombine.low %v1946_v35, %v1950_v31 }
 0x3c5   :  { %8385 = vmatpush2.bf16.msra.mxu0 %v11887_v11  ;;  %v2078_v29 = vld [vmem:[#allocation8 + $0x1670] sm:$0xff] }
 0x3c6   :  { %8426 = vmatpush2.bf16.msra.mxu1 %v12015_v46  ;;  %8386 = vmatprep.subr.bf16.mxu0 %v11880_v39  ;;  %v11976_v38 = vcombine.high %v2074_v28, %v2078_v29  ;;  %v1938_v11 = vld [vmem:[#allocation8 + $0x1210] sm:$0xff]  ;;  %v11975_v32 = vcombine.low %v2074_v28, %v2078_v29 }
 0x3c7   :  { %8427 = vmatprep.subr.bf16.mxu1 %v12008_v56  ;;  %v1942_v46 = vld [vmem:[#allocation8 + $0x1230] sm:$0xff] }
 0x3c8   :  { %v2066_v39 = vld [vmem:[#allocation8 + $0x1610] sm:$0xff]  ;;  %v11840_v49 = vcombine.high %v1938_v11, %v1942_v46  ;;  %v11839_v58 = vcombine.low %v1938_v11, %v1942_v46 }
 0x3c9   :  { %8387 = vmatpush2.bf16.msra.mxu0 %v11879_v50  ;;  %v2070_v56 = vld [vmem:[#allocation8 + $0x1630] sm:$0xff] }
 0x3ca   :  { %8428 = vmatpush2.bf16.msra.mxu1 %v12007_v51  ;;  %8388 = vmatprep.subr.bf16.mxu0 %v11872_v54  ;;  %v11968_v55 = vcombine.high %v2066_v39, %v2070_v56  ;;  %v2186_v50 = vld [vmem:[#allocation8 + $0x19d0] sm:$0xff]  ;;  %v11967_v60 = vcombine.low %v2066_v39, %v2070_v56 }
 0x3cb   :  { %8429 = vmatprep.subr.bf16.mxu1 %v12000_v57  ;;  %v2190_v51 = vld [vmem:[#allocation8 + $0x19f0] sm:$0xff] }
 0x3cc   :  { %v2314_v54 = vld [vmem:[#allocation8 + $0x1dd0] sm:$0xff]  ;;  %v12088_v63 = vcombine.high %v2186_v50, %v2190_v51 }
 0x3cd   :  { %8389 = vmatpush2.bf16.msra.mxu0 %v11871_v4  ;;  %v2318_v57 = vld [vmem:[#allocation8 + $0x1df0] sm:$0xff] }
 0x3ce   :  { %8430 = vmatpush2.bf16.msra.mxu1 %v11999_v5  ;;  %8390 = vmatprep.subr.bf16.mxu0 %v11864_v27  ;;  %v12216_v18 = vcombine.high %v2314_v54, %v2318_v57  ;;  %v2178_v4 = vld [vmem:[#allocation8 + $0x1990] sm:$0xff]  ;;  %v12087_v27 = vcombine.low %v2186_v50, %v2190_v51  ;;  %v12215_v16 = vcombine.low %v2314_v54, %v2318_v57 }
 0x3cf   :  { %8431 = vmatprep.subr.bf16.mxu1 %v11992_v6  ;;  %v2182_v5 = vld [vmem:[#allocation8 + $0x19b0] sm:$0xff] }
 0x3d0   :  { %v2306_v6 = vld [vmem:[#allocation8 + $0x1d90] sm:$0xff]  ;;  %v12080_v10 = vcombine.high %v2178_v4, %v2182_v5  ;;  %v12079_v29 = vcombine.low %v2178_v4, %v2182_v5 }
 0x3d1   :  { %8391 = vmatpush2.bf16.msra.mxu0 %v11863_v23  ;;  %v2310_v7 = vld [vmem:[#allocation8 + $0x1db0] sm:$0xff] }
 0x3d2   :  { %8432 = vmatpush2.bf16.msra.mxu1 %v11991_v24  ;;  %8392 = vmatprep.subr.bf16.mxu0 %v11856_v26  ;;  %v2170_v14 = vld [vmem:[#allocation8 + $0x1950] sm:$0xff]  ;;  %v12208_v26 = vcombine.high %v2306_v6, %v2310_v7 }
 0x3d3   :  { %8433 = vmatprep.subr.bf16.mxu1 %v11984_v9  ;;  %v2174_v23 = vld [vmem:[#allocation8 + $0x1970] sm:$0xff] }
 0x3d4   :  { %v2298_v9 = vld [vmem:[#allocation8 + $0x1d50] sm:$0xff]  ;;  %v12071_v51 = vcombine.low %v2170_v14, %v2174_v23 }
 0x3d5   :  { %8393 = vmatpush2.bf16.msra.mxu0 %v11855_v30  ;;  %v2302_v35 = vld [vmem:[#allocation8 + $0x1d70] sm:$0xff] }
 0x3d6   :  { %8434 = vmatpush2.bf16.msra.mxu1 %v11983_v53  ;;  %8394 = vmatprep.subr.bf16.mxu0 %v11848_v37  ;;  %v12207_v53 = vcombine.low %v2306_v6, %v2310_v7  ;;  %v12072_v37 = vcombine.high %v2170_v14, %v2174_v23  ;;  %v2162_v39 = vld [vmem:[#allocation8 + $0x1910] sm:$0xff]  ;;  %v12199_v57 = vcombine.low %v2298_v9, %v2302_v35 }
 0x3d7   :  { %8435 = vmatprep.subr.bf16.mxu1 %v11976_v38  ;;  %v2166_v56 = vld [vmem:[#allocation8 + $0x1930] sm:$0xff] }
 0x3d8   :  { %v2282_v4 = vld [vmem:[#allocation8 + $0x1cd0] sm:$0xff] }
 0x3d9   :  { %8395 = vmatpush2.bf16.msra.mxu0 %v11847_v41  ;;  %v2286_v5 = vld [vmem:[#allocation8 + $0x1cf0] sm:$0xff] }
 0x3da   :  { %8436 = vmatpush2.bf16.msra.mxu1 %v11975_v32  ;;  %8396 = vmatprep.subr.bf16.mxu0 %v11840_v49  ;;  %v2290_v32 = vld [vmem:[#allocation8 + $0x1d10] sm:$0xff] }
 0x3db   :  { %8437 = vmatprep.subr.bf16.mxu1 %v11968_v55  ;;  %v2294_v49 = vld [vmem:[#allocation8 + $0x1d30] sm:$0xff] }
 0x3dc   :  { %v12191_v6 = vcombine.low %v2290_v32, %v2294_v49  ;;  %v2150_v14 = vld [vmem:[#allocation8 + $0x18b0] sm:$0xff] }
 0x3dd   :  { %8397 = vmatpush2.bf16.msra.mxu0 %v11839_v58  ;;  %v12064_v58 = vcombine.high %v2162_v39, %v2166_v56  ;;  %v2274_v23 = vld [vmem:[#allocation8 + $0x1c90] sm:$0xff] }
 0x3de   :  { %8438 = vmatpush2.bf16.msra.mxu1 %v11967_v60  ;;  %8448 = vmatprep.subr.bf16.mxu0 %v12088_v63  ;;  %v12192_v60 = vcombine.high %v2290_v32, %v2294_v49  ;;  %v2154_v63 = vld [vmem:[#allocation8 + $0x18d0] sm:$0xff] }
 0x3df   :  { %8489 = vmatprep.subr.bf16.mxu1 %v12216_v18  ;;  %v2158_v18 = vld [vmem:[#allocation8 + $0x18f0] sm:$0xff] }
 0x3e0   :  { %v8154_v24 = vpop.f32.mrf.mxu0  ;;  %8399 = vmatmul.mubr.bf16.vlgmr.msra.gmra.mxu0 %v13507_v40  ;;  %v12056_v7 = vcombine.high %v2154_v63, %v2158_v18  ;;  %v2262_v32 = vld [vmem:[#allocation8 + $0x1c30] sm:$0xff] }
 0x3e1   :  { %v8155_v31 = vadd.f32 %v8154_v24, %v13589_v42  ;;  %v8195_v28 = vpop.f32.mrf.mxu1  ;;  %8440 = vmatmul.mubr.bf16.vlgmr.msra.gmra.mxu1 %v13509_v43  ;;  %8449 = vmatpush1.bf16.msra.mxu0 %v12087_v27  ;;  %v12200_v42 = vcombine.high %v2298_v9, %v2302_v35  ;;  %v12063_v27 = vcombine.low %v2162_v39, %v2166_v56  ;;  %v2278_v24 = vld [vmem:[#allocation8 + $0x1cb0] sm:$0xff] }
 0x3e2   :  { %8480 = vmatprep.mubr.bf16.mxu0 %v13511_v0  ;;  %8490 = vmatpush1.bf16.msra.mxu1 %v12215_v16  ;;  %v8156_v30 = vpop.f32.mrf.mxu0  ;;  %v12184_v16 = vcombine.high %v2282_v4, %v2286_v5  ;;  %v12183_v9 = vcombine.low %v2282_v4, %v2286_v5  ;;  %v2130_v39 = vld [vmem:[#allocation8 + $0x1810] sm:$0xff] }
 0x3e3   :  { %v13599_v38 = vadd.f32 %v8195_v28, %v8155_v31  ;;  %8521 = vmatprep.mubr.bf16.mxu1 %v13513_v52  ;;  %v8157_v11 = vadd.f32 %v8156_v30, %v13593_v15  ;;  %v8197_v46 = vpop.f32.mrf.mxu1  ;;  %8450 = vmatprep.subr.bf16.mxu0 %v12080_v10  ;;  %v2146_v10 = vld [vmem:[#allocation8 + $0x1890] sm:$0xff]  ;;  %v12176_v31 = vcombine.high %v2274_v23, %v2278_v24 }
 0x3e4   :  { %v8158_v41 = vpop.f32.mrf.mxu0  ;;  %8491 = vmatprep.subr.bf16.mxu1 %v12208_v26  ;;  %v12055_v26 = vcombine.low %v2154_v63, %v2158_v18  ;;  %v12048_v35 = vcombine.high %v2146_v10, %v2150_v14  ;;  %v2138_v28 = vld [vmem:[#allocation8 + $0x1850] sm:$0xff] }
 0x3e5   :  { %v13603_v55 = vadd.f32 %v8197_v46, %v8157_v11  ;;  %v8199_v50 = vpop.f32.mrf.mxu1  ;;  %8451 = vmatpush1.bf16.msra.mxu0 %v12079_v29  ;;  %v2142_v29 = vld [vmem:[#allocation8 + $0x1870] sm:$0xff]  ;;  %v12175_v11 = vcombine.low %v2274_v23, %v2278_v24 }
 0x3e6   :  { %8492 = vmatpush1.bf16.msra.mxu1 %v12207_v53  ;;  %v8159_v54 = vpop.f32.mrf.mxu0  ;;  %8452 = vmatprep.subr.bf16.mxu0 %v12072_v37  ;;  %v2266_v30 = vld [vmem:[#allocation8 + $0x1c50] sm:$0xff]  ;;  %v12047_v37 = vcombine.low %v2146_v10, %v2150_v14  ;;  %v12040_v46 = vcombine.high %v2138_v28, %v2142_v29  ;;  %v12039_v49 = vcombine.low %v2138_v28, %v2142_v29 }
 0x3e7   :  { %v8200_v15 = vpop.f32.mrf.mxu1  ;;  %8493 = vmatprep.subr.bf16.mxu1 %v12200_v42  ;;  %v2270_v53 = vld [vmem:[#allocation8 + $0x1c70] sm:$0xff] }
 0x3e8   :  { %v12168_v42 = vcombine.high %v2266_v30, %v2270_v53  ;;  %v2134_v56 = vld [vmem:[#allocation8 + $0x1830] sm:$0xff]  ;;  %v12167_v50 = vcombine.low %v2266_v30, %v2270_v53 }
 0x3e9   :  { %8453 = vmatpush1.bf16.msra.mxu0 %v12071_v51  ;;  %v2258_v41 = vld [vmem:[#allocation8 + $0x1c10] sm:$0xff]  ;;  %v12032_v51 = vcombine.high %v2130_v39, %v2134_v56  ;;  %v12031_v63 = vcombine.low %v2130_v39, %v2134_v56 }
 0x3ea   :  { %8494 = vmatpush1.bf16.msra.mxu1 %v12199_v57  ;;  %8454 = vmatprep.subr.bf16.mxu0 %v12064_v58  ;;  %v12160_v54 = vcombine.high %v2258_v41, %v2262_v32  ;;  %v2250_v57 = vld [vmem:[#allocation8 + $0x1bd0] sm:$0xff]  ;;  %v12159_v18 = vcombine.low %v2258_v41, %v2262_v32 }
 0x3eb   :  { %8495 = vmatprep.subr.bf16.mxu1 %v12192_v60  ;;  %v2254_v58 = vld [vmem:[#allocation8 + $0x1bf0] sm:$0xff] }
 0x3ec   :  { %v2378_v15 = vld [vmem:[#allocation8 + $0x1fd0] sm:$0xff]  ;;  %v12152_v4 = vcombine.high %v2250_v57, %v2254_v58  ;;  %v12151_v10 = vcombine.low %v2250_v57, %v2254_v58 }
 0x3ed   :  { %8455 = vmatpush1.bf16.msra.mxu0 %v12063_v27  ;;  %v2382_v60 = vld [vmem:[#allocation8 + $0x1ff0] sm:$0xff] }
 0x3ee   :  { %8496 = vmatpush1.bf16.msra.mxu1 %v12191_v6  ;;  %8456 = vmatprep.subr.bf16.mxu0 %v12056_v7  ;;  %v12280_v5 = vcombine.high %v2378_v15, %v2382_v60  ;;  %v2242_v27 = vld [vmem:[#allocation8 + $0x1b90] sm:$0xff]  ;;  %v12279_v14 = vcombine.low %v2378_v15, %v2382_v60 }
 0x3ef   :  { %8497 = vmatprep.subr.bf16.mxu1 %v12184_v16  ;;  %v2246_v6 = vld [vmem:[#allocation8 + $0x1bb0] sm:$0xff] }
 0x3f0   :  { %v2370_v7 = vld [vmem:[#allocation8 + $0x1f90] sm:$0xff]  ;;  %v12144_v23 = vcombine.high %v2242_v27, %v2246_v6  ;;  %v12143_v28 = vcombine.low %v2242_v27, %v2246_v6 }
 0x3f1   :  { %8457 = vmatpush1.bf16.msra.mxu0 %v12055_v26  ;;  %v2374_v16 = vld [vmem:[#allocation8 + $0x1fb0] sm:$0xff] }
 0x3f2   :  { %8498 = vmatpush1.bf16.msra.mxu1 %v12183_v9  ;;  %8458 = vmatprep.subr.bf16.mxu0 %v12048_v35  ;;  %v12272_v24 = vcombine.high %v2370_v7, %v2374_v16  ;;  %v2234_v26 = vld [vmem:[#allocation8 + $0x1b50] sm:$0xff]  ;;  %v12271_v29 = vcombine.low %v2370_v7, %v2374_v16 }
 0x3f3   :  { %8499 = vmatprep.subr.bf16.mxu1 %v12176_v31  ;;  %v2238_v9 = vld [vmem:[#allocation8 + $0x1b70] sm:$0xff] }
 0x3f4   :  { %v2362_v35 = vld [vmem:[#allocation8 + $0x1f50] sm:$0xff]  ;;  %v12136_v30 = vcombine.high %v2234_v26, %v2238_v9  ;;  %v12135_v39 = vcombine.low %v2234_v26, %v2238_v9 }
 0x3f5   :  { %8459 = vmatpush1.bf16.msra.mxu0 %v12047_v37  ;;  %v2366_v31 = vld [vmem:[#allocation8 + $0x1f70] sm:$0xff] }
 0x3f6   :  { %8500 = vmatpush1.bf16.msra.mxu1 %v12175_v11  ;;  %8460 = vmatprep.subr.bf16.mxu0 %v12040_v46  ;;  %v12264_v53 = vcombine.high %v2362_v35, %v2366_v31  ;;  %v2226_v37 = vld [vmem:[#allocation8 + $0x1b10] sm:$0xff]  ;;  %v12263_v56 = vcombine.low %v2362_v35, %v2366_v31 }
 0x3f7   :  { %8501 = vmatprep.subr.bf16.mxu1 %v12168_v42  ;;  %v2230_v11 = vld [vmem:[#allocation8 + $0x1b30] sm:$0xff] }
 0x3f8   :  { %v2354_v46 = vld [vmem:[#allocation8 + $0x1f10] sm:$0xff]  ;;  %v12128_v41 = vcombine.high %v2226_v37, %v2230_v11  ;;  %v12127_v57 = vcombine.low %v2226_v37, %v2230_v11 }
 0x3f9   :  { %8461 = vmatpush1.bf16.msra.mxu0 %v12039_v49  ;;  %v2358_v42 = vld [vmem:[#allocation8 + $0x1f30] sm:$0xff] }
 0x3fa   :  { %8502 = vmatpush1.bf16.msra.mxu1 %v12167_v50  ;;  %8462 = vmatprep.subr.bf16.mxu0 %v12032_v51  ;;  %v12256_v32 = vcombine.high %v2354_v46, %v2358_v42  ;;  %v2218_v49 = vld [vmem:[#allocation8 + $0x1ad0] sm:$0xff]  ;;  %v12255_v58 = vcombine.low %v2354_v46, %v2358_v42 }
 0x3fb   :  { %8503 = vmatprep.subr.bf16.mxu1 %v12160_v54  ;;  %v2222_v50 = vld [vmem:[#allocation8 + $0x1af0] sm:$0xff] }
 0x3fc   :  { %v2346_v51 = vld [vmem:[#allocation8 + $0x1ed0] sm:$0xff]  ;;  %v12120_v15 = vcombine.high %v2218_v49, %v2222_v50  ;;  %v12119_v27 = vcombine.low %v2218_v49, %v2222_v50 }
 0x3fd   :  { %8463 = vmatpush1.bf16.msra.mxu0 %v12031_v63  ;;  %v2350_v54 = vld [vmem:[#allocation8 + $0x1ef0] sm:$0xff] }
 0x3fe   :  { %8504 = vmatpush1.bf16.msra.mxu1 %v12159_v18  ;;  %8464 = vmatprep.subr.bf16.mxu0 %v12152_v4  ;;  %v12248_v60 = vcombine.high %v2346_v51, %v2350_v54  ;;  %v2210_v63 = vld [vmem:[#allocation8 + $0x1a90] sm:$0xff]  ;;  %v12247_v6 = vcombine.low %v2346_v51, %v2350_v54 }
 0x3ff   :  { %8505 = vmatprep.subr.bf16.mxu1 %v12280_v5  ;;  %v2214_v18 = vld [vmem:[#allocation8 + $0x1ab0] sm:$0xff] }
 0x400   :  { %v2338_v4 = vld [vmem:[#allocation8 + $0x1e90] sm:$0xff]  ;;  %v12112_v7 = vcombine.high %v2210_v63, %v2214_v18  ;;  %v12111_v26 = vcombine.low %v2210_v63, %v2214_v18  ;;  %v1539_v18 = vld [vmem:[#allocation8 + $0x598] sm:$0xff] }
 0x401   :  { %8465 = vmatpush2.bf16.msra.mxu0 %v12151_v10  ;;  %v2342_v5 = vld [vmem:[#allocation8 + $0x1eb0] sm:$0xff] }
 0x402   :  { %8506 = vmatpush2.bf16.msra.mxu1 %v12279_v14  ;;  %8466 = vmatprep.subr.bf16.mxu0 %v12144_v23  ;;  %v12240_v16 = vcombine.high %v2338_v4, %v2342_v5  ;;  %v2202_v10 = vld [vmem:[#allocation8 + $0x1a50] sm:$0xff]  ;;  %v12239_v9 = vcombine.low %v2338_v4, %v2342_v5  ;;  %v1543_v4 = vld [vmem:[#allocation8 + $0x5b8] sm:$0xff] }
 0x403   :  { %8507 = vmatprep.subr.bf16.mxu1 %v12272_v24  ;;  %v2206_v14 = vld [vmem:[#allocation8 + $0x1a70] sm:$0xff] }
 0x404   :  { %v2330_v23 = vld [vmem:[#allocation8 + $0x1e50] sm:$0xff]  ;;  %v12104_v35 = vcombine.high %v2202_v10, %v2206_v14  ;;  %v12103_v37 = vcombine.low %v2202_v10, %v2206_v14  ;;  %v11442_v14 = vcombine.high %v1539_v18, %v1543_v4 }
 0x405   :  { %8467 = vmatpush2.bf16.msra.mxu0 %v12143_v28  ;;  %v2334_v24 = vld [vmem:[#allocation8 + $0x1e70] sm:$0xff] }
 0x406   :  { %8508 = vmatpush2.bf16.msra.mxu1 %v12271_v29  ;;  %8468 = vmatprep.subr.bf16.mxu0 %v12136_v30  ;;  %v12232_v31 = vcombine.high %v2330_v23, %v2334_v24  ;;  %v2194_v28 = vld [vmem:[#allocation8 + $0x1a10] sm:$0xff]  ;;  %v12231_v11 = vcombine.low %v2330_v23, %v2334_v24  ;;  %v1531_v23 = vld [vmem:[#allocation8 + $0x558] sm:$0xff] }
 0x407   :  { %8509 = vmatprep.subr.bf16.mxu1 %v12264_v53  ;;  %v2198_v29 = vld [vmem:[#allocation8 + $0x1a30] sm:$0xff]  ;;  %v1535_v24 = vld [vmem:[#allocation8 + $0x578] sm:$0xff] }
 0x408   :  { %v2322_v30 = vld [vmem:[#allocation8 + $0x1e10] sm:$0xff]  ;;  %v12096_v46 = vcombine.high %v2194_v28, %v2198_v29  ;;  %v12095_v49 = vcombine.low %v2194_v28, %v2198_v29 }
 0x409   :  { %8469 = vmatpush2.bf16.msra.mxu0 %v12135_v39  ;;  %v2326_v53 = vld [vmem:[#allocation8 + $0x1e30] sm:$0xff]  ;;  %v1419_v39 = vld [vmem:[#allocation8 + $0x1d8] sm:$0xff] }
 0x40a   :  { %8510 = vmatpush2.bf16.msra.mxu1 %v12263_v56  ;;  %8470 = vmatprep.subr.bf16.mxu0 %v12128_v41  ;;  %v12224_v42 = vcombine.high %v2322_v30, %v2326_v53  ;;  %v1423_v56 = vld [vmem:[#allocation8 + $0x1f8] sm:$0xff]  ;;  %v12223_v50 = vcombine.low %v2322_v30, %v2326_v53  ;;  %v11434_v53 = vcombine.high %v1531_v23, %v1535_v24 }
 0x40b   :  { %8511 = vmatprep.subr.bf16.mxu1 %v12256_v32  ;;  %v1547_v41 = vld [vmem:[#allocation8 + $0x5d8] sm:$0xff]  ;;  %v11322_v51 = vcombine.high %v1419_v39, %v1423_v56  ;;  %v11321_v63 = vcombine.low %v1419_v39, %v1423_v56 }
 0x40c   :  { %v1551_v32 = vld [vmem:[#allocation8 + $0x5f8] sm:$0xff] }
 0x40d   :  { %8471 = vmatpush2.bf16.msra.mxu0 %v12127_v57  ;;  %v11450_v54 = vcombine.high %v1547_v41, %v1551_v32  ;;  %v1411_v57 = vld [vmem:[#allocation8 + $0x198] sm:$0xff]  ;;  %v11449_v5 = vcombine.low %v1547_v41, %v1551_v32 }
 0x40e   :  { %8512 = vmatpush2.bf16.msra.mxu1 %v12255_v58  ;;  %8472 = vmatprep.subr.bf16.mxu0 %v12120_v15  ;;  %v1415_v58 = vld [vmem:[#allocation8 + $0x1b8] sm:$0xff]  ;;  %v13051_v15 = vld [vmem:[#allocation10] sm:$0xff] }
 0x40f   :  { %8513 = vmatprep.subr.bf16.mxu1 %v12248_v60  ;;  %v2405_v60 = vrot.slane %v13051_v15, %v13453_v61  ;;  %v1527_v39 = vld [vmem:[#allocation8 + $0x538] sm:$0xff] }
 0x411   :  { %8473 = vmatpush2.bf16.msra.mxu0 %v12119_v27  ;;  %v2409_v27 = vrot.slane %v13051_v15, %v13430_v33  ;;  %v11441_v33 = vcombine.low %v1539_v18, %v1543_v4  ;;  %v1519_v15 = vld [vmem:[#allocation8 + $0x4f8] sm:$0xff] }
 0x412   :  { %8514 = vmatpush2.bf16.msra.mxu1 %v12247_v6  ;;  %8474 = vmatprep.subr.bf16.mxu0 %v12112_v7  ;;  %v11314_v6 = vcombine.high %v1411_v57, %v1415_v58  ;;  %v1403_v7 = vld [vmem:[#allocation8 + $0x158] sm:$0xff] }
 0x413   :  { %8515 = vmatprep.subr.bf16.mxu1 %v12240_v16  ;;  %v1407_v16 = vld [vmem:[#allocation8 + $0x178] sm:$0xff] }
 0x414   :  { %v11305_v41 = vcombine.low %v1403_v7, %v1407_v16 }
 0x415   :  { %8475 = vmatpush2.bf16.msra.mxu0 %v12111_v26 }
 0x416   :  { %8516 = vmatpush2.bf16.msra.mxu1 %v12239_v9  ;;  %8476 = vmatprep.subr.bf16.mxu0 %v12104_v35  ;;  %v11313_v9 = vcombine.low %v1411_v57, %v1415_v58  ;;  %v1391_v57 = vld [vmem:[#allocation8 + $0xf8] sm:$0xff] }
 0x417   :  { %8517 = vmatprep.subr.bf16.mxu1 %v12232_v31  ;;  %v11306_v31 = vcombine.high %v1403_v7, %v1407_v16  ;;  %v1515_v58 = vld [vmem:[#allocation8 + $0x4d8] sm:$0xff] }
 0x418   :  { %v11418_v4 = vcombine.high %v1515_v58, %v1519_v15  ;;  %v1511_v7 = vld [vmem:[#allocation8 + $0x4b8] sm:$0xff] }
 0x419   :  { %8477 = vmatpush2.bf16.msra.mxu0 %v12103_v37  ;;  %v1395_v37 = vld [vmem:[#allocation8 + $0x118] sm:$0xff] }
 0x41a   :  { %8518 = vmatpush2.bf16.msra.mxu1 %v12231_v11  ;;  %8478 = vmatprep.subr.bf16.mxu0 %v12096_v46  ;;  %v1399_v11 = vld [vmem:[#allocation8 + $0x138] sm:$0xff] }
 0x41b   :  { %8519 = vmatprep.subr.bf16.mxu1 %v12224_v42  ;;  %v1523_v42 = vld [vmem:[#allocation8 + $0x518] sm:$0xff] }
 0x41d   :  { %8479 = vmatpush2.bf16.msra.mxu0 %v12095_v49  ;;  %v11433_v49 = vcombine.low %v1531_v23, %v1535_v24  ;;  %v1371_v24 = vld [vmem:[#allocation8 + $0x58] sm:$0xff] }
 0x41e   :  { %8520 = vmatpush2.bf16.msra.mxu1 %v12223_v50  ;;  %8530 = vmatprep.subr.bf16.mxu0 %v11322_v51  ;;  %v11426_v51 = vcombine.high %v1523_v42, %v1527_v39 }
 0x41f   :  { %8571 = vmatprep.subr.bf16.mxu1 %v11450_v54  ;;  %v1387_v54 = vld [vmem:[#allocation8 + $0xd8] sm:$0xff] }
 0x420   :  { %v8236_v10 = vpop.f32.mrf.mxu0  ;;  %8481 = vmatmul.mubr.bf16.vlgmr.msra.gmra.mxu0 %v13522_v1  ;;  %v11290_v18 = vcombine.high %v1387_v54, %v1391_v57  ;;  %v11289_v16 = vcombine.low %v1387_v54, %v1391_v57 }
 0x421   :  { %v8237_v26 = vadd.f32 %v8236_v10, %v2405_v60  ;;  %v8277_v61 = vpop.f32.mrf.mxu1  ;;  %8522 = vmatmul.mubr.bf16.vlgmr.msra.gmra.mxu1 %v13524_v3  ;;  %8531 = vmatpush1.bf16.msra.mxu0 %v11321_v63  ;;  %v11297_v60 = vcombine.low %v1395_v37, %v1399_v11  ;;  %v11425_v63 = vcombine.low %v1523_v42, %v1527_v39 }
 0x422   :  { %8562 = vmatprep.mubr.bf16.mxu0 %v13416_v45  ;;  %8572 = vmatpush1.bf16.msra.mxu1 %v11449_v5  ;;  %v8238_v35 = vpop.f32.mrf.mxu0  ;;  %v1379_v5 = vld [vmem:[#allocation8 + $0x98] sm:$0xff]  ;;  %v11417_v10 = vcombine.low %v1515_v58, %v1519_v15 }
 0x423   :  { %v13610_v28 = vadd.f32 %v8277_v61, %v8237_v26  ;;  %8603 = vmatprep.mubr.bf16.mxu1 %v13422_v48  ;;  %v8239_v29 = vadd.f32 %v8238_v35, %v2409_v27  ;;  %v8279_v30 = vpop.f32.mrf.mxu1  ;;  %8532 = vmatprep.subr.bf16.mxu0 %v11314_v6  ;;  %v11298_v48 = vcombine.high %v1395_v37, %v1399_v11  ;;  %v1383_v27 = vld [vmem:[#allocation8 + $0xb8] sm:$0xff] }
 0x424   :  { %v8240_v46 = vpop.f32.mrf.mxu0  ;;  %8573 = vmatprep.subr.bf16.mxu1 %v11442_v14  ;;  %v1507_v6 = vld [vmem:[#allocation8 + $0x498] sm:$0xff]  ;;  %v11282_v14 = vcombine.high %v1379_v5, %v1383_v27  ;;  %v11281_v35 = vcombine.low %v1379_v5, %v1383_v27 }
 0x425   :  { %v13613_v56 = vadd.f32 %v8279_v30, %v8239_v29  ;;  %v8281_v45 = vpop.f32.mrf.mxu1  ;;  %8533 = vmatpush1.bf16.msra.mxu0 %v11313_v9  ;;  %v11410_v23 = vcombine.high %v1507_v6, %v1511_v7  ;;  %v1375_v26 = vld [vmem:[#allocation8 + $0x78] sm:$0xff] }
 0x426   :  { %8574 = vmatpush1.bf16.msra.mxu1 %v11441_v33  ;;  %v8241_v32 = vpop.f32.mrf.mxu0  ;;  %8534 = vmatprep.subr.bf16.mxu0 %v11306_v31  ;;  %v1499_v61 = vld [vmem:[#allocation8 + $0x458] sm:$0xff]  ;;  %v11409_v33 = vcombine.low %v1507_v6, %v1511_v7  ;;  %v11274_v31 = vcombine.high %v1371_v24, %v1375_v26  ;;  %v11273_v46 = vcombine.low %v1371_v24, %v1375_v26 }
 0x427   :  { %v8282_v50 = vpop.f32.mrf.mxu1  ;;  %8575 = vmatprep.subr.bf16.mxu1 %v11434_v53  ;;  %v1503_v9 = vld [vmem:[#allocation8 + $0x478] sm:$0xff] }
 0x428   :  { %v11402_v29 = vcombine.high %v1499_v61, %v1503_v9  ;;  %v1363_v30 = vld [vmem:[#allocation8 + $0x18] sm:$0xff]  ;;  %v11401_v42 = vcombine.low %v1499_v61, %v1503_v9 }
 0x429   :  { %8535 = vmatpush1.bf16.msra.mxu0 %v11305_v41  ;;  %v1367_v53 = vld [vmem:[#allocation8 + $0x38] sm:$0xff] }
 0x42a   :  { %8576 = vmatpush1.bf16.msra.mxu1 %v11433_v49  ;;  %8536 = vmatprep.subr.bf16.mxu0 %v11298_v48  ;;  %v1491_v37 = vld [vmem:[#allocation8 + $0x418] sm:$0xff]  ;;  %v11266_v39 = vcombine.high %v1363_v30, %v1367_v53  ;;  %v11265_v50 = vcombine.low %v1363_v30, %v1367_v53 }
 0x42b   :  { %8577 = vmatprep.subr.bf16.mxu1 %v11426_v51  ;;  %v1495_v11 = vld [vmem:[#allocation8 + $0x438] sm:$0xff] }
 0x42c   :  { %v11394_v45 = vcombine.high %v1491_v37, %v1495_v11  ;;  %v1483_v41 = vld [vmem:[#allocation8 + $0x3d8] sm:$0xff]  ;;  %v11393_v51 = vcombine.low %v1491_v37, %v1495_v11 }
 0x42d   :  { %8537 = vmatpush1.bf16.msra.mxu0 %v11297_v60  ;;  %v1487_v32 = vld [vmem:[#allocation8 + $0x3f8] sm:$0xff] }
 0x42e   :  { %8578 = vmatpush1.bf16.msra.mxu1 %v11425_v63  ;;  %8538 = vmatprep.subr.bf16.mxu0 %v11290_v18  ;;  %v1611_v49 = vld [vmem:[#allocation8 + $0x7d8] sm:$0xff]  ;;  %v11386_v54 = vcombine.high %v1483_v41, %v1487_v32  ;;  %v11385_v18 = vcombine.low %v1483_v41, %v1487_v32 }
 0x42f   :  { %8579 = vmatprep.subr.bf16.mxu1 %v11418_v4  ;;  %v1615_v48 = vld [vmem:[#allocation8 + $0x7f8] sm:$0xff] }
 0x430   :  { %v11514_v57 = vcombine.high %v1611_v49, %v1615_v48  ;;  %v1475_v58 = vld [vmem:[#allocation8 + $0x398] sm:$0xff]  ;;  %v11513_v4 = vcombine.low %v1611_v49, %v1615_v48 }
 0x431   :  { %8539 = vmatpush1.bf16.msra.mxu0 %v11289_v16  ;;  %v1479_v15 = vld [vmem:[#allocation8 + $0x3b8] sm:$0xff] }
 0x432   :  { %8580 = vmatpush1.bf16.msra.mxu1 %v11417_v10  ;;  %8540 = vmatprep.subr.bf16.mxu0 %v11282_v14  ;;  %v1603_v60 = vld [vmem:[#allocation8 + $0x798] sm:$0xff]  ;;  %v11378_v5 = vcombine.high %v1475_v58, %v1479_v15  ;;  %v11377_v14 = vcombine.low %v1475_v58, %v1479_v15 }
 0x433   :  { %8581 = vmatprep.subr.bf16.mxu1 %v11410_v23  ;;  %v1607_v63 = vld [vmem:[#allocation8 + $0x7b8] sm:$0xff] }
 0x434   :  { %v11506_v27 = vcombine.high %v1603_v60, %v1607_v63  ;;  %v1467_v6 = vld [vmem:[#allocation8 + $0x358] sm:$0xff]  ;;  %v11505_v23 = vcombine.low %v1603_v60, %v1607_v63 }
 0x435   :  { %8541 = vmatpush1.bf16.msra.mxu0 %v11281_v35  ;;  %v1471_v7 = vld [vmem:[#allocation8 + $0x378] sm:$0xff] }
 0x436   :  { %8582 = vmatpush1.bf16.msra.mxu1 %v11409_v33  ;;  %8542 = vmatprep.subr.bf16.mxu0 %v11274_v31  ;;  %v1595_v16 = vld [vmem:[#allocation8 + $0x758] sm:$0xff]  ;;  %v11370_v24 = vcombine.high %v1467_v6, %v1471_v7  ;;  %v11369_v31 = vcombine.low %v1467_v6, %v1471_v7 }
 0x437   :  { %8583 = vmatprep.subr.bf16.mxu1 %v11402_v29  ;;  %v1599_v10 = vld [vmem:[#allocation8 + $0x778] sm:$0xff] }
 0x438   :  { %v11498_v26 = vcombine.high %v1595_v16, %v1599_v10  ;;  %v1459_v61 = vld [vmem:[#allocation8 + $0x318] sm:$0xff]  ;;  %v11497_v29 = vcombine.low %v1595_v16, %v1599_v10 }
 0x439   :  { %8543 = vmatpush1.bf16.msra.mxu0 %v11273_v46  ;;  %v1463_v9 = vld [vmem:[#allocation8 + $0x338] sm:$0xff] }
 0x43a   :  { %8584 = vmatpush1.bf16.msra.mxu1 %v11401_v42  ;;  %8544 = vmatprep.subr.bf16.mxu0 %v11266_v39  ;;  %v1587_v35 = vld [vmem:[#allocation8 + $0x718] sm:$0xff]  ;;  %v11362_v30 = vcombine.high %v1459_v61, %v1463_v9  ;;  %v11361_v39 = vcombine.low %v1459_v61, %v1463_v9 }
 0x43b   :  { %8585 = vmatprep.subr.bf16.mxu1 %v11394_v45  ;;  %v1591_v33 = vld [vmem:[#allocation8 + $0x738] sm:$0xff] }
 0x43c   :  { %v11490_v53 = vcombine.high %v1587_v35, %v1591_v33  ;;  %v1451_v37 = vld [vmem:[#allocation8 + $0x2d8] sm:$0xff]  ;;  %v11489_v45 = vcombine.low %v1587_v35, %v1591_v33 }
 0x43d   :  { %8545 = vmatpush1.bf16.msra.mxu0 %v11265_v50  ;;  %v1455_v11 = vld [vmem:[#allocation8 + $0x2f8] sm:$0xff] }
 0x43e   :  { %8586 = vmatpush1.bf16.msra.mxu1 %v11393_v51  ;;  %8546 = vmatprep.subr.bf16.mxu0 %v11386_v54  ;;  %v1579_v46 = vld [vmem:[#allocation8 + $0x6d8] sm:$0xff]  ;;  %v11354_v41 = vcombine.high %v1451_v37, %v1455_v11  ;;  %v11353_v54 = vcombine.low %v1451_v37, %v1455_v11 }
 0x43f   :  { %8587 = vmatprep.subr.bf16.mxu1 %v11514_v57  ;;  %v1583_v42 = vld [vmem:[#allocation8 + $0x6f8] sm:$0xff] }
 0x440   :  { %v11482_v32 = vcombine.high %v1579_v46, %v1583_v42  ;;  %v1443_v49 = vld [vmem:[#allocation8 + $0x298] sm:$0xff]  ;;  %v11481_v57 = vcombine.low %v1579_v46, %v1583_v42 }
 0x441   :  { %8547 = vmatpush2.bf16.msra.mxu0 %v11385_v18  ;;  %v1447_v48 = vld [vmem:[#allocation8 + $0x2b8] sm:$0xff] }
 0x442   :  { %8588 = vmatpush2.bf16.msra.mxu1 %v11513_v4  ;;  %8548 = vmatprep.subr.bf16.mxu0 %v11378_v5  ;;  %v1571_v50 = vld [vmem:[#allocation8 + $0x698] sm:$0xff]  ;;  %v11346_v58 = vcombine.high %v1443_v49, %v1447_v48  ;;  %v11345_v5 = vcombine.low %v1443_v49, %v1447_v48 }
 0x443   :  { %8589 = vmatprep.subr.bf16.mxu1 %v11506_v27  ;;  %v1575_v51 = vld [vmem:[#allocation8 + $0x6b8] sm:$0xff] }
 0x444   :  { %v11474_v15 = vcombine.high %v1571_v50, %v1575_v51  ;;  %v1435_v60 = vld [vmem:[#allocation8 + $0x258] sm:$0xff]  ;;  %v11473_v27 = vcombine.low %v1571_v50, %v1575_v51 }
 0x445   :  { %8549 = vmatpush2.bf16.msra.mxu0 %v11377_v14  ;;  %v1439_v63 = vld [vmem:[#allocation8 + $0x278] sm:$0xff] }
 0x446   :  { %8590 = vmatpush2.bf16.msra.mxu1 %v11505_v23  ;;  %8550 = vmatprep.subr.bf16.mxu0 %v11370_v24  ;;  %v1563_v18 = vld [vmem:[#allocation8 + $0x658] sm:$0xff]  ;;  %v11338_v6 = vcombine.high %v1435_v60, %v1439_v63  ;;  %v11337_v24 = vcombine.low %v1435_v60, %v1439_v63 }
 0x447   :  { %8591 = vmatprep.subr.bf16.mxu1 %v11498_v26  ;;  %v1567_v4 = vld [vmem:[#allocation8 + $0x678] sm:$0xff] }
 0x448   :  { %v11466_v7 = vcombine.high %v1563_v18, %v1567_v4  ;;  %v1427_v16 = vld [vmem:[#allocation8 + $0x218] sm:$0xff]  ;;  %v11465_v26 = vcombine.low %v1563_v18, %v1567_v4 }
 0x449   :  { %8551 = vmatpush2.bf16.msra.mxu0 %v11369_v31  ;;  %v1431_v10 = vld [vmem:[#allocation8 + $0x238] sm:$0xff] }
 0x44a   :  { %8592 = vmatpush2.bf16.msra.mxu1 %v11497_v29  ;;  %8552 = vmatprep.subr.bf16.mxu0 %v11362_v30  ;;  %v1555_v14 = vld [vmem:[#allocation8 + $0x618] sm:$0xff]  ;;  %v11330_v61 = vcombine.high %v1427_v16, %v1431_v10  ;;  %v11329_v30 = vcombine.low %v1427_v16, %v1431_v10 }
 0x44b   :  { %8593 = vmatprep.subr.bf16.mxu1 %v11490_v53  ;;  %v1559_v23 = vld [vmem:[#allocation8 + $0x638] sm:$0xff] }
 0x44c   :  { %v11458_v9 = vcombine.high %v1555_v14, %v1559_v23  ;;  %v1675_v35 = vld [vmem:[#allocation8 + $0x9d8] sm:$0xff]  ;;  %v11457_v53 = vcombine.low %v1555_v14, %v1559_v23 }
 0x44d   :  { %8553 = vmatpush2.bf16.msra.mxu0 %v11361_v39  ;;  %v1679_v33 = vld [vmem:[#allocation8 + $0x9f8] sm:$0xff] }
 0x44e   :  { %8594 = vmatpush2.bf16.msra.mxu1 %v11489_v45  ;;  %8554 = vmatprep.subr.bf16.mxu0 %v11354_v41  ;;  %v1803_v31 = vld [vmem:[#allocation8 + $0xdd8] sm:$0xff]  ;;  %v11578_v37 = vcombine.high %v1675_v35, %v1679_v33  ;;  %v11577_v39 = vcombine.low %v1675_v35, %v1679_v33 }
 0x44f   :  { %8595 = vmatprep.subr.bf16.mxu1 %v11482_v32  ;;  %v1807_v29 = vld [vmem:[#allocation8 + $0xdf8] sm:$0xff] }
 0x450   :  { %v11706_v11 = vcombine.high %v1803_v31, %v1807_v29  ;;  %v1667_v46 = vld [vmem:[#allocation8 + $0x998] sm:$0xff]  ;;  %v11705_v32 = vcombine.low %v1803_v31, %v1807_v29 }
 0x451   :  { %8555 = vmatpush2.bf16.msra.mxu0 %v11353_v54  ;;  %v1671_v42 = vld [vmem:[#allocation8 + $0x9b8] sm:$0xff] }
 0x452   :  { %8596 = vmatpush2.bf16.msra.mxu1 %v11481_v57  ;;  %8556 = vmatprep.subr.bf16.mxu0 %v11346_v58  ;;  %v1795_v45 = vld [vmem:[#allocation8 + $0xd98] sm:$0xff]  ;;  %v11570_v49 = vcombine.high %v1667_v46, %v1671_v42  ;;  %v11569_v63 = vcombine.low %v1667_v46, %v1671_v42 }
 0x453   :  { %8597 = vmatprep.subr.bf16.mxu1 %v11474_v15  ;;  %v1799_v41 = vld [vmem:[#allocation8 + $0xdb8] sm:$0xff] }
 0x454   :  { %v1659_v48 = vld [vmem:[#allocation8 + $0x958] sm:$0xff]  ;;  %v11698_v54 = vcombine.high %v1795_v45, %v1799_v41  ;;  %v11697_v4 = vcombine.low %v1795_v45, %v1799_v41 }
 0x455   :  { %8557 = vmatpush2.bf16.msra.mxu0 %v11345_v5  ;;  %v1663_v50 = vld [vmem:[#allocation8 + $0x978] sm:$0xff] }
 0x456   :  { %8598 = vmatpush2.bf16.msra.mxu1 %v11473_v27  ;;  %8558 = vmatprep.subr.bf16.mxu0 %v11338_v6  ;;  %v1787_v57 = vld [vmem:[#allocation8 + $0xd58] sm:$0xff]  ;;  %v11562_v5 = vcombine.high %v1659_v48, %v1663_v50 }
 0x457   :  { %8599 = vmatprep.subr.bf16.mxu1 %v11466_v7  ;;  %v1791_v58 = vld [vmem:[#allocation8 + $0xd78] sm:$0xff] }
 0x458   :  { %v1651_v7 = vld [vmem:[#allocation8 + $0x918] sm:$0xff] }
 0x459   :  { %8559 = vmatpush2.bf16.msra.mxu0 %v11337_v24  ;;  %v1655_v16 = vld [vmem:[#allocation8 + $0x938] sm:$0xff]  ;;  %v11561_v24 = vcombine.low %v1659_v48, %v1663_v50 }
 0x45a   :  { %8600 = vmatpush2.bf16.msra.mxu1 %v11465_v26  ;;  %8560 = vmatprep.subr.bf16.mxu0 %v11330_v61  ;;  %v1779_v10 = vld [vmem:[#allocation8 + $0xd18] sm:$0xff]  ;;  %v11554_v61 = vcombine.high %v1651_v7, %v1655_v16 }
 0x45b   :  { %8601 = vmatprep.subr.bf16.mxu1 %v11458_v9  ;;  %v1783_v14 = vld [vmem:[#allocation8 + $0xd38] sm:$0xff] }
 0x45c   :  { %v11682_v9 = vcombine.high %v1779_v10, %v1783_v14  ;;  %v1643_v35 = vld [vmem:[#allocation8 + $0x8d8] sm:$0xff] }
 0x45d   :  { %8561 = vmatpush2.bf16.msra.mxu0 %v11329_v30  ;;  %v1647_v33 = vld [vmem:[#allocation8 + $0x8f8] sm:$0xff]  ;;  %v11553_v30 = vcombine.low %v1651_v7, %v1655_v16 }
 0x45e   :  { %8602 = vmatpush2.bf16.msra.mxu1 %v11457_v53  ;;  %8612 = vmatprep.subr.bf16.mxu0 %v11578_v37  ;;  %v1771_v31 = vld [vmem:[#allocation8 + $0xcd8] sm:$0xff]  ;;  %v11681_v53 = vcombine.low %v1779_v10, %v1783_v14  ;;  %v11546_v37 = vcombine.high %v1643_v35, %v1647_v33  ;;  %v11545_v41 = vcombine.low %v1643_v35, %v1647_v33 }
 0x45f   :  { %8653 = vmatprep.subr.bf16.mxu1 %v11706_v11  ;;  %v1775_v29 = vld [vmem:[#allocation8 + $0xcf8] sm:$0xff] }
 0x460   :  { %v8318_v51 = vpop.f32.mrf.mxu0  ;;  %8563 = vmatmul.mubr.bf16.vlgmr.msra.gmra.mxu0 %v13420_v47  ;;  %v11674_v11 = vcombine.high %v1771_v31, %v1775_v29  ;;  %v1635_v46 = vld [vmem:[#allocation8 + $0x898] sm:$0xff] }
 0x461   :  { %v8319_v15 = vadd.f32 %v8318_v51, %v13610_v28  ;;  %v8359_v60 = vpop.f32.mrf.mxu1  ;;  %8604 = vmatmul.mubr.bf16.vlgmr.msra.gmra.mxu1 %v13414_v44  ;;  %8613 = vmatpush1.bf16.msra.mxu0 %v11577_v39  ;;  %v11690_v28 = vcombine.high %v1787_v57, %v1791_v58  ;;  %v1639_v42 = vld [vmem:[#allocation8 + $0x8b8] sm:$0xff] }
 0x462   :  { %8644 = vmatprep.mubr.bf16.mxu0 %v13443_v12  ;;  %8654 = vmatpush1.bf16.msra.mxu1 %v11705_v32  ;;  %v8320_v18 = vpop.f32.mrf.mxu0  ;;  %v1763_v39 = vld [vmem:[#allocation8 + $0xc98] sm:$0xff]  ;;  %v11673_v32 = vcombine.low %v1771_v31, %v1775_v29 }
 0x463   :  { %v13619_v27 = vadd.f32 %v8359_v60, %v8319_v15  ;;  %8685 = vmatprep.mubr.bf16.mxu1 %v13445_v22  ;;  %v8321_v47 = vadd.f32 %v8320_v18, %v13613_v56  ;;  %v8361_v6 = vpop.f32.mrf.mxu1  ;;  %8614 = vmatprep.subr.bf16.mxu0 %v11570_v49  ;;  %v11689_v22 = vcombine.low %v1787_v57, %v1791_v58  ;;  %v1767_v45 = vld [vmem:[#allocation8 + $0xcb8] sm:$0xff] }
 0x464   :  { %v8322_v44 = vpop.f32.mrf.mxu0  ;;  %8655 = vmatprep.subr.bf16.mxu1 %v11698_v54  ;;  %v11538_v49 = vcombine.high %v1635_v46, %v1639_v42  ;;  %v11666_v48 = vcombine.high %v1763_v39, %v1767_v45  ;;  %v1627_v50 = vld [vmem:[#allocation8 + $0x858] sm:$0xff]  ;;  %v11537_v58 = vcombine.low %v1635_v46, %v1639_v42  ;;  %v11665_v15 = vcombine.low %v1763_v39, %v1767_v45 }
 0x465   :  { %v13623_v12 = vadd.f32 %v8361_v6, %v8321_v47  ;;  %v8363_v23 = vpop.f32.mrf.mxu1  ;;  %8615 = vmatpush1.bf16.msra.mxu0 %v11569_v63  ;;  %v1631_v51 = vld [vmem:[#allocation8 + $0x878] sm:$0xff] }
 0x466   :  { %8656 = vmatpush1.bf16.msra.mxu1 %v11697_v4  ;;  %v8323_v26 = vpop.f32.mrf.mxu0  ;;  %8616 = vmatprep.subr.bf16.mxu0 %v11562_v5  ;;  %v1755_v54 = vld [vmem:[#allocation8 + $0xc58] sm:$0xff]  ;;  %v11530_v60 = vcombine.high %v1627_v50, %v1631_v51  ;;  %v11529_v6 = vcombine.low %v1627_v50, %v1631_v51 }
 0x467   :  { %v8364_v56 = vpop.f32.mrf.mxu1  ;;  %8657 = vmatprep.subr.bf16.mxu1 %v11690_v28  ;;  %v1759_v57 = vld [vmem:[#allocation8 + $0xc78] sm:$0xff] }
 0x468   :  { %v11658_v63 = vcombine.high %v1755_v54, %v1759_v57  ;;  %v1619_v18 = vld [vmem:[#allocation8 + $0x818] sm:$0xff]  ;;  %v11657_v28 = vcombine.low %v1755_v54, %v1759_v57 }
 0x469   :  { %8617 = vmatpush1.bf16.msra.mxu0 %v11561_v24  ;;  %v1623_v4 = vld [vmem:[#allocation8 + $0x838] sm:$0xff] }
 0x46a   :  { %8658 = vmatpush1.bf16.msra.mxu1 %v11689_v22  ;;  %8618 = vmatprep.subr.bf16.mxu0 %v11554_v61  ;;  %v1747_v5 = vld [vmem:[#allocation8 + $0xc18] sm:$0xff]  ;;  %v11522_v7 = vcombine.high %v1619_v18, %v1623_v4  ;;  %v11521_v24 = vcombine.low %v1619_v18, %v1623_v4 }
 0x46b   :  { %8659 = vmatprep.subr.bf16.mxu1 %v11682_v9  ;;  %v1751_v47 = vld [vmem:[#allocation8 + $0xc38] sm:$0xff] }
 0x46c   :  { %v11650_v16 = vcombine.high %v1747_v5, %v1751_v47  ;;  %v1739_v44 = vld [vmem:[#allocation8 + $0xbd8] sm:$0xff]  ;;  %v11649_v26 = vcombine.low %v1747_v5, %v1751_v47 }
 0x46d   :  { %8619 = vmatpush1.bf16.msra.mxu0 %v11553_v30  ;;  %v1743_v10 = vld [vmem:[#allocation8 + $0xbf8] sm:$0xff] }
 0x46e   :  { %8660 = vmatpush1.bf16.msra.mxu1 %v11681_v53  ;;  %8620 = vmatprep.subr.bf16.mxu0 %v11546_v37  ;;  %v1867_v14 = vld [vmem:[#allocation8 + $0xfd8] sm:$0xff]  ;;  %v11642_v22 = vcombine.high %v1739_v44, %v1743_v10  ;;  %v11641_v31 = vcombine.low %v1739_v44, %v1743_v10 }
 0x46f   :  { %8661 = vmatprep.subr.bf16.mxu1 %v11674_v11  ;;  %v1871_v23 = vld [vmem:[#allocation8 + $0xff8] sm:$0xff] }
 0x470   :  { %v11770_v61 = vcombine.high %v1867_v14, %v1871_v23  ;;  %v1731_v56 = vld [vmem:[#allocation8 + $0xb98] sm:$0xff]  ;;  %v11769_v29 = vcombine.low %v1867_v14, %v1871_v23 }
 0x471   :  { %8621 = vmatpush1.bf16.msra.mxu0 %v11545_v41  ;;  %v1735_v9 = vld [vmem:[#allocation8 + $0xbb8] sm:$0xff] }
 0x472   :  { %8662 = vmatpush1.bf16.msra.mxu1 %v11673_v32  ;;  %8622 = vmatprep.subr.bf16.mxu0 %v11538_v49  ;;  %v1859_v35 = vld [vmem:[#allocation8 + $0xf98] sm:$0xff]  ;;  %v11634_v30 = vcombine.high %v1731_v56, %v1735_v9  ;;  %v11633_v39 = vcombine.low %v1731_v56, %v1735_v9 }
 0x473   :  { %8663 = vmatprep.subr.bf16.mxu1 %v11666_v48  ;;  %v1863_v33 = vld [vmem:[#allocation8 + $0xfb8] sm:$0xff] }
 0x474   :  { %v11762_v53 = vcombine.high %v1859_v35, %v1863_v33  ;;  %v1723_v37 = vld [vmem:[#allocation8 + $0xb58] sm:$0xff]  ;;  %v11761_v45 = vcombine.low %v1859_v35, %v1863_v33 }
 0x475   :  { %8623 = vmatpush1.bf16.msra.mxu0 %v11537_v58  ;;  %v1727_v11 = vld [vmem:[#allocation8 + $0xb78] sm:$0xff] }
 0x476   :  { %8664 = vmatpush1.bf16.msra.mxu1 %v11665_v15  ;;  %8624 = vmatprep.subr.bf16.mxu0 %v11530_v60  ;;  %v1851_v46 = vld [vmem:[#allocation8 + $0xf58] sm:$0xff]  ;;  %v11626_v41 = vcombine.high %v1723_v37, %v1727_v11  ;;  %v11625_v54 = vcombine.low %v1723_v37, %v1727_v11 }
 0x477   :  { %8665 = vmatprep.subr.bf16.mxu1 %v11658_v63  ;;  %v1855_v42 = vld [vmem:[#allocation8 + $0xf78] sm:$0xff] }
 0x478   :  { %v11754_v32 = vcombine.high %v1851_v46, %v1855_v42  ;;  %v1715_v49 = vld [vmem:[#allocation8 + $0xb18] sm:$0xff]  ;;  %v11753_v57 = vcombine.low %v1851_v46, %v1855_v42 }
 0x479   :  { %8625 = vmatpush1.bf16.msra.mxu0 %v11529_v6  ;;  %v1719_v48 = vld [vmem:[#allocation8 + $0xb38] sm:$0xff] }
 0x47a   :  { %8666 = vmatpush1.bf16.msra.mxu1 %v11657_v28  ;;  %8626 = vmatprep.subr.bf16.mxu0 %v11522_v7  ;;  %v1843_v50 = vld [vmem:[#allocation8 + $0xf18] sm:$0xff]  ;;  %v11618_v58 = vcombine.high %v1715_v49, %v1719_v48  ;;  %v11617_v5 = vcombine.low %v1715_v49, %v1719_v48 }
 0x47b   :  { %8667 = vmatprep.subr.bf16.mxu1 %v11650_v16  ;;  %v1847_v51 = vld [vmem:[#allocation8 + $0xf38] sm:$0xff] }
 0x47c   :  { %v11746_v15 = vcombine.high %v1843_v50, %v1847_v51  ;;  %v1707_v60 = vld [vmem:[#allocation8 + $0xad8] sm:$0xff]  ;;  %v11745_v47 = vcombine.low %v1843_v50, %v1847_v51 }
 0x47d   :  { %8627 = vmatpush1.bf16.msra.mxu0 %v11521_v24  ;;  %v1711_v63 = vld [vmem:[#allocation8 + $0xaf8] sm:$0xff] }
 0x47e   :  { %8668 = vmatpush1.bf16.msra.mxu1 %v11649_v26  ;;  %8628 = vmatprep.subr.bf16.mxu0 %v11642_v22  ;;  %v1835_v18 = vld [vmem:[#allocation8 + $0xed8] sm:$0xff]  ;;  %v11610_v6 = vcombine.high %v1707_v60, %v1711_v63  ;;  %v11609_v14 = vcombine.low %v1707_v60, %v1711_v63 }
 0x47f   :  { %8669 = vmatprep.subr.bf16.mxu1 %v11770_v61  ;;  %v1839_v4 = vld [vmem:[#allocation8 + $0xef8] sm:$0xff] }
 0x480   :  { %v11738_v28 = vcombine.high %v1835_v18, %v1839_v4  ;;  %v1699_v7 = vld [vmem:[#allocation8 + $0xa98] sm:$0xff]  ;;  %v11737_v23 = vcombine.low %v1835_v18, %v1839_v4 }
 0x481   :  { %8629 = vmatpush2.bf16.msra.mxu0 %v11641_v31  ;;  %v1703_v16 = vld [vmem:[#allocation8 + $0xab8] sm:$0xff] }
 0x482   :  { %8670 = vmatpush2.bf16.msra.mxu1 %v11769_v29  ;;  %8630 = vmatprep.subr.bf16.mxu0 %v11634_v30  ;;  %v1827_v44 = vld [vmem:[#allocation8 + $0xe98] sm:$0xff]  ;;  %v11602_v24 = vcombine.high %v1699_v7, %v1703_v16  ;;  %v11601_v35 = vcombine.low %v1699_v7, %v1703_v16 }
 0x483   :  { %8671 = vmatprep.subr.bf16.mxu1 %v11762_v53  ;;  %v1831_v10 = vld [vmem:[#allocation8 + $0xeb8] sm:$0xff] }
 0x484   :  { %v11730_v26 = vcombine.high %v1827_v44, %v1831_v10  ;;  %v1691_v22 = vld [vmem:[#allocation8 + $0xa58] sm:$0xff]  ;;  %v11729_v33 = vcombine.low %v1827_v44, %v1831_v10 }
 0x485   :  { %8631 = vmatpush2.bf16.msra.mxu0 %v11633_v39  ;;  %v1695_v61 = vld [vmem:[#allocation8 + $0xa78] sm:$0xff] }
 0x486   :  { %8672 = vmatpush2.bf16.msra.mxu1 %v11761_v45  ;;  %8632 = vmatprep.subr.bf16.mxu0 %v11626_v41  ;;  %v1819_v56 = vld [vmem:[#allocation8 + $0xe58] sm:$0xff]  ;;  %v11594_v31 = vcombine.high %v1691_v22, %v1695_v61  ;;  %v11593_v46 = vcombine.low %v1691_v22, %v1695_v61 }
 0x487   :  { %8673 = vmatprep.subr.bf16.mxu1 %v11754_v32  ;;  %v1823_v9 = vld [vmem:[#allocation8 + $0xe78] sm:$0xff] }
 0x488   :  { %v11722_v29 = vcombine.high %v1819_v56, %v1823_v9  ;;  %v1683_v30 = vld [vmem:[#allocation8 + $0xa18] sm:$0xff]  ;;  %v11721_v42 = vcombine.low %v1819_v56, %v1823_v9 }
 0x489   :  { %8633 = vmatpush2.bf16.msra.mxu0 %v11625_v54  ;;  %v1687_v53 = vld [vmem:[#allocation8 + $0xa38] sm:$0xff] }
 0x48a   :  { %8674 = vmatpush2.bf16.msra.mxu1 %v11753_v57  ;;  %8634 = vmatprep.subr.bf16.mxu0 %v11618_v58  ;;  %v1811_v37 = vld [vmem:[#allocation8 + $0xe18] sm:$0xff]  ;;  %v11586_v39 = vcombine.high %v1683_v30, %v1687_v53  ;;  %v11585_v50 = vcombine.low %v1683_v30, %v1687_v53 }
 0x48b   :  { %8675 = vmatprep.subr.bf16.mxu1 %v11746_v15  ;;  %v1815_v11 = vld [vmem:[#allocation8 + $0xe38] sm:$0xff] }
 0x48c   :  { %v11714_v45 = vcombine.high %v1811_v37, %v1815_v11  ;;  %v1931_v41 = vld [vmem:[#allocation8 + $0x11d8] sm:$0xff]  ;;  %v11713_v51 = vcombine.low %v1811_v37, %v1815_v11 }
 0x48d   :  { %8635 = vmatpush2.bf16.msra.mxu0 %v11617_v5  ;;  %v1935_v32 = vld [vmem:[#allocation8 + $0x11f8] sm:$0xff] }
 0x48e   :  { %8676 = vmatpush2.bf16.msra.mxu1 %v11745_v47  ;;  %8636 = vmatprep.subr.bf16.mxu0 %v11610_v6  ;;  %v2059_v49 = vld [vmem:[#allocation8 + $0x15d8] sm:$0xff]  ;;  %v11834_v54 = vcombine.high %v1931_v41, %v1935_v32  ;;  %v11833_v60 = vcombine.low %v1931_v41, %v1935_v32 }
 0x48f   :  { %8677 = vmatprep.subr.bf16.mxu1 %v11738_v28  ;;  %v2063_v48 = vld [vmem:[#allocation8 + $0x15f8] sm:$0xff] }
 0x490   :  { %v11962_v57 = vcombine.high %v2059_v49, %v2063_v48  ;;  %v1923_v58 = vld [vmem:[#allocation8 + $0x1198] sm:$0xff]  ;;  %v11961_v4 = vcombine.low %v2059_v49, %v2063_v48 }
 0x491   :  { %8637 = vmatpush2.bf16.msra.mxu0 %v11609_v14  ;;  %v1927_v15 = vld [vmem:[#allocation8 + $0x11b8] sm:$0xff] }
 0x492   :  { %8678 = vmatpush2.bf16.msra.mxu1 %v11737_v23  ;;  %8638 = vmatprep.subr.bf16.mxu0 %v11602_v24  ;;  %v2051_v63 = vld [vmem:[#allocation8 + $0x1598] sm:$0xff]  ;;  %v11826_v5 = vcombine.high %v1923_v58, %v1927_v15  ;;  %v11825_v23 = vcombine.low %v1923_v58, %v1927_v15 }
 0x493   :  { %8679 = vmatprep.subr.bf16.mxu1 %v11730_v26  ;;  %v2055_v18 = vld [vmem:[#allocation8 + $0x15b8] sm:$0xff] }
 0x494   :  { %v1915_v47 = vld [vmem:[#allocation8 + $0x1158] sm:$0xff]  ;;  %v11954_v7 = vcombine.high %v2051_v63, %v2055_v18  ;;  %v11953_v26 = vcombine.low %v2051_v63, %v2055_v18 }
 0x495   :  { %8639 = vmatpush2.bf16.msra.mxu0 %v11601_v35  ;;  %v1919_v6 = vld [vmem:[#allocation8 + $0x1178] sm:$0xff] }
 0x496   :  { %8680 = vmatpush2.bf16.msra.mxu1 %v11729_v33  ;;  %8640 = vmatprep.subr.bf16.mxu0 %v11594_v31  ;;  %v2043_v16 = vld [vmem:[#allocation8 + $0x1558] sm:$0xff]  ;;  %v11818_v22 = vcombine.high %v1915_v47, %v1919_v6  ;;  %v11817_v30 = vcombine.low %v1915_v47, %v1919_v6 }
 0x497   :  { %8681 = vmatprep.subr.bf16.mxu1 %v11722_v29  ;;  %v2047_v44 = vld [vmem:[#allocation8 + $0x1578] sm:$0xff] }
 0x498   :  { %v1907_v9 = vld [vmem:[#allocation8 + $0x1118] sm:$0xff] }
 0x499   :  { %8641 = vmatpush2.bf16.msra.mxu0 %v11593_v46  ;;  %v1911_v35 = vld [vmem:[#allocation8 + $0x1138] sm:$0xff] }
 0x49a   :  { %8682 = vmatpush2.bf16.msra.mxu1 %v11721_v42  ;;  %8642 = vmatprep.subr.bf16.mxu0 %v11586_v39  ;;  %v2035_v33 = vld [vmem:[#allocation8 + $0x1518] sm:$0xff]  ;;  %v11810_v37 = vcombine.high %v1907_v9, %v1911_v35  ;;  %v11809_v41 = vcombine.low %v1907_v9, %v1911_v35 }
 0x49b   :  { %8683 = vmatprep.subr.bf16.mxu1 %v11714_v45  ;;  %v2039_v31 = vld [vmem:[#allocation8 + $0x1538] sm:$0xff] }
 0x49c   :  { %v11938_v11 = vcombine.high %v2035_v33, %v2039_v31  ;;  %v1899_v46 = vld [vmem:[#allocation8 + $0x10d8] sm:$0xff]  ;;  %v11937_v32 = vcombine.low %v2035_v33, %v2039_v31 }
 0x49d   :  { %8643 = vmatpush2.bf16.msra.mxu0 %v11585_v50  ;;  %v1903_v42 = vld [vmem:[#allocation8 + $0x10f8] sm:$0xff] }
 0x49e   :  { %8684 = vmatpush2.bf16.msra.mxu1 %v11713_v51  ;;  %8694 = vmatprep.subr.bf16.mxu0 %v11834_v54  ;;  %v2027_v39 = vld [vmem:[#allocation8 + $0x14d8] sm:$0xff]  ;;  %v11802_v49 = vcombine.high %v1899_v46, %v1903_v42  ;;  %v11801_v58 = vcombine.low %v1899_v46, %v1903_v42 }
 0x49f   :  { %8735 = vmatprep.subr.bf16.mxu1 %v11962_v57  ;;  %v2031_v45 = vld [vmem:[#allocation8 + $0x14f8] sm:$0xff] }
 0x4a0   :  { %v8400_v28 = vpop.f32.mrf.mxu0  ;;  %8645 = vmatmul.mubr.bf16.vlgmr.msra.gmra.mxu0 %v13473_v2  ;;  %v11930_v48 = vcombine.high %v2027_v39, %v2031_v45  ;;  %v1891_v50 = vld [vmem:[#allocation8 + $0x1098] sm:$0xff]  ;;  %v11929_v15 = vcombine.low %v2027_v39, %v2031_v45 }
 0x4a1   :  { %v8401_v10 = vadd.f32 %v8400_v28, %v13619_v27  ;;  %v8441_v14 = vpop.f32.mrf.mxu1  ;;  %8686 = vmatmul.mubr.bf16.vlgmr.msra.gmra.mxu1 %v13471_v62  ;;  %8695 = vmatpush1.bf16.msra.mxu0 %v11833_v60  ;;  %v11946_v27 = vcombine.high %v2043_v16, %v2047_v44  ;;  %v1895_v51 = vld [vmem:[#allocation8 + $0x10b8] sm:$0xff] }
 0x4a2   :  { %8726 = vmatprep.mubr.bf16.mxu0 %v13475_v8  ;;  %8736 = vmatpush1.bf16.msra.mxu1 %v11961_v4  ;;  %v8402_v24 = vpop.f32.mrf.mxu0  ;;  %v2019_v54 = vld [vmem:[#allocation8 + $0x1498] sm:$0xff]  ;;  %v11794_v60 = vcombine.high %v1891_v50, %v1895_v51  ;;  %v11793_v6 = vcombine.low %v1891_v50, %v1895_v51 }
 0x4a3   :  { %v13629_v61 = vadd.f32 %v8441_v14, %v8401_v10  ;;  %8767 = vmatprep.mubr.bf16.mxu1 %v13478_v13  ;;  %v8403_v2 = vadd.f32 %v8402_v24, %v13623_v12  ;;  %v8443_v56 = vpop.f32.mrf.mxu1  ;;  %8696 = vmatprep.subr.bf16.mxu0 %v11826_v5  ;;  %v11945_v13 = vcombine.low %v2043_v16, %v2047_v44  ;;  %v2023_v57 = vld [vmem:[#allocation8 + $0x14b8] sm:$0xff] }
 0x4a4   :  { %v8404_v62 = vpop.f32.mrf.mxu0  ;;  %8737 = vmatprep.subr.bf16.mxu1 %v11954_v7  ;;  %v11922_v63 = vcombine.high %v2019_v54, %v2023_v57  ;;  %v1883_v18 = vld [vmem:[#allocation8 + $0x1058] sm:$0xff]  ;;  %v11921_v28 = vcombine.low %v2019_v54, %v2023_v57 }
 0x4a5   :  { %v13633_v8 = vadd.f32 %v8443_v56, %v8403_v2  ;;  %v8445_v29 = vpop.f32.mrf.mxu1  ;;  %8697 = vmatpush1.bf16.msra.mxu0 %v11825_v23  ;;  %v1887_v4 = vld [vmem:[#allocation8 + $0x1078] sm:$0xff] }
 0x4a6   :  { %8738 = vmatpush1.bf16.msra.mxu1 %v11953_v26  ;;  %v8405_v53 = vpop.f32.mrf.mxu0  ;;  %8698 = vmatprep.subr.bf16.mxu0 %v11818_v22  ;;  %v2011_v5 = vld [vmem:[#allocation8 + $0x1458] sm:$0xff]  ;;  %v11786_v7 = vcombine.high %v1883_v18, %v1887_v4  ;;  %v11785_v24 = vcombine.low %v1883_v18, %v1887_v4 }
 0x4a7   :  { %v8446_v12 = vpop.f32.mrf.mxu1  ;;  %8739 = vmatprep.subr.bf16.mxu1 %v11946_v27  ;;  %v2015_v47 = vld [vmem:[#allocation8 + $0x1478] sm:$0xff] }
 0x4a8   :  { %v11914_v16 = vcombine.high %v2011_v5, %v2015_v47  ;;  %v1875_v44 = vld [vmem:[#allocation8 + $0x1018] sm:$0xff]  ;;  %v11913_v26 = vcombine.low %v2011_v5, %v2015_v47 }
 0x4a9   :  { %8699 = vmatpush1.bf16.msra.mxu0 %v11817_v30  ;;  %v1879_v10 = vld [vmem:[#allocation8 + $0x1038] sm:$0xff] }
 0x4aa   :  { %8740 = vmatpush1.bf16.msra.mxu1 %v11945_v13  ;;  %8700 = vmatprep.subr.bf16.mxu0 %v11810_v37  ;;  %v2003_v14 = vld [vmem:[#allocation8 + $0x1418] sm:$0xff]  ;;  %v11778_v22 = vcombine.high %v1875_v44, %v1879_v10  ;;  %v11777_v62 = vcombine.low %v1875_v44, %v1879_v10 }
 0x4ab   :  { %8741 = vmatprep.subr.bf16.mxu1 %v11938_v11  ;;  %v2007_v23 = vld [vmem:[#allocation8 + $0x1438] sm:$0xff] }
 0x4ac   :  { %v11906_v2 = vcombine.high %v2003_v14, %v2007_v23  ;;  %v1995_v56 = vld [vmem:[#allocation8 + $0x13d8] sm:$0xff]  ;;  %v11905_v33 = vcombine.low %v2003_v14, %v2007_v23 }
 0x4ad   :  { %8701 = vmatpush1.bf16.msra.mxu0 %v11809_v41  ;;  %v1999_v27 = vld [vmem:[#allocation8 + $0x13f8] sm:$0xff] }
 0x4ae   :  { %8742 = vmatpush1.bf16.msra.mxu1 %v11937_v32  ;;  %8702 = vmatprep.subr.bf16.mxu0 %v11802_v49  ;;  %v2123_v9 = vld [vmem:[#allocation8 + $0x17d8] sm:$0xff]  ;;  %v11898_v31 = vcombine.high %v1995_v56, %v1999_v27  ;;  %v11897_v12 = vcombine.low %v1995_v56, %v1999_v27 }
 0x4af   :  { %8743 = vmatprep.subr.bf16.mxu1 %v11930_v48  ;;  %v2127_v35 = vld [vmem:[#allocation8 + $0x17f8] sm:$0xff] }
 0x4b0   :  { %v12026_v29 = vcombine.high %v2123_v9, %v2127_v35  ;;  %v1987_v30 = vld [vmem:[#allocation8 + $0x1398] sm:$0xff]  ;;  %v12025_v11 = vcombine.low %v2123_v9, %v2127_v35 }
 0x4b1   :  { %8703 = vmatpush1.bf16.msra.mxu0 %v11801_v58  ;;  %v1991_v53 = vld [vmem:[#allocation8 + $0x13b8] sm:$0xff] }
 0x4b2   :  { %8744 = vmatpush1.bf16.msra.mxu1 %v11929_v15  ;;  %8704 = vmatprep.subr.bf16.mxu0 %v11794_v60  ;;  %v2115_v13 = vld [vmem:[#allocation8 + $0x1798] sm:$0xff]  ;;  %v11890_v46 = vcombine.high %v1987_v30, %v1991_v53  ;;  %v11889_v49 = vcombine.low %v1987_v30, %v1991_v53 }
 0x4b3   :  { %8745 = vmatprep.subr.bf16.mxu1 %v11922_v63  ;;  %v2119_v37 = vld [vmem:[#allocation8 + $0x17b8] sm:$0xff] }
 0x4b4   :  { %v12018_v42 = vcombine.high %v2115_v13, %v2119_v37  ;;  %v1979_v39 = vld [vmem:[#allocation8 + $0x1358] sm:$0xff]  ;;  %v12017_v48 = vcombine.low %v2115_v13, %v2119_v37 }
 0x4b5   :  { %8705 = vmatpush1.bf16.msra.mxu0 %v11793_v6  ;;  %v1983_v45 = vld [vmem:[#allocation8 + $0x1378] sm:$0xff] }
 0x4b6   :  { %8746 = vmatpush1.bf16.msra.mxu1 %v11921_v28  ;;  %8706 = vmatprep.subr.bf16.mxu0 %v11786_v7  ;;  %v2107_v41 = vld [vmem:[#allocation8 + $0x1758] sm:$0xff]  ;;  %v11882_v50 = vcombine.high %v1979_v39, %v1983_v45  ;;  %v11881_v60 = vcombine.low %v1979_v39, %v1983_v45 }
 0x4b7   :  { %8747 = vmatprep.subr.bf16.mxu1 %v11914_v16  ;;  %v2111_v32 = vld [vmem:[#allocation8 + $0x1778] sm:$0xff] }
 0x4b8   :  { %v12010_v51 = vcombine.high %v2107_v41, %v2111_v32  ;;  %v1971_v54 = vld [vmem:[#allocation8 + $0x1318] sm:$0xff]  ;;  %v12009_v63 = vcombine.low %v2107_v41, %v2111_v32 }
 0x4b9   :  { %8707 = vmatpush1.bf16.msra.mxu0 %v11785_v24  ;;  %v1975_v57 = vld [vmem:[#allocation8 + $0x1338] sm:$0xff] }
 0x4ba   :  { %8748 = vmatpush1.bf16.msra.mxu1 %v11913_v26  ;;  %8708 = vmatprep.subr.bf16.mxu0 %v11778_v22  ;;  %v2099_v58 = vld [vmem:[#allocation8 + $0x1718] sm:$0xff]  ;;  %v11874_v18 = vcombine.high %v1971_v54, %v1975_v57  ;;  %v11873_v7 = vcombine.low %v1971_v54, %v1975_v57 }
 0x4bb   :  { %8749 = vmatprep.subr.bf16.mxu1 %v11906_v2  ;;  %v2103_v15 = vld [vmem:[#allocation8 + $0x1738] sm:$0xff] }
 0x4bc   :  { %v12002_v4 = vcombine.high %v2099_v58, %v2103_v15  ;;  %v1963_v5 = vld [vmem:[#allocation8 + $0x12d8] sm:$0xff]  ;;  %v12001_v16 = vcombine.low %v2099_v58, %v2103_v15 }
 0x4bd   :  { %8709 = vmatpush1.bf16.msra.mxu0 %v11777_v62  ;;  %v1967_v47 = vld [vmem:[#allocation8 + $0x12f8] sm:$0xff] }
 0x4be   :  { %8750 = vmatpush1.bf16.msra.mxu1 %v11905_v33  ;;  %8710 = vmatprep.subr.bf16.mxu0 %v11898_v31  ;;  %v2091_v6 = vld [vmem:[#allocation8 + $0x16d8] sm:$0xff]  ;;  %v11866_v44 = vcombine.high %v1963_v5, %v1967_v47  ;;  %v11865_v22 = vcombine.low %v1963_v5, %v1967_v47 }
 0x4bf   :  { %8751 = vmatprep.subr.bf16.mxu1 %v12026_v29  ;;  %v2095_v28 = vld [vmem:[#allocation8 + $0x16f8] sm:$0xff] }
 0x4c0   :  { %v11994_v10 = vcombine.high %v2091_v6, %v2095_v28  ;;  %v1955_v14 = vld [vmem:[#allocation8 + $0x1298] sm:$0xff]  ;;  %v11993_v2 = vcombine.low %v2091_v6, %v2095_v28 }
 0x4c1   :  { %8711 = vmatpush2.bf16.msra.mxu0 %v11897_v12  ;;  %v1959_v23 = vld [vmem:[#allocation8 + $0x12b8] sm:$0xff] }
 0x4c2   :  { %8752 = vmatpush2.bf16.msra.mxu1 %v12025_v11  ;;  %8712 = vmatprep.subr.bf16.mxu0 %v11890_v46  ;;  %v2083_v24 = vld [vmem:[#allocation8 + $0x1698] sm:$0xff]  ;;  %v11858_v56 = vcombine.high %v1955_v14, %v1959_v23  ;;  %v11857_v31 = vcombine.low %v1955_v14, %v1959_v23 }
 0x4c3   :  { %8753 = vmatprep.subr.bf16.mxu1 %v12018_v42  ;;  %v2087_v26 = vld [vmem:[#allocation8 + $0x16b8] sm:$0xff] }
 0x4c4   :  { %v11986_v27 = vcombine.high %v2083_v24, %v2087_v26  ;;  %v1947_v9 = vld [vmem:[#allocation8 + $0x1258] sm:$0xff]  ;;  %v11985_v29 = vcombine.low %v2083_v24, %v2087_v26 }
 0x4c5   :  { %8713 = vmatpush2.bf16.msra.mxu0 %v11889_v49  ;;  %v1951_v35 = vld [vmem:[#allocation8 + $0x1278] sm:$0xff] }
 0x4c6   :  { %8754 = vmatpush2.bf16.msra.mxu1 %v12017_v48  ;;  %8714 = vmatprep.subr.bf16.mxu0 %v11882_v50  ;;  %v2075_v62 = vld [vmem:[#allocation8 + $0x1658] sm:$0xff]  ;;  %v11850_v30 = vcombine.high %v1947_v9, %v1951_v35  ;;  %v11849_v46 = vcombine.low %v1947_v9, %v1951_v35 }
 0x4c7   :  { %8755 = vmatprep.subr.bf16.mxu1 %v12010_v51  ;;  %v2079_v33 = vld [vmem:[#allocation8 + $0x1678] sm:$0xff] }
 0x4c8   :  { %v11978_v53 = vcombine.high %v2075_v62, %v2079_v33  ;;  %v1939_v13 = vld [vmem:[#allocation8 + $0x1218] sm:$0xff]  ;;  %v11977_v42 = vcombine.low %v2075_v62, %v2079_v33 }
 0x4c9   :  { %8715 = vmatpush2.bf16.msra.mxu0 %v11881_v60  ;;  %v1943_v37 = vld [vmem:[#allocation8 + $0x1238] sm:$0xff] }
 0x4ca   :  { %8756 = vmatpush2.bf16.msra.mxu1 %v12009_v63  ;;  %8716 = vmatprep.subr.bf16.mxu0 %v11874_v18  ;;  %v2067_v12 = vld [vmem:[#allocation8 + $0x1618] sm:$0xff]  ;;  %v11842_v39 = vcombine.high %v1939_v13, %v1943_v37  ;;  %v11841_v50 = vcombine.low %v1939_v13, %v1943_v37 }
 0x4cb   :  { %8757 = vmatprep.subr.bf16.mxu1 %v12002_v4  ;;  %v2071_v11 = vld [vmem:[#allocation8 + $0x1638] sm:$0xff] }
 0x4cc   :  { %v11970_v45 = vcombine.high %v2067_v12, %v2071_v11  ;;  %v2187_v41 = vld [vmem:[#allocation8 + $0x19d8] sm:$0xff]  ;;  %v11969_v51 = vcombine.low %v2067_v12, %v2071_v11 }
 0x4cd   :  { %8717 = vmatpush2.bf16.msra.mxu0 %v11873_v7  ;;  %v2191_v32 = vld [vmem:[#allocation8 + $0x19f8] sm:$0xff] }
 0x4ce   :  { %8758 = vmatpush2.bf16.msra.mxu1 %v12001_v16  ;;  %8718 = vmatprep.subr.bf16.mxu0 %v11866_v44  ;;  %v2315_v49 = vld [vmem:[#allocation8 + $0x1dd8] sm:$0xff]  ;;  %v12090_v54 = vcombine.high %v2187_v41, %v2191_v32  ;;  %v12089_v60 = vcombine.low %v2187_v41, %v2191_v32 }
 0x4cf   :  { %8759 = vmatprep.subr.bf16.mxu1 %v11994_v10  ;;  %v2319_v48 = vld [vmem:[#allocation8 + $0x1df8] sm:$0xff] }
 0x4d0   :  { %v12218_v57 = vcombine.high %v2315_v49, %v2319_v48  ;;  %v2179_v58 = vld [vmem:[#allocation8 + $0x1998] sm:$0xff]  ;;  %v12217_v4 = vcombine.low %v2315_v49, %v2319_v48 }
 0x4d1   :  { %8719 = vmatpush2.bf16.msra.mxu0 %v11865_v22  ;;  %v2183_v15 = vld [vmem:[#allocation8 + $0x19b8] sm:$0xff] }
 0x4d2   :  { %8760 = vmatpush2.bf16.msra.mxu1 %v11993_v2  ;;  %8720 = vmatprep.subr.bf16.mxu0 %v11858_v56  ;;  %v2307_v63 = vld [vmem:[#allocation8 + $0x1d98] sm:$0xff]  ;;  %v12082_v5 = vcombine.high %v2179_v58, %v2183_v15  ;;  %v12081_v23 = vcombine.low %v2179_v58, %v2183_v15 }
 0x4d3   :  { %8761 = vmatprep.subr.bf16.mxu1 %v11986_v27  ;;  %v2311_v18 = vld [vmem:[#allocation8 + $0x1db8] sm:$0xff] }
 0x4d4   :  { %v2171_v47 = vld [vmem:[#allocation8 + $0x1958] sm:$0xff]  ;;  %v12210_v7 = vcombine.high %v2307_v63, %v2311_v18  ;;  %v12209_v26 = vcombine.low %v2307_v63, %v2311_v18 }
 0x4d5   :  { %8721 = vmatpush2.bf16.msra.mxu0 %v11857_v31  ;;  %v2175_v6 = vld [vmem:[#allocation8 + $0x1978] sm:$0xff] }
 0x4d6   :  { %8762 = vmatpush2.bf16.msra.mxu1 %v11985_v29  ;;  %8722 = vmatprep.subr.bf16.mxu0 %v11850_v30  ;;  %v2299_v16 = vld [vmem:[#allocation8 + $0x1d58] sm:$0xff]  ;;  %v12074_v22 = vcombine.high %v2171_v47, %v2175_v6  ;;  %v12073_v31 = vcombine.low %v2171_v47, %v2175_v6 }
 0x4d7   :  { %8763 = vmatprep.subr.bf16.mxu1 %v11978_v53  ;;  %v2303_v44 = vld [vmem:[#allocation8 + $0x1d78] sm:$0xff] }
 0x4d8   :  { %v2163_v27 = vld [vmem:[#allocation8 + $0x1918] sm:$0xff] }
 0x4d9   :  { %8723 = vmatpush2.bf16.msra.mxu0 %v11849_v46  ;;  %v2167_v9 = vld [vmem:[#allocation8 + $0x1938] sm:$0xff] }
 0x4da   :  { %8764 = vmatpush2.bf16.msra.mxu1 %v11977_v42  ;;  %8724 = vmatprep.subr.bf16.mxu0 %v11842_v39  ;;  %v2291_v35 = vld [vmem:[#allocation8 + $0x1d18] sm:$0xff]  ;;  %v12066_v30 = vcombine.high %v2163_v27, %v2167_v9  ;;  %v12065_v46 = vcombine.low %v2163_v27, %v2167_v9 }
 0x4db   :  { %8765 = vmatprep.subr.bf16.mxu1 %v11970_v45  ;;  %v2295_v62 = vld [vmem:[#allocation8 + $0x1d38] sm:$0xff] }
 0x4dc   :  { %v12194_v53 = vcombine.high %v2291_v35, %v2295_v62  ;;  %v2155_v13 = vld [vmem:[#allocation8 + $0x18d8] sm:$0xff]  ;;  %v12193_v42 = vcombine.low %v2291_v35, %v2295_v62 }
 0x4dd   :  { %8725 = vmatpush2.bf16.msra.mxu0 %v11841_v50  ;;  %v2159_v37 = vld [vmem:[#allocation8 + $0x18f8] sm:$0xff] }
 0x4de   :  { %8766 = vmatpush2.bf16.msra.mxu1 %v11969_v51  ;;  %8776 = vmatprep.subr.bf16.mxu0 %v12090_v54  ;;  %v2283_v12 = vld [vmem:[#allocation8 + $0x1cd8] sm:$0xff]  ;;  %v12058_v39 = vcombine.high %v2155_v13, %v2159_v37  ;;  %v12057_v50 = vcombine.low %v2155_v13, %v2159_v37 }
 0x4df   :  { %8817 = vmatprep.subr.bf16.mxu1 %v12218_v57  ;;  %v2287_v11 = vld [vmem:[#allocation8 + $0x1cf8] sm:$0xff] }
 0x4e0   :  { %v8482_v28 = vpop.f32.mrf.mxu0  ;;  %8727 = vmatmul.mubr.bf16.vlgmr.msra.gmra.mxu0 %v13507_v40  ;;  %v12186_v45 = vcombine.high %v2283_v12, %v2287_v11  ;;  %v2147_v41 = vld [vmem:[#allocation8 + $0x1898] sm:$0xff]  ;;  %v12185_v51 = vcombine.low %v2283_v12, %v2287_v11 }
 0x4e1   :  { %v8483_v10 = vadd.f32 %v8482_v28, %v13629_v61  ;;  %v8523_v14 = vpop.f32.mrf.mxu1  ;;  %8768 = vmatmul.mubr.bf16.vlgmr.msra.gmra.mxu1 %v13509_v43  ;;  %8777 = vmatpush1.bf16.msra.mxu0 %v12089_v60  ;;  %v12202_v61 = vcombine.high %v2299_v16, %v2303_v44  ;;  %v2151_v32 = vld [vmem:[#allocation8 + $0x18b8] sm:$0xff] }
 0x4e2   :  { %8808 = vmatprep.mubr.bf16.mxu0 %v13511_v0  ;;  %8818 = vmatpush1.bf16.msra.mxu1 %v12217_v4  ;;  %v8484_v24 = vpop.f32.mrf.mxu0  ;;  %v2275_v49 = vld [vmem:[#allocation8 + $0x1c98] sm:$0xff]  ;;  %v12050_v54 = vcombine.high %v2147_v41, %v2151_v32  ;;  %v12049_v18 = vcombine.low %v2147_v41, %v2151_v32 }
 0x4e3   :  { %v13639_v2 = vadd.f32 %v8523_v14, %v8483_v10  ;;  %8849 = vmatprep.mubr.bf16.mxu1 %v13513_v52  ;;  %v8485_v40 = vadd.f32 %v8484_v24, %v13633_v8  ;;  %v8525_v56 = vpop.f32.mrf.mxu1  ;;  %8778 = vmatprep.subr.bf16.mxu0 %v12082_v5  ;;  %v12201_v52 = vcombine.low %v2299_v16, %v2303_v44  ;;  %v2279_v48 = vld [vmem:[#allocation8 + $0x1cb8] sm:$0xff] }
 0x4e4   :  { %v8486_v43 = vpop.f32.mrf.mxu0  ;;  %8819 = vmatprep.subr.bf16.mxu1 %v12210_v7  ;;  %v12178_v57 = vcombine.high %v2275_v49, %v2279_v48  ;;  %v2139_v58 = vld [vmem:[#allocation8 + $0x1858] sm:$0xff]  ;;  %v12177_v4 = vcombine.low %v2275_v49, %v2279_v48 }
 0x4e5   :  { %v13643_v0 = vadd.f32 %v8525_v56, %v8485_v40  ;;  %v8527_v33 = vpop.f32.mrf.mxu1  ;;  %8779 = vmatpush1.bf16.msra.mxu0 %v12081_v23  ;;  %v2143_v15 = vld [vmem:[#allocation8 + $0x1878] sm:$0xff] }
 0x4e6   :  { %8820 = vmatpush1.bf16.msra.mxu1 %v12209_v26  ;;  %v8487_v29 = vpop.f32.mrf.mxu0  ;;  %8780 = vmatprep.subr.bf16.mxu0 %v12074_v22  ;;  %v2267_v60 = vld [vmem:[#allocation8 + $0x1c58] sm:$0xff]  ;;  %v12042_v5 = vcombine.high %v2139_v58, %v2143_v15  ;;  %v12041_v44 = vcombine.low %v2139_v58, %v2143_v15 }
 0x4e7   :  { %v8528_v8 = vpop.f32.mrf.mxu1  ;;  %8821 = vmatprep.subr.bf16.mxu1 %v12202_v61  ;;  %v2271_v63 = vld [vmem:[#allocation8 + $0x1c78] sm:$0xff] }
 0x4e8   :  { %v12170_v47 = vcombine.high %v2267_v60, %v2271_v63  ;;  %v2131_v6 = vld [vmem:[#allocation8 + $0x1818] sm:$0xff]  ;;  %v12169_v10 = vcombine.low %v2267_v60, %v2271_v63 }
 0x4e9   :  { %8781 = vmatpush1.bf16.msra.mxu0 %v12073_v31  ;;  %v2135_v28 = vld [vmem:[#allocation8 + $0x1838] sm:$0xff] }
 0x4ea   :  { %8822 = vmatpush1.bf16.msra.mxu1 %v12201_v52  ;;  %8782 = vmatprep.subr.bf16.mxu0 %v12066_v30  ;;  %v2259_v7 = vld [vmem:[#allocation8 + $0x1c18] sm:$0xff]  ;;  %v12034_v14 = vcombine.high %v2131_v6, %v2135_v28  ;;  %v12033_v56 = vcombine.low %v2131_v6, %v2135_v28 }
 0x4eb   :  { %8823 = vmatprep.subr.bf16.mxu1 %v12194_v53  ;;  %v2263_v16 = vld [vmem:[#allocation8 + $0x1c38] sm:$0xff] }
 0x4ec   :  { %v12162_v23 = vcombine.high %v2259_v7, %v2263_v16  ;;  %v2251_v24 = vld [vmem:[#allocation8 + $0x1bd8] sm:$0xff]  ;;  %v12161_v61 = vcombine.low %v2259_v7, %v2263_v16 }
 0x4ed   :  { %8783 = vmatpush1.bf16.msra.mxu0 %v12065_v46  ;;  %v2255_v26 = vld [vmem:[#allocation8 + $0x1bf8] sm:$0xff] }
 0x4ee   :  { %8824 = vmatpush1.bf16.msra.mxu1 %v12193_v42  ;;  %8784 = vmatprep.subr.bf16.mxu0 %v12058_v39  ;;  %v2379_v22 = vld [vmem:[#allocation8 + $0x1fd8] sm:$0xff]  ;;  %v12154_v27 = vcombine.high %v2251_v24, %v2255_v26  ;;  %v12153_v31 = vcombine.low %v2251_v24, %v2255_v26 }
 0x4ef   :  { %8825 = vmatprep.subr.bf16.mxu1 %v12186_v45  ;;  %v2383_v40 = vld [vmem:[#allocation8 + $0x1ff8] sm:$0xff] }
 0x4f0   :  { %v12282_v9 = vcombine.high %v2379_v22, %v2383_v40  ;;  %v2243_v43 = vld [vmem:[#allocation8 + $0x1b98] sm:$0xff]  ;;  %v12281_v29 = vcombine.low %v2379_v22, %v2383_v40 }
 0x4f1   :  { %8785 = vmatpush1.bf16.msra.mxu0 %v12057_v50  ;;  %v2247_v35 = vld [vmem:[#allocation8 + $0x1bb8] sm:$0xff] }
 0x4f2   :  { %8826 = vmatpush1.bf16.msra.mxu1 %v12185_v51  ;;  %8786 = vmatprep.subr.bf16.mxu0 %v12050_v54  ;;  %v2371_v62 = vld [vmem:[#allocation8 + $0x1f98] sm:$0xff]  ;;  %v12146_v52 = vcombine.high %v2243_v43, %v2247_v35  ;;  %v12145_v12 = vcombine.low %v2243_v43, %v2247_v35 }
 0x4f3   :  { %8827 = vmatprep.subr.bf16.mxu1 %v12178_v57  ;;  %v2375_v33 = vld [vmem:[#allocation8 + $0x1fb8] sm:$0xff] }
 0x4f4   :  { %v12274_v30 = vcombine.high %v2371_v62, %v2375_v33  ;;  %v2235_v8 = vld [vmem:[#allocation8 + $0x1b58] sm:$0xff]  ;;  %v12273_v11 = vcombine.low %v2371_v62, %v2375_v33 }
 0x4f5   :  { %8787 = vmatpush1.bf16.msra.mxu0 %v12049_v18  ;;  %v2239_v53 = vld [vmem:[#allocation8 + $0x1b78] sm:$0xff] }
 0x4f6   :  { %8828 = vmatpush1.bf16.msra.mxu1 %v12177_v4  ;;  %8788 = vmatprep.subr.bf16.mxu0 %v12042_v5  ;;  %v2363_v13 = vld [vmem:[#allocation8 + $0x1f58] sm:$0xff]  ;;  %v12138_v46 = vcombine.high %v2235_v8, %v2239_v53  ;;  %v12137_v49 = vcombine.low %v2235_v8, %v2239_v53 }
 0x4f7   :  { %8829 = vmatprep.subr.bf16.mxu1 %v12170_v47  ;;  %v2367_v37 = vld [vmem:[#allocation8 + $0x1f78] sm:$0xff] }
 0x4f8   :  { %v12266_v42 = vcombine.high %v2363_v13, %v2367_v37  ;;  %v2227_v39 = vld [vmem:[#allocation8 + $0x1b18] sm:$0xff]  ;;  %v12265_v48 = vcombine.low %v2363_v13, %v2367_v37  ;;  %v8859_v13 = vmax.f32 %v13563_v34, 0.0  ;;  %v8861_v37 = vmax.f32 %v13603_v55, 0.0 }
 0x4f9   :  { %8789 = vmatpush1.bf16.msra.mxu0 %v12041_v44  ;;  %v2231_v45 = vld [vmem:[#allocation8 + $0x1b38] sm:$0xff] }
 0x4fa   :  { %8830 = vmatpush1.bf16.msra.mxu1 %v12169_v10  ;;  %8790 = vmatprep.subr.bf16.mxu0 %v12034_v14  ;;  %v2355_v41 = vld [vmem:[#allocation8 + $0x1f18] sm:$0xff]  ;;  %v12130_v50 = vcombine.high %v2227_v39, %v2231_v45  ;;  %v12129_v60 = vcombine.low %v2227_v39, %v2231_v45 }
 0x4fb   :  { %8831 = vmatprep.subr.bf16.mxu1 %v12162_v23  ;;  %v2359_v32 = vld [vmem:[#allocation8 + $0x1f38] sm:$0xff] }
 0x4fc   :  { %v12258_v51 = vcombine.high %v2355_v41, %v2359_v32  ;;  %v2219_v54 = vld [vmem:[#allocation8 + $0x1ad8] sm:$0xff]  ;;  %v12257_v63 = vcombine.low %v2355_v41, %v2359_v32  ;;  %v13649_v41 = vpack.c.bf16 %v8859_v13, %v8859_v13 }
 0x4fd   :  { %8791 = vmatpush1.bf16.msra.mxu0 %v12033_v56  ;;  %v2223_v57 = vld [vmem:[#allocation8 + $0x1af8] sm:$0xff] }
 0x4fe   :  { %8832 = vmatpush1.bf16.msra.mxu1 %v12161_v61  ;;  %8792 = vmatprep.subr.bf16.mxu0 %v12154_v27  ;;  %v2347_v58 = vld [vmem:[#allocation8 + $0x1ed8] sm:$0xff]  ;;  %v12122_v18 = vcombine.high %v2219_v54, %v2223_v57  ;;  %v12121_v7 = vcombine.low %v2219_v54, %v2223_v57 }
 0x4ff   :  { %8833 = vmatprep.subr.bf16.mxu1 %v12282_v9  ;;  %v2351_v15 = vld [vmem:[#allocation8 + $0x1ef8] sm:$0xff] }
 0x500   :  { %v12250_v4 = vcombine.high %v2347_v58, %v2351_v15  ;;  %v2211_v5 = vld [vmem:[#allocation8 + $0x1a98] sm:$0xff]  ;;  %v12249_v16 = vcombine.low %v2347_v58, %v2351_v15 }
 0x501   :  { %8793 = vmatpush2.bf16.msra.mxu0 %v12153_v31  ;;  %v2215_v47 = vld [vmem:[#allocation8 + $0x1ab8] sm:$0xff] }
 0x502   :  { %8834 = vmatpush2.bf16.msra.mxu1 %v12281_v29  ;;  %8794 = vmatprep.subr.bf16.mxu0 %v12146_v52  ;;  %v2339_v6 = vld [vmem:[#allocation8 + $0x1e98] sm:$0xff]  ;;  %v12114_v44 = vcombine.high %v2211_v5, %v2215_v47  ;;  %v12113_v22 = vcombine.low %v2211_v5, %v2215_v47 }
 0x503   :  { %8835 = vmatprep.subr.bf16.mxu1 %v12274_v30  ;;  %v2343_v28 = vld [vmem:[#allocation8 + $0x1eb8] sm:$0xff] }
 0x504   :  { %v12242_v10 = vcombine.high %v2339_v6, %v2343_v28  ;;  %v2203_v14 = vld [vmem:[#allocation8 + $0x1a58] sm:$0xff]  ;;  %v12241_v40 = vcombine.low %v2339_v6, %v2343_v28 }
 0x505   :  { %8795 = vmatpush2.bf16.msra.mxu0 %v12145_v12  ;;  %v2207_v23 = vld [vmem:[#allocation8 + $0x1a78] sm:$0xff]  ;;  %v13052_v12 = vld [vmem:[#allocation10] sm:$0xff] }
 0x506   :  { %8836 = vmatpush2.bf16.msra.mxu1 %v12273_v11  ;;  %8796 = vmatprep.subr.bf16.mxu0 %v12138_v46  ;;  %v2331_v24 = vld [vmem:[#allocation8 + $0x1e58] sm:$0xff]  ;;  %v12106_v56 = vcombine.high %v2203_v14, %v2207_v23  ;;  %v12105_v62 = vcombine.low %v2203_v14, %v2207_v23  ;;  %v2413_v11 = vrot.slane %v13052_v12, %v13450_v59 }
 0x507   :  { %8837 = vmatprep.subr.bf16.mxu1 %v12266_v42  ;;  %v2335_v26 = vld [vmem:[#allocation8 + $0x1e78] sm:$0xff]  ;;  %v2417_v39 = vrot.slane %v13052_v12, %v13433_v36 }
 0x508   :  { %v12234_v61 = vcombine.high %v2331_v24, %v2335_v26  ;;  %v2195_v27 = vld [vmem:[#allocation8 + $0x1a18] sm:$0xff]  ;;  %v12233_v33 = vcombine.low %v2331_v24, %v2335_v26 }
 0x509   :  { %8797 = vmatpush2.bf16.msra.mxu0 %v12137_v49  ;;  %v2199_v9 = vld [vmem:[#allocation8 + $0x1a38] sm:$0xff]  ;;  %v13652_v49 = vpack.c.bf16 %v8861_v37, %v8861_v37 }
 0x50a   :  { %8838 = vmatpush2.bf16.msra.mxu1 %v12265_v48  ;;  %8798 = vmatprep.subr.bf16.mxu0 %v12130_v50  ;;  %v2323_v43 = vld [vmem:[#allocation8 + $0x1e18] sm:$0xff]  ;;  %v12098_v31 = vcombine.high %v2195_v27, %v2199_v9  ;;  %v12097_v52 = vcombine.low %v2195_v27, %v2199_v9 }
 0x50b   :  { %8839 = vmatprep.subr.bf16.mxu1 %v12258_v51  ;;  %v2327_v35 = vld [vmem:[#allocation8 + $0x1e38] sm:$0xff] }
 0x50c   :  { %v12226_v29 = vcombine.high %v2323_v43, %v2327_v35  ;;  %v12225_v30 = vcombine.low %v2323_v43, %v2327_v35  ;;  %v12636_v8 = vld [vmem:[#allocation11 + $0xe4] ss:$16 sps:$4 sm:$0xff]   ;;  %v12634_v46 = vld [vmem:[#allocation11 + $0xe0] ss:$16 sps:$4 sm:$0xff]  }
 0x50d   :  { %8799 = vmatpush2.bf16.msra.mxu0 %v12129_v60  ;;  %v12639_v53 = vld [vmem:[#allocation11 + $0x2e4] ss:$16 sps:$4 sm:$0xff]   ;;  %v12637_v42 = vld [vmem:[#allocation11 + $0x2e0] ss:$16 sps:$4 sm:$0xff]  }
 0x50e   :  { %8840 = vmatpush2.bf16.msra.mxu1 %v12257_v63  ;;  %8800 = vmatprep.subr.bf16.mxu0 %v12122_v18  ;;  %v12642_v45 = vld [vmem:[#allocation11 + $0xc4] ss:$16 sps:$4 sm:$0xff]   ;;  %v12640_v59 = vld [vmem:[#allocation11 + $0xc0] ss:$16 sps:$4 sm:$0xff]  }
 0x50f   :  { %8841 = vmatprep.subr.bf16.mxu1 %v12250_v4  ;;  %v12645_v34 = vld [vmem:[#allocation11 + $0x2c4] ss:$16 sps:$4 sm:$0xff]   ;;  %v12643_v36 = vld [vmem:[#allocation11 + $0x2c0] ss:$16 sps:$4 sm:$0xff]  }
 0x510   :  { %v12648_v51 = vld [vmem:[#allocation11 + $0xa4] ss:$16 sps:$4 sm:$0xff]   ;;  %v12646_v63 = vld [vmem:[#allocation11 + $0xa0] ss:$16 sps:$4 sm:$0xff]  }
 0x511   :  { %8801 = vmatpush2.bf16.msra.mxu0 %v12121_v7  ;;  %v12651_v58 = vld [vmem:[#allocation11 + $0x2a4] ss:$16 sps:$4 sm:$0xff]   ;;  %v12649_v4 = vld [vmem:[#allocation11 + $0x2a0] ss:$16 sps:$4 sm:$0xff]  }
 0x512   :  { %8842 = vmatpush2.bf16.msra.mxu1 %v12249_v16  ;;  %8802 = vmatprep.subr.bf16.mxu0 %v12114_v44  ;;  %v12654_v5 = vld [vmem:[#allocation11 + $0x84] ss:$16 sps:$4 sm:$0xff]   ;;  %v12652_v28 = vld [vmem:[#allocation11 + $0x80] ss:$16 sps:$4 sm:$0xff]  }
 0x513   :  { %8843 = vmatprep.subr.bf16.mxu1 %v12242_v10  ;;  %v12657_v6 = vld [vmem:[#allocation11 + $0x284] ss:$16 sps:$4 sm:$0xff]   ;;  %v12655_v7 = vld [vmem:[#allocation11 + $0x280] ss:$16 sps:$4 sm:$0xff]  }
 0x514   :  { %v12660_v16 = vld [vmem:[#allocation11 + $0x64] ss:$16 sps:$4 sm:$0xff]   ;;  %v12658_v10 = vld [vmem:[#allocation11 + $0x60] ss:$16 sps:$4 sm:$0xff]  }
 0x515   :  { %8803 = vmatpush2.bf16.msra.mxu0 %v12113_v22  ;;  %v12663_v44 = vld [vmem:[#allocation11 + $0x264] ss:$16 sps:$4 sm:$0xff]   ;;  %v12661_v14 = vld [vmem:[#allocation11 + $0x260] ss:$16 sps:$4 sm:$0xff]  }
 0x516   :  { %8844 = vmatpush2.bf16.msra.mxu1 %v12241_v40  ;;  %8804 = vmatprep.subr.bf16.mxu0 %v12106_v56  ;;  %v12666_v23 = vld [vmem:[#allocation11 + $0x44] ss:$16 sps:$4 sm:$0xff]   ;;  %v12664_v26 = vld [vmem:[#allocation11 + $0x40] ss:$16 sps:$4 sm:$0xff]  }
 0x517   :  { %8845 = vmatprep.subr.bf16.mxu1 %v12234_v61  ;;  %v12669_v24 = vld [vmem:[#allocation11 + $0x244] ss:$16 sps:$4 sm:$0xff]   ;;  %v12667_v22 = vld [vmem:[#allocation11 + $0x240] ss:$16 sps:$4 sm:$0xff]  }
 0x518   :  { %v12672_v40 = vld [vmem:[#allocation11 + $0x24] ss:$16 sps:$4 sm:$0xff]   ;;  %v12670_v61 = vld [vmem:[#allocation11 + $0x20] ss:$16 sps:$4 sm:$0xff]  }
 0x519   :  { %8805 = vmatpush2.bf16.msra.mxu0 %v12105_v62  ;;  %v12675_v56 = vld [vmem:[#allocation11 + $0x224] ss:$16 sps:$4 sm:$0xff]   ;;  %v12673_v27 = vld [vmem:[#allocation11 + $0x220] ss:$16 sps:$4 sm:$0xff]  }
 0x51a   :  { %8846 = vmatpush2.bf16.msra.mxu1 %v12233_v33  ;;  %8806 = vmatprep.subr.bf16.mxu0 %v12098_v31  ;;  %v12678_v9 = vld [vmem:[#allocation11 + $0x4] ss:$16 sps:$4 sm:$0xff]   ;;  %v12676_v35 = vld [vmem:[#allocation11] ss:$16 sps:$4 sm:$0xff]  }
 0x51b   :  { %8847 = vmatprep.subr.bf16.mxu1 %v12226_v29  ;;  %v12681_v43 = vld [vmem:[#allocation11 + $0x204] ss:$16 sps:$4 sm:$0xff]   ;;  %v12679_v62 = vld [vmem:[#allocation11 + $0x200] ss:$16 sps:$4 sm:$0xff]  }
 0x51c   :  { %v12684_v33 = vld [vmem:[#allocation11 + $0x1e4] ss:$16 sps:$4 sm:$0xff]   ;;  %v12682_v29 = vld [vmem:[#allocation11 + $0x1e0] ss:$16 sps:$4 sm:$0xff]  }
 0x51d   :  { %8807 = vmatpush2.bf16.msra.mxu0 %v12097_v52  ;;  %v12687_v31 = vld [vmem:[#allocation11 + $0x3e4] ss:$16 sps:$4 sm:$0xff]   ;;  %v12685_v52 = vld [vmem:[#allocation11 + $0x3e0] ss:$16 sps:$4 sm:$0xff]  }
 0x51e   :  { %8848 = vmatpush2.bf16.msra.mxu1 %v12225_v30  ;;  %10432 = vmatprep.subr.bf16.mxu0 %v12636_v8  ;;  %v12690_v30 = vld [vmem:[#allocation11 + $0x1c4] ss:$16 sps:$4 sm:$0xff]   ;;  %v12691_v13 = vld [vmem:[#allocation11 + $0x3c0] ss:$16 sps:$4 sm:$0xff]  }
 0x51f   :  { %10473 = vmatprep.subr.bf16.mxu1 %v12639_v53  ;;  %v12693_v8 = vld [vmem:[#allocation11 + $0x3c4] ss:$16 sps:$4 sm:$0xff]   ;;  %v12688_v53 = vld [vmem:[#allocation11 + $0x1c0] ss:$16 sps:$4 sm:$0xff]  }
 0x520   :  { %v8564_v32 = vpop.f32.mrf.mxu0  ;;  %8809 = vmatmul.mubr.bf16.vlgmr.msra.gmra.mxu0 %v13522_v1  ;;  %v12696_v37 = vld [vmem:[#allocation11 + $0x1a4] ss:$16 sps:$4 sm:$0xff]  }
 0x521   :  { %v8565_v55 = vadd.f32 %v8564_v32, %v2413_v11  ;;  %v8605_v48 = vpop.f32.mrf.mxu1  ;;  %8850 = vmatmul.mubr.bf16.vlgmr.msra.gmra.mxu1 %v13524_v3  ;;  %10433 = vmatpush1.bf16.msra.mxu0 %v12634_v46  ;;  %v12699_v12 = vld [vmem:[#allocation11 + $0x3a4] ss:$16 sps:$4 sm:$0xff]   ;;  %v12694_v11 = vld [vmem:[#allocation11 + $0x1a0] ss:$16 sps:$4 sm:$0xff]  }
 0x522   :  { %10464 = vmatprep.mubr.bf16.mxu0 %v13649_v41  ;;  %10474 = vmatpush1.bf16.msra.mxu1 %v12637_v42  ;;  %v8566_v50 = vpop.f32.mrf.mxu0  ;;  %v12697_v46 = vld [vmem:[#allocation11 + $0x3a0] ss:$16 sps:$4 sm:$0xff]   ;;  %v12702_v42 = vld [vmem:[#allocation11 + $0x184] ss:$16 sps:$4 sm:$0xff]  }
 0x523   :  { %v13656_v54 = vadd.f32 %v8605_v48, %v8565_v55  ;;  %10505 = vmatprep.mubr.bf16.mxu1 %v13652_v49  ;;  %v8567_v1 = vadd.f32 %v8566_v50, %v2417_v39  ;;  %v8607_v57 = vpop.f32.mrf.mxu1  ;;  %10434 = vmatprep.subr.bf16.mxu0 %v12642_v45  ;;  %v12705_v39 = vld [vmem:[#allocation11 + $0x384] ss:$16 sps:$4 sm:$0xff]   ;;  %v12700_v45 = vld [vmem:[#allocation11 + $0x180] ss:$16 sps:$4 sm:$0xff]  }
 0x524   :  { %v8568_v15 = vpop.f32.mrf.mxu0  ;;  %10475 = vmatprep.subr.bf16.mxu1 %v12645_v34  ;;  %v12703_v32 = vld [vmem:[#allocation11 + $0x380] ss:$16 sps:$4 sm:$0xff]   ;;  %v12708_v34 = vld [vmem:[#allocation11 + $0x164] ss:$16 sps:$4 sm:$0xff]  }
 0x525   :  { %v13659_v60 = vadd.f32 %v8607_v57, %v8567_v1  ;;  %v8609_v3 = vpop.f32.mrf.mxu1  ;;  %10435 = vmatpush1.bf16.msra.mxu0 %v12640_v59  ;;  %v12711_v55 = vld [vmem:[#allocation11 + $0x364] ss:$16 sps:$4 sm:$0xff]   ;;  %v12706_v48 = vld [vmem:[#allocation11 + $0x160] ss:$16 sps:$4 sm:$0xff]  }
 0x526   :  { %10476 = vmatpush1.bf16.msra.mxu1 %v12643_v36  ;;  %v8569_v18 = vpop.f32.mrf.mxu0  ;;  %10436 = vmatprep.subr.bf16.mxu0 %v12648_v51  ;;  %v12709_v59 = vld [vmem:[#allocation11 + $0x360] ss:$16 sps:$4 sm:$0xff]   ;;  %v12714_v50 = vld [vmem:[#allocation11 + $0x144] ss:$16 sps:$4 sm:$0xff]  }
 0x527   :  { %v8610_v47 = vpop.f32.mrf.mxu1  ;;  %10477 = vmatprep.subr.bf16.mxu1 %v12651_v58  ;;  %v12717_v36 = vld [vmem:[#allocation11 + $0x344] ss:$16 sps:$4 sm:$0xff]   ;;  %v12712_v51 = vld [vmem:[#allocation11 + $0x140] ss:$16 sps:$4 sm:$0xff]  }
 0x528   :  { %v12715_v1 = vld [vmem:[#allocation11 + $0x340] ss:$16 sps:$4 sm:$0xff]   ;;  %v12720_v57 = vld [vmem:[#allocation11 + $0x124] ss:$16 sps:$4 sm:$0xff]  }
 0x529   :  { %10437 = vmatpush1.bf16.msra.mxu0 %v12646_v63  ;;  %v12723_v58 = vld [vmem:[#allocation11 + $0x324] ss:$16 sps:$4 sm:$0xff]   ;;  %v12718_v15 = vld [vmem:[#allocation11 + $0x120] ss:$16 sps:$4 sm:$0xff]  }
 0x52a   :  { %10478 = vmatpush1.bf16.msra.mxu1 %v12649_v4  ;;  %10438 = vmatprep.subr.bf16.mxu0 %v12654_v5  ;;  %v12721_v3 = vld [vmem:[#allocation11 + $0x320] ss:$16 sps:$4 sm:$0xff]   ;;  %v12726_v63 = vld [vmem:[#allocation11 + $0x104] ss:$16 sps:$4 sm:$0xff]   ;;  %v8858_v5 = vmax.f32 %v13559_v25, 0.0 }
 0x52b   :  { %10479 = vmatprep.subr.bf16.mxu1 %v12657_v6  ;;  %v12729_v18 = vld [vmem:[#allocation11 + $0x304] ss:$16 sps:$4 sm:$0xff]   ;;  %v12724_v4 = vld [vmem:[#allocation11 + $0x100] ss:$16 sps:$4 sm:$0xff]  }
 0x52c   :  { %v12727_v47 = vld [vmem:[#allocation11 + $0x300] ss:$16 sps:$4 sm:$0xff]   ;;  %v12732_v6 = vld [vmem:[#allocation11 + $0x4e4] ss:$16 sps:$4 sm:$0xff]  }
 0x52d   :  { %10439 = vmatpush1.bf16.msra.mxu0 %v12652_v28  ;;  %v8860_v28 = vmax.f32 %v13599_v38, 0.0  ;;  %v12787_v25 = vld [vmem:[#allocation11 + $0x6e0] ss:$16 sps:$4 sm:$0xff]   ;;  %v12795_v38 = vld [vmem:[#allocation11 + $0x6c4] ss:$16 sps:$4 sm:$0xff]  }
 0x52e   :  { %10480 = vmatpush1.bf16.msra.mxu1 %v12655_v7  ;;  %10440 = vmatprep.subr.bf16.mxu0 %v12660_v16  ;;  %v12789_v7 = vld [vmem:[#allocation11 + $0x6e4] ss:$16 sps:$4 sm:$0xff]   ;;  %v8863_v16 = vmax.f32 %v13643_v0, 0.0 }
 0x52f   :  { %10481 = vmatprep.subr.bf16.mxu1 %v12663_v44  ;;  %v12730_v44 = vld [vmem:[#allocation11 + $0x4e0] ss:$16 sps:$4 sm:$0xff]  }
 0x531   :  { %10441 = vmatpush1.bf16.msra.mxu0 %v12658_v10  ;;  %v13664_v10 = vpack.c.bf16 %v8858_v5, %v8858_v5  ;;  %v12757_v5 = vld [vmem:[#allocation11 + $0x5c0] ss:$16 sps:$4 sm:$0xff]  }
 0x532   :  { %10482 = vmatpush1.bf16.msra.mxu1 %v12661_v14  ;;  %10442 = vmatprep.subr.bf16.mxu0 %v12666_v23  ;;  %v12735_v14 = vld [vmem:[#allocation11 + $0x4c4] ss:$16 sps:$4 sm:$0xff]   ;;  %v13666_v23 = vpack.c.bf16 %v8860_v28, %v8860_v28 }
 0x533   :  { %10483 = vmatprep.subr.bf16.mxu1 %v12669_v24  ;;  %v13668_v24 = vpack.c.bf16 %v8863_v16, %v8863_v16  ;;  %v12849_v28 = vld [vmem:[#allocation11 + $0x7a4] ss:$16 sps:$4 sm:$0xff]  }
 0x534   :  { %v12765_v16 = vld [vmem:[#allocation11 + $0x584] ss:$16 sps:$4 sm:$0xff]  }
 0x535   :  { %10443 = vmatpush1.bf16.msra.mxu0 %v12664_v26 }
 0x536   :  { %10484 = vmatpush1.bf16.msra.mxu1 %v12667_v22  ;;  %10444 = vmatprep.subr.bf16.mxu0 %v12672_v40  ;;  %v12733_v40 = vld [vmem:[#allocation11 + $0x4c0] ss:$16 sps:$4 sm:$0xff]  }
 0x537   :  { %10485 = vmatprep.subr.bf16.mxu1 %v12675_v56 }
 0x539   :  { %10445 = vmatpush1.bf16.msra.mxu0 %v12670_v61  ;;  %v12738_v61 = vld [vmem:[#allocation11 + $0x4a4] ss:$16 sps:$4 sm:$0xff]  }
 0x53a   :  { %10486 = vmatpush1.bf16.msra.mxu1 %v12673_v27  ;;  %10446 = vmatprep.subr.bf16.mxu0 %v12678_v9 }
 0x53b   :  { %10487 = vmatprep.subr.bf16.mxu1 %v12681_v43 }
 0x53d   :  { %10447 = vmatpush1.bf16.msra.mxu0 %v12676_v35  ;;  %v12793_v35 = vld [vmem:[#allocation11 + $0x6c0] ss:$16 sps:$4 sm:$0xff]  }
 0x53e   :  { %10488 = vmatpush1.bf16.msra.mxu1 %v12679_v62  ;;  %10448 = vmatprep.subr.bf16.mxu0 %v12684_v33 }
 0x53f   :  { %10489 = vmatprep.subr.bf16.mxu1 %v12687_v31 }
 0x541   :  { %10449 = vmatpush2.bf16.msra.mxu0 %v12682_v29  ;;  %v12736_v29 = vld [vmem:[#allocation11 + $0x4a0] ss:$16 sps:$4 sm:$0xff]  }
 0x542   :  { %10490 = vmatpush2.bf16.msra.mxu1 %v12685_v52  ;;  %10450 = vmatprep.subr.bf16.mxu0 %v12690_v30  ;;  %v12741_v30 = vld [vmem:[#allocation11 + $0x484] ss:$16 sps:$4 sm:$0xff]  }
 0x543   :  { %10491 = vmatprep.subr.bf16.mxu1 %v12693_v8 }
 0x545   :  { %10451 = vmatpush2.bf16.msra.mxu0 %v12688_v53  ;;  %v12799_v53 = vld [vmem:[#allocation11 + $0x6a0] ss:$16 sps:$4 sm:$0xff]  }
 0x546   :  { %10492 = vmatpush2.bf16.msra.mxu1 %v12691_v13  ;;  %10452 = vmatprep.subr.bf16.mxu0 %v12696_v37  ;;  %v12807_v13 = vld [vmem:[#allocation11 + $0x684] ss:$16 sps:$4 sm:$0xff]  }
 0x547   :  { %10493 = vmatprep.subr.bf16.mxu1 %v12699_v12  ;;  %v12744_v37 = vld [vmem:[#allocation11 + $0x464] ss:$16 sps:$4 sm:$0xff]   ;;  %v12805_v12 = vld [vmem:[#allocation11 + $0x680] ss:$16 sps:$4 sm:$0xff]  }
 0x549   :  { %10453 = vmatpush2.bf16.msra.mxu0 %v12694_v11  ;;  %v12813_v11 = vld [vmem:[#allocation11 + $0x664] ss:$16 sps:$4 sm:$0xff]  }
 0x54a   :  { %10494 = vmatpush2.bf16.msra.mxu1 %v12697_v46  ;;  %10454 = vmatprep.subr.bf16.mxu0 %v12702_v42  ;;  %v12742_v46 = vld [vmem:[#allocation11 + $0x460] ss:$16 sps:$4 sm:$0xff]   ;;  %v12747_v42 = vld [vmem:[#allocation11 + $0x444] ss:$16 sps:$4 sm:$0xff]  }
 0x54b   :  { %10495 = vmatprep.subr.bf16.mxu1 %v12705_v39  ;;  %v12811_v39 = vld [vmem:[#allocation11 + $0x660] ss:$16 sps:$4 sm:$0xff]  }
 0x54d   :  { %10455 = vmatpush2.bf16.msra.mxu0 %v12700_v45  ;;  %v12819_v45 = vld [vmem:[#allocation11 + $0x644] ss:$16 sps:$4 sm:$0xff]  }
 0x54e   :  { %10496 = vmatpush2.bf16.msra.mxu1 %v12703_v32  ;;  %10456 = vmatprep.subr.bf16.mxu0 %v12708_v34  ;;  %v12745_v32 = vld [vmem:[#allocation11 + $0x440] ss:$16 sps:$4 sm:$0xff]   ;;  %v12750_v34 = vld [vmem:[#allocation11 + $0x424] ss:$16 sps:$4 sm:$0xff]  }
 0x54f   :  { %10497 = vmatprep.subr.bf16.mxu1 %v12711_v55  ;;  %v12817_v55 = vld [vmem:[#allocation11 + $0x640] ss:$16 sps:$4 sm:$0xff]  }
 0x551   :  { %10457 = vmatpush2.bf16.msra.mxu0 %v12706_v48  ;;  %v12825_v48 = vld [vmem:[#allocation11 + $0x624] ss:$16 sps:$4 sm:$0xff]  }
 0x552   :  { %10498 = vmatpush2.bf16.msra.mxu1 %v12709_v59  ;;  %10458 = vmatprep.subr.bf16.mxu0 %v12714_v50  ;;  %v12748_v59 = vld [vmem:[#allocation11 + $0x420] ss:$16 sps:$4 sm:$0xff]   ;;  %v12753_v50 = vld [vmem:[#allocation11 + $0x404] ss:$16 sps:$4 sm:$0xff]  }
 0x553   :  { %10499 = vmatprep.subr.bf16.mxu1 %v12717_v36  ;;  %v12823_v36 = vld [vmem:[#allocation11 + $0x620] ss:$16 sps:$4 sm:$0xff]  }
 0x555   :  { %10459 = vmatpush2.bf16.msra.mxu0 %v12712_v51  ;;  %v12831_v51 = vld [vmem:[#allocation11 + $0x604] ss:$16 sps:$4 sm:$0xff]  }
 0x556   :  { %10500 = vmatpush2.bf16.msra.mxu1 %v12715_v1  ;;  %10460 = vmatprep.subr.bf16.mxu0 %v12720_v57  ;;  %v12751_v1 = vld [vmem:[#allocation11 + $0x400] ss:$16 sps:$4 sm:$0xff]   ;;  %v12756_v57 = vld [vmem:[#allocation11 + $0x5e4] ss:$16 sps:$4 sm:$0xff]  }
 0x557   :  { %10501 = vmatprep.subr.bf16.mxu1 %v12723_v58  ;;  %v12829_v58 = vld [vmem:[#allocation11 + $0x600] ss:$16 sps:$4 sm:$0xff]  }
 0x559   :  { %10461 = vmatpush2.bf16.msra.mxu0 %v12718_v15  ;;  %v12837_v15 = vld [vmem:[#allocation11 + $0x7e4] ss:$16 sps:$4 sm:$0xff]  }
 0x55a   :  { %10502 = vmatpush2.bf16.msra.mxu1 %v12721_v3  ;;  %10462 = vmatprep.subr.bf16.mxu0 %v12726_v63  ;;  %v12754_v3 = vld [vmem:[#allocation11 + $0x5e0] ss:$16 sps:$4 sm:$0xff]   ;;  %v12759_v63 = vld [vmem:[#allocation11 + $0x5c4] ss:$16 sps:$4 sm:$0xff]  }
 0x55b   :  { %10503 = vmatprep.subr.bf16.mxu1 %v12729_v18  ;;  %v12835_v18 = vld [vmem:[#allocation11 + $0x7e0] ss:$16 sps:$4 sm:$0xff]  }
 0x55d   :  { %10463 = vmatpush2.bf16.msra.mxu0 %v12724_v4  ;;  %v12843_v4 = vld [vmem:[#allocation11 + $0x7c4] ss:$16 sps:$4 sm:$0xff]  }
 0x55e   :  { %10504 = vmatpush2.bf16.msra.mxu1 %v12727_v47  ;;  %10514 = vmatprep.subr.bf16.mxu0 %v12732_v6  ;;  %v12762_v47 = vld [vmem:[#allocation11 + $0x5a4] ss:$16 sps:$4 sm:$0xff]   ;;  %v12841_v6 = vld [vmem:[#allocation11 + $0x7c0] ss:$16 sps:$4 sm:$0xff]  }
 0x55f   :  { %10555 = vmatprep.subr.bf16.mxu1 %v12789_v7  ;;  %v12760_v7 = vld [vmem:[#allocation11 + $0x5a0] ss:$16 sps:$4 sm:$0xff]  }
 0x560   :  { %v8646_v26 = vpop.f32.mrf.mxu0  ;;  %10465 = vmatmul.mubr.bf16.vlgmr.msra.gmra.mxu0 %v13664_v10 }
 0x561   :  { %v8647_v22 = vadd.f32 %v8646_v26, %v13656_v54  ;;  %v8687_v0 = vpop.f32.mrf.mxu1  ;;  %10506 = vmatmul.mubr.bf16.vlgmr.msra.gmra.mxu1 %v13666_v23  ;;  %10515 = vmatpush1.bf16.msra.mxu0 %v12730_v44  ;;  %v12801_v54 = vld [vmem:[#allocation11 + $0x6a4] ss:$16 sps:$4 sm:$0xff]   ;;  %v12847_v44 = vld [vmem:[#allocation11 + $0x7a0] ss:$16 sps:$4 sm:$0xff]  }
 0x562   :  { %10546 = vmatprep.mubr.bf16.mxu0 %v13668_v24  ;;  %v8648_v56 = vpop.f32.mrf.mxu0  ;;  %10516 = vmatprep.subr.bf16.mxu0 %v12735_v14  ;;  %v12855_v14 = vld [vmem:[#allocation11 + $0x784] ss:$16 sps:$4 sm:$0xff]  }
 0x563   :  { %v13674_v27 = vadd.f32 %v8687_v0, %v8647_v22  ;;  %v8649_v9 = vadd.f32 %v8648_v56, %v13659_v60  ;;  %v8689_v43 = vpop.f32.mrf.mxu1  ;;  %10556 = vmatpush1.bf16.msra.mxu1 %v12787_v25  ;;  %v12739_v60 = vld [vmem:[#allocation11 + $0x480] ss:$16 sps:$4 sm:$0xff]   ;;  %v12768_v26 = vld [vmem:[#allocation11 + $0x564] ss:$16 sps:$4 sm:$0xff]  }
 0x564   :  { %v8650_v62 = vpop.f32.mrf.mxu0  ;;  %10557 = vmatprep.subr.bf16.mxu1 %v12795_v38  ;;  %v12763_v25 = vld [vmem:[#allocation11 + $0x580] ss:$16 sps:$4 sm:$0xff]   ;;  %v12861_v22 = vld [vmem:[#allocation11 + $0x764] ss:$16 sps:$4 sm:$0xff]  }
 0x565   :  { %v13677_v33 = vadd.f32 %v8689_v43, %v8649_v9  ;;  %v8691_v31 = vpop.f32.mrf.mxu1  ;;  %10517 = vmatpush1.bf16.msra.mxu0 %v12733_v40  ;;  %v12853_v38 = vld [vmem:[#allocation11 + $0x780] ss:$16 sps:$4 sm:$0xff]   ;;  %v12771_v40 = vld [vmem:[#allocation11 + $0x544] ss:$16 sps:$4 sm:$0xff]  }
 0x566   :  { %v8651_v52 = vpop.f32.mrf.mxu0  ;;  %10518 = vmatprep.subr.bf16.mxu0 %v12738_v61  ;;  %v12766_v0 = vld [vmem:[#allocation11 + $0x560] ss:$16 sps:$4 sm:$0xff]   ;;  %v12867_v61 = vld [vmem:[#allocation11 + $0x744] ss:$16 sps:$4 sm:$0xff]  }
 0x567   :  { %v8692_v8 = vpop.f32.mrf.mxu1  ;;  %10558 = vmatpush1.bf16.msra.mxu1 %v12793_v35  ;;  %v12859_v56 = vld [vmem:[#allocation11 + $0x760] ss:$16 sps:$4 sm:$0xff]   ;;  %v12774_v43 = vld [vmem:[#allocation11 + $0x524] ss:$16 sps:$4 sm:$0xff]  }
 0x568   :  { %10559 = vmatprep.subr.bf16.mxu1 %v12801_v54  ;;  %v12769_v9 = vld [vmem:[#allocation11 + $0x540] ss:$16 sps:$4 sm:$0xff]   ;;  %v12873_v62 = vld [vmem:[#allocation11 + $0x724] ss:$16 sps:$4 sm:$0xff]   ;;  %v8862_v8 = vmax.f32 %v13639_v2, 0.0 }
 0x569   :  { %10519 = vmatpush1.bf16.msra.mxu0 %v12736_v29  ;;  %v12865_v35 = vld [vmem:[#allocation11 + $0x740] ss:$16 sps:$4 sm:$0xff]   ;;  %v12777_v31 = vld [vmem:[#allocation11 + $0x504] ss:$16 sps:$4 sm:$0xff]  }
 0x56a   :  { %10520 = vmatprep.subr.bf16.mxu0 %v12741_v30  ;;  %v12772_v54 = vld [vmem:[#allocation11 + $0x520] ss:$16 sps:$4 sm:$0xff]   ;;  %v12879_v52 = vld [vmem:[#allocation11 + $0x704] ss:$16 sps:$4 sm:$0xff]  }
 0x56b   :  { %10560 = vmatpush1.bf16.msra.mxu1 %v12799_v53  ;;  %v12871_v29 = vld [vmem:[#allocation11 + $0x720] ss:$16 sps:$4 sm:$0xff]   ;;  %v12780_v53 = vld [vmem:[#allocation11 + $0xec] ss:$16 sps:$4 sm:$0xff]  }
 0x56c   :  { %10561 = vmatprep.subr.bf16.mxu1 %v12807_v13  ;;  %v12775_v30 = vld [vmem:[#allocation11 + $0x500] ss:$16 sps:$4 sm:$0xff]  }
 0x56d   :  { %10521 = vmatpush1.bf16.msra.mxu0 %v12739_v60  ;;  %v12877_v13 = vld [vmem:[#allocation11 + $0x700] ss:$16 sps:$4 sm:$0xff]   ;;  %v12885_v60 = vld [vmem:[#allocation11 + $0x2ec] ss:$16 sps:$4 sm:$0xff]  }
 0x56e   :  { %10522 = vmatprep.subr.bf16.mxu0 %v12744_v37  ;;  %v12778_v37 = vld [vmem:[#allocation11 + $0xe8] ss:$16 sps:$4 sm:$0xff]  }
 0x56f   :  { %10562 = vmatpush1.bf16.msra.mxu1 %v12805_v12  ;;  %v13680_v12 = vpack.c.bf16 %v8862_v8, %v8862_v8 }
 0x570   :  { %10563 = vmatprep.subr.bf16.mxu1 %v12813_v11  ;;  %v12783_v11 = vld [vmem:[#allocation11 + $0xcc] ss:$16 sps:$4 sm:$0xff]  }
 0x571   :  { %10523 = vmatpush1.bf16.msra.mxu0 %v12742_v46 }
 0x572   :  { %10524 = vmatprep.subr.bf16.mxu0 %v12747_v42 }
 0x573   :  { %10564 = vmatpush1.bf16.msra.mxu1 %v12811_v39  ;;  %v12781_v39 = vld [vmem:[#allocation11 + $0xc8] ss:$16 sps:$4 sm:$0xff]  }
 0x574   :  { %10565 = vmatprep.subr.bf16.mxu1 %v12819_v45 }
 0x575   :  { %10525 = vmatpush1.bf16.msra.mxu0 %v12745_v32  ;;  %v12786_v32 = vld [vmem:[#allocation11 + $0xac] ss:$16 sps:$4 sm:$0xff]  }
 0x576   :  { %10526 = vmatprep.subr.bf16.mxu0 %v12750_v34 }
 0x577   :  { %10566 = vmatpush1.bf16.msra.mxu1 %v12817_v55 }
 0x578   :  { %10567 = vmatprep.subr.bf16.mxu1 %v12825_v48 }
 0x579   :  { %10527 = vmatpush1.bf16.msra.mxu0 %v12748_v59 }
 0x57a   :  { %10528 = vmatprep.subr.bf16.mxu0 %v12753_v50  ;;  %v12784_v50 = vld [vmem:[#allocation11 + $0xa8] ss:$16 sps:$4 sm:$0xff]  }
 0x57b   :  { %10568 = vmatpush1.bf16.msra.mxu1 %v12823_v36 }
 0x57c   :  { %10569 = vmatprep.subr.bf16.mxu1 %v12831_v51 }
 0x57d   :  { %10529 = vmatpush1.bf16.msra.mxu0 %v12751_v1  ;;  %v12790_v1 = vld [vmem:[#allocation11 + $0x88] ss:$16 sps:$4 sm:$0xff]  }
 0x57e   :  { %10530 = vmatprep.subr.bf16.mxu0 %v12756_v57  ;;  %v12796_v57 = vld [vmem:[#allocation11 + $0x68] ss:$16 sps:$4 sm:$0xff]  }
 0x57f   :  { %10570 = vmatpush1.bf16.msra.mxu1 %v12829_v58  ;;  %v12804_v58 = vld [vmem:[#allocation11 + $0x4c] ss:$16 sps:$4 sm:$0xff]  }
 0x580   :  { %10571 = vmatprep.subr.bf16.mxu1 %v12837_v15  ;;  %v12802_v15 = vld [vmem:[#allocation11 + $0x48] ss:$16 sps:$4 sm:$0xff]  }
 0x581   :  { %10531 = vmatpush2.bf16.msra.mxu0 %v12754_v3  ;;  %v12810_v3 = vld [vmem:[#allocation11 + $0x2c] ss:$16 sps:$4 sm:$0xff]  }
 0x582   :  { %10532 = vmatprep.subr.bf16.mxu0 %v12759_v63  ;;  %v12808_v63 = vld [vmem:[#allocation11 + $0x28] ss:$16 sps:$4 sm:$0xff]  }
 0x583   :  { %10572 = vmatpush2.bf16.msra.mxu1 %v12835_v18  ;;  %v12816_v18 = vld [vmem:[#allocation11 + $0xc] ss:$16 sps:$4 sm:$0xff]  }
 0x584   :  { %10573 = vmatprep.subr.bf16.mxu1 %v12843_v4  ;;  %v12814_v4 = vld [vmem:[#allocation11 + $0x8] ss:$16 sps:$4 sm:$0xff]  }
 0x585   :  { %10533 = vmatpush2.bf16.msra.mxu0 %v12757_v5  ;;  %v12822_v5 = vld [vmem:[#allocation11 + $0x1ec] ss:$16 sps:$4 sm:$0xff]  }
 0x586   :  { %10534 = vmatprep.subr.bf16.mxu0 %v12762_v47  ;;  %v12820_v47 = vld [vmem:[#allocation11 + $0x1e8] ss:$16 sps:$4 sm:$0xff]  }
 0x587   :  { %10574 = vmatpush2.bf16.msra.mxu1 %v12841_v6  ;;  %v12828_v6 = vld [vmem:[#allocation11 + $0x1cc] ss:$16 sps:$4 sm:$0xff]  }
 0x588   :  { %10575 = vmatprep.subr.bf16.mxu1 %v12849_v28  ;;  %v12826_v28 = vld [vmem:[#allocation11 + $0x1c8] ss:$16 sps:$4 sm:$0xff]  }
 0x589   :  { %10535 = vmatpush2.bf16.msra.mxu0 %v12760_v7  ;;  %v12834_v7 = vld [vmem:[#allocation11 + $0x1ac] ss:$16 sps:$4 sm:$0xff]  }
 0x58a   :  { %10536 = vmatprep.subr.bf16.mxu0 %v12765_v16  ;;  %v12832_v16 = vld [vmem:[#allocation11 + $0x1a8] ss:$16 sps:$4 sm:$0xff]  }
 0x58b   :  { %10576 = vmatpush2.bf16.msra.mxu1 %v12847_v44  ;;  %v12840_v44 = vld [vmem:[#allocation11 + $0x18c] ss:$16 sps:$4 sm:$0xff]  }
 0x58c   :  { %10577 = vmatprep.subr.bf16.mxu1 %v12855_v14  ;;  %v12838_v14 = vld [vmem:[#allocation11 + $0x188] ss:$16 sps:$4 sm:$0xff]  }
 0x58d   :  { %10537 = vmatpush2.bf16.msra.mxu0 %v12763_v25  ;;  %v12846_v25 = vld [vmem:[#allocation11 + $0x16c] ss:$16 sps:$4 sm:$0xff]  }
 0x58e   :  { %10538 = vmatprep.subr.bf16.mxu0 %v12768_v26  ;;  %v12844_v26 = vld [vmem:[#allocation11 + $0x168] ss:$16 sps:$4 sm:$0xff]  }
 0x58f   :  { %10578 = vmatpush2.bf16.msra.mxu1 %v12853_v38  ;;  %v12852_v38 = vld [vmem:[#allocation11 + $0x14c] ss:$16 sps:$4 sm:$0xff]  }
 0x590   :  { %10579 = vmatprep.subr.bf16.mxu1 %v12861_v22  ;;  %v12850_v22 = vld [vmem:[#allocation11 + $0x148] ss:$16 sps:$4 sm:$0xff]  }
 0x591   :  { %10539 = vmatpush2.bf16.msra.mxu0 %v12766_v0  ;;  %v12858_v0 = vld [vmem:[#allocation11 + $0x12c] ss:$16 sps:$4 sm:$0xff]  }
 0x592   :  { %10540 = vmatprep.subr.bf16.mxu0 %v12771_v40  ;;  %v12856_v40 = vld [vmem:[#allocation11 + $0x128] ss:$16 sps:$4 sm:$0xff]  }
 0x593   :  { %10580 = vmatpush2.bf16.msra.mxu1 %v12859_v56  ;;  %v12864_v56 = vld [vmem:[#allocation11 + $0x10c] ss:$16 sps:$4 sm:$0xff]  }
 0x594   :  { %10581 = vmatprep.subr.bf16.mxu1 %v12867_v61  ;;  %v12862_v61 = vld [vmem:[#allocation11 + $0x108] ss:$16 sps:$4 sm:$0xff]  }
 0x595   :  { %10541 = vmatpush2.bf16.msra.mxu0 %v12769_v9  ;;  %v12870_v9 = vld [vmem:[#allocation11 + $0x4ec] ss:$16 sps:$4 sm:$0xff]  }
 0x596   :  { %10542 = vmatprep.subr.bf16.mxu0 %v12774_v43 }
 0x597   :  { %10582 = vmatpush2.bf16.msra.mxu1 %v12865_v35  ;;  %v12868_v35 = vld [vmem:[#allocation11 + $0x4e8] ss:$16 sps:$4 sm:$0xff]  }
 0x598   :  { %10583 = vmatprep.subr.bf16.mxu1 %v12873_v62  ;;  %v12876_v62 = vld [vmem:[#allocation11 + $0x4cc] ss:$16 sps:$4 sm:$0xff]  }
 0x599   :  { %10543 = vmatpush2.bf16.msra.mxu0 %v12772_v54 }
 0x59a   :  { %10544 = vmatprep.subr.bf16.mxu0 %v12777_v31 }
 0x59b   :  { %10584 = vmatpush2.bf16.msra.mxu1 %v12871_v29 }
 0x59c   :  { %10585 = vmatprep.subr.bf16.mxu1 %v12879_v52 }
 0x59d   :  { %10545 = vmatpush2.bf16.msra.mxu0 %v12775_v30  ;;  %v12874_v30 = vld [vmem:[#allocation11 + $0x4c8] ss:$16 sps:$4 sm:$0xff]  }
 0x59e   :  { %10596 = vmatprep.subr.bf16.mxu0 %v12780_v53  ;;  %v12882_v53 = vld [vmem:[#allocation11 + $0x4ac] ss:$16 sps:$4 sm:$0xff]  }
 0x59f   :  { %10586 = vmatpush2.bf16.msra.mxu1 %v12877_v13 }
 0x5a0   :  { %v8728_v46 = vpop.f32.mrf.mxu0  ;;  %10547 = vmatmul.mubr.bf16.vlgmr.msra.gmra.mxu0 %v13680_v12  ;;  %10637 = vmatprep.subr.bf16.mxu1 %v12885_v60 }
 0x5a1   :  { %v8729_v42 = vadd.f32 %v8728_v46, %v13674_v27  ;;  %v8769_v2 = vpop.f32.mrf.mxu1  ;;  %10597 = vmatpush1.bf16.msra.mxu0 %v12778_v37  ;;  %10628 = vmatprep.mubr.bf16.mxu0 %v13649_v41  ;;  %v12792_v27 = vld [vmem:[#allocation11 + $0x8c] ss:$16 sps:$4 sm:$0xff]  }
 0x5a2   :  { %v13685_v45 = vpop.f32.mrf.mxu0  ;;  %10598 = vmatprep.subr.bf16.mxu0 %v12783_v11  ;;  %v12798_v41 = vld [vmem:[#allocation11 + $0x6c] ss:$16 sps:$4 sm:$0xff]  }
 0x5a3   :  { %v13687_v34 = vadd.f32 %v8769_v2, %v8729_v42  ;;  %v13689_v55 = vpop.f32.mrf.mxu1  ;;  %v8731_v43 = vadd.f32 %v13685_v45, %v13677_v33 }
 0x5a4   :  { %v8732_v48 = vpop.f32.mrf.mxu0 }
 0x5a5   :  { %v8773_v59 = vpop.f32.mrf.mxu1  ;;  %10599 = vmatpush1.bf16.msra.mxu0 %v12781_v39  ;;  %v8772_v31 = vadd.f32 %v13689_v55, %v8731_v43  ;;  %v12888_v39 = vld [vmem:[#allocation11 + $0x48c] ss:$16 sps:$4 sm:$0xff]   ;;  %v12886_v48 = vld [vmem:[#allocation11 + $0x488] ss:$16 sps:$4 sm:$0xff]  }
 0x5a6   :  { %v8733_v36 = vpop.f32.mrf.mxu0  ;;  %10600 = vmatprep.subr.bf16.mxu0 %v12786_v32  ;;  %v12891_v59 = vld [vmem:[#allocation11 + $0x2cc] ss:$16 sps:$4 sm:$0xff]  }
 0x5a7   :  { %v8774_v51 = vpop.f32.mrf.mxu1  ;;  %v12889_v36 = vld [vmem:[#allocation11 + $0x2c8] ss:$16 sps:$4 sm:$0xff]   ;;  %v12939_v43 = vld [vmem:[#allocation11 + $0x3cc] ss:$16 sps:$4 sm:$0xff]  }
 0x5a8   :  { %v12897_v51 = vld [vmem:[#allocation11 + $0x2ac] ss:$16 sps:$4 sm:$0xff]  }
 0x5a9   :  { %10601 = vmatpush1.bf16.msra.mxu0 %v12784_v50  ;;  %v12894_v50 = vld [vmem:[#allocation11 + $0x46c] ss:$16 sps:$4 sm:$0xff]  }
 0x5aa   :  { %10602 = vmatprep.subr.bf16.mxu0 %v12792_v27  ;;  %v12892_v27 = vld [vmem:[#allocation11 + $0x468] ss:$16 sps:$4 sm:$0xff]  }
 0x5ad   :  { %10603 = vmatpush1.bf16.msra.mxu0 %v12790_v1  ;;  %v12900_v1 = vld [vmem:[#allocation11 + $0x44c] ss:$16 sps:$4 sm:$0xff]  }
 0x5ae   :  { %10604 = vmatprep.subr.bf16.mxu0 %v12798_v41  ;;  %v12895_v41 = vld [vmem:[#allocation11 + $0x2a8] ss:$16 sps:$4 sm:$0xff]  }
 0x5b1   :  { %10605 = vmatpush1.bf16.msra.mxu0 %v12796_v57  ;;  %v12898_v57 = vld [vmem:[#allocation11 + $0x448] ss:$16 sps:$4 sm:$0xff]  }
 0x5b2   :  { %10606 = vmatprep.subr.bf16.mxu0 %v12804_v58  ;;  %v12903_v58 = vld [vmem:[#allocation11 + $0x28c] ss:$16 sps:$4 sm:$0xff]  }
 0x5b5   :  { %10607 = vmatpush1.bf16.msra.mxu0 %v12802_v15  ;;  %v12906_v15 = vld [vmem:[#allocation11 + $0x42c] ss:$16 sps:$4 sm:$0xff]  }
 0x5b6   :  { %10608 = vmatprep.subr.bf16.mxu0 %v12810_v3  ;;  %v12901_v3 = vld [vmem:[#allocation11 + $0x288] ss:$16 sps:$4 sm:$0xff]  }
 0x5b9   :  { %10609 = vmatpush1.bf16.msra.mxu0 %v12808_v63  ;;  %v12909_v63 = vld [vmem:[#allocation11 + $0x26c] ss:$16 sps:$4 sm:$0xff]  }
 0x5ba   :  { %10610 = vmatprep.subr.bf16.mxu0 %v12816_v18  ;;  %v12912_v18 = vld [vmem:[#allocation11 + $0x40c] ss:$16 sps:$4 sm:$0xff]  }
 0x5bd   :  { %10611 = vmatpush1.bf16.msra.mxu0 %v12814_v4  ;;  %v12907_v4 = vld [vmem:[#allocation11 + $0x268] ss:$16 sps:$4 sm:$0xff]  }
 0x5be   :  { %10612 = vmatprep.subr.bf16.mxu0 %v12822_v5  ;;  %v12910_v5 = vld [vmem:[#allocation11 + $0x408] ss:$16 sps:$4 sm:$0xff]  }
 0x5c1   :  { %10613 = vmatpush2.bf16.msra.mxu0 %v12820_v47  ;;  %v12915_v47 = vld [vmem:[#allocation11 + $0x24c] ss:$16 sps:$4 sm:$0xff]  }
 0x5c2   :  { %10614 = vmatprep.subr.bf16.mxu0 %v12828_v6  ;;  %v12918_v6 = vld [vmem:[#allocation11 + $0x5ec] ss:$16 sps:$4 sm:$0xff]  }
 0x5c5   :  { %10615 = vmatpush2.bf16.msra.mxu0 %v12826_v28  ;;  %v12913_v28 = vld [vmem:[#allocation11 + $0x248] ss:$16 sps:$4 sm:$0xff]  }
 0x5c6   :  { %10616 = vmatprep.subr.bf16.mxu0 %v12834_v7  ;;  %v12916_v7 = vld [vmem:[#allocation11 + $0x5e8] ss:$16 sps:$4 sm:$0xff]  }
 0x5c9   :  { %10617 = vmatpush2.bf16.msra.mxu0 %v12832_v16  ;;  %v12921_v16 = vld [vmem:[#allocation11 + $0x22c] ss:$16 sps:$4 sm:$0xff]  }
 0x5ca   :  { %10618 = vmatprep.subr.bf16.mxu0 %v12840_v44  ;;  %v12924_v44 = vld [vmem:[#allocation11 + $0x5cc] ss:$16 sps:$4 sm:$0xff]  }
 0x5cd   :  { %10619 = vmatpush2.bf16.msra.mxu0 %v12838_v14  ;;  %v12919_v14 = vld [vmem:[#allocation11 + $0x228] ss:$16 sps:$4 sm:$0xff]  }
 0x5ce   :  { %10620 = vmatprep.subr.bf16.mxu0 %v12846_v25  ;;  %v12922_v25 = vld [vmem:[#allocation11 + $0x5c8] ss:$16 sps:$4 sm:$0xff]  }
 0x5d1   :  { %10621 = vmatpush2.bf16.msra.mxu0 %v12844_v26  ;;  %v12927_v26 = vld [vmem:[#allocation11 + $0x20c] ss:$16 sps:$4 sm:$0xff]  }
 0x5d2   :  { %10622 = vmatprep.subr.bf16.mxu0 %v12852_v38  ;;  %v12930_v38 = vld [vmem:[#allocation11 + $0x5ac] ss:$16 sps:$4 sm:$0xff]  }
 0x5d5   :  { %10623 = vmatpush2.bf16.msra.mxu0 %v12850_v22  ;;  %v12925_v22 = vld [vmem:[#allocation11 + $0x208] ss:$16 sps:$4 sm:$0xff]  }
 0x5d6   :  { %10624 = vmatprep.subr.bf16.mxu0 %v12858_v0  ;;  %v12928_v0 = vld [vmem:[#allocation11 + $0x5a8] ss:$16 sps:$4 sm:$0xff]  }
 0x5d9   :  { %10625 = vmatpush2.bf16.msra.mxu0 %v12856_v40  ;;  %v12933_v40 = vld [vmem:[#allocation11 + $0x3ec] ss:$16 sps:$4 sm:$0xff]  }
 0x5da   :  { %10626 = vmatprep.subr.bf16.mxu0 %v12864_v56  ;;  %v12936_v56 = vld [vmem:[#allocation11 + $0x58c] ss:$16 sps:$4 sm:$0xff]  }
 0x5dd   :  { %10627 = vmatpush2.bf16.msra.mxu0 %v12862_v61  ;;  %v12931_v61 = vld [vmem:[#allocation11 + $0x3e8] ss:$16 sps:$4 sm:$0xff]  }
 0x5de   :  { %10678 = vmatprep.subr.bf16.mxu0 %v12870_v9  ;;  %v12934_v9 = vld [vmem:[#allocation11 + $0x588] ss:$16 sps:$4 sm:$0xff]  }
 0x5e0   :  { %v8810_v54 = vpop.f32.mrf.mxu0  ;;  %10629 = vmatmul.mubr.bf16.vlgmr.msra.gmra.mxu0 %v13664_v10  ;;  %v12880_v10 = vld [vmem:[#allocation11 + $0x4a8] ss:$16 sps:$4 sm:$0xff]  }
 0x5e1   :  { %v8811_v29 = vadd.f32 %v8810_v54, %v13687_v34  ;;  %v8851_v52 = vpop.f32.mrf.mxu1  ;;  %10679 = vmatpush1.bf16.msra.mxu0 %v12868_v35  ;;  %10710 = vmatprep.mubr.bf16.mxu0 %v13668_v24  ;;  %v12883_v24 = vld [vmem:[#allocation11 + $0x2e8] ss:$16 sps:$4 sm:$0xff]   ;;  %v12942_v35 = vld [vmem:[#allocation11 + $0x56c] ss:$16 sps:$4 sm:$0xff]  }
 0x5e2   :  { %v8812_v8 = vpop.f32.mrf.mxu0  ;;  %10680 = vmatprep.subr.bf16.mxu0 %v12876_v62  ;;  %v12937_v62 = vld [vmem:[#allocation11 + $0x3c8] ss:$16 sps:$4 sm:$0xff]  }
 0x5e3   :  { %v8852_v33 = vadd.f32 %v8851_v52, %v8811_v29  ;;  %v8813_v13 = vadd.f32 %v8812_v8, %v8772_v31  ;;  %v8853_v60 = vpop.f32.mrf.mxu1  ;;  %v12940_v54 = vld [vmem:[#allocation11 + $0x568] ss:$16 sps:$4 sm:$0xff]   ;;  %v12945_v31 = vld [vmem:[#allocation11 + $0x3ac] ss:$16 sps:$4 sm:$0xff]  }
 0x5e4   :  { %v8814_v37 = vpop.f32.mrf.mxu0  ;;  %v12948_v29 = vld [vmem:[#allocation11 + $0x54c] ss:$16 sps:$4 sm:$0xff]   ;;  %v12943_v52 = vld [vmem:[#allocation11 + $0x3a8] ss:$16 sps:$4 sm:$0xff]  }
 0x5e5   :  { %v8854_v11 = vadd.f32 %v8853_v60, %v8813_v13  ;;  %v8855_v46 = vpop.f32.mrf.mxu1  ;;  %10681 = vmatpush1.bf16.msra.mxu0 %v12874_v30  ;;  %v8864_v42 = vmax.f32 %v8852_v33, 0.0  ;;  %v12946_v30 = vld [vmem:[#allocation11 + $0x548] ss:$16 sps:$4 sm:$0xff]   ;;  %v12951_v8 = vld [vmem:[#allocation11 + $0x38c] ss:$16 sps:$4 sm:$0xff]  }
 0x5e6   :  { %v8815_v2 = vpop.f32.mrf.mxu0  ;;  %10682 = vmatprep.subr.bf16.mxu0 %v12882_v53  ;;  %v12954_v53 = vld [vmem:[#allocation11 + $0x52c] ss:$16 sps:$4 sm:$0xff]   ;;  %v12949_v33 = vld [vmem:[#allocation11 + $0x388] ss:$16 sps:$4 sm:$0xff]  }
 0x5e7   :  { %v8865_v45 = vmax.f32 %v8854_v11, 0.0  ;;  %v8856_v32 = vpop.f32.mrf.mxu1  ;;  %v13699_v55 = vpack.c.bf16 %v8864_v42, %v8864_v42  ;;  %v12952_v13 = vld [vmem:[#allocation11 + $0x528] ss:$16 sps:$4 sm:$0xff]   ;;  %v12957_v60 = vld [vmem:[#allocation11 + $0x36c] ss:$16 sps:$4 sm:$0xff]  }
 0x5e8   :  { %v12960_v37 = vld [vmem:[#allocation11 + $0x50c] ss:$16 sps:$4 sm:$0xff]   ;;  %v12955_v11 = vld [vmem:[#allocation11 + $0x368] ss:$16 sps:$4 sm:$0xff]   ;;  %v13704_v42 = vld [vmem:[#allocation13] sm:$0xf] }
 0x5e9   :  { %v13697_v34 = vpack.c.bf16 %v8865_v45, %v8865_v45  ;;  %10683 = vmatpush1.bf16.msra.mxu0 %v12880_v10  ;;  %v12958_v46 = vld [vmem:[#allocation11 + $0x508] ss:$16 sps:$4 sm:$0xff]   ;;  %v12963_v10 = vld [vmem:[#allocation11 + $0x34c] ss:$16 sps:$4 sm:$0xff]   ;;  %v9135_v45 = vrot.slane %v13704_v42, %v13393_v17 }
 0x5ea   :  { %10684 = vmatprep.subr.bf16.mxu0 %v12888_v39  ;;  %v13018_v2 = vld [vmem:[#allocation14 + $0x78] sm:$0xff]   ;;  %v12961_v39 = vld [vmem:[#allocation11 + $0x348] ss:$16 sps:$4 sm:$0xff]  }
 0x5eb   :  { %10587 = vmatprep.mubr.bf16.mxu1 %v13697_v34  ;;  %v12966_v32 = vld [vmem:[#allocation11 + $0x32c] ss:$16 sps:$4 sm:$0xff]   ;;  %v13021_v17 = vld [vmem:[#allocation14 + $0x30] sm:$0xff]  }
 0x5ec   :  { %10588 = vmatmul.mubr.bf16.vlgmr.msra.gmra.mxu1 %v13699_v55 }
 0x5ed   :  { %10638 = vmatpush1.bf16.msra.mxu1 %v12883_v24  ;;  %10669 = vmatprep.mubr.bf16.mxu1 %v13652_v49  ;;  %v12904_v49 = vld [vmem:[#allocation11 + $0x428] ss:$16 sps:$4 sm:$0xff]   ;;  %v13019_v24 = vld [vmem:[#allocation14 + $0x38] sm:$0xff]  }
 0x5ee   :  { %10685 = vmatpush1.bf16.msra.mxu0 %v12886_v48  ;;  %10639 = vmatprep.subr.bf16.mxu1 %v12891_v59  ;;  %v9139_v48 = vrot.slane %v13704_v42, %v13401_v20  ;;  %v13020_v59 = vld [vmem:[#allocation14 + $0x70] sm:$0xff]   ;;  %v13022_v20 = vld [vmem:[#allocation14 + $0x68] sm:$0xff]  }
 0x5ef   :  { %10686 = vmatprep.subr.bf16.mxu0 %v12894_v50 }
 0x5f1   :  { %10640 = vmatpush1.bf16.msra.mxu1 %v12889_v36 }
 0x5f2   :  { %10687 = vmatpush1.bf16.msra.mxu0 %v12892_v27  ;;  %10641 = vmatprep.subr.bf16.mxu1 %v12897_v51  ;;  %v12964_v51 = vld [vmem:[#allocation11 + $0x328] ss:$16 sps:$4 sm:$0xff]  }
 0x5f3   :  { %10688 = vmatprep.subr.bf16.mxu0 %v12900_v1 }
 0x5f5   :  { %10642 = vmatpush1.bf16.msra.mxu1 %v12895_v41  ;;  %v12969_v41 = vld [vmem:[#allocation11 + $0x30c] ss:$16 sps:$4 sm:$0xff]  }
 0x5f6   :  { %10689 = vmatpush1.bf16.msra.mxu0 %v12898_v57  ;;  %10643 = vmatprep.subr.bf16.mxu1 %v12903_v58 }
 0x5f7   :  { %10690 = vmatprep.subr.bf16.mxu0 %v12906_v15 }
 0x5f9   :  { %10644 = vmatpush1.bf16.msra.mxu1 %v12901_v3 }
 0x5fa   :  { %10691 = vmatpush1.bf16.msra.mxu0 %v12904_v49  ;;  %10645 = vmatprep.subr.bf16.mxu1 %v12909_v63 }
 0x5fb   :  { %10692 = vmatprep.subr.bf16.mxu0 %v12912_v18  ;;  %v12967_v18 = vld [vmem:[#allocation11 + $0x308] ss:$16 sps:$4 sm:$0xff]  }
 0x5fd   :  { %10646 = vmatpush1.bf16.msra.mxu1 %v12907_v4 }
 0x5fe   :  { %10693 = vmatpush1.bf16.msra.mxu0 %v12910_v5  ;;  %10647 = vmatprep.subr.bf16.mxu1 %v12915_v47  ;;  %v13023_v5 = vld [vmem:[#allocation14 + $0x28] sm:$0xff]  }
 0x5ff   :  { %10694 = vmatprep.subr.bf16.mxu0 %v12918_v6  ;;  %v13024_v6 = vld [vmem:[#allocation14 + $0x60] sm:$0xff]  }
 0x601   :  { %10648 = vmatpush1.bf16.msra.mxu1 %v12913_v28  ;;  %v12970_v28 = vld [vmem:[#allocation11 + $0x6e8] ss:$16 sps:$4 sm:$0xff]  }
 0x602   :  { %10695 = vmatpush2.bf16.msra.mxu0 %v12916_v7  ;;  %10649 = vmatprep.subr.bf16.mxu1 %v12921_v16  ;;  %v12975_v7 = vld [vmem:[#allocation11 + $0x6cc] ss:$16 sps:$4 sm:$0xff]   ;;  %v13025_v16 = vld [vmem:[#allocation14 + $0x20] sm:$0xff]  }
 0x603   :  { %10696 = vmatprep.subr.bf16.mxu0 %v12924_v44  ;;  %v13026_v44 = vld [vmem:[#allocation14 + $0x58] sm:$0xff]  }
 0x605   :  { %10650 = vmatpush1.bf16.msra.mxu1 %v12919_v14  ;;  %v12973_v14 = vld [vmem:[#allocation11 + $0x6c8] ss:$16 sps:$4 sm:$0xff]  }
 0x606   :  { %10697 = vmatpush2.bf16.msra.mxu0 %v12922_v25  ;;  %10651 = vmatprep.subr.bf16.mxu1 %v12927_v26  ;;  %v12978_v25 = vld [vmem:[#allocation11 + $0x6ac] ss:$16 sps:$4 sm:$0xff]  }
 0x607   :  { %10698 = vmatprep.subr.bf16.mxu0 %v12930_v38  ;;  %v13027_v26 = vld [vmem:[#allocation14 + $0x18] sm:$0xff]   ;;  %v13028_v38 = vld [vmem:[#allocation14 + $0x50] sm:$0xff]  }
 0x609   :  { %10652 = vmatpush1.bf16.msra.mxu1 %v12925_v22  ;;  %v12976_v22 = vld [vmem:[#allocation11 + $0x6a8] ss:$16 sps:$4 sm:$0xff]  }
 0x60a   :  { %10699 = vmatpush2.bf16.msra.mxu0 %v12928_v0  ;;  %10653 = vmatprep.subr.bf16.mxu1 %v12933_v40  ;;  %v12981_v0 = vld [vmem:[#allocation11 + $0x68c] ss:$16 sps:$4 sm:$0xff]   ;;  %v13029_v40 = vld [vmem:[#allocation14 + $0x10] sm:$0xff]  }
 0x60b   :  { %10700 = vmatprep.subr.bf16.mxu0 %v12936_v56  ;;  %v13030_v56 = vld [vmem:[#allocation14 + $0x48] sm:$0xff]  }
 0x60d   :  { %10654 = vmatpush2.bf16.msra.mxu1 %v12931_v61  ;;  %v12984_v61 = vld [vmem:[#allocation11 + $0x66c] ss:$16 sps:$4 sm:$0xff]  }
 0x60e   :  { %10701 = vmatpush2.bf16.msra.mxu0 %v12934_v9  ;;  %10655 = vmatprep.subr.bf16.mxu1 %v12939_v43  ;;  %v13032_v9 = vld [vmem:[#allocation14 + $0x40] sm:$0xff]  }
 0x60f   :  { %10702 = vmatprep.subr.bf16.mxu0 %v12942_v35  ;;  %v12982_v43 = vld [vmem:[#allocation11 + $0x668] ss:$16 sps:$4 sm:$0xff]   ;;  %v12987_v35 = vld [vmem:[#allocation11 + $0x64c] ss:$16 sps:$4 sm:$0xff]  }
 0x611   :  { %10656 = vmatpush2.bf16.msra.mxu1 %v12937_v62  ;;  %v13033_v62 = vld [vmem:[#allocation14] sm:$0xff]  }
 0x612   :  { %10703 = vmatpush2.bf16.msra.mxu0 %v12940_v54  ;;  %10657 = vmatprep.subr.bf16.mxu1 %v12945_v31  ;;  %v12985_v54 = vld [vmem:[#allocation11 + $0x648] ss:$16 sps:$4 sm:$0xff]   ;;  %v12990_v31 = vld [vmem:[#allocation11 + $0x62c] ss:$16 sps:$4 sm:$0xff]  }
 0x613   :  { %10704 = vmatprep.subr.bf16.mxu0 %v12948_v29  ;;  %v12988_v29 = vld [vmem:[#allocation11 + $0x628] ss:$16 sps:$4 sm:$0xff]  }
 0x615   :  { %10658 = vmatpush2.bf16.msra.mxu1 %v12943_v52  ;;  %v12993_v52 = vld [vmem:[#allocation11 + $0x60c] ss:$16 sps:$4 sm:$0xff]  }
 0x616   :  { %10705 = vmatpush2.bf16.msra.mxu0 %v12946_v30  ;;  %10659 = vmatprep.subr.bf16.mxu1 %v12951_v8  ;;  %v12991_v30 = vld [vmem:[#allocation11 + $0x608] ss:$16 sps:$4 sm:$0xff]   ;;  %v12996_v8 = vld [vmem:[#allocation11 + $0x7ec] ss:$16 sps:$4 sm:$0xff]  }
 0x617   :  { %10706 = vmatprep.subr.bf16.mxu0 %v12954_v53  ;;  %v12994_v53 = vld [vmem:[#allocation11 + $0x7e8] ss:$16 sps:$4 sm:$0xff]  }
 0x619   :  { %10660 = vmatpush2.bf16.msra.mxu1 %v12949_v33  ;;  %v12999_v33 = vld [vmem:[#allocation11 + $0x7cc] ss:$16 sps:$4 sm:$0xff]  }
 0x61a   :  { %10707 = vmatpush2.bf16.msra.mxu0 %v12952_v13  ;;  %10661 = vmatprep.subr.bf16.mxu1 %v12957_v60  ;;  %v12997_v13 = vld [vmem:[#allocation11 + $0x7c8] ss:$16 sps:$4 sm:$0xff]   ;;  %v13002_v60 = vld [vmem:[#allocation11 + $0x7ac] ss:$16 sps:$4 sm:$0xff]  }
 0x61b   :  { %10708 = vmatprep.subr.bf16.mxu0 %v12960_v37  ;;  %v13000_v37 = vld [vmem:[#allocation11 + $0x7a8] ss:$16 sps:$4 sm:$0xff]  }
 0x61d   :  { %10662 = vmatpush2.bf16.msra.mxu1 %v12955_v11  ;;  %v13005_v11 = vld [vmem:[#allocation11 + $0x78c] ss:$16 sps:$4 sm:$0xff]  }
 0x61e   :  { %10709 = vmatpush2.bf16.msra.mxu0 %v12958_v46  ;;  %10663 = vmatprep.subr.bf16.mxu1 %v12963_v10  ;;  %v13003_v46 = vld [vmem:[#allocation11 + $0x788] ss:$16 sps:$4 sm:$0xff]   ;;  %v13008_v10 = vld [vmem:[#allocation11 + $0x76c] ss:$16 sps:$4 sm:$0xff]  }
 0x61f   :  { %12572 = vmatprep.subr.bf16.mxu0 %v13018_v2  ;;  %v13006_v2 = vld [vmem:[#allocation11 + $0x768] ss:$16 sps:$4 sm:$0xff]  }
 0x620   :  { %v10466_v50 = vpop.f32.mrf.mxu0 }
 0x621   :  { %v10467_v36 = vadd.f32 %v10466_v50, %v9135_v45  ;;  %v10507_v27 = vpop.f32.mrf.mxu1  ;;  %10664 = vmatpush2.bf16.msra.mxu1 %v12961_v39  ;;  %10711 = vmatmul.mubr.bf16.vlgmr.msra.gmra.mxu0 %v13680_v12  ;;  %v12972_v12 = vld [vmem:[#allocation11 + $0x6ec] ss:$16 sps:$4 sm:$0xff]   ;;  %v13009_v45 = vld [vmem:[#allocation11 + $0x748] ss:$16 sps:$4 sm:$0xff]  }
 0x622   :  { %v10468_v1 = vpop.f32.mrf.mxu0  ;;  %10665 = vmatprep.subr.bf16.mxu1 %v12966_v32  ;;  %12573 = vmatpush3.bf16.msra.mxu0 %v13019_v24  ;;  %v13011_v39 = vld [vmem:[#allocation11 + $0x74c] ss:$16 sps:$4 sm:$0xff]  }
 0x623   :  { %v13711_v57 = vadd.f32 %v10507_v27, %v10467_v36  ;;  %v10469_v58 = vadd.f32 %v10468_v1, %v9139_v48  ;;  %v10509_v15 = vpop.f32.mrf.mxu1  ;;  %12574 = vmatprep.subr.bf16.mxu0 %v13020_v59  ;;  %v13014_v32 = vld [vmem:[#allocation11 + $0x72c] ss:$16 sps:$4 sm:$0xff]   ;;  %v13012_v59 = vld [vmem:[#allocation11 + $0x728] ss:$16 sps:$4 sm:$0xff]  }
 0x624   :  { %v10470_v3 = vpop.f32.mrf.mxu0  ;;  %v13017_v36 = vld [vmem:[#allocation11 + $0x70c] ss:$16 sps:$4 sm:$0xff]   ;;  %v13015_v1 = vld [vmem:[#allocation11 + $0x708] ss:$16 sps:$4 sm:$0xff]  }
 0x625   :  { %v13713_v49 = vadd.f32 %v10509_v15, %v10469_v58  ;;  %v10511_v63 = vpop.f32.mrf.mxu1  ;;  %10666 = vmatpush2.bf16.msra.mxu1 %v12964_v51  ;;  %v13035_v58 = vld [vmem:[#allocation14 + $0xb8] sm:$0xff]   ;;  %v13036_v15 = vld [vmem:[#allocation14 + $0xf0] sm:$0xff]   ;;  %v13039_v3 = vld [vmem:[#allocation14 + $0xa8] sm:$0xff]  }
 0x626   :  { %v10471_v4 = vpop.f32.mrf.mxu0  ;;  %10667 = vmatprep.subr.bf16.mxu1 %v12969_v41  ;;  %12575 = vmatpush3.bf16.msra.mxu0 %v13021_v17  ;;  %v13034_v17 = vld [vmem:[#allocation14 + $0xf8] sm:$0xff]   ;;  %v13041_v63 = vld [vmem:[#allocation14 + $0xa0] sm:$0xff]  }
 0x627   :  { %v10512_v47 = vpop.f32.mrf.mxu1  ;;  %12576 = vmatprep.subr.bf16.mxu0 %v13022_v20  ;;  %v13038_v20 = vld [vmem:[#allocation14 + $0xe8] sm:$0xff]   ;;  %v13043_v4 = vld [vmem:[#allocation14 + $0x98] sm:$0xff]  }
 0x629   :  { %10668 = vmatpush2.bf16.msra.mxu1 %v12967_v18  ;;  %v13042_v18 = vld [vmem:[#allocation14 + $0xd8] sm:$0xff]  }
 0x62a   :  { %10719 = vmatprep.subr.bf16.mxu1 %v12972_v12  ;;  %12577 = vmatpush3.bf16.msra.mxu0 %v13023_v5  ;;  %v13045_v12 = vld [vmem:[#allocation14 + $0x90] sm:$0xff]  }
 0x62b   :  { %12578 = vmatprep.subr.bf16.mxu0 %v13024_v6 }
 0x62c   :  { %10670 = vmatmul.mubr.bf16.vlgmr.msra.gmra.mxu1 %v13666_v23  ;;  %v12979_v23 = vld [vmem:[#allocation11 + $0x688] ss:$16 sps:$4 sm:$0xff]  }
 0x62d   :  { %10720 = vmatpush1.bf16.msra.mxu1 %v12970_v28  ;;  %10751 = vmatprep.mubr.bf16.mxu1 %v13697_v34  ;;  %v13031_v34 = vld [vmem:[#allocation14 + $0x8] sm:$0xff]  }
 0x62e   :  { %10721 = vmatprep.subr.bf16.mxu1 %v12975_v7  ;;  %12579 = vmatpush3.bf16.msra.mxu0 %v13025_v16 }
 0x62f   :  { %12580 = vmatprep.subr.bf16.mxu0 %v13026_v44  ;;  %v13046_v44 = vld [vmem:[#allocation14 + $0xc8] sm:$0xff]  }
 0x631   :  { %10722 = vmatpush1.bf16.msra.mxu1 %v12973_v14 }
 0x632   :  { %10723 = vmatprep.subr.bf16.mxu1 %v12978_v25  ;;  %12581 = vmatpush3.bf16.msra.mxu0 %v13027_v26  ;;  %v13047_v25 = vld [vmem:[#allocation14 + $0x88] sm:$0xff]  }
 0x633   :  { %12582 = vmatprep.subr.bf16.mxu0 %v13028_v38 }
 0x635   :  { %10724 = vmatpush1.bf16.msra.mxu1 %v12976_v22 }
 0x636   :  { %10725 = vmatprep.subr.bf16.mxu1 %v12981_v0  ;;  %12583 = vmatpush3.bf16.msra.mxu0 %v13029_v40  ;;  %v13048_v40 = vld [vmem:[#allocation14 + $0xc0] sm:$0xff]  }
 0x637   :  { %12584 = vmatprep.subr.bf16.mxu0 %v13030_v56 }
 0x639   :  { %10726 = vmatpush1.bf16.msra.mxu1 %v12979_v23  ;;  %v13049_v23 = vld [vmem:[#allocation14 + $0x80] sm:$0xff]  }
 0x63a   :  { %10727 = vmatprep.subr.bf16.mxu1 %v12984_v61  ;;  %12585 = vmatpush3.bf16.msra.mxu0 %v13031_v34 }
 0x63b   :  { %12586 = vmatprep.subr.bf16.mxu0 %v13032_v9 }
 0x63d   :  { %10728 = vmatpush1.bf16.msra.mxu1 %v12982_v43 }
 0x63e   :  { %10729 = vmatprep.subr.bf16.mxu1 %v12987_v35  ;;  %12587 = vmatpush3.bf16.msra.mxu0 %v13033_v62  ;;  %v9143_v62 = vrot.slane %v13704_v42, %v13398_v19 }
 0x641   :  { %10730 = vmatpush1.bf16.msra.mxu1 %v12985_v54 }
 0x642   :  { %10731 = vmatprep.subr.bf16.mxu1 %v12990_v31  ;;  %v9147_v31 = vrot.slane %v13704_v42, %v13404_v21 }
 0x645   :  { %10732 = vmatpush1.bf16.msra.mxu1 %v12988_v29 }
 0x646   :  { %10733 = vmatprep.subr.bf16.mxu1 %v12993_v52 }
 0x649   :  { %10734 = vmatpush1.bf16.msra.mxu1 %v12991_v30 }
 0x64a   :  { %10735 = vmatprep.subr.bf16.mxu1 %v12996_v8 }
 0x64d   :  { %10736 = vmatpush2.bf16.msra.mxu1 %v12994_v53 }
 0x64e   :  { %10737 = vmatprep.subr.bf16.mxu1 %v12999_v33 }
 0x651   :  { %10738 = vmatpush2.bf16.msra.mxu1 %v12997_v13 }
 0x652   :  { %10739 = vmatprep.subr.bf16.mxu1 %v13002_v60 }
 0x655   :  { %10740 = vmatpush2.bf16.msra.mxu1 %v13000_v37 }
 0x656   :  { %10741 = vmatprep.subr.bf16.mxu1 %v13005_v11 }
 0x659   :  { %10742 = vmatpush2.bf16.msra.mxu1 %v13003_v46 }
 0x65a   :  { %10743 = vmatprep.subr.bf16.mxu1 %v13008_v10 }
 0x65d   :  { %10744 = vmatpush2.bf16.msra.mxu1 %v13006_v2 }
 0x65e   :  { %10745 = vmatprep.subr.bf16.mxu1 %v13011_v39 }
 0x660   :  { %v10548_v24 = vpop.f32.mrf.mxu0 }
 0x661   :  { %v10549_v48 = vadd.f32 %v10548_v24, %v13711_v57  ;;  %10746 = vmatpush2.bf16.msra.mxu1 %v13009_v45  ;;  %v13037_v57 = vld [vmem:[#allocation14 + $0xb0] sm:$0xff]  }
 0x662   :  { %v10550_v50 = vpop.f32.mrf.mxu0  ;;  %10747 = vmatprep.subr.bf16.mxu1 %v13014_v32 }
 0x663   :  { %v10551_v27 = vadd.f32 %v10550_v50, %v13713_v49  ;;  %v13040_v49 = vld [vmem:[#allocation14 + $0xe0] sm:$0xff]  }
 0x664   :  { %v10552_v51 = vpop.f32.mrf.mxu0 }
 0x665   :  { %10748 = vmatpush2.bf16.msra.mxu1 %v13012_v59  ;;  %v12539_v51 = vld [vmem:[#allocation16] ss:$0 sm:$0xff] }
 0x666   :  { %v10553_v41 = vpop.f32.mrf.mxu0  ;;  %10749 = vmatprep.subr.bf16.mxu1 %v13017_v36 }
 0x669   :  { %10750 = vmatpush2.bf16.msra.mxu1 %v13015_v1 }
 0x66a   :  { %12594 = vmatprep.subr.bf16.mxu1 %v13034_v17 }
 0x66c   :  { %10752 = vmatmul.mubr.bf16.vlgmr.msra.gmra.mxu1 %v13699_v55  ;;  %v13044_v55 = vld [vmem:[#allocation14 + $0xd0] sm:$0xff]  }
 0x66d   :  { %12595 = vmatpush3.bf16.msra.mxu1 %v13035_v58 }
 0x66e   :  { %12596 = vmatprep.subr.bf16.mxu1 %v13036_v15 }
 0x671   :  { %12597 = vmatpush3.bf16.msra.mxu1 %v13037_v57 }
 0x672   :  { %12598 = vmatprep.subr.bf16.mxu1 %v13038_v20 }
 0x675   :  { %12599 = vmatpush3.bf16.msra.mxu1 %v13039_v3 }
 0x676   :  { %12600 = vmatprep.subr.bf16.mxu1 %v13040_v49 }
 0x679   :  { %12601 = vmatpush3.bf16.msra.mxu1 %v13041_v63 }
 0x67a   :  { %12602 = vmatprep.subr.bf16.mxu1 %v13042_v18 }
 0x67d   :  { %12603 = vmatpush3.bf16.msra.mxu1 %v13043_v4 }
 0x67e   :  { %12604 = vmatprep.subr.bf16.mxu1 %v13044_v55 }
 0x681   :  { %12605 = vmatpush3.bf16.msra.mxu1 %v13045_v12 }
 0x682   :  { %12606 = vmatprep.subr.bf16.mxu1 %v13046_v44 }
 0x685   :  { %12607 = vmatpush3.bf16.msra.mxu1 %v13047_v25 }
 0x686   :  { %12608 = vmatprep.subr.bf16.mxu1 %v13048_v40 }
 0x689   :  { %12609 = vmatpush3.bf16.msra.mxu1 %v13049_v23 }
 0x6a0   :  { %v10630_v5 = vpop.f32.mrf.mxu0 }
 0x6a1   :  { %v10631_v29 = vadd.f32 %v10630_v5, %v9143_v62 }
 0x6a2   :  { %v10632_v47 = vpop.f32.mrf.mxu0 }
 0x6a3   :  { %v10633_v30 = vadd.f32 %v10632_v47, %v9147_v31 }
 0x6a4   :  { %v10634_v6 = vpop.f32.mrf.mxu0 }
 0x6a6   :  { %v10635_v28 = vpop.f32.mrf.mxu0 }
 0x6ac   :  { %v10589_v7 = vpop.f32.mrf.mxu1 }
 0x6ad   :  { %v10590_v16 = vadd.f32 %v10589_v7, %v10549_v48 }
 0x6ae   :  { %v10591_v14 = vpop.f32.mrf.mxu1 }
 0x6af   :  { %v10592_v26 = vadd.f32 %v10591_v14, %v10551_v27  ;;  %v10760_v38 = vmax.f32 %v10590_v16, 0.0 }
 0x6b0   :  { %v10593_v22 = vpop.f32.mrf.mxu1 }
 0x6b1   :  { %v10761_v0 = vmax.f32 %v10592_v26, 0.0  ;;  %v10764_v34 = vpack.c.bf16 %v10760_v38, %v10760_v38 }
 0x6b2   :  { %v10594_v56 = vpop.f32.mrf.mxu1 }
 0x6b3   :  { %v10765_v61 = vpack.c.bf16 %v10761_v0, %v10761_v0 }
 0x6b5   :  { %11063 = vmatprep.mubr.bf16.mxu0 %v10765_v61 }
 0x6b6   :  { %11064 = vmatmul.mubr.bf16.vlgmr.msra.gmra.mxu0 %v10764_v34 }
 0x6e1   :  { %v10712_v9 = vpop.f32.mrf.mxu0 }
 0x6e3   :  { %v10714_v43 = vpop.f32.mrf.mxu0 }
 0x6e5   :  { %v10716_v35 = vpop.f32.mrf.mxu0 }
 0x6e7   :  { %v10717_v54 = vpop.f32.mrf.mxu0 }
 0x6ec   :  { %v10671_v52 = vpop.f32.mrf.mxu1 }
 0x6ed   :  { %v10672_v8 = vadd.f32 %v10671_v52, %v10631_v29 }
 0x6ee   :  { %v10673_v53 = vpop.f32.mrf.mxu1 }
 0x6ef   :  { %v10674_v33 = vadd.f32 %v10673_v53, %v10633_v30  ;;  %v10713_v13 = vadd.f32 %v10712_v9, %v10672_v8 }
 0x6f0   :  { %v10675_v60 = vpop.f32.mrf.mxu1 }
 0x6f1   :  { %v10715_v37 = vadd.f32 %v10714_v43, %v10674_v33 }
 0x6f2   :  { %v10676_v11 = vpop.f32.mrf.mxu1 }
 0x72c   :  { %v10753_v46 = vpop.f32.mrf.mxu1 }
 0x72d   :  { %v10754_v10 = vadd.f32 %v10753_v46, %v10713_v13 }
 0x72e   :  { %v10755_v2 = vpop.f32.mrf.mxu1 }
 0x72f   :  { %v10756_v39 = vadd.f32 %v10755_v2, %v10715_v37  ;;  %v10762_v45 = vmax.f32 %v10754_v10, 0.0 }
 0x730   :  { %v10757_v19 = vpop.f32.mrf.mxu1 }
 0x731   :  { %v10763_v32 = vmax.f32 %v10756_v39, 0.0  ;;  %v10766_v21 = vpack.c.bf16 %v10762_v45, %v10762_v45 }
 0x732   :  { %v10758_v24 = vpop.f32.mrf.mxu1 }
 0x733   :  { %v10767_v48 = vpack.c.bf16 %v10763_v32, %v10763_v32 }
 0x735   :  { %11103 = vmatprep.mubr.bf16.mxu1 %v10767_v48 }
 0x736   :  { %11104 = vmatmul.mubr.bf16.vlgmr.msra.gmra.mxu1 %v10766_v21 }
 0x776   :  { %v12588_v42 = vpop.f32.mrf.mxu0 }
 0x778   :  { %v12589_v59 = vpop.f32.mrf.mxu0 }
 0x779   :  { %v12590_v50 = vadd.f32 %v12589_v59, %v12588_v42 }
 0x77a   :  { %v12591_v36 = vpop.f32.mrf.mxu0 }
 0x77b   :  { %v11066_v17 = vadd.f32 %v12590_v50, %v12539_v51 }
 0x77c   :  { %v12592_v27 = vpop.f32.mrf.mxu0 }
 0x7f6   :  { %v12610_v1 = vpop.f32.mrf.mxu1 }
 0x7f8   :  { %v12611_v41 = vpop.f32.mrf.mxu1 }
 0x7f9   :  { %v12612_v58 = vadd.f32 %v12611_v41, %v12610_v1 }
 0x7fa   :  { %v12613_v15 = vpop.f32.mrf.mxu1 }
 0x7fb   :  { %v11106_v57 = vadd.f32 %v12612_v58, %v11066_v17 }
 0x7fc   :  { %v12614_v20 = vpop.f32.mrf.mxu1 }
 0x7fd   :  { %11111 = vst [vmem:[#allocation17] sm:$0xff] %v11106_v57 }
 0x7fe   :  { %13244 = shalt.err (!%p13241_p7)
}
 0x7ff   :  { %11121 = dma.vmem_to_hbm [thread:$0]  %s11119_s8, 128, %s13736_s9, [#allocation4]  }
 0x800   :  { %13263 = dma.done.wait [#allocation4], 128  }
 0x801   :  { %13264 = vsyncadd [#allocation4], 4294967168 }
 0x802   :  { %11125 = vsyncpa [#allocation3], 1 }
 0x803   :  { %11126 = vsyncpa [#allocation6], 1 }
 0x804   :  { %11127 = vsyncpa [#allocation9], 1 }
 0x805   :  { %11128 = vsyncpa [#allocation12], 1 }
 0x806   :  { %11129 = vsyncpa [#allocation15], 1 }
 0x807   :  { %11130 = vsyncpa [#allocation4], 1 }

</bundles_post_ra>
